<compile_context>
chip_gen: v6e
topology: v6e:2x2x1
jax: 0.10.0
libtpu: 0.0.40
codegen_flags: <defaults>
</compile_context>

<pallas_src>
import functools

import jax
import jax.numpy as jnp
from jax.experimental import pallas as pl
from jax.experimental.pallas import tpu as pltpu

EPS = 1e-5


# ------------------------------ tiling helpers ------------------------------ #

def _round_up(x, m):
    return ((x + m - 1) // m) * m


def _config():
    """TPU-generation aware tiling constants."""
    try:
        kind = jax.devices()[0].device_kind.lower()
    except Exception:
        kind = ""
    if "v5" in kind:      # v5e/v5p: 128-wide MXU, 128 MiB VMEM
        return {"tm": 1024, "ctile": 128, "vmem": 64 * 1024 * 1024}
    if "v6" in kind:      # v6e: 2x256 MXU, 128 MiB VMEM
        return {"tm": 1024, "ctile": 256, "vmem": 64 * 1024 * 1024}
    # v7x (64 MiB VMEM per TC) and anything unknown: conservative tiles.
    return {"tm": 512, "ctile": 256, "vmem": 48 * 1024 * 1024}


def _tiles(rows, pref):
    tm = min(pref, _round_up(rows, 16))      # 16: bf16 sublane packing
    nm = -(-rows // tm)
    return tm, nm, nm * tm


def _ctiles(cout, pref):
    ct = min(pref, _round_up(cout, 128))     # lane-dense channel tile
    cp = _round_up(cout, ct)
    return ct, cp // ct, cp


# ---------------- Pass 1: tap-GEMM + fused BN batch statistics -------------- #

def _tap_gemm_kernel(xm_ref, xh_ref, mk_ref, w_ref, y_ref, st_ref,
                     *, taps, cin, tm):
    """Shift-and-matmul conv GEMM fused with per-tile BN statistics.

    xm_ref: (tm, cin)         bf16  main activation slab (rows i*tm .. +tm)
    xh_ref: (1, halo, cin)    bf16  halo rows that follow the main slab
    mk_ref: (tm, 1)           f32   1.0 on rows that are real conv outputs
    w_ref : (ntaps*cin, ct)   bf16  per-tap weights (resident per C tile)
    y_ref : (tm, ct)          bf16  conv output (non-output rows zeroed)
    st_ref: (8, ct)           f32   row 0 = sum(y), row 1 = sum(y*y), rest 0
    """
    ct = y_ref.shape[-1]
    full = jnp.concatenate([xm_ref[...], xh_ref[0]], axis=0)   # (tm+halo, cin)
    acc = jnp.zeros((tm, ct), jnp.float32)
    for t, off in enumerate(taps):                              # static unroll
        lhs = full[off:off + tm, :]
        rhs = w_ref[pl.ds(t * cin, cin), :]
        acc = acc + jnp.dot(lhs, rhs, preferred_element_type=jnp.float32)
    accm = acc * mk_ref[...]                 # zero rows that are not outputs
    y_ref[...] = accm.astype(y_ref.dtype)
    s = jnp.sum(accm, axis=0, keepdims=True)
    q = jnp.sum(accm * accm, axis=0, keepdims=True)
    rows = jax.lax.broadcasted_iota(jnp.int32, (8, ct), 0)
    st_ref[...] = jnp.where(rows == 0, s, jnp.where(rows == 1, q, 0.0))


def _tap_gemm(x_main, x_halo, mask, wt, taps, cin, tm, nm, ctile, nj, cp, cfg):
    """Tiled tap-GEMM.  Returns (y bf16 (nm*tm, cp), ysum (cp,), ysq (cp,))."""
    rp = nm * tm
    k = len(taps) * cin
    halo_p = x_halo.shape[1]
    kern = functools.partial(_tap_gemm_kernel, taps=taps, cin=cin, tm=tm)
    y, stats = pl.pallas_call(
        kern,
        out_shape=(jax.ShapeDtypeStruct((rp, cp), jnp.bfloat16),
                   jax.ShapeDtypeStruct((nm * 8, cp), jnp.float32)),
        grid=(nj, nm),                       # M axis innermost: weight resident
        in_specs=[
            pl.BlockSpec((tm, cin), lambda j, i: (i, 0)),
            pl.BlockSpec((1, halo_p, cin), lambda j, i: (i, 0, 0)),
            pl.BlockSpec((tm, 1), lambda j, i: (i, 0)),
            pl.BlockSpec((k, ctile), lambda j, i: (0, j)),
        ],
        out_specs=(
            pl.BlockSpec((tm, ctile), lambda j, i: (i, j)),
            pl.BlockSpec((8, ctile), lambda j, i: (i, j)),
        ),
        compiler_params=pltpu.CompilerParams(
            dimension_semantics=("parallel", "parallel"),
            vmem_limit_bytes=cfg["vmem"]),
    )(x_main, x_halo, mask, wt)
    st = stats.reshape(nm, 8, cp)
    return y, st[:, 0, :].sum(axis=0), st[:, 1, :].sum(axis=0)


# ------------- Pass 2: scale/shift (+ residual / shortcut) + ReLU ----------- #

def _bn_act_kernel(y_ref, sc_ref, sh_ref, o_ref):
    y = y_ref[...].astype(jnp.float32)
    o_ref[...] = jnp.maximum(y * sc_ref[...] + sh_ref[...], 0.0).astype(o_ref.dtype)


def _bn_add_act_kernel(y_ref, sc_ref, sh_ref, r_ref, o_ref):
    y = y_ref[...].astype(jnp.float32)
    r = r_ref[...].astype(jnp.float32)
    o_ref[...] = jnp.maximum(y * sc_ref[...] + sh_ref[...] + r, 0.0).astype(o_ref.dtype)


def _bn2_add_act_kernel(y_ref, sc_ref, sh_ref, ys_ref, scs_ref, shs_ref, o_ref):
    y = y_ref[...].astype(jnp.float32)
    ys = ys_ref[...].astype(jnp.float32)
    o = y * sc_ref[...] + sh_ref[...] + ys * scs_ref[...] + shs_ref[...]
    o_ref[...] = jnp.maximum(o, 0.0).astype(o_ref.dtype)


def _bn_relu_pass(y, scale, shift, tm, ctile, out_dtype, cfg,
                  residual=None, shortcut=None):
    rp, cp = y.shape
    nm, nj = rp // tm, cp // ctile
    big = pl.BlockSpec((tm, ctile), lambda i, j: (i, j))
    vec = pl.BlockSpec((1, ctile), lambda i, j: (0, j))
    comp = pltpu.CompilerParams(dimension_semantics=("parallel", "parallel"),
                                vmem_limit_bytes=cfg["vmem"])
    out_shape = jax.ShapeDtypeStruct((rp, cp), out_dtype)
    if shortcut is not None:
        ys, scs, shs = shortcut
        return pl.pallas_call(_bn2_add_act_kernel, out_shape=out_shape,
                              grid=(nm, nj),
                              in_specs=[big, vec, vec, big, vec, vec],
                              out_specs=big, compiler_params=comp,
                              )(y, scale, shift, ys, scs, shs)
    if residual is not None:
        return pl.pallas_call(_bn_add_act_kernel, out_shape=out_shape,
                              grid=(nm, nj),
                              in_specs=[big, vec, vec, big],
                              out_specs=big, compiler_params=comp,
                              )(y, scale, shift, residual)
    return pl.pallas_call(_bn_act_kernel, out_shape=out_shape, grid=(nm, nj),
                          in_specs=[big, vec, vec], out_specs=big,
                          compiler_params=comp)(y, scale, shift)


# ------------------------------ JAX glue code ------------------------------ #

def _bn_params(ysum, ysq, gamma, beta, count, cp):
    """Per-channel scale/shift from fused batch statistics (train-mode BN)."""
    mean = ysum / count
    var = jnp.maximum(ysq / count - mean * mean, 0.0)
    g = jnp.pad(gamma.astype(jnp.float32), (0, cp - gamma.shape[0]))
    b = jnp.pad(beta.astype(jnp.float32), (0, cp - beta.shape[0]))
    scale = g * jax.lax.rsqrt(var + EPS)
    shift = b - mean * scale
    return scale.reshape(1, cp), shift.reshape(1, cp)


def _conv3x3(x_nhwc, w_oihw, stride, cfg):
    """3x3 conv (pad=1) as a tap-GEMM over the flattened padded grid."""
    n, h, w, cin = x_nhwc.shape
    cout = w_oihw.shape[0]
    hp, wp = h + 2, w + 2
    ho = (h - 1) // stride + 1
    wo = (w - 1) // stride + 1
    rows = n * hp * wp
    tm, nm, rp = _tiles(rows, cfg["tm"])
    ctile, nj, cp = _ctiles(cout, cfg["ctile"])
    halo_p = _round_up(2 * wp + 2, 16)

    xq = jnp.pad(x_nhwc.astype(jnp.bfloat16), ((0, 0), (1, 1), (1, 1), (0, 0)))
    x2 = jnp.pad(xq.reshape(rows, cin), ((0, rp + halo_p - rows), (0, 0)))
    x_main = x2[:rp]
    gidx = (jnp.arange(nm)[:, None] + 1) * tm + jnp.arange(halo_p)[None, :]
    x_halo = x2[gidx]                                        # (nm, halo_p, cin)

    hv = (jnp.arange(hp) % stride == 0) & (jnp.arange(hp) <= stride * (ho - 1))
    wv = (jnp.arange(wp) % stride == 0) & (jnp.arange(wp) <= stride * (wo - 1))
    m2 = (hv[:, None] & wv[None, :]).astype(jnp.float32).reshape(1, hp * wp)
    mask = jnp.broadcast_to(m2, (n, hp * wp)).reshape(rows, 1)
    mask = jnp.pad(mask, ((0, rp - rows), (0, 0)))

    wt = jnp.transpose(w_oihw, (2, 3, 1, 0)).reshape(9 * cin, cout)
    wt = jnp.pad(wt.astype(jnp.bfloat16), ((0, 0), (0, cp - cout)))

    taps = tuple(kh * wp + kw for kh in range(3) for kw in range(3))
    y, ysum, ysq = _tap_gemm(x_main, x_halo, mask, wt, taps, cin,
                             tm, nm, ctile, nj, cp, cfg)
    geo = (n, hp, wp, ho, wo, stride)
    return y, ysum, ysq, geo, tm, ctile, cp


def _conv1x1(x_nhwc, w_oihw, tm, nm, mp, ctile, cp, cfg):
    """1x1 conv (shortcut projection) as a single-tap GEMM on compact rows."""
    n, ho, wo, cin = x_nhwc.shape
    cout = w_oihw.shape[0]
    m = n * ho * wo
    x = jnp.pad(x_nhwc.astype(jnp.bfloat16).reshape(m, cin), ((0, mp - m), (0, 0)))
    x_halo = jnp.zeros((nm, 16, cin), jnp.bfloat16)
    mask = (jnp.arange(mp) < m).astype(jnp.float32).reshape(mp, 1)
    wt = jnp.pad(w_oihw.reshape(cout, cin).T.astype(jnp.bfloat16),
                 ((0, 0), (0, cp - cout)))
    return _tap_gemm(x, x_halo, mask, wt, (0,), cin, tm, nm, ctile,
                     cp // ctile, cp, cfg)


def _extract(y_full, geo, cout):
    """Gather the valid conv-output rows from the full padded-grid result."""
    n, hp, wp, ho, wo, s = geo
    c = y_full.shape[-1]
    y4 = y_full[:n * hp * wp].reshape(n, hp, wp, c)
    return y4[:, : s * (ho - 1) + 1 : s, : s * (wo - 1) + 1 : s, :cout]


def basic_block_forward(x_nchw, params, stride):
    """Pallas-backed BasicBlock forward. Input/output are NCHW like PyTorch."""
    cfg = _config()
    x = jnp.transpose(x_nchw, (0, 2, 3, 1)).astype(jnp.float32)   # -> NHWC
    n, h, w, cin = x.shape
    planes = params["w1"].shape[0]

    # conv1 (3x3, stride) + BN1 stats, then normalize + ReLU (bf16 out)
    y1, s1, q1, geo1, tm1, ct1, cp = _conv3x3(x, params["w1"], stride, cfg)
    _, _, _, ho, wo, _ = geo1
    m = n * ho * wo
    sc1, sh1 = _bn_params(s1, q1, params["g1"], params["b1"], m, cp)
    out1_full = _bn_relu_pass(y1, sc1, sh1, tm1, ct1, jnp.bfloat16, cfg)
    out1 = _extract(out1_full, geo1, planes)                 # (n, ho, wo, planes)

    # conv2 (3x3, stride 1) + BN2 stats
    y2, s2, q2, geo2, _, ct2, cp2 = _conv3x3(out1, params["w2"], 1, cfg)
    sc2, sh2 = _bn_params(s2, q2, params["g2"], params["b2"], m, cp2)
    y2c = _extract(y2, geo2, cp2).reshape(m, cp2)            # compact valid rows
    tmc, nmc, mp = _tiles(m, cfg["tm"])
    y2c = jnp.pad(y2c, ((0, mp - m), (0, 0)))

    if stride != 1 or cin != planes:
        # projection shortcut: 1x1 conv (stride) + BN, fused into the final pass
        xs = x[:, : stride * (ho - 1) + 1 : stride,
               : stride * (wo - 1) + 1 : stride, :]
        ys, ss, qs = _conv1x1(xs, params["ws"], tmc, nmc, mp, ct2, cp2, cfg)
        scs, shs = _bn_params(ss, qs, params["gs"], params["bs"], m, cp2)
        out = _bn_relu_pass(y2c, sc2, sh2, tmc, ct2, jnp.float32, cfg,
                            shortcut=(ys, scs, shs))
    else:
        # identity shortcut, fed as bf16
        res = x.astype(jnp.bfloat16).reshape(m, cin)
        res = jnp.pad(res, ((0, mp - m), (0, cp2 - cin)))
        out = _bn_relu_pass(y2c, sc2, sh2, tmc, ct2, jnp.float32, cfg,
                            residual=res)

    out = out[:m, :planes].reshape(n, ho, wo, planes)
    return jnp.transpose(out, (0, 3, 1, 2))                  # -> NCHW


# --------------------------- Pure-JAX reference ---------------------------- #

def _bn_ref(y, g, b):
    mean = jnp.mean(y, axis=(0, 2, 3), keepdims=True)
    var = jnp.var(y, axis=(0, 2, 3), keepdims=True)          # biased, train-mode
    return (y - mean) * jax.lax.rsqrt(var + EPS) * g[None, :, None, None] \
        + b[None, :, None, None]


def basic_block_ref(x, params, stride, cast_dtype=jnp.float32):
    def conv(inp, wgt, s, pad):
        return jax.lax.conv_general_dilated(
            inp.astype(cast_dtype), wgt.astype(cast_dtype), (s, s),
            [(pad, pad), (pad, pad)],
            dimension_numbers=("NCHW", "OIHW", "NCHW"),
            preferred_element_type=jnp.float32)

    out = jax.nn.relu(_bn_ref(conv(x, params["w1"], stride, 1),
                              params["g1"], params["b1"]))
    out = _bn_ref(conv(out, params["w2"], 1, 1), params["g2"], params["b2"])
    if "ws" in params:
        sc = _bn_ref(conv(x, params["ws"], stride, 0), params["gs"], params["bs"])
    else:
        sc = x
    return jax.nn.relu(out + sc)


# --------------------------------- Params ---------------------------------- #

def init_params(key, in_planes, planes, stride):
    ks = jax.random.split(key, 8)
    params = {
        "w1": 0.1 * jax.random.normal(ks[0], (planes, in_planes, 3, 3), jnp.float32),
        "g1": 1.0 + 0.1 * jax.random.normal(ks[1], (planes,), jnp.float32),
        "b1": 0.1 * jax.random.normal(ks[2], (planes,), jnp.float32),
        "w2": 0.1 * jax.random.normal(ks[3], (planes, planes, 3, 3), jnp.float32),
        "g2": 1.0 + 0.1 * jax.random.normal(ks[4], (planes,), jnp.float32),
        "b2": 0.1 * jax.random.normal(ks[5], (planes,), jnp.float32),
    }
    if stride != 1 or in_planes != planes:
        params["ws"] = 0.1 * jax.random.normal(ks[6], (planes, in_planes, 1, 1),
                                               jnp.float32)
        params["gs"] = 1.0 + 0.05 * jax.random.normal(ks[7], (planes,), jnp.float32)
        params["bs"] = jnp.full((planes,), 0.02, jnp.float32)
    return params


# ----------------------------------- Main ----------------------------------- #

if __name__ == "__main__":
    key = jax.random.PRNGKey(0)
    kx, kp1, kp2 = jax.random.split(key, 3)

    # Config A: identity shortcut (stride=1, in_planes == planes)
    xA = jax.random.normal(kx, (2, 4, 16, 16), jnp.float32)
    pA = init_params(kp1, in_planes=4, planes=4, stride=1)
    fwdA = jax.jit(functools.partial(basic_block_forward, stride=1))
    outA = jax.block_until_ready(fwdA(xA, pA))
    assert outA.shape == (2, 4, 16, 16)
    refA_bf = basic_block_ref(xA, pA, 1, cast_dtype=jnp.bfloat16)
    assert jnp.allclose(outA, refA_bf, atol=8e-2, rtol=8e-2), "mismatch vs bf16 ref (A)"
    refA_f32 = basic_block_ref(xA, pA, 1, cast_dtype=jnp.float32)
    assert jnp.allclose(outA, refA_f32, atol=2e-1, rtol=1e-1), "mismatch vs fp32 ref (A)"

    # Config B: 1x1-conv shortcut (stride=2, channel expansion 4 -> 8)
    xB = jax.random.normal(kx, (2, 4, 16, 16), jnp.float32)
    pB = init_params(kp2, in_planes=4, planes=8, stride=2)
    fwdB = jax.jit(functools.partial(basic_block_forward, stride=2))
    outB = jax.block_until_ready(fwdB(xB, pB))
    assert outB.shape == (2, 8, 8, 8)
    refB_bf = basic_block_ref(xB, pB, 2, cast_dtype=jnp.bfloat16)
    assert jnp.allclose(outB, refB_bf, atol=8e-2, rtol=8e-2), "mismatch vs bf16 ref (B)"
    refB_f32 = basic_block_ref(xB, pB, 2, cast_dtype=jnp.float32)
    assert jnp.allclose(outB, refB_f32, atol=2e-1, rtol=1e-1), "mismatch vs fp32 ref (B)"

    print("KERNEL_OK")
</pallas_src>

<mosaic_0001>
module attributes {stable_mosaic.version = 11 : i64} {
  func.func @_tap_gemm_kernel(%arg0: i32, %arg1: i32, %arg2: memref<512x4xbf16, #tpu.memory_space<vmem>>, %arg3: memref<1x48x4xbf16, #tpu.memory_space<vmem>>, %arg4: memref<512x1xf32, #tpu.memory_space<vmem>>, %arg5: memref<36x128xbf16, #tpu.memory_space<vmem>>, %arg6: memref<512x128xbf16, #tpu.memory_space<vmem>>, %arg7: memref<8x128xf32, #tpu.memory_space<vmem>>) attributes {dimension_semantics = [#tpu.dimension_semantics<parallel>, #tpu.dimension_semantics<parallel>], iteration_bounds = array<i64: 1, 2>, scalar_prefetch = 0 : i64, scratch_operands = 0 : i64, tpu.core_type = #tpu.core_type<tc>, window_params = [{transform_indices = @transform_0, window_bounds = array<i64: 512, 4>}, {transform_indices = @transform_1, window_bounds = array<i64: 1, 48, 4>}, {transform_indices = @transform_2, window_bounds = array<i64: 512, 1>}, {transform_indices = @transform_3, window_bounds = array<i64: 36, 128>}, {transform_indices = @transform_4, window_bounds = array<i64: 512, 128>}, {transform_indices = @transform_5, window_bounds = array<i64: 8, 128>}]} {
    %c0 = arith.constant 0 : index
    %c0_0 = arith.constant 0 : index
    %0 = vector.load %arg2[%c0, %c0_0] : memref<512x4xbf16, #tpu.memory_space<vmem>>, vector<512x4xbf16>
    %c0_1 = arith.constant 0 : index
    %c0_2 = arith.constant 0 : index
    %c0_3 = arith.constant 0 : index
    %1 = vector.load %arg3[%c0_1, %c0_2, %c0_3] : memref<1x48x4xbf16, #tpu.memory_space<vmem>>, vector<1x48x4xbf16>
    %2 = vector.shape_cast %1 : vector<1x48x4xbf16> to vector<48x4xbf16>
    %3 = tpu.concatenate %0, %2 in 0 : vector<512x4xbf16>, vector<48x4xbf16> -> vector<560x4xbf16>
    %cst = arith.constant 0.000000e+00 : f32
    %4 = vector.broadcast %cst : f32 to vector<512x128xf32>
    %5 = vector.extract_strided_slice %3 {offsets = [0, 0], sizes = [512, 4], strides = [1, 1]} : vector<560x4xbf16> to vector<512x4xbf16>
    %c0_4 = arith.constant 0 : index
    %c0_5 = arith.constant 0 : index
    %6 = vector.load %arg5[%c0_4, %c0_5] : memref<36x128xbf16, #tpu.memory_space<vmem>>, vector<4x128xbf16>
    %cst_6 = arith.constant dense<0.000000e+00> : vector<512x128xf32>
    %7 = tpu.matmul %5, %6, %cst_6 {dimension_numbers = #tpu.dot_dimension_numbers<[1], [0], [0], [1], [0, 0, 1, 1], [], []>} : vector<512x4xbf16>, vector<4x128xbf16>, vector<512x128xf32> -> vector<512x128xf32>
    %8 = arith.addf %4, %7 : vector<512x128xf32>
    %9 = vector.extract_strided_slice %3 {offsets = [1, 0], sizes = [512, 4], strides = [1, 1]} : vector<560x4xbf16> to vector<512x4xbf16>
    %c4 = arith.constant 4 : index
    %c0_7 = arith.constant 0 : index
    %10 = vector.load %arg5[%c4, %c0_7] : memref<36x128xbf16, #tpu.memory_space<vmem>>, vector<4x128xbf16>
    %cst_8 = arith.constant dense<0.000000e+00> : vector<512x128xf32>
    %11 = tpu.matmul %9, %10, %cst_8 {dimension_numbers = #tpu.dot_dimension_numbers<[1], [0], [0], [1], [0, 0, 1, 1], [], []>} : vector<512x4xbf16>, vector<4x128xbf16>, vector<512x128xf32> -> vector<512x128xf32>
    %12 = arith.addf %8, %11 : vector<512x128xf32>
    %13 = vector.extract_strided_slice %3 {offsets = [2, 0], sizes = [512, 4], strides = [1, 1]} : vector<560x4xbf16> to vector<512x4xbf16>
    %c8 = arith.constant 8 : index
    %c0_9 = arith.constant 0 : index
    %14 = vector.load %arg5[%c8, %c0_9] : memref<36x128xbf16, #tpu.memory_space<vmem>>, vector<4x128xbf16>
    %cst_10 = arith.constant dense<0.000000e+00> : vector<512x128xf32>
    %15 = tpu.matmul %13, %14, %cst_10 {dimension_numbers = #tpu.dot_dimension_numbers<[1], [0], [0], [1], [0, 0, 1, 1], [], []>} : vector<512x4xbf16>, vector<4x128xbf16>, vector<512x128xf32> -> vector<512x128xf32>
    %16 = arith.addf %12, %15 : vector<512x128xf32>
    %17 = vector.extract_strided_slice %3 {offsets = [18, 0], sizes = [512, 4], strides = [1, 1]} : vector<560x4xbf16> to vector<512x4xbf16>
    %c12 = arith.constant 12 : index
    %c0_11 = arith.constant 0 : index
    %18 = vector.load %arg5[%c12, %c0_11] : memref<36x128xbf16, #tpu.memory_space<vmem>>, vector<4x128xbf16>
    %cst_12 = arith.constant dense<0.000000e+00> : vector<512x128xf32>
    %19 = tpu.matmul %17, %18, %cst_12 {dimension_numbers = #tpu.dot_dimension_numbers<[1], [0], [0], [1], [0, 0, 1, 1], [], []>} : vector<512x4xbf16>, vector<4x128xbf16>, vector<512x128xf32> -> vector<512x128xf32>
    %20 = arith.addf %16, %19 : vector<512x128xf32>
    %21 = vector.extract_strided_slice %3 {offsets = [19, 0], sizes = [512, 4], strides = [1, 1]} : vector<560x4xbf16> to vector<512x4xbf16>
    %c16 = arith.constant 16 : index
    %c0_13 = arith.constant 0 : index
    %22 = vector.load %arg5[%c16, %c0_13] : memref<36x128xbf16, #tpu.memory_space<vmem>>, vector<4x128xbf16>
    %cst_14 = arith.constant dense<0.000000e+00> : vector<512x128xf32>
    %23 = tpu.matmul %21, %22, %cst_14 {dimension_numbers = #tpu.dot_dimension_numbers<[1], [0], [0], [1], [0, 0, 1, 1], [], []>} : vector<512x4xbf16>, vector<4x128xbf16>, vector<512x128xf32> -> vector<512x128xf32>
    %24 = arith.addf %20, %23 : vector<512x128xf32>
    %25 = vector.extract_strided_slice %3 {offsets = [20, 0], sizes = [512, 4], strides = [1, 1]} : vector<560x4xbf16> to vector<512x4xbf16>
    %c20 = arith.constant 20 : index
    %c0_15 = arith.constant 0 : index
    %26 = vector.load %arg5[%c20, %c0_15] : memref<36x128xbf16, #tpu.memory_space<vmem>>, vector<4x128xbf16>
    %cst_16 = arith.constant dense<0.000000e+00> : vector<512x128xf32>
    %27 = tpu.matmul %25, %26, %cst_16 {dimension_numbers = #tpu.dot_dimension_numbers<[1], [0], [0], [1], [0, 0, 1, 1], [], []>} : vector<512x4xbf16>, vector<4x128xbf16>, vector<512x128xf32> -> vector<512x128xf32>
    %28 = arith.addf %24, %27 : vector<512x128xf32>
    %29 = vector.extract_strided_slice %3 {offsets = [36, 0], sizes = [512, 4], strides = [1, 1]} : vector<560x4xbf16> to vector<512x4xbf16>
    %c24 = arith.constant 24 : index
    %c0_17 = arith.constant 0 : index
    %30 = vector.load %arg5[%c24, %c0_17] : memref<36x128xbf16, #tpu.memory_space<vmem>>, vector<4x128xbf16>
    %cst_18 = arith.constant dense<0.000000e+00> : vector<512x128xf32>
    %31 = tpu.matmul %29, %30, %cst_18 {dimension_numbers = #tpu.dot_dimension_numbers<[1], [0], [0], [1], [0, 0, 1, 1], [], []>} : vector<512x4xbf16>, vector<4x128xbf16>, vector<512x128xf32> -> vector<512x128xf32>
    %32 = arith.addf %28, %31 : vector<512x128xf32>
    %33 = vector.extract_strided_slice %3 {offsets = [37, 0], sizes = [512, 4], strides = [1, 1]} : vector<560x4xbf16> to vector<512x4xbf16>
    %c28 = arith.constant 28 : index
    %c0_19 = arith.constant 0 : index
    %34 = vector.load %arg5[%c28, %c0_19] : memref<36x128xbf16, #tpu.memory_space<vmem>>, vector<4x128xbf16>
    %cst_20 = arith.constant dense<0.000000e+00> : vector<512x128xf32>
    %35 = tpu.matmul %33, %34, %cst_20 {dimension_numbers = #tpu.dot_dimension_numbers<[1], [0], [0], [1], [0, 0, 1, 1], [], []>} : vector<512x4xbf16>, vector<4x128xbf16>, vector<512x128xf32> -> vector<512x128xf32>
    %36 = arith.addf %32, %35 : vector<512x128xf32>
    %37 = vector.extract_strided_slice %3 {offsets = [38, 0], sizes = [512, 4], strides = [1, 1]} : vector<560x4xbf16> to vector<512x4xbf16>
    %c32 = arith.constant 32 : index
    %c0_21 = arith.constant 0 : index
    %38 = vector.load %arg5[%c32, %c0_21] : memref<36x128xbf16, #tpu.memory_space<vmem>>, vector<4x128xbf16>
    %cst_22 = arith.constant dense<0.000000e+00> : vector<512x128xf32>
    %39 = tpu.matmul %37, %38, %cst_22 {dimension_numbers = #tpu.dot_dimension_numbers<[1], [0], [0], [1], [0, 0, 1, 1], [], []>} : vector<512x4xbf16>, vector<4x128xbf16>, vector<512x128xf32> -> vector<512x128xf32>
    %40 = arith.addf %36, %39 : vector<512x128xf32>
    %c0_23 = arith.constant 0 : index
    %c0_24 = arith.constant 0 : index
    %41 = vector.load %arg4[%c0_23, %c0_24] : memref<512x1xf32, #tpu.memory_space<vmem>>, vector<512x1xf32>
    %42 = vector.broadcast %41 : vector<512x1xf32> to vector<512x128xf32>
    %43 = arith.mulf %40, %42 : vector<512x128xf32>
    %44 = arith.truncf %43 : vector<512x128xf32> to vector<512x128xbf16>
    %c0_25 = arith.constant 0 : index
    %c0_26 = arith.constant 0 : index
    %45 = vector.load %arg6[%c0_25, %c0_26] : memref<512x128xbf16, #tpu.memory_space<vmem>>, vector<512x128xbf16>
    tpu.vector_store %arg6[%c0_25, %c0_26], %44 {strides = array<i32>} : memref<512x128xbf16, #tpu.memory_space<vmem>>, vector<512x128xbf16>,
    %cst_27 = arith.constant dense<0.000000e+00> : vector<128xf32>
    %46 = vector.multi_reduction <add>, %43, %cst_27 [0] : vector<512x128xf32> to vector<128xf32>
    %47 = vector.shape_cast %46 : vector<128xf32> to vector<1x128xf32>
    %48 = arith.mulf %43, %43 : vector<512x128xf32>
    %cst_28 = arith.constant dense<0.000000e+00> : vector<128xf32>
    %49 = vector.multi_reduction <add>, %48, %cst_28 [0] : vector<512x128xf32> to vector<128xf32>
    %50 = vector.shape_cast %49 : vector<128xf32> to vector<1x128xf32>
    %51 = tpu.iota {dimensions = array<i32: 0>} : vector<8x128xi32>
    %c0_i32 = arith.constant 0 : i32
    %52 = vector.broadcast %c0_i32 : i32 to vector<8x128xi32>
    %53 = arith.cmpi eq, %51, %52 : vector<8x128xi32>
    %c1_i32 = arith.constant 1 : i32
    %54 = vector.broadcast %c1_i32 : i32 to vector<8x128xi32>
    %55 = arith.cmpi eq, %51, %54 : vector<8x128xi32>
    %cst_29 = arith.constant 0.000000e+00 : f32
    %56 = vector.shape_cast %50 : vector<1x128xf32> to vector<1x128xf32>
    %57 = vector.broadcast %56 : vector<1x128xf32> to vector<8x128xf32>
    %58 = vector.broadcast %cst_29 : f32 to vector<8x128xf32>
    %59 = arith.select %55, %57, %58 : vector<8x128xi1>, vector<8x128xf32>
    %60 = vector.shape_cast %47 : vector<1x128xf32> to vector<1x128xf32>
    %61 = vector.broadcast %60 : vector<1x128xf32> to vector<8x128xf32>
    %62 = arith.select %53, %61, %59 : vector<8x128xi1>, vector<8x128xf32>
    %c0_30 = arith.constant 0 : index
    %c0_31 = arith.constant 0 : index
    %63 = vector.load %arg7[%c0_30, %c0_31] : memref<8x128xf32, #tpu.memory_space<vmem>>, vector<8x128xf32>
    tpu.vector_store %arg7[%c0_30, %c0_31], %62 {strides = array<i32>} : memref<8x128xf32, #tpu.memory_space<vmem>>, vector<8x128xf32>,
    return
  }
  func.func @transform_0(%arg0: i32, %arg1: i32) -> (i32, i32) {
    %c0_i32 = arith.constant 0 : i32
    %c0_i32_0 = arith.constant 0 : i32
    return %arg1, %c0_i32 : i32, i32
  }
  func.func @transform_1(%arg0: i32, %arg1: i32) -> (i32, i32, i32) {
    %c0_i32 = arith.constant 0 : i32
    %c0_i32_0 = arith.constant 0 : i32
    %c0_i32_1 = arith.constant 0 : i32
    return %arg1, %c0_i32, %c0_i32_0 : i32, i32, i32
  }
  func.func @transform_2(%arg0: i32, %arg1: i32) -> (i32, i32) {
    %c0_i32 = arith.constant 0 : i32
    %c0_i32_0 = arith.constant 0 : i32
    return %arg1, %c0_i32 : i32, i32
  }
  func.func @transform_3(%arg0: i32, %arg1: i32) -> (i32, i32) {
    %c0_i32 = arith.constant 0 : i32
    %c0_i32_0 = arith.constant 0 : i32
    return %c0_i32, %arg0 : i32, i32
  }
  func.func @transform_4(%arg0: i32, %arg1: i32) -> (i32, i32) {
    %c0_i32 = arith.constant 0 : i32
    return %arg1, %arg0 : i32, i32
  }
  func.func @transform_5(%arg0: i32, %arg1: i32) -> (i32, i32) {
    %c0_i32 = arith.constant 0 : i32
    return %arg1, %arg0 : i32, i32
  }
}

module attributes {stable_mosaic.version = 11 : i64} {
  func.func @_bn_act_kernel(%arg0: i32, %arg1: i32, %arg2: memref<512x128xbf16, #tpu.memory_space<vmem>>, %arg3: memref<1x128xf32, #tpu.memory_space<vmem>>, %arg4: memref<1x128xf32, #tpu.memory_space<vmem>>, %arg5: memref<512x128xbf16, #tpu.memory_space<vmem>>) attributes {dimension_semantics = [#tpu.dimension_semantics<parallel>, #tpu.dimension_semantics<parallel>], iteration_bounds = array<i64: 2, 1>, scalar_prefetch = 0 : i64, scratch_operands = 0 : i64, tpu.core_type = #tpu.core_type<tc>, window_params = [{transform_indices = @transform_0, window_bounds = array<i64: 512, 128>}, {transform_indices = @transform_1, window_bounds = array<i64: 1, 128>}, {transform_indices = @transform_2, window_bounds = array<i64: 1, 128>}, {transform_indices = @transform_3, window_bounds = array<i64: 512, 128>}]} {
    %c0 = arith.constant 0 : index
    %c0_0 = arith.constant 0 : index
    %0 = vector.load %arg2[%c0, %c0_0] : memref<512x128xbf16, #tpu.memory_space<vmem>>, vector<512x128xbf16>
    %1 = arith.extf %0 : vector<512x128xbf16> to vector<512x128xf32>
    %c0_1 = arith.constant 0 : index
    %c0_2 = arith.constant 0 : index
    %2 = vector.load %arg3[%c0_1, %c0_2] : memref<1x128xf32, #tpu.memory_space<vmem>>, vector<1x128xf32>
    %3 = vector.broadcast %2 : vector<1x128xf32> to vector<512x128xf32>
    %4 = arith.mulf %1, %3 : vector<512x128xf32>
    %c0_3 = arith.constant 0 : index
    %c0_4 = arith.constant 0 : index
    %5 = vector.load %arg4[%c0_3, %c0_4] : memref<1x128xf32, #tpu.memory_space<vmem>>, vector<1x128xf32>
    %6 = vector.broadcast %5 : vector<1x128xf32> to vector<512x128xf32>
    %7 = arith.addf %4, %6 : vector<512x128xf32>
    %cst = arith.constant 0.000000e+00 : f32
    %8 = vector.broadcast %cst : f32 to vector<512x128xf32>
    %9 = arith.maximumf %7, %8 : vector<512x128xf32>
    %10 = arith.truncf %9 : vector<512x128xf32> to vector<512x128xbf16>
    %c0_5 = arith.constant 0 : index
    %c0_6 = arith.constant 0 : index
    %11 = vector.load %arg5[%c0_5, %c0_6] : memref<512x128xbf16, #tpu.memory_space<vmem>>, vector<512x128xbf16>
    tpu.vector_store %arg5[%c0_5, %c0_6], %10 {strides = array<i32>} : memref<512x128xbf16, #tpu.memory_space<vmem>>, vector<512x128xbf16>,
    return
  }
  func.func @transform_0(%arg0: i32, %arg1: i32) -> (i32, i32) {
    %c0_i32 = arith.constant 0 : i32
    return %arg0, %arg1 : i32, i32
  }
  func.func @transform_1(%arg0: i32, %arg1: i32) -> (i32, i32) {
    %c0_i32 = arith.constant 0 : i32
    %c0_i32_0 = arith.constant 0 : i32
    return %c0_i32, %arg1 : i32, i32
  }
  func.func @transform_2(%arg0: i32, %arg1: i32) -> (i32, i32) {
    %c0_i32 = arith.constant 0 : i32
    %c0_i32_0 = arith.constant 0 : i32
    return %c0_i32, %arg1 : i32, i32
  }
  func.func @transform_3(%arg0: i32, %arg1: i32) -> (i32, i32) {
    %c0_i32 = arith.constant 0 : i32
    return %arg0, %arg1 : i32, i32
  }
}

module attributes {stable_mosaic.version = 11 : i64} {
  func.func @_bn_add_act_kernel(%arg0: i32, %arg1: i32, %arg2: memref<512x128xbf16, #tpu.memory_space<vmem>>, %arg3: memref<1x128xf32, #tpu.memory_space<vmem>>, %arg4: memref<1x128xf32, #tpu.memory_space<vmem>>, %arg5: memref<512x128xbf16, #tpu.memory_space<vmem>>, %arg6: memref<512x128xf32, #tpu.memory_space<vmem>>) attributes {dimension_semantics = [#tpu.dimension_semantics<parallel>, #tpu.dimension_semantics<parallel>], iteration_bounds = array<i64: 1, 1>, scalar_prefetch = 0 : i64, scratch_operands = 0 : i64, tpu.core_type = #tpu.core_type<tc>, window_params = [{transform_indices = @transform_0, window_bounds = array<i64: 512, 128>}, {transform_indices = @transform_1, window_bounds = array<i64: 1, 128>}, {transform_indices = @transform_2, window_bounds = array<i64: 1, 128>}, {transform_indices = @transform_3, window_bounds = array<i64: 512, 128>}, {transform_indices = @transform_4, window_bounds = array<i64: 512, 128>}]} {
    %c0 = arith.constant 0 : index
    %c0_0 = arith.constant 0 : index
    %0 = vector.load %arg2[%c0, %c0_0] : memref<512x128xbf16, #tpu.memory_space<vmem>>, vector<512x128xbf16>
    %1 = arith.extf %0 : vector<512x128xbf16> to vector<512x128xf32>
    %c0_1 = arith.constant 0 : index
    %c0_2 = arith.constant 0 : index
    %2 = vector.load %arg5[%c0_1, %c0_2] : memref<512x128xbf16, #tpu.memory_space<vmem>>, vector<512x128xbf16>
    %3 = arith.extf %2 : vector<512x128xbf16> to vector<512x128xf32>
    %c0_3 = arith.constant 0 : index
    %c0_4 = arith.constant 0 : index
    %4 = vector.load %arg3[%c0_3, %c0_4] : memref<1x128xf32, #tpu.memory_space<vmem>>, vector<1x128xf32>
    %5 = vector.broadcast %4 : vector<1x128xf32> to vector<512x128xf32>
    %6 = arith.mulf %1, %5 : vector<512x128xf32>
    %c0_5 = arith.constant 0 : index
    %c0_6 = arith.constant 0 : index
    %7 = vector.load %arg4[%c0_5, %c0_6] : memref<1x128xf32, #tpu.memory_space<vmem>>, vector<1x128xf32>
    %8 = vector.broadcast %7 : vector<1x128xf32> to vector<512x128xf32>
    %9 = arith.addf %6, %8 : vector<512x128xf32>
    %10 = arith.addf %9, %3 : vector<512x128xf32>
    %cst = arith.constant 0.000000e+00 : f32
    %11 = vector.broadcast %cst : f32 to vector<512x128xf32>
    %12 = arith.maximumf %10, %11 : vector<512x128xf32>
    %c0_7 = arith.constant 0 : index
    %c0_8 = arith.constant 0 : index
    %13 = vector.load %arg6[%c0_7, %c0_8] : memref<512x128xf32, #tpu.memory_space<vmem>>, vector<512x128xf32>
    tpu.vector_store %arg6[%c0_7, %c0_8], %12 {strides = array<i32>} : memref<512x128xf32, #tpu.memory_space<vmem>>, vector<512x128xf32>,
    return
  }
  func.func @transform_0(%arg0: i32, %arg1: i32) -> (i32, i32) {
    %c0_i32 = arith.constant 0 : i32
    return %arg0, %arg1 : i32, i32
  }
  func.func @transform_1(%arg0: i32, %arg1: i32) -> (i32, i32) {
    %c0_i32 = arith.constant 0 : i32
    %c0_i32_0 = arith.constant 0 : i32
    return %c0_i32, %arg1 : i32, i32
  }
  func.func @transform_2(%arg0: i32, %arg1: i32) -> (i32, i32) {
    %c0_i32 = arith.constant 0 : i32
    %c0_i32_0 = arith.constant 0 : i32
    return %c0_i32, %arg1 : i32, i32
  }
  func.func @transform_3(%arg0: i32, %arg1: i32) -> (i32, i32) {
    %c0_i32 = arith.constant 0 : i32
    return %arg0, %arg1 : i32, i32
  }
  func.func @transform_4(%arg0: i32, %arg1: i32) -> (i32, i32) {
    %c0_i32 = arith.constant 0 : i32
    return %arg0, %arg1 : i32, i32
  }
}

</mosaic_0001>

<bundles_post_ra>
// kernel: basic_block_forward.5
= control target key start
LH: loop header
LB: loop body
LE: loop exit
PB: predicated region body
PF: predicated region fallthrough
CT: control target
= control target key end

     0   :  { %s1550_s12 = smov 0   ;;  %s1552_s13 = smov 0   ;;  %s1796_s0 = inlined_call_operand.vmem [shape: bf16[1024,128], index: 0, kind: input, shape index: {}]   ;;  %s1797_s1 = inlined_call_operand.vmem [shape: f32[1,128], index: 1, kind: input, shape index: {}]   ;;  %s1798_s2 = inlined_call_operand.vmem [shape: f32[1,128], index: 2, kind: input, shape index: {}]   ;;  %s1799_s3 = inlined_call_operand.vmem [shape: bf16[1024,128], index: 3, kind: output, shape index: {}]  }
   0x1   :  { %s1554_s14 = smov 0  }
   0x2 LB: > { %s25_s15 = sadd.s32 1, %s1524_s13  ;;  %p995_p0 = scmp.ge.s32.totalorder %s1528_s14, 1  ;;  %s1528_s14 = sphi %s1554_s14, %s13_s14   ;;  %s1524_s13 = sphi %s1552_s13, %s1801_s13   ;;  %s1520_s12 = sphi %s1550_s12, %s1800_s12  }
   0x3   : > { %p27_p1 = scmp.ge.s32.totalorder %s25_s15, 2  ;;  %p173_p2 = scmp.lt.s32.totalorder %s1528_s14, 3 }
   0x5   : > { %s1803_s15 = smov (%p27_p1, %s25_s15), 0  ;;  %p174_p3 = pnand %p995_p0, %p173_p2 }
   0x6   : > { %s996_s16 = sshll.u32 (!%p174_p3), %s1520_s12, 6 }
   0x7   : > { %177 = sbr.rel (%p174_p3) target bundleno = 94 (0x5e), region = 32  ;;  %p210_p4 = scmp.lt.s32.totalorder (!%p174_p3), %s996_s16, 127 }
   0xc   : > { %s1805_s16 = smov (!%p210_p4, %s996_s16), 127  ;;  %v1581_v0 = vld [vmem:[%s1797_s1] ss:$0 sm:$0xff] }
   0xd   : > { %s997_s17 = sshll.u32 %s1805_s16, 2  ;;  %v1590_v9 = vld [vmem:[%s1798_s2] ss:$0 sm:$0xff] }
   0xe   : > { %s1576_s20 = scalar_lea.vmem %s1796_s0, %s997_s17  ;;  %s1615_s27 = scalar_lea.vmem %s1799_s3, %s997_s17 }
   0xf   : > { %v1133_v1 = vld [vmem:[%s1576_s20] sm:$0xff]   ;;  %v1420_v2 = vld [vmem:[%s1576_s20 + $0x8] sm:$0xff]   ;;  %v1421_v3 = vld [vmem:[%s1576_s20 + $0x10] sm:$0xff]  }
  0x10   : > { %v1134_v4 = vunpack.c.l.bf16 %v1133_v1  ;;  %v1135_v5 = vunpack.c.h.bf16 %v1133_v1  ;;  %v1138_v6 = vunpack.c.l.bf16 %v1420_v2  ;;  %v1139_v7 = vunpack.c.h.bf16 %v1420_v2  ;;  %v1422_v8 = vld [vmem:[%s1576_s20 + $0x18] sm:$0xff]   ;;  %v1423_v30 = vld [vmem:[%s1576_s20 + $0x20] sm:$0xff]   ;;  %v1424_v35 = vld [vmem:[%s1576_s20 + $0x28] sm:$0xff]  }
  0x11   : > { %v1142_v10 = vunpack.c.l.bf16 %v1421_v3  ;;  %v1143_v11 = vunpack.c.h.bf16 %v1421_v3  ;;  %v1146_v12 = vunpack.c.l.bf16 %v1422_v8  ;;  %v1147_v13 = vunpack.c.h.bf16 %v1422_v8  ;;  %v1425_v40 = vld [vmem:[%s1576_s20 + $0x30] sm:$0xff]   ;;  %v1426_v45 = vld [vmem:[%s1576_s20 + $0x38] sm:$0xff]   ;;  %v1427_v3 = vld [vmem:[%s1576_s20 + $0x40] sm:$0xff]  }
  0x12   : > { %v368_v14 = vmul.f32 %v1134_v4, %v1581_v0  ;;  %v369_v15 = vmul.f32 %v1135_v5, %v1581_v0  ;;  %v370_v16 = vmul.f32 %v1138_v6, %v1581_v0  ;;  %v371_v17 = vmul.f32 %v1139_v7, %v1581_v0 }
  0x13   : > { %v372_v18 = vmul.f32 %v1142_v10, %v1581_v0  ;;  %v373_v19 = vmul.f32 %v1143_v11, %v1581_v0  ;;  %v374_v20 = vmul.f32 %v1146_v12, %v1581_v0  ;;  %v375_v21 = vmul.f32 %v1147_v13, %v1581_v0  ;;  %v1428_v13 = vld [vmem:[%s1576_s20 + $0x48] sm:$0xff]  }
  0x14   : > { %v439_v22 = vadd.f32 %v1590_v9, %v368_v14  ;;  %v440_v23 = vadd.f32 %v1590_v9, %v369_v15  ;;  %v441_v24 = vadd.f32 %v1590_v9, %v370_v16  ;;  %v442_v25 = vadd.f32 %v1590_v9, %v371_v17 }
  0x15   : > { %v443_v26 = vadd.f32 %v1590_v9, %v372_v18  ;;  %v444_v27 = vadd.f32 %v1590_v9, %v373_v19  ;;  %v445_v28 = vadd.f32 %v1590_v9, %v374_v20  ;;  %v446_v29 = vadd.f32 %v1590_v9, %v375_v21  ;;  %v1429_v18 = vld [vmem:[%s1576_s20 + $0x50] sm:$0xff]  }
  0x16   : > { %v503_v31 = vmax.f32 %v439_v22, 0.0  ;;  %v504_v32 = vmax.f32 %v440_v23, 0.0  ;;  %v505_v33 = vmax.f32 %v441_v24, 0.0  ;;  %v506_v34 = vmax.f32 %v442_v25, 0.0  ;;  %v1430_v23 = vld [vmem:[%s1576_s20 + $0x58] sm:$0xff]  }
  0x17   : > { %v507_v36 = vmax.f32 %v443_v26, 0.0  ;;  %v508_v37 = vmax.f32 %v444_v27, 0.0  ;;  %v509_v38 = vmax.f32 %v445_v28, 0.0  ;;  %v510_v39 = vmax.f32 %v446_v29, 0.0 }
  0x18   : > { %v1263_v41 = vpack.c.bf16 %v504_v32, %v503_v31  ;;  %v1268_v42 = vpack.c.bf16 %v506_v34, %v505_v33  ;;  %v1150_v43 = vunpack.c.l.bf16 %v1423_v30  ;;  %v1151_v44 = vunpack.c.h.bf16 %v1423_v30 }
  0x19   : > { %v1273_v46 = vpack.c.bf16 %v508_v37, %v507_v36  ;;  %v1278_v47 = vpack.c.bf16 %v510_v39, %v509_v38  ;;  %v1154_v48 = vunpack.c.l.bf16 %v1424_v35  ;;  %v1155_v49 = vunpack.c.h.bf16 %v1424_v35 }
  0x1a   : > { %1264 = vst [vmem:[%s1615_s27] sm:$0xff] %v1263_v41   ;;  %1451 = vst [vmem:[%s1615_s27 + $0x8] sm:$0xff] %v1268_v42   ;;  %v376_v50 = vmul.f32 %v1150_v43, %v1581_v0  ;;  %v377_v51 = vmul.f32 %v1151_v44, %v1581_v0  ;;  %v1158_v52 = vunpack.c.l.bf16 %v1425_v40  ;;  %v1159_v53 = vunpack.c.h.bf16 %v1425_v40  ;;  %v1431_v40 = vld [vmem:[%s1576_s20 + $0x60] sm:$0xff]  }
  0x1b   : > { %1452 = vst [vmem:[%s1615_s27 + $0x10] sm:$0xff] %v1273_v46   ;;  %1453 = vst [vmem:[%s1615_s27 + $0x18] sm:$0xff] %v1278_v47   ;;  %v378_v54 = vmul.f32 %v1154_v48, %v1581_v0  ;;  %v379_v55 = vmul.f32 %v1155_v49, %v1581_v0  ;;  %v1162_v56 = vunpack.c.l.bf16 %v1426_v45  ;;  %v1163_v57 = vunpack.c.h.bf16 %v1426_v45 }
  0x1c   : > { %v447_v58 = vadd.f32 %v1590_v9, %v376_v50  ;;  %v448_v59 = vadd.f32 %v1590_v9, %v377_v51  ;;  %v380_v60 = vmul.f32 %v1158_v52, %v1581_v0  ;;  %v381_v61 = vmul.f32 %v1159_v53, %v1581_v0  ;;  %v1432_v53 = vld [vmem:[%s1576_s20 + $0x68] sm:$0xff]  }
  0x1d   : > { %v449_v62 = vadd.f32 %v1590_v9, %v378_v54  ;;  %v450_v63 = vadd.f32 %v1590_v9, %v379_v55  ;;  %v382_v1 = vmul.f32 %v1162_v56, %v1581_v0  ;;  %v383_v2 = vmul.f32 %v1163_v57, %v1581_v0 }
  0x1e   : > { %v511_v4 = vmax.f32 %v447_v58, 0.0  ;;  %v512_v5 = vmax.f32 %v448_v59, 0.0  ;;  %v451_v6 = vadd.f32 %v1590_v9, %v380_v60  ;;  %v452_v7 = vadd.f32 %v1590_v9, %v381_v61  ;;  %v1433_v58 = vld [vmem:[%s1576_s20 + $0x70] sm:$0xff]  }
  0x1f   : > { %v513_v8 = vmax.f32 %v449_v62, 0.0  ;;  %v514_v10 = vmax.f32 %v450_v63, 0.0  ;;  %v453_v11 = vadd.f32 %v1590_v9, %v382_v1  ;;  %v454_v12 = vadd.f32 %v1590_v9, %v383_v2  ;;  %v1434_v63 = vld [vmem:[%s1576_s20 + $0x78] sm:$0xff]  }
  0x20   : > { %v1283_v14 = vpack.c.bf16 %v512_v5, %v511_v4  ;;  %v515_v15 = vmax.f32 %v451_v6, 0.0  ;;  %v516_v16 = vmax.f32 %v452_v7, 0.0  ;;  %v1166_v17 = vunpack.c.l.bf16 %v1427_v3 }
  0x21   : > { %v1288_v19 = vpack.c.bf16 %v514_v10, %v513_v8  ;;  %v517_v20 = vmax.f32 %v453_v11, 0.0  ;;  %v518_v21 = vmax.f32 %v454_v12, 0.0  ;;  %v1167_v22 = vunpack.c.h.bf16 %v1427_v3 }
  0x22   : > { %1454 = vst [vmem:[%s1615_s27 + $0x20] sm:$0xff] %v1283_v14   ;;  %v1293_v24 = vpack.c.bf16 %v516_v16, %v515_v15  ;;  %v384_v25 = vmul.f32 %v1166_v17, %v1581_v0  ;;  %v1170_v26 = vunpack.c.l.bf16 %v1428_v13  ;;  %v1171_v27 = vunpack.c.h.bf16 %v1428_v13  ;;  %v1435_v14 = vld [vmem:[%s1576_s20 + $0x80] sm:$0xff]  }
  0x23   : > { %1455 = vst [vmem:[%s1615_s27 + $0x28] sm:$0xff] %v1288_v19   ;;  %v1298_v28 = vpack.c.bf16 %v518_v21, %v517_v20  ;;  %v385_v29 = vmul.f32 %v1167_v22, %v1581_v0  ;;  %v1174_v30 = vunpack.c.l.bf16 %v1429_v18  ;;  %v1175_v31 = vunpack.c.h.bf16 %v1429_v18 }
  0x24   : > { %1456 = vst [vmem:[%s1615_s27 + $0x30] sm:$0xff] %v1293_v24   ;;  %v455_v32 = vadd.f32 %v1590_v9, %v384_v25  ;;  %v386_v33 = vmul.f32 %v1170_v26, %v1581_v0  ;;  %v387_v34 = vmul.f32 %v1171_v27, %v1581_v0  ;;  %v1178_v35 = vunpack.c.l.bf16 %v1430_v23 }
  0x25   : > { %1457 = vst [vmem:[%s1615_s27 + $0x38] sm:$0xff] %v1298_v28   ;;  %v456_v36 = vadd.f32 %v1590_v9, %v385_v29  ;;  %v388_v37 = vmul.f32 %v1174_v30, %v1581_v0  ;;  %v389_v38 = vmul.f32 %v1175_v31, %v1581_v0  ;;  %v1179_v39 = vunpack.c.h.bf16 %v1430_v23  ;;  %v1436_v31 = vld [vmem:[%s1576_s20 + $0x88] sm:$0xff]  }
  0x26   : > { %v519_v41 = vmax.f32 %v455_v32, 0.0  ;;  %v457_v42 = vadd.f32 %v1590_v9, %v386_v33  ;;  %v458_v43 = vadd.f32 %v1590_v9, %v387_v34  ;;  %v390_v44 = vmul.f32 %v1178_v35, %v1581_v0 }
  0x27   : > { %v520_v45 = vmax.f32 %v456_v36, 0.0  ;;  %v459_v46 = vadd.f32 %v1590_v9, %v388_v37  ;;  %v460_v47 = vadd.f32 %v1590_v9, %v389_v38  ;;  %v391_v48 = vmul.f32 %v1179_v39, %v1581_v0  ;;  %v1437_v36 = vld [vmem:[%s1576_s20 + $0x90] sm:$0xff]  }
  0x28   : > { %v521_v49 = vmax.f32 %v457_v42, 0.0  ;;  %v522_v50 = vmax.f32 %v458_v43, 0.0  ;;  %v461_v51 = vadd.f32 %v1590_v9, %v390_v44  ;;  %v1182_v52 = vunpack.c.l.bf16 %v1431_v40 }
  0x29   : > { %v1303_v54 = vpack.c.bf16 %v520_v45, %v519_v41  ;;  %v523_v55 = vmax.f32 %v459_v46, 0.0  ;;  %v524_v56 = vmax.f32 %v460_v47, 0.0  ;;  %v462_v57 = vadd.f32 %v1590_v9, %v391_v48  ;;  %v1438_v41 = vld [vmem:[%s1576_s20 + $0x98] sm:$0xff]  }
  0x2a   : > { %v1308_v59 = vpack.c.bf16 %v522_v50, %v521_v49  ;;  %v525_v60 = vmax.f32 %v461_v51, 0.0  ;;  %v1183_v61 = vunpack.c.h.bf16 %v1431_v40  ;;  %v392_v62 = vmul.f32 %v1182_v52, %v1581_v0 }
  0x2b   : > { %1458 = vst [vmem:[%s1615_s27 + $0x40] sm:$0xff] %v1303_v54   ;;  %v1313_v1 = vpack.c.bf16 %v524_v56, %v523_v55  ;;  %v526_v2 = vmax.f32 %v462_v57, 0.0  ;;  %v1186_v3 = vunpack.c.l.bf16 %v1432_v53  ;;  %v1187_v4 = vunpack.c.h.bf16 %v1432_v53  ;;  %v1439_v54 = vld [vmem:[%s1576_s20 + $0xa0] sm:$0xff]  }
  0x2c   : > { %1459 = vst [vmem:[%s1615_s27 + $0x48] sm:$0xff] %v1308_v59   ;;  %v393_v5 = vmul.f32 %v1183_v61, %v1581_v0  ;;  %v463_v6 = vadd.f32 %v1590_v9, %v392_v62  ;;  %v1190_v7 = vunpack.c.l.bf16 %v1433_v58  ;;  %v1191_v8 = vunpack.c.h.bf16 %v1433_v58 }
  0x2d   : > { %1460 = vst [vmem:[%s1615_s27 + $0x50] sm:$0xff] %v1313_v1   ;;  %v1318_v10 = vpack.c.bf16 %v526_v2, %v525_v60  ;;  %v394_v11 = vmul.f32 %v1186_v3, %v1581_v0  ;;  %v395_v12 = vmul.f32 %v1187_v4, %v1581_v0  ;;  %v1194_v13 = vunpack.c.l.bf16 %v1434_v63  ;;  %v1440_v4 = vld [vmem:[%s1576_s20 + $0xa8] sm:$0xff]  }
  0x2e   : > { %v464_v15 = vadd.f32 %v1590_v9, %v393_v5  ;;  %v527_v16 = vmax.f32 %v463_v6, 0.0  ;;  %v396_v17 = vmul.f32 %v1190_v7, %v1581_v0  ;;  %v397_v18 = vmul.f32 %v1191_v8, %v1581_v0 }
  0x2f   : > { %1461 = vst [vmem:[%s1615_s27 + $0x58] sm:$0xff] %v1318_v10   ;;  %v465_v19 = vadd.f32 %v1590_v9, %v394_v11  ;;  %v466_v20 = vadd.f32 %v1590_v9, %v395_v12  ;;  %v1195_v21 = vunpack.c.h.bf16 %v1434_v63  ;;  %v398_v22 = vmul.f32 %v1194_v13, %v1581_v0 }
  0x30   : > { %v528_v23 = vmax.f32 %v464_v15, 0.0  ;;  %v467_v24 = vadd.f32 %v1590_v9, %v396_v17  ;;  %v468_v25 = vadd.f32 %v1590_v9, %v397_v18  ;;  %v1198_v26 = vunpack.c.l.bf16 %v1435_v14 }
  0x31   : > { %v529_v27 = vmax.f32 %v465_v19, 0.0  ;;  %v530_v28 = vmax.f32 %v466_v20, 0.0  ;;  %v399_v29 = vmul.f32 %v1195_v21, %v1581_v0  ;;  %v469_v30 = vadd.f32 %v1590_v9, %v398_v22  ;;  %v1442_v19 = vld [vmem:[%s1576_s20 + $0xb8] sm:$0xff]  }
  0x32   : > { %v1323_v32 = vpack.c.bf16 %v528_v23, %v527_v16  ;;  %v531_v33 = vmax.f32 %v467_v24, 0.0  ;;  %v532_v34 = vmax.f32 %v468_v25, 0.0  ;;  %v1199_v35 = vunpack.c.h.bf16 %v1435_v14  ;;  %v1441_v14 = vld [vmem:[%s1576_s20 + $0xb0] sm:$0xff]  }
  0x33   : > { %v1328_v37 = vpack.c.bf16 %v530_v28, %v529_v27  ;;  %v470_v38 = vadd.f32 %v1590_v9, %v399_v29  ;;  %v533_v39 = vmax.f32 %v469_v30, 0.0  ;;  %v400_v40 = vmul.f32 %v1198_v26, %v1581_v0 }
  0x34   : > { %1462 = vst [vmem:[%s1615_s27 + $0x60] sm:$0xff] %v1323_v32   ;;  %v1333_v42 = vpack.c.bf16 %v532_v34, %v531_v33  ;;  %v401_v43 = vmul.f32 %v1199_v35, %v1581_v0  ;;  %v1202_v44 = vunpack.c.l.bf16 %v1436_v31  ;;  %v1203_v45 = vunpack.c.h.bf16 %v1436_v31  ;;  %v1443_v32 = vld [vmem:[%s1576_s20 + $0xc0] sm:$0xff]  }
  0x35   : > { %1463 = vst [vmem:[%s1615_s27 + $0x68] sm:$0xff] %v1328_v37   ;;  %v534_v46 = vmax.f32 %v470_v38, 0.0  ;;  %v471_v47 = vadd.f32 %v1590_v9, %v400_v40  ;;  %v1206_v48 = vunpack.c.l.bf16 %v1437_v36  ;;  %v1207_v49 = vunpack.c.h.bf16 %v1437_v36 }
  0x36   : > { %1464 = vst [vmem:[%s1615_s27 + $0x70] sm:$0xff] %v1333_v42   ;;  %v472_v50 = vadd.f32 %v1590_v9, %v401_v43  ;;  %v402_v51 = vmul.f32 %v1202_v44, %v1581_v0  ;;  %v403_v52 = vmul.f32 %v1203_v45, %v1581_v0  ;;  %v1210_v53 = vunpack.c.l.bf16 %v1438_v41  ;;  %v1444_v45 = vld [vmem:[%s1576_s20 + $0xc8] sm:$0xff]  }
  0x37   : > { %v1338_v55 = vpack.c.bf16 %v534_v46, %v533_v39  ;;  %v535_v56 = vmax.f32 %v471_v47, 0.0  ;;  %v404_v57 = vmul.f32 %v1206_v48, %v1581_v0  ;;  %v405_v58 = vmul.f32 %v1207_v49, %v1581_v0 }
  0x38   : > { %v536_v59 = vmax.f32 %v472_v50, 0.0  ;;  %v473_v60 = vadd.f32 %v1590_v9, %v402_v51  ;;  %v474_v61 = vadd.f32 %v1590_v9, %v403_v52  ;;  %v1211_v62 = vunpack.c.h.bf16 %v1438_v41 }
  0x39   : > { %1465 = vst [vmem:[%s1615_s27 + $0x78] sm:$0xff] %v1338_v55   ;;  %v475_v63 = vadd.f32 %v1590_v9, %v404_v57  ;;  %v476_v1 = vadd.f32 %v1590_v9, %v405_v58  ;;  %v406_v2 = vmul.f32 %v1210_v53, %v1581_v0  ;;  %v1214_v3 = vunpack.c.l.bf16 %v1439_v54 }
  0x3a   : > { %v1343_v5 = vpack.c.bf16 %v536_v59, %v535_v56  ;;  %v537_v6 = vmax.f32 %v473_v60, 0.0  ;;  %v538_v7 = vmax.f32 %v474_v61, 0.0  ;;  %v407_v8 = vmul.f32 %v1211_v62, %v1581_v0 }
  0x3b   : > { %v539_v10 = vmax.f32 %v475_v63, 0.0  ;;  %v540_v11 = vmax.f32 %v476_v1, 0.0  ;;  %v477_v12 = vadd.f32 %v1590_v9, %v406_v2  ;;  %v1215_v13 = vunpack.c.h.bf16 %v1439_v54  ;;  %v1445_v54 = vld [vmem:[%s1576_s20 + $0xd0] sm:$0xff]   ;;  %v1446_v63 = vld [vmem:[%s1576_s20 + $0xd8] sm:$0xff]  }
  0x3c   : > { %1466 = vst [vmem:[%s1615_s27 + $0x80] sm:$0xff] %v1343_v5   ;;  %v1348_v15 = vpack.c.bf16 %v538_v7, %v537_v6  ;;  %v478_v16 = vadd.f32 %v1590_v9, %v407_v8  ;;  %v408_v17 = vmul.f32 %v1214_v3, %v1581_v0  ;;  %v1218_v18 = vunpack.c.l.bf16 %v1440_v4 }
  0x3d   : > { %v1353_v20 = vpack.c.bf16 %v540_v11, %v539_v10  ;;  %v541_v21 = vmax.f32 %v477_v12, 0.0  ;;  %v409_v22 = vmul.f32 %v1215_v13, %v1581_v0  ;;  %v1219_v23 = vunpack.c.h.bf16 %v1440_v4  ;;  %v1447_v10 = vld [vmem:[%s1576_s20 + $0xe0] sm:$0xff]  }
  0x3e   : > { %1467 = vst [vmem:[%s1615_s27 + $0x88] sm:$0xff] %v1348_v15   ;;  %v542_v24 = vmax.f32 %v478_v16, 0.0  ;;  %v479_v25 = vadd.f32 %v1590_v9, %v408_v17  ;;  %v410_v26 = vmul.f32 %v1218_v18, %v1581_v0  ;;  %v1222_v27 = vunpack.c.l.bf16 %v1441_v14 }
  0x3f   : > { %1468 = vst [vmem:[%s1615_s27 + $0x90] sm:$0xff] %v1353_v20   ;;  %v480_v28 = vadd.f32 %v1590_v9, %v409_v22  ;;  %v411_v29 = vmul.f32 %v1219_v23, %v1581_v0  ;;  %v1223_v30 = vunpack.c.h.bf16 %v1441_v14  ;;  %v1226_v31 = vunpack.c.l.bf16 %v1442_v19  ;;  %v1448_v23 = vld [vmem:[%s1576_s20 + $0xe8] sm:$0xff]  }
  0x40   : > { %v1358_v33 = vpack.c.bf16 %v542_v24, %v541_v21  ;;  %v543_v34 = vmax.f32 %v479_v25, 0.0  ;;  %v481_v35 = vadd.f32 %v1590_v9, %v410_v26  ;;  %v412_v36 = vmul.f32 %v1222_v27, %v1581_v0 }
  0x41   : > { %v544_v37 = vmax.f32 %v480_v28, 0.0  ;;  %v482_v38 = vadd.f32 %v1590_v9, %v411_v29  ;;  %v413_v39 = vmul.f32 %v1223_v30, %v1581_v0  ;;  %v1227_v40 = vunpack.c.h.bf16 %v1442_v19 }
  0x42   : > { %1469 = vst [vmem:[%s1615_s27 + $0x98] sm:$0xff] %v1358_v33   ;;  %v545_v41 = vmax.f32 %v481_v35, 0.0  ;;  %v483_v42 = vadd.f32 %v1590_v9, %v412_v36  ;;  %v414_v43 = vmul.f32 %v1226_v31, %v1581_v0  ;;  %v1230_v44 = vunpack.c.l.bf16 %v1443_v32 }
  0x43   : > { %v1363_v46 = vpack.c.bf16 %v544_v37, %v543_v34  ;;  %v546_v47 = vmax.f32 %v482_v38, 0.0  ;;  %v484_v48 = vadd.f32 %v1590_v9, %v413_v39  ;;  %v415_v49 = vmul.f32 %v1227_v40, %v1581_v0 }
  0x44   : > { %v547_v50 = vmax.f32 %v483_v42, 0.0  ;;  %v485_v51 = vadd.f32 %v1590_v9, %v414_v43  ;;  %v1231_v52 = vunpack.c.h.bf16 %v1443_v32  ;;  %v416_v53 = vmul.f32 %v1230_v44, %v1581_v0  ;;  %v1449_v32 = vld [vmem:[%s1576_s20 + $0xf0] sm:$0xff]  }
  0x45   : > { %1470 = vst [vmem:[%s1615_s27 + $0xa0] sm:$0xff] %v1363_v46   ;;  %v1368_v55 = vpack.c.bf16 %v546_v47, %v545_v41  ;;  %v548_v56 = vmax.f32 %v484_v48, 0.0  ;;  %v486_v57 = vadd.f32 %v1590_v9, %v415_v49  ;;  %v1234_v58 = vunpack.c.l.bf16 %v1444_v45  ;;  %v1450_v41 = vld [vmem:[%s1576_s20 + $0xf8] sm:$0xff]  }
  0x46   : > { %v549_v59 = vmax.f32 %v485_v51, 0.0  ;;  %v417_v60 = vmul.f32 %v1231_v52, %v1581_v0  ;;  %v487_v61 = vadd.f32 %v1590_v9, %v416_v53  ;;  %v1235_v62 = vunpack.c.h.bf16 %v1444_v45 }
  0x47   : > { %1471 = vst [vmem:[%s1615_s27 + $0xa8] sm:$0xff] %v1368_v55   ;;  %v1373_v1 = vpack.c.bf16 %v548_v56, %v547_v50  ;;  %v550_v2 = vmax.f32 %v486_v57, 0.0  ;;  %v418_v3 = vmul.f32 %v1234_v58, %v1581_v0  ;;  %v1238_v4 = vunpack.c.l.bf16 %v1445_v54 }
  0x48   : > { %v488_v5 = vadd.f32 %v1590_v9, %v417_v60  ;;  %v551_v6 = vmax.f32 %v487_v61, 0.0  ;;  %v419_v7 = vmul.f32 %v1235_v62, %v1581_v0  ;;  %v1239_v8 = vunpack.c.h.bf16 %v1445_v54 }
  0x49   : > { %1472 = vst [vmem:[%s1615_s27 + $0xb0] sm:$0xff] %v1373_v1   ;;  %v1378_v11 = vpack.c.bf16 %v550_v2, %v549_v59  ;;  %v489_v12 = vadd.f32 %v1590_v9, %v418_v3  ;;  %v420_v13 = vmul.f32 %v1238_v4, %v1581_v0  ;;  %v1242_v14 = vunpack.c.l.bf16 %v1446_v63 }
  0x4a   : > { %v552_v15 = vmax.f32 %v488_v5, 0.0  ;;  %v490_v16 = vadd.f32 %v1590_v9, %v419_v7  ;;  %v421_v17 = vmul.f32 %v1239_v8, %v1581_v0  ;;  %v1243_v18 = vunpack.c.h.bf16 %v1446_v63 }
  0x4b   : > { %1473 = vst [vmem:[%s1615_s27 + $0xb8] sm:$0xff] %v1378_v11   ;;  %v553_v19 = vmax.f32 %v489_v12, 0.0  ;;  %v491_v20 = vadd.f32 %v1590_v9, %v420_v13  ;;  %v422_v21 = vmul.f32 %v1242_v14, %v1581_v0  ;;  %v1246_v22 = vunpack.c.l.bf16 %v1447_v10 }
  0x4c   : > { %v1383_v24 = vpack.c.bf16 %v552_v15, %v551_v6  ;;  %v554_v25 = vmax.f32 %v490_v16, 0.0  ;;  %v492_v26 = vadd.f32 %v1590_v9, %v421_v17  ;;  %v423_v27 = vmul.f32 %v1243_v18, %v1581_v0 }
  0x4d   : > { %v555_v28 = vmax.f32 %v491_v20, 0.0  ;;  %v493_v29 = vadd.f32 %v1590_v9, %v422_v21  ;;  %v1247_v30 = vunpack.c.h.bf16 %v1447_v10  ;;  %v424_v31 = vmul.f32 %v1246_v22, %v1581_v0 }
  0x4e   : > { %1474 = vst [vmem:[%s1615_s27 + $0xc0] sm:$0xff] %v1383_v24   ;;  %v1388_v33 = vpack.c.bf16 %v554_v25, %v553_v19  ;;  %v556_v34 = vmax.f32 %v492_v26, 0.0  ;;  %v494_v35 = vadd.f32 %v1590_v9, %v423_v27  ;;  %v1250_v36 = vunpack.c.l.bf16 %v1448_v23 }
  0x4f   : > { %v557_v37 = vmax.f32 %v493_v29, 0.0  ;;  %v425_v38 = vmul.f32 %v1247_v30, %v1581_v0  ;;  %v495_v39 = vadd.f32 %v1590_v9, %v424_v31  ;;  %v1251_v40 = vunpack.c.h.bf16 %v1448_v23 }
  0x50   : > { %1475 = vst [vmem:[%s1615_s27 + $0xc8] sm:$0xff] %v1388_v33   ;;  %v1393_v42 = vpack.c.bf16 %v556_v34, %v555_v28  ;;  %v558_v43 = vmax.f32 %v494_v35, 0.0  ;;  %v426_v44 = vmul.f32 %v1250_v36, %v1581_v0  ;;  %v1254_v45 = vunpack.c.l.bf16 %v1449_v32 }
  0x51   : > { %v496_v46 = vadd.f32 %v1590_v9, %v425_v38  ;;  %v559_v47 = vmax.f32 %v495_v39, 0.0  ;;  %v427_v48 = vmul.f32 %v1251_v40, %v1581_v0  ;;  %v1255_v49 = vunpack.c.h.bf16 %v1449_v32 }
  0x52   : > { %1476 = vst [vmem:[%s1615_s27 + $0xd0] sm:$0xff] %v1393_v42   ;;  %v1398_v50 = vpack.c.bf16 %v558_v43, %v557_v37  ;;  %v497_v51 = vadd.f32 %v1590_v9, %v426_v44  ;;  %v428_v52 = vmul.f32 %v1254_v45, %v1581_v0  ;;  %v1258_v53 = vunpack.c.l.bf16 %v1450_v41 }
  0x53   : > { %v560_v54 = vmax.f32 %v496_v46, 0.0  ;;  %v498_v55 = vadd.f32 %v1590_v9, %v427_v48  ;;  %v429_v56 = vmul.f32 %v1255_v49, %v1581_v0  ;;  %v1259_v57 = vunpack.c.h.bf16 %v1450_v41 }
  0x54   : > { %1477 = vst [vmem:[%s1615_s27 + $0xd8] sm:$0xff] %v1398_v50   ;;  %v561_v58 = vmax.f32 %v497_v51, 0.0  ;;  %v499_v59 = vadd.f32 %v1590_v9, %v428_v52  ;;  %v430_v60 = vmul.f32 %v1258_v53, %v1581_v0 }
  0x55   : > { %v1403_v61 = vpack.c.bf16 %v560_v54, %v559_v47  ;;  %v562_v62 = vmax.f32 %v498_v55, 0.0  ;;  %v500_v63 = vadd.f32 %v1590_v9, %v429_v56  ;;  %v431_v1 = vmul.f32 %v1259_v57, %v1581_v0 }
  0x56   : > { %v563_v2 = vmax.f32 %v499_v59, 0.0  ;;  %v501_v3 = vadd.f32 %v1590_v9, %v430_v60 }
  0x57   : > { %1478 = vst [vmem:[%s1615_s27 + $0xe0] sm:$0xff] %v1403_v61   ;;  %v1408_v4 = vpack.c.bf16 %v562_v62, %v561_v58  ;;  %v564_v5 = vmax.f32 %v500_v63, 0.0  ;;  %v502_v6 = vadd.f32 %v1590_v9, %v431_v1 }
  0x58   : > { %v565_v7 = vmax.f32 %v501_v3, 0.0 }
  0x59   : > { %1479 = vst [vmem:[%s1615_s27 + $0xe8] sm:$0xff] %v1408_v4   ;;  %v1413_v8 = vpack.c.bf16 %v564_v5, %v563_v2  ;;  %v566_v10 = vmax.f32 %v502_v6, 0.0 }
  0x5b   : > { %1480 = vst [vmem:[%s1615_s27 + $0xf0] sm:$0xff] %v1413_v8   ;;  %v1418_v11 = vpack.c.bf16 %v566_v10, %v565_v7 }
  0x5d   : > { %1481 = vst [vmem:[%s1615_s27 + $0xf8] sm:$0xff] %v1418_v11  }
  0x5e PF: > { %s13_s14 = sadd.s32 1, %s1528_s14   ;;  %s1800_s12 = smov %s1524_s13 }
  0x5f   : > { %p10_p5 = scmp.ge.s32.totalorder %s13_s14, 4   ;;  %s1801_s13 = smov %s1803_s15 }
  0x61   :  { %12 = sbr.rel (!%p10_p5) target bundleno = 2 (0x2), region = 68 }

// kernel: basic_block_forward.7
= control target key start
LH: loop header
LB: loop body
LE: loop exit
PB: predicated region body
PF: predicated region fallthrough
CT: control target
= control target key end

     0   :  { %s1478_s0 = inlined_call_operand.vmem [shape: bf16[512,128], index: 0, kind: input, shape index: {}]   ;;  %s1479_s1 = inlined_call_operand.vmem [shape: f32[1,128], index: 1, kind: input, shape index: {}]   ;;  %s1480_s2 = inlined_call_operand.vmem [shape: f32[1,128], index: 2, kind: input, shape index: {}]   ;;  %s1481_s3 = inlined_call_operand.vmem [shape: bf16[512,128], index: 3, kind: input, shape index: {}]   ;;  %s1482_s4 = inlined_call_operand.vmem [shape: f32[512,128], index: 4, kind: output, shape index: {}]  }
   0x1   :  { %v614_v0 = vld [vmem:[%s1478_s0] sm:$0xff]   ;;  %v869_v8 = vld [vmem:[%s1478_s0 + $0x8] sm:$0xff]   ;;  %v870_v14 = vld [vmem:[%s1478_s0 + $0x10] sm:$0xff]  }
   0x2   :  { %v742_v1 = vld [vmem:[%s1481_s3] sm:$0xff]   ;;  %v615_v3 = vunpack.c.l.bf16 %v614_v0  ;;  %v616_v6 = vunpack.c.h.bf16 %v614_v0  ;;  %v900_v9 = vld [vmem:[%s1481_s3 + $0x8] sm:$0xff]   ;;  %v619_v10 = vunpack.c.l.bf16 %v869_v8  ;;  %v620_v12 = vunpack.c.h.bf16 %v869_v8  ;;  %v901_v15 = vld [vmem:[%s1481_s3 + $0x10] sm:$0xff]  }
   0x3   :  { %v965_v2 = vld [vmem:[%s1479_s1] ss:$0 sm:$0xff]  ;;  %v743_v4 = vunpack.c.l.bf16 %v742_v1  ;;  %v744_v7 = vunpack.c.h.bf16 %v742_v1  ;;  %v747_v11 = vunpack.c.l.bf16 %v900_v9  ;;  %v748_v13 = vunpack.c.h.bf16 %v900_v9  ;;  %v871_v16 = vld [vmem:[%s1478_s0 + $0x18] sm:$0xff]   ;;  %v873_v52 = vld [vmem:[%s1478_s0 + $0x28] sm:$0xff]  }
   0x4   :  { %v970_v5 = vld [vmem:[%s1480_s2] ss:$0 sm:$0xff]  ;;  %v280_v17 = vmul.f32 %v615_v3, %v965_v2  ;;  %v281_v18 = vmul.f32 %v616_v6, %v965_v2  ;;  %v623_v19 = vunpack.c.l.bf16 %v870_v14  ;;  %v751_v20 = vunpack.c.l.bf16 %v901_v15  ;;  %v902_v21 = vld [vmem:[%s1481_s3 + $0x18] sm:$0xff]   ;;  %v904_v57 = vld [vmem:[%s1481_s3 + $0x28] sm:$0xff]  }
   0x5   :  { %v282_v22 = vmul.f32 %v619_v10, %v965_v2  ;;  %v283_v23 = vmul.f32 %v620_v12, %v965_v2  ;;  %v624_v24 = vunpack.c.h.bf16 %v870_v14  ;;  %v752_v25 = vunpack.c.h.bf16 %v901_v15  ;;  %v872_v42 = vld [vmem:[%s1478_s0 + $0x20] sm:$0xff]   ;;  %v874_v62 = vld [vmem:[%s1478_s0 + $0x30] sm:$0xff]  }
   0x6   :  { %v351_v26 = vadd.f32 %v970_v5, %v280_v17  ;;  %v352_v27 = vadd.f32 %v970_v5, %v281_v18  ;;  %v284_v28 = vmul.f32 %v623_v19, %v965_v2  ;;  %v627_v29 = vunpack.c.l.bf16 %v871_v16  ;;  %v903_v47 = vld [vmem:[%s1481_s3 + $0x20] sm:$0xff]   ;;  %v875_v18 = vld [vmem:[%s1478_s0 + $0x38] sm:$0xff]  }
   0x7   :  { %v353_v30 = vadd.f32 %v970_v5, %v282_v22  ;;  %v354_v31 = vadd.f32 %v970_v5, %v283_v23  ;;  %v285_v32 = vmul.f32 %v624_v24, %v965_v2  ;;  %v755_v33 = vunpack.c.l.bf16 %v902_v21  ;;  %v906_v23 = vld [vmem:[%s1481_s3 + $0x38] sm:$0xff]  }
   0x8   :  { %v415_v34 = vadd.f32 %v743_v4, %v351_v26  ;;  %v416_v35 = vadd.f32 %v744_v7, %v352_v27  ;;  %v355_v36 = vadd.f32 %v970_v5, %v284_v28  ;;  %v286_v37 = vmul.f32 %v627_v29, %v965_v2  ;;  %v905_v4 = vld [vmem:[%s1481_s3 + $0x30] sm:$0xff]  }
   0x9   :  { %v417_v38 = vadd.f32 %v747_v11, %v353_v30  ;;  %v418_v39 = vadd.f32 %v748_v13, %v354_v31  ;;  %v356_v40 = vadd.f32 %v970_v5, %v285_v32  ;;  %v628_v41 = vunpack.c.h.bf16 %v871_v16  ;;  %v876_v32 = vld [vmem:[%s1478_s0 + $0x40] sm:$0xff]  }
   0xa   :  { %v479_v43 = vmax.f32 %v415_v34, 0.0  ;;  %v480_v44 = vmax.f32 %v416_v35, 0.0  ;;  %v419_v45 = vadd.f32 %v751_v20, %v355_v36  ;;  %v357_v46 = vadd.f32 %v970_v5, %v286_v37  ;;  %v907_v37 = vld [vmem:[%s1481_s3 + $0x40] sm:$0xff]  }
   0xb   :  { %v481_v48 = vmax.f32 %v417_v38, 0.0  ;;  %v482_v49 = vmax.f32 %v418_v39, 0.0  ;;  %v420_v50 = vadd.f32 %v752_v25, %v356_v40  ;;  %v756_v51 = vunpack.c.h.bf16 %v902_v21 }
   0xc   :  { %543 = vst [vmem:[%s1482_s4] sm:$0xff] %v479_v43  ;;  %544 = vst [vmem:[%s1482_s4 + $0x8] sm:$0xff] %v480_v44  ;;  %v483_v53 = vmax.f32 %v419_v45, 0.0  ;;  %v421_v54 = vadd.f32 %v755_v33, %v357_v46  ;;  %v287_v55 = vmul.f32 %v628_v41, %v965_v2  ;;  %v631_v56 = vunpack.c.l.bf16 %v872_v42  ;;  %v877_v46 = vld [vmem:[%s1478_s0 + $0x48] sm:$0xff]  }
   0xd   :  { %545 = vst [vmem:[%s1482_s4 + $0x10] sm:$0xff] %v481_v48  ;;  %546 = vst [vmem:[%s1482_s4 + $0x18] sm:$0xff] %v482_v49  ;;  %v484_v58 = vmax.f32 %v420_v50, 0.0  ;;  %v759_v59 = vunpack.c.l.bf16 %v903_v47  ;;  %v632_v60 = vunpack.c.h.bf16 %v872_v42  ;;  %v760_v61 = vunpack.c.h.bf16 %v903_v47  ;;  %v908_v47 = vld [vmem:[%s1481_s3 + $0x48] sm:$0xff]  }
   0xe   :  { %547 = vst [vmem:[%s1482_s4 + $0x20] sm:$0xff] %v483_v53  ;;  %v485_v63 = vmax.f32 %v421_v54, 0.0  ;;  %v358_v0 = vadd.f32 %v970_v5, %v287_v55  ;;  %v288_v1 = vmul.f32 %v631_v56, %v965_v2  ;;  %v635_v3 = vunpack.c.l.bf16 %v873_v52  ;;  %v878_v56 = vld [vmem:[%s1478_s0 + $0x50] sm:$0xff]  }
   0xf   :  { %548 = vst [vmem:[%s1482_s4 + $0x28] sm:$0xff] %v484_v58  ;;  %v289_v6 = vmul.f32 %v632_v60, %v965_v2  ;;  %v763_v7 = vunpack.c.l.bf16 %v904_v57  ;;  %v636_v8 = vunpack.c.h.bf16 %v873_v52  ;;  %v764_v9 = vunpack.c.h.bf16 %v904_v57 }
  0x10   :  { %549 = vst [vmem:[%s1482_s4 + $0x30] sm:$0xff] %v485_v63  ;;  %v422_v10 = vadd.f32 %v756_v51, %v358_v0  ;;  %v359_v11 = vadd.f32 %v970_v5, %v288_v1  ;;  %v290_v12 = vmul.f32 %v635_v3, %v965_v2  ;;  %v639_v13 = vunpack.c.l.bf16 %v874_v62 }
  0x11   :  { %v360_v14 = vadd.f32 %v970_v5, %v289_v6  ;;  %v291_v15 = vmul.f32 %v636_v8, %v965_v2  ;;  %v767_v16 = vunpack.c.l.bf16 %v905_v4  ;;  %v640_v17 = vunpack.c.h.bf16 %v874_v62 }
  0x12   :  { %v486_v19 = vmax.f32 %v422_v10, 0.0  ;;  %v423_v20 = vadd.f32 %v759_v59, %v359_v11  ;;  %v361_v21 = vadd.f32 %v970_v5, %v290_v12  ;;  %v292_v22 = vmul.f32 %v639_v13, %v965_v2  ;;  %v879_v12 = vld [vmem:[%s1478_s0 + $0x58] sm:$0xff]  }
  0x13   :  { %v424_v24 = vadd.f32 %v760_v61, %v360_v14  ;;  %v362_v25 = vadd.f32 %v970_v5, %v291_v15  ;;  %v768_v26 = vunpack.c.h.bf16 %v905_v4  ;;  %v293_v27 = vmul.f32 %v640_v17, %v965_v2  ;;  %v909_v61 = vld [vmem:[%s1481_s3 + $0x50] sm:$0xff]   ;;  %v910_v17 = vld [vmem:[%s1481_s3 + $0x58] sm:$0xff]  }
  0x14   :  { %550 = vst [vmem:[%s1482_s4 + $0x38] sm:$0xff] %v486_v19  ;;  %v487_v28 = vmax.f32 %v423_v20, 0.0  ;;  %v425_v29 = vadd.f32 %v763_v7, %v361_v21  ;;  %v363_v30 = vadd.f32 %v970_v5, %v292_v22  ;;  %v643_v31 = vunpack.c.l.bf16 %v875_v18 }
  0x15   :  { %v488_v33 = vmax.f32 %v424_v24, 0.0  ;;  %v426_v34 = vadd.f32 %v764_v9, %v362_v25  ;;  %v364_v35 = vadd.f32 %v970_v5, %v293_v27  ;;  %v771_v36 = vunpack.c.l.bf16 %v906_v23 }
  0x16   :  { %551 = vst [vmem:[%s1482_s4 + $0x40] sm:$0xff] %v487_v28  ;;  %v489_v38 = vmax.f32 %v425_v29, 0.0  ;;  %v427_v39 = vadd.f32 %v767_v16, %v363_v30  ;;  %v294_v40 = vmul.f32 %v643_v31, %v965_v2  ;;  %v644_v41 = vunpack.c.h.bf16 %v875_v18  ;;  %v911_v31 = vld [vmem:[%s1481_s3 + $0x60] sm:$0xff]  }
  0x17   :  { %552 = vst [vmem:[%s1482_s4 + $0x48] sm:$0xff] %v488_v33  ;;  %v490_v42 = vmax.f32 %v426_v34, 0.0  ;;  %v428_v43 = vadd.f32 %v768_v26, %v364_v35  ;;  %v772_v44 = vunpack.c.h.bf16 %v906_v23  ;;  %v647_v45 = vunpack.c.l.bf16 %v876_v32  ;;  %v880_v26 = vld [vmem:[%s1478_s0 + $0x60] sm:$0xff]  }
  0x18   :  { %553 = vst [vmem:[%s1482_s4 + $0x50] sm:$0xff] %v489_v38  ;;  %v491_v48 = vmax.f32 %v427_v39, 0.0  ;;  %v365_v49 = vadd.f32 %v970_v5, %v294_v40  ;;  %v295_v50 = vmul.f32 %v644_v41, %v965_v2  ;;  %v775_v51 = vunpack.c.l.bf16 %v907_v37  ;;  %v881_v40 = vld [vmem:[%s1478_s0 + $0x68] sm:$0xff]  }
  0x19   :  { %554 = vst [vmem:[%s1482_s4 + $0x58] sm:$0xff] %v490_v42  ;;  %v492_v52 = vmax.f32 %v428_v43, 0.0  ;;  %v296_v53 = vmul.f32 %v647_v45, %v965_v2  ;;  %v648_v54 = vunpack.c.h.bf16 %v876_v32  ;;  %v776_v55 = vunpack.c.h.bf16 %v907_v37  ;;  %v912_v41 = vld [vmem:[%s1481_s3 + $0x68] sm:$0xff]  }
  0x1a   :  { %555 = vst [vmem:[%s1482_s4 + $0x60] sm:$0xff] %v491_v48  ;;  %v429_v57 = vadd.f32 %v771_v36, %v365_v49  ;;  %v366_v58 = vadd.f32 %v970_v5, %v295_v50  ;;  %v651_v59 = vunpack.c.l.bf16 %v877_v46  ;;  %v779_v60 = vunpack.c.l.bf16 %v908_v47  ;;  %v882_v50 = vld [vmem:[%s1478_s0 + $0x70] sm:$0xff]  }
  0x1b   :  { %556 = vst [vmem:[%s1482_s4 + $0x68] sm:$0xff] %v492_v52  ;;  %v367_v62 = vadd.f32 %v970_v5, %v296_v53  ;;  %v297_v63 = vmul.f32 %v648_v54, %v965_v2  ;;  %v652_v0 = vunpack.c.h.bf16 %v877_v46  ;;  %v780_v1 = vunpack.c.h.bf16 %v908_v47 }
  0x1c   :  { %v493_v3 = vmax.f32 %v429_v57, 0.0  ;;  %v430_v4 = vadd.f32 %v772_v44, %v366_v58  ;;  %v298_v6 = vmul.f32 %v651_v59, %v965_v2  ;;  %v655_v7 = vunpack.c.l.bf16 %v878_v56  ;;  %v913_v59 = vld [vmem:[%s1481_s3 + $0x70] sm:$0xff]  }
  0x1d   :  { %v431_v8 = vadd.f32 %v775_v51, %v367_v62  ;;  %v368_v9 = vadd.f32 %v970_v5, %v297_v63  ;;  %v299_v10 = vmul.f32 %v652_v0, %v965_v2  ;;  %v783_v11 = vunpack.c.l.bf16 %v909_v61 }
  0x1e   :  { %557 = vst [vmem:[%s1482_s4 + $0x70] sm:$0xff] %v493_v3  ;;  %v494_v13 = vmax.f32 %v430_v4, 0.0  ;;  %v369_v14 = vadd.f32 %v970_v5, %v298_v6  ;;  %v300_v15 = vmul.f32 %v655_v7, %v965_v2  ;;  %v656_v16 = vunpack.c.h.bf16 %v878_v56  ;;  %v883_v6 = vld [vmem:[%s1478_s0 + $0x78] sm:$0xff]  }
  0x1f   :  { %v495_v18 = vmax.f32 %v431_v8, 0.0  ;;  %v432_v19 = vadd.f32 %v776_v55, %v368_v9  ;;  %v370_v20 = vadd.f32 %v970_v5, %v299_v10  ;;  %v784_v21 = vunpack.c.h.bf16 %v909_v61 }
  0x20   :  { %558 = vst [vmem:[%s1482_s4 + $0x78] sm:$0xff] %v494_v13  ;;  %v433_v22 = vadd.f32 %v779_v60, %v369_v14  ;;  %v371_v23 = vadd.f32 %v970_v5, %v300_v15  ;;  %v301_v24 = vmul.f32 %v656_v16, %v965_v2  ;;  %v659_v25 = vunpack.c.l.bf16 %v879_v12 }
  0x21   :  { %559 = vst [vmem:[%s1482_s4 + $0x80] sm:$0xff] %v495_v18  ;;  %v496_v27 = vmax.f32 %v432_v19, 0.0  ;;  %v434_v28 = vadd.f32 %v780_v1, %v370_v20  ;;  %v787_v29 = vunpack.c.l.bf16 %v910_v17  ;;  %v660_v30 = vunpack.c.h.bf16 %v879_v12  ;;  %v884_v20 = vld [vmem:[%s1478_s0 + $0x80] sm:$0xff]  }
  0x22   :  { %v497_v32 = vmax.f32 %v433_v22, 0.0  ;;  %v435_v33 = vadd.f32 %v783_v11, %v371_v23  ;;  %v372_v34 = vadd.f32 %v970_v5, %v301_v24  ;;  %v302_v35 = vmul.f32 %v659_v25, %v965_v2  ;;  %v914_v11 = vld [vmem:[%s1481_s3 + $0x78] sm:$0xff]   ;;  %v915_v25 = vld [vmem:[%s1481_s3 + $0x80] sm:$0xff]  }
  0x23   :  { %560 = vst [vmem:[%s1482_s4 + $0x88] sm:$0xff] %v496_v27  ;;  %v498_v36 = vmax.f32 %v434_v28, 0.0  ;;  %v788_v37 = vunpack.c.h.bf16 %v910_v17  ;;  %v303_v38 = vmul.f32 %v660_v30, %v965_v2  ;;  %v663_v39 = vunpack.c.l.bf16 %v880_v26 }
  0x24   :  { %561 = vst [vmem:[%s1482_s4 + $0x90] sm:$0xff] %v497_v32  ;;  %v499_v42 = vmax.f32 %v435_v33, 0.0  ;;  %v436_v43 = vadd.f32 %v784_v21, %v372_v34  ;;  %v373_v44 = vadd.f32 %v970_v5, %v302_v35  ;;  %v791_v45 = vunpack.c.l.bf16 %v911_v31  ;;  %v885_v34 = vld [vmem:[%s1478_s0 + $0x88] sm:$0xff]  }
  0x25   :  { %562 = vst [vmem:[%s1482_s4 + $0x98] sm:$0xff] %v498_v36  ;;  %v374_v46 = vadd.f32 %v970_v5, %v303_v38  ;;  %v304_v47 = vmul.f32 %v663_v39, %v965_v2  ;;  %v664_v48 = vunpack.c.h.bf16 %v880_v26  ;;  %v792_v49 = vunpack.c.h.bf16 %v911_v31  ;;  %v916_v35 = vld [vmem:[%s1481_s3 + $0x88] sm:$0xff]  }
  0x26   :  { %563 = vst [vmem:[%s1482_s4 + $0xa0] sm:$0xff] %v499_v42  ;;  %v500_v51 = vmax.f32 %v436_v43, 0.0  ;;  %v437_v52 = vadd.f32 %v787_v29, %v373_v44  ;;  %v667_v53 = vunpack.c.l.bf16 %v881_v40  ;;  %v795_v54 = vunpack.c.l.bf16 %v912_v41  ;;  %v886_v44 = vld [vmem:[%s1478_s0 + $0x90] sm:$0xff]  }
  0x27   :  { %v438_v55 = vadd.f32 %v788_v37, %v374_v46  ;;  %v375_v56 = vadd.f32 %v970_v5, %v304_v47  ;;  %v305_v57 = vmul.f32 %v664_v48, %v965_v2  ;;  %v668_v58 = vunpack.c.h.bf16 %v881_v40 }
  0x28   :  { %564 = vst [vmem:[%s1482_s4 + $0xa8] sm:$0xff] %v500_v51  ;;  %v501_v60 = vmax.f32 %v437_v52, 0.0  ;;  %v306_v61 = vmul.f32 %v667_v53, %v965_v2  ;;  %v796_v62 = vunpack.c.h.bf16 %v912_v41  ;;  %v671_v63 = vunpack.c.l.bf16 %v882_v50  ;;  %v917_v53 = vld [vmem:[%s1481_s3 + $0x90] sm:$0xff]  }
  0x29   :  { %v502_v0 = vmax.f32 %v438_v55, 0.0  ;;  %v439_v1 = vadd.f32 %v791_v45, %v375_v56  ;;  %v376_v3 = vadd.f32 %v970_v5, %v305_v57  ;;  %v307_v4 = vmul.f32 %v668_v58, %v965_v2 }
  0x2a   :  { %565 = vst [vmem:[%s1482_s4 + $0xb0] sm:$0xff] %v501_v60  ;;  %v377_v7 = vadd.f32 %v970_v5, %v306_v61  ;;  %v799_v8 = vunpack.c.l.bf16 %v913_v59  ;;  %v308_v9 = vmul.f32 %v671_v63, %v965_v2  ;;  %v672_v10 = vunpack.c.h.bf16 %v882_v50 }
  0x2b   :  { %566 = vst [vmem:[%s1482_s4 + $0xb8] sm:$0xff] %v502_v0  ;;  %v503_v12 = vmax.f32 %v439_v1, 0.0  ;;  %v440_v13 = vadd.f32 %v792_v49, %v376_v3  ;;  %v378_v14 = vadd.f32 %v970_v5, %v307_v4  ;;  %v800_v15 = vunpack.c.h.bf16 %v913_v59  ;;  %v918_v4 = vld [vmem:[%s1481_s3 + $0x98] sm:$0xff]  }
  0x2c   :  { %v441_v16 = vadd.f32 %v795_v54, %v377_v7  ;;  %v379_v17 = vadd.f32 %v970_v5, %v308_v9  ;;  %v309_v18 = vmul.f32 %v672_v10, %v965_v2  ;;  %v675_v19 = vunpack.c.l.bf16 %v883_v6 }
  0x2d   :  { %567 = vst [vmem:[%s1482_s4 + $0xc0] sm:$0xff] %v503_v12  ;;  %v504_v21 = vmax.f32 %v440_v13, 0.0  ;;  %v442_v22 = vadd.f32 %v796_v62, %v378_v14  ;;  %v803_v23 = vunpack.c.l.bf16 %v914_v11  ;;  %v676_v24 = vunpack.c.h.bf16 %v883_v6  ;;  %v887_v62 = vld [vmem:[%s1478_s0 + $0x98] sm:$0xff]   ;;  %v888_v14 = vld [vmem:[%s1478_s0 + $0xa0] sm:$0xff]  }
  0x2e   :  { %v505_v26 = vmax.f32 %v441_v16, 0.0  ;;  %v443_v27 = vadd.f32 %v799_v8, %v379_v17  ;;  %v380_v28 = vadd.f32 %v970_v5, %v309_v18  ;;  %v310_v29 = vmul.f32 %v675_v19, %v965_v2  ;;  %v919_v19 = vld [vmem:[%s1481_s3 + $0xa0] sm:$0xff]  }
  0x2f   :  { %568 = vst [vmem:[%s1482_s4 + $0xc8] sm:$0xff] %v504_v21  ;;  %v506_v30 = vmax.f32 %v442_v22, 0.0  ;;  %v804_v31 = vunpack.c.h.bf16 %v914_v11  ;;  %v311_v32 = vmul.f32 %v676_v24, %v965_v2  ;;  %v679_v33 = vunpack.c.l.bf16 %v884_v20 }
  0x30   :  { %569 = vst [vmem:[%s1482_s4 + $0xd0] sm:$0xff] %v505_v26  ;;  %v507_v36 = vmax.f32 %v443_v27, 0.0  ;;  %v444_v37 = vadd.f32 %v800_v15, %v380_v28  ;;  %v381_v38 = vadd.f32 %v970_v5, %v310_v29  ;;  %v807_v39 = vunpack.c.l.bf16 %v915_v25  ;;  %v889_v28 = vld [vmem:[%s1478_s0 + $0xa8] sm:$0xff]  }
  0x31   :  { %570 = vst [vmem:[%s1482_s4 + $0xd8] sm:$0xff] %v506_v30  ;;  %v382_v40 = vadd.f32 %v970_v5, %v311_v32  ;;  %v312_v41 = vmul.f32 %v679_v33, %v965_v2  ;;  %v680_v42 = vunpack.c.h.bf16 %v884_v20  ;;  %v808_v43 = vunpack.c.h.bf16 %v915_v25  ;;  %v920_v29 = vld [vmem:[%s1481_s3 + $0xa8] sm:$0xff]  }
  0x32   :  { %571 = vst [vmem:[%s1482_s4 + $0xe0] sm:$0xff] %v507_v36  ;;  %v508_v45 = vmax.f32 %v444_v37, 0.0  ;;  %v445_v46 = vadd.f32 %v803_v23, %v381_v38  ;;  %v683_v47 = vunpack.c.l.bf16 %v885_v34  ;;  %v811_v48 = vunpack.c.l.bf16 %v916_v35  ;;  %v890_v38 = vld [vmem:[%s1478_s0 + $0xb0] sm:$0xff]  }
  0x33   :  { %v446_v49 = vadd.f32 %v804_v31, %v382_v40  ;;  %v383_v50 = vadd.f32 %v970_v5, %v312_v41  ;;  %v313_v51 = vmul.f32 %v680_v42, %v965_v2  ;;  %v684_v52 = vunpack.c.h.bf16 %v885_v34 }
  0x34   :  { %572 = vst [vmem:[%s1482_s4 + $0xe8] sm:$0xff] %v508_v45  ;;  %v509_v54 = vmax.f32 %v445_v46, 0.0  ;;  %v314_v55 = vmul.f32 %v683_v47, %v965_v2  ;;  %v812_v56 = vunpack.c.h.bf16 %v916_v35  ;;  %v687_v57 = vunpack.c.l.bf16 %v886_v44  ;;  %v921_v47 = vld [vmem:[%s1481_s3 + $0xb0] sm:$0xff]  }
  0x35   :  { %v510_v58 = vmax.f32 %v446_v49, 0.0  ;;  %v447_v59 = vadd.f32 %v807_v39, %v383_v50  ;;  %v384_v60 = vadd.f32 %v970_v5, %v313_v51  ;;  %v315_v61 = vmul.f32 %v684_v52, %v965_v2 }
  0x36   :  { %573 = vst [vmem:[%s1482_s4 + $0xf0] sm:$0xff] %v509_v54  ;;  %v385_v63 = vadd.f32 %v970_v5, %v314_v55  ;;  %v815_v0 = vunpack.c.l.bf16 %v917_v53  ;;  %v316_v1 = vmul.f32 %v687_v57, %v965_v2  ;;  %v688_v3 = vunpack.c.h.bf16 %v886_v44 }
  0x37   :  { %574 = vst [vmem:[%s1482_s4 + $0xf8] sm:$0xff] %v510_v58  ;;  %v511_v6 = vmax.f32 %v447_v59, 0.0  ;;  %v448_v7 = vadd.f32 %v808_v43, %v384_v60  ;;  %v386_v8 = vadd.f32 %v970_v5, %v315_v61  ;;  %v816_v9 = vunpack.c.h.bf16 %v917_v53  ;;  %v922_v61 = vld [vmem:[%s1481_s3 + $0xb8] sm:$0xff]  }
  0x38   :  { %v449_v10 = vadd.f32 %v811_v48, %v385_v63  ;;  %v387_v11 = vadd.f32 %v970_v5, %v316_v1  ;;  %v317_v12 = vmul.f32 %v688_v3, %v965_v2  ;;  %v691_v13 = vunpack.c.l.bf16 %v887_v62 }
  0x39   :  { %575 = vst [vmem:[%s1482_s4 + $0x100] sm:$0xff] %v511_v6  ;;  %v512_v15 = vmax.f32 %v448_v7, 0.0  ;;  %v450_v16 = vadd.f32 %v812_v56, %v386_v8  ;;  %v819_v17 = vunpack.c.l.bf16 %v918_v4  ;;  %v692_v18 = vunpack.c.h.bf16 %v887_v62  ;;  %v891_v56 = vld [vmem:[%s1478_s0 + $0xb8] sm:$0xff]   ;;  %v892_v8 = vld [vmem:[%s1478_s0 + $0xc0] sm:$0xff]  }
  0x3a   :  { %v513_v20 = vmax.f32 %v449_v10, 0.0  ;;  %v451_v21 = vadd.f32 %v815_v0, %v387_v11  ;;  %v388_v22 = vadd.f32 %v970_v5, %v317_v12  ;;  %v318_v23 = vmul.f32 %v691_v13, %v965_v2  ;;  %v923_v13 = vld [vmem:[%s1481_s3 + $0xc0] sm:$0xff]  }
  0x3b   :  { %576 = vst [vmem:[%s1482_s4 + $0x108] sm:$0xff] %v512_v15  ;;  %v514_v24 = vmax.f32 %v450_v16, 0.0  ;;  %v820_v25 = vunpack.c.h.bf16 %v918_v4  ;;  %v319_v26 = vmul.f32 %v692_v18, %v965_v2  ;;  %v695_v27 = vunpack.c.l.bf16 %v888_v14 }
  0x3c   :  { %577 = vst [vmem:[%s1482_s4 + $0x110] sm:$0xff] %v513_v20  ;;  %v515_v30 = vmax.f32 %v451_v21, 0.0  ;;  %v452_v31 = vadd.f32 %v816_v9, %v388_v22  ;;  %v389_v32 = vadd.f32 %v970_v5, %v318_v23  ;;  %v823_v33 = vunpack.c.l.bf16 %v919_v19  ;;  %v893_v22 = vld [vmem:[%s1478_s0 + $0xc8] sm:$0xff]  }
  0x3d   :  { %578 = vst [vmem:[%s1482_s4 + $0x118] sm:$0xff] %v514_v24  ;;  %v390_v34 = vadd.f32 %v970_v5, %v319_v26  ;;  %v320_v35 = vmul.f32 %v695_v27, %v965_v2  ;;  %v696_v36 = vunpack.c.h.bf16 %v888_v14  ;;  %v824_v37 = vunpack.c.h.bf16 %v919_v19  ;;  %v924_v23 = vld [vmem:[%s1481_s3 + $0xc8] sm:$0xff]  }
  0x3e   :  { %579 = vst [vmem:[%s1482_s4 + $0x120] sm:$0xff] %v515_v30  ;;  %v516_v39 = vmax.f32 %v452_v31, 0.0  ;;  %v453_v40 = vadd.f32 %v819_v17, %v389_v32  ;;  %v699_v41 = vunpack.c.l.bf16 %v889_v28  ;;  %v827_v42 = vunpack.c.l.bf16 %v920_v29  ;;  %v894_v32 = vld [vmem:[%s1478_s0 + $0xd0] sm:$0xff]  }
  0x3f   :  { %v454_v43 = vadd.f32 %v820_v25, %v390_v34  ;;  %v391_v44 = vadd.f32 %v970_v5, %v320_v35  ;;  %v321_v45 = vmul.f32 %v696_v36, %v965_v2  ;;  %v700_v46 = vunpack.c.h.bf16 %v889_v28 }
  0x40   :  { %580 = vst [vmem:[%s1482_s4 + $0x128] sm:$0xff] %v516_v39  ;;  %v517_v48 = vmax.f32 %v453_v40, 0.0  ;;  %v322_v49 = vmul.f32 %v699_v41, %v965_v2  ;;  %v828_v50 = vunpack.c.h.bf16 %v920_v29  ;;  %v703_v51 = vunpack.c.l.bf16 %v890_v38  ;;  %v925_v41 = vld [vmem:[%s1481_s3 + $0xd0] sm:$0xff]  }
  0x41   :  { %v518_v52 = vmax.f32 %v454_v43, 0.0  ;;  %v455_v53 = vadd.f32 %v823_v33, %v391_v44  ;;  %v392_v54 = vadd.f32 %v970_v5, %v321_v45  ;;  %v323_v55 = vmul.f32 %v700_v46, %v965_v2 }
  0x42   :  { %581 = vst [vmem:[%s1482_s4 + $0x130] sm:$0xff] %v517_v48  ;;  %v393_v57 = vadd.f32 %v970_v5, %v322_v49  ;;  %v831_v58 = vunpack.c.l.bf16 %v921_v47  ;;  %v324_v59 = vmul.f32 %v703_v51, %v965_v2  ;;  %v704_v60 = vunpack.c.h.bf16 %v890_v38 }
  0x43   :  { %582 = vst [vmem:[%s1482_s4 + $0x138] sm:$0xff] %v518_v52  ;;  %v519_v62 = vmax.f32 %v455_v53, 0.0  ;;  %v456_v63 = vadd.f32 %v824_v37, %v392_v54  ;;  %v394_v0 = vadd.f32 %v970_v5, %v323_v55  ;;  %v832_v1 = vunpack.c.h.bf16 %v921_v47  ;;  %v926_v55 = vld [vmem:[%s1481_s3 + $0xd8] sm:$0xff]  }
  0x44   :  { %v457_v3 = vadd.f32 %v827_v42, %v393_v57  ;;  %v395_v4 = vadd.f32 %v970_v5, %v324_v59  ;;  %v325_v6 = vmul.f32 %v704_v60, %v965_v2  ;;  %v707_v7 = vunpack.c.l.bf16 %v891_v56 }
  0x45   :  { %583 = vst [vmem:[%s1482_s4 + $0x140] sm:$0xff] %v519_v62  ;;  %v520_v9 = vmax.f32 %v456_v63, 0.0  ;;  %v458_v10 = vadd.f32 %v828_v50, %v394_v0  ;;  %v835_v11 = vunpack.c.l.bf16 %v922_v61  ;;  %v708_v12 = vunpack.c.h.bf16 %v891_v56  ;;  %v895_v50 = vld [vmem:[%s1478_s0 + $0xd8] sm:$0xff]   ;;  %v896_v0 = vld [vmem:[%s1478_s0 + $0xe0] sm:$0xff]  }
  0x46   :  { %v521_v14 = vmax.f32 %v457_v3, 0.0  ;;  %v459_v15 = vadd.f32 %v831_v58, %v395_v4  ;;  %v396_v16 = vadd.f32 %v970_v5, %v325_v6  ;;  %v326_v17 = vmul.f32 %v707_v7, %v965_v2  ;;  %v927_v7 = vld [vmem:[%s1481_s3 + $0xe0] sm:$0xff]  }
  0x47   :  { %584 = vst [vmem:[%s1482_s4 + $0x148] sm:$0xff] %v520_v9  ;;  %v522_v18 = vmax.f32 %v458_v10, 0.0  ;;  %v836_v19 = vunpack.c.h.bf16 %v922_v61  ;;  %v327_v20 = vmul.f32 %v708_v12, %v965_v2  ;;  %v711_v21 = vunpack.c.l.bf16 %v892_v8 }
  0x48   :  { %585 = vst [vmem:[%s1482_s4 + $0x150] sm:$0xff] %v521_v14  ;;  %v523_v24 = vmax.f32 %v459_v15, 0.0  ;;  %v460_v25 = vadd.f32 %v832_v1, %v396_v16  ;;  %v397_v26 = vadd.f32 %v970_v5, %v326_v17  ;;  %v839_v27 = vunpack.c.l.bf16 %v923_v13  ;;  %v897_v16 = vld [vmem:[%s1478_s0 + $0xe8] sm:$0xff]  }
  0x49   :  { %586 = vst [vmem:[%s1482_s4 + $0x158] sm:$0xff] %v522_v18  ;;  %v398_v28 = vadd.f32 %v970_v5, %v327_v20  ;;  %v328_v29 = vmul.f32 %v711_v21, %v965_v2  ;;  %v712_v30 = vunpack.c.h.bf16 %v892_v8  ;;  %v840_v31 = vunpack.c.h.bf16 %v923_v13  ;;  %v928_v17 = vld [vmem:[%s1481_s3 + $0xe8] sm:$0xff]  }
  0x4a   :  { %587 = vst [vmem:[%s1482_s4 + $0x160] sm:$0xff] %v523_v24  ;;  %v524_v33 = vmax.f32 %v460_v25, 0.0  ;;  %v461_v34 = vadd.f32 %v835_v11, %v397_v26  ;;  %v715_v35 = vunpack.c.l.bf16 %v893_v22  ;;  %v843_v36 = vunpack.c.l.bf16 %v924_v23  ;;  %v898_v26 = vld [vmem:[%s1478_s0 + $0xf0] sm:$0xff]  }
  0x4b   :  { %v462_v37 = vadd.f32 %v836_v19, %v398_v28  ;;  %v399_v38 = vadd.f32 %v970_v5, %v328_v29  ;;  %v329_v39 = vmul.f32 %v712_v30, %v965_v2  ;;  %v716_v40 = vunpack.c.h.bf16 %v893_v22 }
  0x4c   :  { %588 = vst [vmem:[%s1482_s4 + $0x168] sm:$0xff] %v524_v33  ;;  %v525_v42 = vmax.f32 %v461_v34, 0.0  ;;  %v330_v43 = vmul.f32 %v715_v35, %v965_v2  ;;  %v844_v44 = vunpack.c.h.bf16 %v924_v23  ;;  %v719_v45 = vunpack.c.l.bf16 %v894_v32  ;;  %v929_v35 = vld [vmem:[%s1481_s3 + $0xf0] sm:$0xff]  }
  0x4d   :  { %v526_v46 = vmax.f32 %v462_v37, 0.0  ;;  %v463_v47 = vadd.f32 %v839_v27, %v399_v38  ;;  %v400_v48 = vadd.f32 %v970_v5, %v329_v39  ;;  %v331_v49 = vmul.f32 %v716_v40, %v965_v2 }
  0x4e   :  { %589 = vst [vmem:[%s1482_s4 + $0x170] sm:$0xff] %v525_v42  ;;  %v401_v51 = vadd.f32 %v970_v5, %v330_v43  ;;  %v847_v52 = vunpack.c.l.bf16 %v925_v41  ;;  %v332_v53 = vmul.f32 %v719_v45, %v965_v2  ;;  %v720_v54 = vunpack.c.h.bf16 %v894_v32 }
  0x4f   :  { %590 = vst [vmem:[%s1482_s4 + $0x178] sm:$0xff] %v526_v46  ;;  %v527_v56 = vmax.f32 %v463_v47, 0.0  ;;  %v464_v57 = vadd.f32 %v840_v31, %v400_v48  ;;  %v402_v58 = vadd.f32 %v970_v5, %v331_v49  ;;  %v848_v59 = vunpack.c.h.bf16 %v925_v41  ;;  %v930_v49 = vld [vmem:[%s1481_s3 + $0xf8] sm:$0xff]  }
  0x50   :  { %v465_v60 = vadd.f32 %v843_v36, %v401_v51  ;;  %v403_v61 = vadd.f32 %v970_v5, %v332_v53  ;;  %v333_v62 = vmul.f32 %v720_v54, %v965_v2  ;;  %v723_v63 = vunpack.c.l.bf16 %v895_v50 }
  0x51   :  { %591 = vst [vmem:[%s1482_s4 + $0x180] sm:$0xff] %v527_v56  ;;  %v528_v1 = vmax.f32 %v464_v57, 0.0  ;;  %v466_v3 = vadd.f32 %v844_v44, %v402_v58  ;;  %v851_v4 = vunpack.c.l.bf16 %v926_v55  ;;  %v724_v6 = vunpack.c.h.bf16 %v895_v50  ;;  %v899_v44 = vld [vmem:[%s1478_s0 + $0xf8] sm:$0xff]  }
  0x52   :  { %v529_v8 = vmax.f32 %v465_v60, 0.0  ;;  %v467_v9 = vadd.f32 %v847_v52, %v403_v61  ;;  %v404_v10 = vadd.f32 %v970_v5, %v333_v62  ;;  %v334_v11 = vmul.f32 %v723_v63, %v965_v2 }
  0x53   :  { %592 = vst [vmem:[%s1482_s4 + $0x188] sm:$0xff] %v528_v1  ;;  %v530_v12 = vmax.f32 %v466_v3, 0.0  ;;  %v852_v13 = vunpack.c.h.bf16 %v926_v55  ;;  %v335_v14 = vmul.f32 %v724_v6, %v965_v2  ;;  %v727_v15 = vunpack.c.l.bf16 %v896_v0 }
  0x54   :  { %593 = vst [vmem:[%s1482_s4 + $0x190] sm:$0xff] %v529_v8  ;;  %v531_v18 = vmax.f32 %v467_v9, 0.0  ;;  %v468_v19 = vadd.f32 %v848_v59, %v404_v10  ;;  %v405_v20 = vadd.f32 %v970_v5, %v334_v11  ;;  %v855_v21 = vunpack.c.l.bf16 %v927_v7 }
  0x55   :  { %594 = vst [vmem:[%s1482_s4 + $0x198] sm:$0xff] %v530_v12  ;;  %v406_v22 = vadd.f32 %v970_v5, %v335_v14  ;;  %v336_v23 = vmul.f32 %v727_v15, %v965_v2  ;;  %v728_v24 = vunpack.c.h.bf16 %v896_v0  ;;  %v856_v25 = vunpack.c.h.bf16 %v927_v7 }
  0x56   :  { %595 = vst [vmem:[%s1482_s4 + $0x1a0] sm:$0xff] %v531_v18  ;;  %v532_v27 = vmax.f32 %v468_v19, 0.0  ;;  %v469_v28 = vadd.f32 %v851_v4, %v405_v20  ;;  %v731_v29 = vunpack.c.l.bf16 %v897_v16  ;;  %v859_v30 = vunpack.c.l.bf16 %v928_v17 }
  0x57   :  { %v470_v31 = vadd.f32 %v852_v13, %v406_v22  ;;  %v407_v32 = vadd.f32 %v970_v5, %v336_v23  ;;  %v337_v33 = vmul.f32 %v728_v24, %v965_v2  ;;  %v732_v34 = vunpack.c.h.bf16 %v897_v16 }
  0x58   :  { %596 = vst [vmem:[%s1482_s4 + $0x1a8] sm:$0xff] %v532_v27  ;;  %v533_v36 = vmax.f32 %v469_v28, 0.0  ;;  %v338_v37 = vmul.f32 %v731_v29, %v965_v2  ;;  %v860_v38 = vunpack.c.h.bf16 %v928_v17  ;;  %v735_v39 = vunpack.c.l.bf16 %v898_v26 }
  0x59   :  { %v534_v40 = vmax.f32 %v470_v31, 0.0  ;;  %v471_v41 = vadd.f32 %v855_v21, %v407_v32  ;;  %v408_v42 = vadd.f32 %v970_v5, %v337_v33  ;;  %v339_v43 = vmul.f32 %v732_v34, %v965_v2 }
  0x5a   :  { %597 = vst [vmem:[%s1482_s4 + $0x1b0] sm:$0xff] %v533_v36  ;;  %v409_v45 = vadd.f32 %v970_v5, %v338_v37  ;;  %v863_v46 = vunpack.c.l.bf16 %v929_v35  ;;  %v340_v47 = vmul.f32 %v735_v39, %v965_v2  ;;  %v736_v48 = vunpack.c.h.bf16 %v898_v26 }
  0x5b   :  { %598 = vst [vmem:[%s1482_s4 + $0x1b8] sm:$0xff] %v534_v40  ;;  %v535_v50 = vmax.f32 %v471_v41, 0.0  ;;  %v472_v51 = vadd.f32 %v856_v25, %v408_v42  ;;  %v410_v52 = vadd.f32 %v970_v5, %v339_v43  ;;  %v864_v53 = vunpack.c.h.bf16 %v929_v35 }
  0x5c   :  { %v473_v54 = vadd.f32 %v859_v30, %v409_v45  ;;  %v411_v55 = vadd.f32 %v970_v5, %v340_v47  ;;  %v341_v56 = vmul.f32 %v736_v48, %v965_v2  ;;  %v739_v57 = vunpack.c.l.bf16 %v899_v44 }
  0x5d   :  { %599 = vst [vmem:[%s1482_s4 + $0x1c0] sm:$0xff] %v535_v50  ;;  %v536_v58 = vmax.f32 %v472_v51, 0.0  ;;  %v474_v59 = vadd.f32 %v860_v38, %v410_v52  ;;  %v867_v60 = vunpack.c.l.bf16 %v930_v49  ;;  %v740_v61 = vunpack.c.h.bf16 %v899_v44 }
  0x5e   :  { %v537_v62 = vmax.f32 %v473_v54, 0.0  ;;  %v475_v63 = vadd.f32 %v863_v46, %v411_v55  ;;  %v412_v0 = vadd.f32 %v970_v5, %v341_v56  ;;  %v342_v1 = vmul.f32 %v739_v57, %v965_v2 }
  0x5f   :  { %600 = vst [vmem:[%s1482_s4 + $0x1c8] sm:$0xff] %v536_v58  ;;  %v538_v3 = vmax.f32 %v474_v59, 0.0  ;;  %v868_v4 = vunpack.c.h.bf16 %v930_v49  ;;  %v343_v6 = vmul.f32 %v740_v61, %v965_v2 }
  0x60   :  { %601 = vst [vmem:[%s1482_s4 + $0x1d0] sm:$0xff] %v537_v62  ;;  %v539_v7 = vmax.f32 %v475_v63, 0.0  ;;  %v476_v8 = vadd.f32 %v864_v53, %v412_v0  ;;  %v413_v9 = vadd.f32 %v970_v5, %v342_v1 }
  0x61   :  { %602 = vst [vmem:[%s1482_s4 + $0x1d8] sm:$0xff] %v538_v3  ;;  %v414_v10 = vadd.f32 %v970_v5, %v343_v6 }
  0x62   :  { %603 = vst [vmem:[%s1482_s4 + $0x1e0] sm:$0xff] %v539_v7  ;;  %v540_v11 = vmax.f32 %v476_v8, 0.0  ;;  %v477_v2 = vadd.f32 %v867_v60, %v413_v9 }
  0x63   :  { %v478_v12 = vadd.f32 %v868_v4, %v414_v10 }
  0x64   :  { %604 = vst [vmem:[%s1482_s4 + $0x1e8] sm:$0xff] %v540_v11  ;;  %v541_v13 = vmax.f32 %v477_v2, 0.0 }
  0x65   :  { %v542_v14 = vmax.f32 %v478_v12, 0.0 }
  0x66   :  { %605 = vst [vmem:[%s1482_s4 + $0x1f0] sm:$0xff] %v541_v13 }
  0x67   :  { %606 = vst [vmem:[%s1482_s4 + $0x1f8] sm:$0xff] %v542_v14 }

// kernel: basic_block_forward.4
= control target key start
LH: loop header
LB: loop body
LE: loop exit
PB: predicated region body
PF: predicated region fallthrough
CT: control target
= control target key end

     0   :  { %s7914_s18 = smov 0   ;;  %s7916_s19 = smov 0   ;;  %s10437_s0 = inlined_call_operand.vmem [shape: bf16[1024,4], index: 0, kind: input, shape index: {}]   ;;  %s10438_s1 = inlined_call_operand.vmem [shape: bf16[2,48,4], index: 1, kind: input, shape index: {}]   ;;  %s10439_s2 = inlined_call_operand.vmem [shape: f32[1024,1], index: 2, kind: input, shape index: {}]   ;;  %s10440_s3 = inlined_call_operand.vmem [shape: bf16[36,128], index: 3, kind: input, shape index: {}]   ;;  %s10441_s4 = inlined_call_operand.vmem [shape: bf16[1024,128], index: 4, kind: output, shape index: {0}]   ;;  %s10442_s5 = inlined_call_operand.vmem [shape: f32[16,128], index: 5, kind: output, shape index: {1}]  }
   0x1   :  { %s7918_s20 = smov 0  }
   0x2 LB: > { %s25_s21 = sadd.s32 1, %s7877_s19  ;;  %p6197_p0 = scmp.ge.s32.totalorder %s7881_s20, 1  ;;  %s7881_s20 = sphi %s7918_s20, %s16_s20   ;;  %s7877_s19 = sphi %s7916_s19, %s11097_s19   ;;  %s7873_s18 = sphi %s7914_s18, %s11096_s18  }
   0x3   : > { %p26_p1 = scmp.ge.s32.totalorder %s25_s21, 2  ;;  %p237_p2 = scmp.lt.s32.totalorder %s7881_s20, 3 }
   0x5   : > { %s11099_s21 = smov (%p26_p1, %s25_s21), 0  ;;  %p238_p3 = pnand %p6197_p0, %p237_p2 }
   0x7   : > { %241 = sbr.rel (%p238_p3) target bundleno = 825 (0x339), region = 36 }
   0xc   : > { %v7785_v0 = vld [vmem:[%s10440_s3] ss:$0 sps:$4 sm:$0xcc]   ;;  %vm936_vm0 = vcmask 1041408   ;;  %s6198_s24 = sshll.u32 %s7873_s18, 6  ;;  %vm839_vm2 = vcmask 31744  }
   0xd   : > { %v838_v1 = vrot.slane %v7785_v0, 2  ;;  %p290_p4 = scmp.lt.s32.totalorder %s6198_s24, 127  ;;  %v572_v2 = vld [vmem:[%s10440_s3] sm:$0x3]  ;;  %v1585_v3 = vld [vmem:[%s10440_s3 + $0x4] sm:$0x3] }
   0xe   : > { %vm574_vm1 = vsmask.f32 7424  ;;  %v7962_v5 = vld [vmem:[%s10440_s3 + $0x4] ss:$0 sps:$4 sm:$0xcc]   ;;  %v1294_v14 = vsel %vm936_vm0, %v572_v2, 0 }
   0xf   : > { %7748 = vmatprep.subr.msk.bf16.mxu1 %vm936_vm0, %v838_v1  ;;  %7747 = vmatprep.subr.msk.bf16.mxu0 %vm936_vm0, %v838_v1  ;;  %v938_v4 = vsel %vm936_vm0, %v838_v1, 0  ;;  %s11101_s24 = smov (!%p290_p4, %s6198_s24), 127  ;;  %v1749_v15 = vsel %vm936_vm0, %v1585_v3, 0  ;;  %v10443_v19 = vrot.slane %v7962_v5, 2  ;;  %v8024_v35 = vld [vmem:[%s10440_s3 + $0x8] sm:$0x3] }
  0x10   : > { %7746 = vmatpush3.bf16.msra.mxu1 %v938_v4  ;;  %7152 = vmatpush3.bf16.msra.mxu0 %v938_v4  ;;  %s6199_s29 = sshll.u32 %s11101_s24, 2  ;;  %p295_p5 = scmp.lt.s32.totalorder %s7873_s18, 1  ;;  %vm1586_vm3 = vcmask 1046528   ;;  %vm2471_vm4 = vsmask.f32 6400  ;;  %vm3063_vm5 = vcmask 1045504  }
  0x11   : > { %7749 = vmatprep.subr.msk.bf16.mxu1 %vm936_vm0, %v572_v2  ;;  %7750 = vmatprep.subr.msk.bf16.mxu0 %vm936_vm0, %v1585_v3  ;;  %s7957_s7 = scalar_lea.vmem %s10437_s0, %s6199_s29  ;;  %s6202_s30 = sshll.u32 %s11101_s24, 3  ;;  %vm4542_vm6 = vcmask 1044480   ;;  %vm3948_vm7 = vsmask.f32 5376 }
  0x12   : > { %v7965_v6 = vld [vmem:[%s7957_s7] sm:$0xff]   ;;  %v7968_v7 = vld [vmem:[%s7957_s7 + $0x8] sm:$0xff]   ;;  %v7985_v18 = vld [vmem:[%s7957_s7 + $0x10] sm:$0xff]   ;;  %s11103_s18 = smov (!%p295_p5, %s7873_s18), 1  ;;  %s9006_s9 = scalar_lea.vmem %s10439_s2, %s6202_s30 }
  0x13   : > { %v576_v8 = vshrl.u32 %v7965_v6, 16  ;;  %v578_v9 = vshll.u32 %v7965_v6, 16  ;;  %v10445_v10 = vshll.u32 %v7968_v7, 16  ;;  %v10444_v11 = vshrl.u32 %v7968_v7, 16  ;;  %v7975_v12 = vld [vmem:[%s7957_s7 + $0x80] sm:$0xff]   ;;  %v7978_v13 = vld [vmem:[%s7957_s7 + $0x88] sm:$0xff]   ;;  %s10219_s11 = scalar_lea.vmem %s10441_s4, %s6199_s29 }
  0x14   : > { %v7989_v20 = vshll.u32 %v7975_v12, 16  ;;  %v7992_v21 = vshrl.u32 %v7975_v12, 16  ;;  %v7995_v22 = vshll.u32 %v7978_v13, 16  ;;  %v7998_v23 = vshrl.u32 %v7978_v13, 16  ;;  %v8006_v27 = vld [vmem:[%s7957_s7 + $0x90] sm:$0xff]   ;;  %v8011_v30 = vld [vmem:[%s7957_s7 + $0x18] sm:$0xff]  }
  0x15   : > { %v580_v16 = vrot.slane %v578_v9, 1  ;;  %v585_v17 = vrot.slane %v10445_v10, 1  ;;  %v8003_v26 = vshll.u32 %v7985_v18, 16  ;;  %v8014_v31 = vshrl.u32 %v7985_v18, 16  ;;  %v8035_v39 = vld [vmem:[%s7957_s7 + $0x98] sm:$0xff]   ;;  %v8041_v41 = vld [vmem:[%s7957_s7 + $0x20] sm:$0xff]  }
  0x16   : > { %10589 = vst [vmem:[#allocation2_spill] sm:$0xff] %v7989_v20  ;;  %10590 = vst [vmem:[#allocation3_spill] sm:$0xff] %v7992_v21  ;;  %v10446_v28 = vrot.slane %v7989_v20, 1  ;;  %v713_v29 = vrot.slane %v7995_v22, 1  ;;  %v8019_v34 = vshll.u32 %v8006_v27, 16  ;;  %v8032_v38 = vshll.u32 %v8011_v30, 16 }
  0x17   : > { %10591 = vst [vmem:[#allocation4_spill] sm:$0xff] %v7995_v22  ;;  %10592 = vst [vmem:[#allocation5_spill] sm:$0xff] %v7998_v23  ;;  %v581_v24 = vor.u32 %v580_v16, %v576_v8  ;;  %v589_v25 = vor.u32 %v10444_v11, %v585_v17  ;;  %v593_v33 = vrot.slane %v8003_v26, 1  ;;  %v8038_v40 = vshrl.u32 %v8006_v27, 16  ;;  %v8059_v50 = vld [vmem:[%s7957_s7 + $0xa0] sm:$0xff]   ;;  %v8068_v54 = vld [vmem:[%s7957_s7 + $0x28] sm:$0xff]  }
  0x18   : > { %10593 = vst [vmem:[#allocation6_spill] sm:$0xff] %v8003_v26  ;;  %10594 = vst [vmem:[#allocation7_spill] sm:$0xff] %v8014_v31  ;;  %v709_v36 = vor.u32 %v7992_v21, %v10446_v28  ;;  %v717_v37 = vor.u32 %v7998_v23, %v713_v29  ;;  %v721_v43 = vrot.slane %v8019_v34, 1  ;;  %v8047_v45 = vshrl.u32 %v8011_v30, 16  ;;  %v8088_v62 = vld [vmem:[%s7957_s7 + $0xa8] sm:$0xff]   ;;  %v8091_v63 = vld [vmem:[%s7957_s7 + $0x30] sm:$0xff]  }
  0x19   : > { %v586_v32 = vsel %vm574_vm1, %v581_v24, %v585_v17  ;;  %10595 = vst [vmem:[#allocation8_spill] sm:$0xff] %v8019_v34  ;;  %10596 = vst [vmem:[#allocation9_spill] sm:$0xff] %v8032_v38  ;;  %v594_v42 = vsel %vm574_vm1, %v589_v25, %v593_v33  ;;  %v597_v44 = vor.u32 %v8014_v31, %v593_v33  ;;  %v601_v47 = vrot.slane %v8032_v38, 1  ;;  %v8099_v3 = vld [vmem:[%s7957_s7 + $0xb0] sm:$0xff]   ;;  %v8183_v11 = vld [vmem:[%s7957_s7 + $0xc8] sm:$0xff]   ;;  %s7757_s12 = smul.u32 24, %s11103_s18 }
  0x1a   : > { %7153 = vmatprep.mubr.msk.bf16.mxu0 %vm839_vm2, %v586_v32  ;;  %10597 = vst [vmem:[#allocation10_spill] sm:$0xff] %v8038_v40  ;;  %10598 = vst [vmem:[#allocation11_spill] sm:$0xff] %v8047_v45  ;;  %v714_v46 = vsel %vm574_vm1, %v709_v36, %v713_v29  ;;  %v8053_v48 = vshll.u32 %v8035_v39, 16  ;;  %v8056_v49 = vshll.u32 %v8041_v41, 16  ;;  %v722_v51 = vsel %vm574_vm1, %v717_v37, %v721_v43  ;;  %v8131_v37 = vld [vmem:[%s7957_s7 + $0xb8] sm:$0xff]   ;;  %v8272_v23 = vld [vmem:[%s7957_s7 + $0x68] sm:$0xff]  }
  0x1b   : > { %7154 = vmatmul.mubr.msk.bf16.vlgmr.msra.gmra.mxu0 %vm839_vm2, %v594_v42  ;;  %7185 = vmatprep.mubr.msk.bf16.mxu1 %vm839_vm2, %v714_v46  ;;  %v725_v52 = vor.u32 %v8038_v40, %v721_v43  ;;  %v8065_v53 = vshrl.u32 %v8035_v39, 16  ;;  %v602_v55 = vsel %vm574_vm1, %v597_v44, %v601_v47  ;;  %v605_v57 = vor.u32 %v8047_v45, %v601_v47  ;;  %v8141_v47 = vld [vmem:[%s7957_s7 + $0x40] sm:$0xff]   ;;  %s8302_s15 = scalar_lea.vmem %s10438_s1, %s7757_s12  ;;  %s6205_s24 = sshll.u32 %s11103_s18, 3 }
  0x1c   : > { %10599 = vst [vmem:[#allocation12_spill] sm:$0xff] %v8053_v48  ;;  %10600 = vst [vmem:[#allocation13_spill] sm:$0xff] %v8056_v49  ;;  %7284 = vmatpush3.bf16.msra.mxu0 %v1749_v15  ;;  %7186 = vmatmul.mubr.msk.bf16.vlgmr.msra.gmra.mxu1 %vm839_vm2, %v722_v51  ;;  %v729_v56 = vrot.slane %v8053_v48, 1  ;;  %v609_v58 = vrot.slane %v8056_v49, 1  ;;  %v8079_v59 = vshll.u32 %v8059_v50, 16  ;;  %v8082_v60 = vshrl.u32 %v8041_v41, 16  ;;  %s325_s13 = scalar_lea.vmem %s10442_s5, %s6205_s24 }
  0x1d   : > { %10601 = vst [vmem:[#allocation14_spill] sm:$0xff] %v8065_v53  ;;  %7752 = vmatprep.subr.msk.bf16.mxu0 %vm936_vm0, %v8024_v35  ;;  %7218 = vmatpush3.bf16.msra.mxu1 %v1294_v14  ;;  %v8085_v61 = vshll.u32 %v8068_v54, 16  ;;  %v8096_v2 = vshrl.u32 %v8059_v50, 16  ;;  %v8110_v15 = vld [vmem:[%s7957_s7 + $0x38] sm:$0xff]   ;;  %v8113_v16 = vshll.u32 %v8088_v62, 16  ;;  %v8116_v17 = vshrl.u32 %v8068_v54, 16 }
  0x1e   : > { %7157 = vmatprep.mubr.msk.bf16.mxu0 %vm839_vm2, %v602_v55  ;;  %10602 = vst [vmem:[#allocation15_spill] sm:$0xff] %v8079_v59  ;;  %10603 = vst [vmem:[#allocation16_spill] sm:$0xff] %v8082_v60  ;;  %v730_v0 = vsel %vm574_vm1, %v725_v52, %v729_v56  ;;  %v733_v1 = vor.u32 %v8065_v53, %v729_v56  ;;  %7751 = vmatprep.subr.msk.bf16.mxu1 %vm936_vm0, %v10443_v19  ;;  %v737_v8 = vrot.slane %v8079_v59, 1  ;;  %v8252_v53 = vld [vmem:[%s7957_s7 + $0x60] sm:$0xff]  }
  0x1f   : > { %10604 = vst [vmem:[#allocation17_spill] sm:$0xff] %v8085_v61  ;;  %10605 = vst [vmem:[#allocation18_spill] sm:$0xff] %v8096_v2  ;;  %7189 = vmatprep.mubr.msk.bf16.mxu1 %vm839_vm2, %v730_v0  ;;  %v610_v4 = vsel %vm574_vm1, %v605_v57, %v609_v58  ;;  %v613_v9 = vor.u32 %v8082_v60, %v609_v58  ;;  %v617_v14 = vrot.slane %v8085_v61, 1  ;;  %v8119_v24 = vshll.u32 %v8091_v63, 16 }
  0x20   : > { %10606 = vst [vmem:[#allocation19_spill] sm:$0xff] %v8113_v16  ;;  %10607 = vst [vmem:[#allocation20_spill] sm:$0xff] %v8116_v17  ;;  %v8122_v25 = vshrl.u32 %v8088_v62, 16  ;;  %v738_v29 = vsel %vm574_vm1, %v733_v1, %v737_v8  ;;  %v741_v33 = vor.u32 %v8096_v2, %v737_v8  ;;  %v8128_v36 = vshll.u32 %v8099_v3, 16  ;;  %v8225_v2 = vld [vmem:[%s7957_s7 + $0xd8] sm:$0xff]  }
  0x21   : > { %10608 = vst [vmem:[#allocation21_spill] sm:$0xff] %v8119_v24  ;;  %v618_v32 = vsel %vm574_vm1, %v613_v9, %v617_v14  ;;  %v745_v42 = vrot.slane %v8113_v16, 1  ;;  %v621_v43 = vor.u32 %v8116_v17, %v617_v14  ;;  %v625_v44 = vrot.slane %v8119_v24, 1 }
  0x22   : > { %10609 = vst [vmem:[#allocation22_spill] sm:$0xff] %v8122_v25  ;;  %10610 = vst [vmem:[#allocation23_spill] sm:$0xff] %v8128_v36  ;;  %v8138_v46 = vshrl.u32 %v8091_v63, 16  ;;  %v753_v51 = vrot.slane %v8128_v36, 1  ;;  %v8146_v52 = vshll.u32 %v8110_v15, 16  ;;  %v8149_v55 = vshrl.u32 %v8099_v3, 16 }
  0x23   : > { %7158 = vmatmul.mubr.msk.bf16.gmra.mxu0 %vm839_vm2, %v610_v4  ;;  %v8152_v56 = vshll.u32 %v8131_v37, 16  ;;  %v746_v57 = vsel %vm574_vm1, %v741_v33, %v745_v42  ;;  %v749_v0 = vor.u32 %v8122_v25, %v745_v42  ;;  %v8161_v4 = vld [vmem:[%s7957_s7 + $0xc0] sm:$0xff]   ;;  %v8166_v14 = vshll.u32 %v8141_v47, 16  ;;  %v8173_v33 = vld [vmem:[%s7957_s7 + $0x48] sm:$0xff]   ;;  %v8215_v25 = vld [vmem:[%s7957_s7 + $0x58] sm:$0xff]  }
  0x24   : > { %10611 = vst [vmem:[#allocation24_spill] sm:$0xff] %v8138_v46  ;;  %7161 = vmatprep.mubr.msk.bf16.mxu0 %vm839_vm2, %v618_v32  ;;  %10612 = vst [vmem:[#allocation25_spill] sm:$0xff] %v8146_v52  ;;  %7190 = vmatmul.mubr.msk.bf16.gmra.mxu1 %vm839_vm2, %v738_v29  ;;  %v629_v58 = vor.u32 %v8138_v46, %v625_v44  ;;  %v633_v1 = vrot.slane %v8146_v52, 1  ;;  %v757_v8 = vor.u32 %v8149_v55, %v753_v51 }
  0x25   : > { %10613 = vst [vmem:[#allocation26_spill] sm:$0xff] %v8149_v55  ;;  %10614 = vst [vmem:[#allocation27_spill] sm:$0xff] %v8152_v56  ;;  %7193 = vmatprep.mubr.msk.bf16.mxu1 %vm839_vm2, %v746_v57  ;;  %v761_v9 = vrot.slane %v8152_v56, 1  ;;  %v626_v29 = vsel %vm574_vm1, %v621_v43, %v625_v44  ;;  %v8170_v32 = vshrl.u32 %v8110_v15, 16  ;;  %v8177_v57 = vshll.u32 %v8161_v4, 16  ;;  %v8207_v55 = vld [vmem:[%s7957_s7 + $0xd0] sm:$0xff]  }
  0x26   : > { %10615 = vst [vmem:[#allocation28_spill] sm:$0xff] %v8166_v14  ;;  %v634_v42 = vsel %vm574_vm1, %v629_v58, %v633_v1  ;;  %v8180_v19 = vshrl.u32 %v8141_v47, 16  ;;  %v754_v10 = vsel %vm574_vm1, %v749_v0, %v753_v51  ;;  %v641_v43 = vrot.slane %v8166_v14, 1  ;;  %v8194_v58 = vld [vmem:[%s7957_s7 + $0x50] sm:$0xff]  }
  0x27   : > { %10616 = vst [vmem:[#allocation29_spill] sm:$0xff] %v8170_v32  ;;  %10617 = vst [vmem:[#allocation30_spill] sm:$0xff] %v8177_v57  ;;  %v8188_v44 = vshrl.u32 %v8131_v37, 16  ;;  %v8191_v28 = vshll.u32 %v8173_v33, 16  ;;  %v762_v56 = vsel %vm574_vm1, %v757_v8, %v761_v9  ;;  %v8199_v36 = vshrl.u32 %v8161_v4, 16  ;;  %v8327_v14 = vld [vmem:[%s7957_s7 + $0xf0] sm:$0xff]  }
  0x28   : > { %10618 = vst [vmem:[#allocation31_spill] sm:$0xff] %v8180_v19  ;;  %v8202_v51 = vshll.u32 %v8183_v11, 16  ;;  %v637_v0 = vor.u32 %v8170_v32, %v633_v1  ;;  %v769_v8 = vrot.slane %v8177_v57, 1  ;;  %v8229_v48 = vshrl.u32 %v8173_v33, 16 }
  0x29   : > { %10619 = vst [vmem:[#allocation32_spill] sm:$0xff] %v8188_v44  ;;  %10620 = vst [vmem:[#allocation33_spill] sm:$0xff] %v8191_v28  ;;  %v649_v16 = vrot.slane %v8191_v28, 1  ;;  %v765_v1 = vor.u32 %v8188_v44, %v761_v9  ;;  %v8249_v44 = vshrl.u32 %v8183_v11, 16  ;;  %v8257_v34 = vshrl.u32 %v8207_v55, 16 }
  0x2a   : > { %10621 = vst [vmem:[#allocation34_spill] sm:$0xff] %v8199_v36  ;;  %10622 = vst [vmem:[#allocation35_spill] sm:$0xff] %v8202_v51  ;;  %v773_v59 = vor.u32 %v8199_v36, %v769_v8  ;;  %v642_v57 = vsel %vm574_vm1, %v637_v0, %v641_v43  ;;  %v8241_v36 = vshrl.u32 %v8194_v58, 16  ;;  %v8260_v40 = vshll.u32 %v8225_v2, 16 }
  0x2b   : > { %7162 = vmatmul.mubr.msk.bf16.gmra.mxu0 %vm839_vm2, %v626_v29  ;;  %v645_v29 = vor.u32 %v8180_v19, %v641_v43  ;;  %10624 = vst [vmem:[#allocation37_spill] sm:$0xff] %v8229_v48  ;;  %v770_v43 = vsel %vm574_vm1, %v765_v1, %v769_v8  ;;  %10628 = vst [vmem:[#allocation41_spill] sm:$0xff] %v8249_v44  ;;  %v653_v8 = vor.u32 %v8229_v48, %v649_v16  ;;  %v8265_v1 = vld [vmem:[%s7957_s7 + $0xe0] sm:$0xff]   ;;  %v8318_v48 = vld [vmem:[%s7957_s7 + $0x70] sm:$0xff]  }
  0x2c   : > { %7165 = vmatprep.mubr.msk.bf16.mxu0 %vm839_vm2, %v634_v42  ;;  %7194 = vmatmul.mubr.msk.bf16.gmra.mxu1 %vm839_vm2, %v754_v10  ;;  %v8220_v42 = vshll.u32 %v8194_v58, 16  ;;  %v777_v10 = vrot.slane %v8202_v51, 1  ;;  %10626 = vst [vmem:[#allocation39_spill] sm:$0xff] %v8241_v36  ;;  %v8244_v51 = vshll.u32 %v8215_v25, 16  ;;  %10629 = vst [vmem:[#allocation42_spill] sm:$0xff] %v8257_v34 }
  0x2d   : > { %7197 = vmatprep.mubr.msk.bf16.mxu1 %vm839_vm2, %v762_v56  ;;  %v8232_v56 = vshll.u32 %v8207_v55, 16  ;;  %v650_v9 = vsel %vm574_vm1, %v645_v29, %v649_v16  ;;  %10630 = vst [vmem:[#allocation43_spill] sm:$0xff] %v8260_v40 }
  0x2e   : > { %10623 = vst [vmem:[#allocation36_spill] sm:$0xff] %v8220_v42  ;;  %10627 = vst [vmem:[#allocation40_spill] sm:$0xff] %v8244_v51  ;;  %v657_v0 = vrot.slane %v8220_v42, 1  ;;  %v778_v29 = vsel %vm574_vm1, %v773_v59, %v777_v10  ;;  %v665_v59 = vrot.slane %v8244_v51, 1  ;;  %v781_v21 = vor.u32 %v8249_v44, %v777_v10 }
  0x2f   : > { %10625 = vst [vmem:[#allocation38_spill] sm:$0xff] %v8232_v56  ;;  %v785_v22 = vrot.slane %v8232_v56, 1  ;;  %v8283_v56 = vld [vmem:[%s7957_s7 + $0xe8] sm:$0xff]   ;;  %v8287_v51 = vshrl.u32 %v8215_v25, 16 }
  0x30   : > { %v658_v42 = vsel %vm574_vm1, %v653_v8, %v657_v0  ;;  %v8315_v28 = vshll.u32 %v8283_v56, 16 }
  0x31   : > { %v789_v16 = vor.u32 %v8257_v34, %v785_v22  ;;  %10632 = vst [vmem:[#allocation45_spill] sm:$0xff] %v8287_v51  ;;  %v8297_v34 = vshll.u32 %v8272_v23, 16 }
  0x32   : > { %10638 = vst [vmem:[#allocation51_spill] sm:$0xff] %v8315_v28 }
  0x33   : > { %7166 = vmatmul.mubr.msk.bf16.gmra.mxu0 %vm839_vm2, %v642_v57  ;;  %v661_v57 = vor.u32 %v8241_v36, %v657_v0  ;;  %v8290_v36 = vshll.u32 %v8265_v1, 16  ;;  %10635 = vst [vmem:[#allocation48_spill] sm:$0xff] %v8297_v34  ;;  %v786_v0 = vsel %vm574_vm1, %v781_v21, %v785_v22  ;;  %v669_v21 = vor.u32 %v8287_v51, %v665_v59 }
  0x34   : > { %7169 = vmatprep.mubr.msk.bf16.mxu0 %vm839_vm2, %v650_v9  ;;  %7198 = vmatmul.mubr.msk.bf16.gmra.mxu1 %vm839_vm2, %v770_v43  ;;  %v8278_v9 = vshll.u32 %v8252_v53, 16  ;;  %v793_v43 = vrot.slane %v8260_v40, 1  ;;  %v8307_v40 = vshrl.u32 %v8225_v2, 16 }
  0x35   : > { %7201 = vmatprep.mubr.msk.bf16.mxu1 %vm839_vm2, %v778_v29  ;;  %10633 = vst [vmem:[#allocation46_spill] sm:$0xff] %v8290_v36  ;;  %v666_v10 = vsel %vm574_vm1, %v661_v57, %v665_v59  ;;  %v8294_v29 = vshrl.u32 %v8252_v53, 16  ;;  %v8310_v57 = vshrl.u32 %v8265_v1, 16  ;;  %v801_v22 = vrot.slane %v8290_v36, 1  ;;  %v8340_v36 = vld [vmem:[%s7957_s7 + $0xf8] sm:$0xff]  }
  0x36   : > { %10631 = vst [vmem:[#allocation44_spill] sm:$0xff] %v8278_v9  ;;  %v673_v8 = vrot.slane %v8278_v9, 1  ;;  %10636 = vst [vmem:[#allocation49_spill] sm:$0xff] %v8307_v40  ;;  %v794_v44 = vsel %vm574_vm1, %v789_v16, %v793_v43  ;;  %v8330_v16 = vld [vmem:[%s7957_s7 + $0x78] sm:$0xff]   ;;  %v797_v19 = vor.u32 %v8307_v40, %v793_v43  ;;  %v809_v59 = vrot.slane %v8315_v28, 1 }
  0x37   : > { %10634 = vst [vmem:[#allocation47_spill] sm:$0xff] %v8294_v29  ;;  %10637 = vst [vmem:[#allocation50_spill] sm:$0xff] %v8310_v57  ;;  %v8351_v43 = vshrl.u32 %v8318_v48, 16  ;;  %v8354_v28 = vshll.u32 %v8330_v16, 16  ;;  %v8358_v40 = vshrl.u32 %v8283_v56, 16  ;;  %v8367_v52 = vshll.u32 %v8340_v36, 16 }
  0x38   : > { %v677_v9 = vor.u32 %v8294_v29, %v673_v8  ;;  %v674_v29 = vsel %vm574_vm1, %v669_v21, %v673_v8  ;;  %v8364_v21 = vshrl.u32 %v8327_v14, 16 }
  0x39   : > { %10642 = vst [vmem:[#allocation55_spill] sm:$0xff] %v8351_v43  ;;  %10643 = vst [vmem:[#allocation56_spill] sm:$0xff] %v8354_v28 }
  0x3a   : > { %10644 = vst [vmem:[#allocation57_spill] sm:$0xff] %v8358_v40  ;;  %10645 = vst [vmem:[#allocation58_spill] sm:$0xff] %v8364_v21 }
  0x3b   : > { %7170 = vmatmul.mubr.msk.bf16.gmra.mxu0 %vm839_vm2, %v658_v42  ;;  %v681_v42 = vrot.slane %v8297_v34, 1  ;;  %v8344_v34 = vshrl.u32 %v8272_v23, 16  ;;  %10646 = vst [vmem:[#allocation59_spill] sm:$0xff] %v8367_v52 }
  0x3c   : > { %7173 = vmatprep.mubr.msk.bf16.mxu0 %vm839_vm2, %v666_v10  ;;  %7202 = vmatmul.mubr.msk.bf16.gmra.mxu1 %vm839_vm2, %v786_v0  ;;  %v805_v10 = vor.u32 %v8310_v57, %v801_v22  ;;  %v8337_v0 = vshll.u32 %v8318_v48, 16  ;;  %v802_v57 = vsel %vm574_vm1, %v797_v19, %v801_v22  ;;  %v697_v22 = vrot.slane %v8354_v28, 1 }
  0x3d   : > { %7205 = vmatprep.mubr.msk.bf16.mxu1 %vm839_vm2, %v794_v44  ;;  %10640 = vst [vmem:[#allocation53_spill] sm:$0xff] %v8344_v34  ;;  %v682_v51 = vsel %vm574_vm1, %v677_v9, %v681_v42  ;;  %v8348_v44 = vshll.u32 %v8327_v14, 16  ;;  %v685_v32 = vor.u32 %v8344_v34, %v681_v42  ;;  %v8389_v28 = vshrl.u32 %v8340_v36, 16 }
  0x3e   : > { %10639 = vst [vmem:[#allocation52_spill] sm:$0xff] %v8337_v0  ;;  %v810_v8 = vsel %vm574_vm1, %v805_v10, %v809_v59  ;;  %v689_v9 = vrot.slane %v8337_v0, 1  ;;  %v813_v10 = vor.u32 %v8358_v40, %v809_v59  ;;  %v8378_v0 = vld [vmem:[%s8302_s15] sm:$0xff]  }
  0x3f   : > { %10641 = vst [vmem:[#allocation54_spill] sm:$0xff] %v8348_v44  ;;  %v817_v19 = vrot.slane %v8348_v44, 1  ;;  %10647 = vst [vmem:[#allocation60_spill] sm:$0xff] %v8378_v0  ;;  %v8392_v59 = vshll.u32 %v8378_v0, 16 }
  0x40   : > { %v690_v42 = vsel %vm574_vm1, %v685_v32, %v689_v9  ;;  %10649 = vst [vmem:[#allocation62_spill] sm:$0xff] %v8389_v28 }
  0x41   : > { %v821_v24 = vor.u32 %v8364_v21, %v817_v19  ;;  %10650 = vst [vmem:[#allocation63_spill] sm:$0xff] %v8392_v59 }
  0x43   : > { %7174 = vmatmul.mubr.msk.bf16.gmra.mxu0 %vm839_vm2, %v674_v29  ;;  %v693_v29 = vor.u32 %v8351_v43, %v689_v9  ;;  %v818_v43 = vsel %vm574_vm1, %v813_v10, %v817_v19  ;;  %v1587_v9 = vrot.slane %v7965_v6, 1  ;;  %v1588_v19 = vrot.slane %v7968_v7, 1 }
  0x44   : > { %7177 = vmatprep.mubr.msk.bf16.mxu0 %vm839_vm2, %v682_v51  ;;  %7206 = vmatmul.mubr.msk.bf16.gmra.mxu1 %vm839_vm2, %v802_v57  ;;  %v825_v51 = vrot.slane %v8367_v52, 1  ;;  %v8384_v57 = vshrl.u32 %v8330_v16, 16  ;;  %v833_v10 = vrot.slane %v8392_v59, 1 }
  0x45   : > { %7209 = vmatprep.mubr.msk.bf16.mxu1 %vm839_vm2, %v810_v8  ;;  %v698_v44 = vsel %vm574_vm1, %v693_v29, %v697_v22 }
  0x46   : > { %10648 = vst [vmem:[#allocation61_spill] sm:$0xff] %v8384_v57  ;;  %v826_v8 = vsel %vm574_vm1, %v821_v24, %v825_v51  ;;  %v701_v32 = vor.u32 %v8384_v57, %v697_v22  ;;  %v829_v29 = vor.u32 %v8389_v28, %v825_v51  ;;  %v1590_v51 = vrot.slane %v7985_v18, 1 }
  0x48   : > { %v834_v22 = vsel %vm574_vm1, %v829_v29, %v833_v10  ;;  %v8427_v29 = vld [vmem:[%s10440_s3 + $0x8] ss:$0 sps:$4 sm:$0xcc]   ;;  %v8430_v10 = vsel %vm1586_vm3, %v1588_v19, %v1590_v51 }
  0x4b   : > { %7178 = vmatmul.mubr.msk.bf16.gmra.mxu0 %vm839_vm2, %v690_v42  ;;  %v10651_v42 = vrot.slane %v7989_v20, 1 }
  0x4c   : > { %7181 = vmatprep.mubr.msk.bf16.mxu0 %vm839_vm2, %v698_v44  ;;  %7210 = vmatmul.mubr.msk.bf16.gmra.mxu1 %vm839_vm2, %v818_v43  ;;  %v1589_v44 = vsel %vm1586_vm3, %v1587_v9, %v1588_v19  ;;  %v10652_v43 = vshll.u32 %v7968_v7, 16  ;;  %v1594_v19 = vrot.slane %v8041_v41, 1 }
  0x4d   : > { %7213 = vmatprep.mubr.msk.bf16.mxu1 %vm839_vm2, %v826_v8  ;;  %v706_v24 = vsel %vm574_vm1, %v701_v32, %v10651_v42  ;;  %v1592_v8 = vrot.slane %v8011_v30, 1  ;;  %v10653_v32 = vshrl.u32 %v7968_v7, 16 }
  0x4e   : > { %v8412_v52 = vrot.slane %v10652_v43, 2  ;;  %v10537_v43 = vrot.slane %v8427_v29, 2 }
  0x4f   : > { %v8422_v9 = vrot.slane %v10653_v32, 1  ;;  %v1600_v32 = vrot.slane %v8110_v15, 1 }
  0x51   : > { %v2474_v42 = vor.u32 %v8412_v52, %v8422_v9  ;;  %v2487_v9 = vrot.slane %v8116_v17, 1 }
  0x53   : > { %7182 = vmatmul.mubr.msk.bf16.gmra.mxu0 %vm839_vm2, %v706_v24  ;;  %v2707_v24 = vsel %vm936_vm0, %v8024_v35, 0  ;;  %v1596_v35 = vrot.slane %v8068_v54, 1 }
  0x54   : > { %7285 = vmatprep.mubr.msk.bf16.mxu0 %vm839_vm2, %v1589_v44  ;;  %7214 = vmatmul.mubr.msk.bf16.gmra.mxu1 %vm839_vm2, %v834_v22  ;;  %v10654_v44 = vrot.slane %v7962_v5, 2  ;;  %v8456_v5 = vld [vmem:[%s10440_s3 + $0xc] sm:$0x3] }
  0x55   : > { %7219 = vmatprep.mubr.msk.bf16.mxu1 %vm839_vm2, %v7965_v6  ;;  %v8437_v6 = vsel %vm1586_vm3, %v1590_v51, %v1592_v8  ;;  %v8467_v51 = vsel %vm1586_vm3, %v1594_v19, %v1596_v35 }
  0x56   : > { %v2115_v22 = vsel %vm936_vm0, %v10654_v44, 0  ;;  %v1602_v44 = vrot.slane %v8141_v47, 1 }
  0x5b   : > { %7286 = vmatmul.mubr.msk.bf16.vlgmr.msra.gmra.mxu0 %vm839_vm2, %v8430_v10 }
  0x5c   : > { %7416 = vmatpush3.bf16.msra.mxu0 %v2707_v24  ;;  %7289 = vmatprep.mubr.msk.bf16.mxu0 %vm839_vm2, %v8437_v6 }
  0x5d   : > { %7220 = vmatmul.mubr.msk.bf16.vlgmr.msra.gmra.mxu1 %vm839_vm2, %v7968_v7  ;;  %7754 = vmatprep.subr.msk.bf16.mxu0 %vm936_vm0, %v8456_v5  ;;  %v8464_v7 = vsel %vm1586_vm3, %v1592_v8, %v1594_v19  ;;  %v1606_v19 = vrot.slane %v8194_v58, 1 }
  0x5e   : > { %7350 = vmatpush3.bf16.msra.mxu1 %v2115_v22  ;;  %7223 = vmatprep.mubr.msk.bf16.mxu1 %vm839_vm2, %v7985_v18  ;;  %v1598_v18 = vrot.slane %v8091_v63, 1 }
  0x5f   : > { %7753 = vmatprep.subr.msk.bf16.mxu1 %vm936_vm0, %v10537_v43 }
  0x60   : > { %v8480_v8 = vsel %vm1586_vm3, %v1596_v35, %v1598_v18  ;;  %v8483_v24 = vsel %vm1586_vm3, %v1598_v18, %v1600_v32  ;;  %v1610_v18 = vrot.slane %v8252_v53, 1 }
  0x63   : > { %7290 = vmatmul.mubr.msk.bf16.gmra.mxu0 %vm839_vm2, %v8464_v7 }
  0x64   : > { %7293 = vmatprep.mubr.msk.bf16.mxu0 %vm839_vm2, %v8467_v51 }
  0x65   : > { %7224 = vmatmul.mubr.msk.bf16.gmra.mxu1 %vm839_vm2, %v8011_v30  ;;  %v1604_v30 = vrot.slane %v8173_v33, 1 }
  0x66   : > { %7227 = vmatprep.mubr.msk.bf16.mxu1 %vm839_vm2, %v8041_v41  ;;  %v8496_v41 = vsel %vm1586_vm3, %v1600_v32, %v1602_v44 }
  0x67   : > { %v8499_v22 = vsel %vm1586_vm3, %v1602_v44, %v1604_v30  ;;  %v1614_v44 = vrot.slane %v8318_v48, 1 }
  0x6b   : > { %7294 = vmatmul.mubr.msk.bf16.gmra.mxu0 %vm839_vm2, %v8480_v8 }
  0x6c   : > { %7297 = vmatprep.mubr.msk.bf16.mxu0 %vm839_vm2, %v8483_v24 }
  0x6d   : > { %7228 = vmatmul.mubr.msk.bf16.gmra.mxu1 %vm839_vm2, %v8068_v54  ;;  %v1608_v54 = vrot.slane %v8215_v25, 1 }
  0x6e   : > { %7231 = vmatprep.mubr.msk.bf16.mxu1 %vm839_vm2, %v8091_v63  ;;  %v8512_v63 = vsel %vm1586_vm3, %v1604_v30, %v1606_v19 }
  0x6f   : > { %v8515_v35 = vsel %vm1586_vm3, %v1606_v19, %v1608_v54  ;;  %v1618_v19 = vrot.slane %v7975_v12, 1 }
  0x73   : > { %7298 = vmatmul.mubr.msk.bf16.gmra.mxu0 %vm839_vm2, %v8496_v41 }
  0x74   : > { %7301 = vmatprep.mubr.msk.bf16.mxu0 %vm839_vm2, %v8499_v22 }
  0x75   : > { %7232 = vmatmul.mubr.msk.bf16.gmra.mxu1 %vm839_vm2, %v8110_v15  ;;  %v1612_v15 = vrot.slane %v8272_v23, 1 }
  0x76   : > { %7235 = vmatprep.mubr.msk.bf16.mxu1 %vm839_vm2, %v8141_v47  ;;  %v8528_v47 = vsel %vm1586_vm3, %v1608_v54, %v1610_v18 }
  0x77   : > { %v8531_v32 = vsel %vm1586_vm3, %v1610_v18, %v1612_v15  ;;  %v1622_v18 = vrot.slane %v8006_v27, 1 }
  0x7b   : > { %7302 = vmatmul.mubr.msk.bf16.gmra.mxu0 %vm839_vm2, %v8512_v63 }
  0x7c   : > { %7305 = vmatprep.mubr.msk.bf16.mxu0 %vm839_vm2, %v8515_v35 }
  0x7d   : > { %7236 = vmatmul.mubr.msk.bf16.gmra.mxu1 %vm839_vm2, %v8173_v33  ;;  %v1616_v33 = vrot.slane %v8330_v16, 1 }
  0x7e   : > { %7239 = vmatprep.mubr.msk.bf16.mxu1 %vm839_vm2, %v8194_v58  ;;  %v8544_v58 = vsel %vm1586_vm3, %v1612_v15, %v1614_v44 }
  0x7f   : > { %v8547_v30 = vsel %vm1586_vm3, %v1614_v44, %v1616_v33  ;;  %v1626_v44 = vrot.slane %v8059_v50, 1 }
  0x83   : > { %7306 = vmatmul.mubr.msk.bf16.gmra.mxu0 %vm839_vm2, %v8528_v47 }
  0x84   : > { %7309 = vmatprep.mubr.msk.bf16.mxu0 %vm839_vm2, %v8531_v32 }
  0x85   : > { %7240 = vmatmul.mubr.msk.bf16.gmra.mxu1 %vm839_vm2, %v8215_v25  ;;  %v1620_v25 = vrot.slane %v7978_v13, 1 }
  0x86   : > { %7243 = vmatprep.mubr.msk.bf16.mxu1 %vm839_vm2, %v8252_v53  ;;  %v8560_v53 = vsel %vm1586_vm3, %v1616_v33, %v1618_v19 }
  0x87   : > { %v8563_v54 = vsel %vm1586_vm3, %v1618_v19, %v1620_v25  ;;  %v1630_v19 = vrot.slane %v8099_v3, 1 }
  0x8b   : > { %7310 = vmatmul.mubr.msk.bf16.gmra.mxu0 %vm839_vm2, %v8544_v58 }
  0x8c   : > { %7313 = vmatprep.mubr.msk.bf16.mxu0 %vm839_vm2, %v8547_v30 }
  0x8d   : > { %7244 = vmatmul.mubr.msk.bf16.gmra.mxu1 %vm839_vm2, %v8272_v23  ;;  %v1624_v23 = vrot.slane %v8035_v39, 1 }
  0x8e   : > { %7247 = vmatprep.mubr.msk.bf16.mxu1 %vm839_vm2, %v8318_v48  ;;  %v8576_v48 = vsel %vm1586_vm3, %v1620_v25, %v1622_v18 }
  0x8f   : > { %v8579_v15 = vsel %vm1586_vm3, %v1622_v18, %v1624_v23  ;;  %v1634_v18 = vrot.slane %v8161_v4, 1 }
  0x93   : > { %7314 = vmatmul.mubr.msk.bf16.gmra.mxu0 %vm839_vm2, %v8560_v53 }
  0x94   : > { %7317 = vmatprep.mubr.msk.bf16.mxu0 %vm839_vm2, %v8563_v54 }
  0x95   : > { %7248 = vmatmul.mubr.msk.bf16.gmra.mxu1 %vm839_vm2, %v8330_v16  ;;  %v1628_v16 = vrot.slane %v8088_v62, 1 }
  0x96   : > { %7251 = vmatprep.mubr.msk.bf16.mxu1 %vm839_vm2, %v7975_v12  ;;  %v8592_v12 = vsel %vm1586_vm3, %v1624_v23, %v1626_v44 }
  0x97   : > { %v8595_v33 = vsel %vm1586_vm3, %v1626_v44, %v1628_v16  ;;  %v1638_v44 = vrot.slane %v8207_v55, 1 }
  0x9b   : > { %7318 = vmatmul.mubr.msk.bf16.gmra.mxu0 %vm839_vm2, %v8576_v48 }
  0x9c   : > { %7321 = vmatprep.mubr.msk.bf16.mxu0 %vm839_vm2, %v8579_v15 }
  0x9d   : > { %7252 = vmatmul.mubr.msk.bf16.gmra.mxu1 %vm839_vm2, %v7978_v13  ;;  %v1632_v13 = vrot.slane %v8131_v37, 1 }
  0x9e   : > { %7255 = vmatprep.mubr.msk.bf16.mxu1 %vm839_vm2, %v8006_v27  ;;  %v8608_v27 = vsel %vm1586_vm3, %v1628_v16, %v1630_v19 }
  0x9f   : > { %v8611_v25 = vsel %vm1586_vm3, %v1630_v19, %v1632_v13  ;;  %v1642_v19 = vrot.slane %v8265_v1, 1 }
  0xa3   : > { %7322 = vmatmul.mubr.msk.bf16.gmra.mxu0 %vm839_vm2, %v8592_v12 }
  0xa4   : > { %7325 = vmatprep.mubr.msk.bf16.mxu0 %vm839_vm2, %v8595_v33 }
  0xa5   : > { %7256 = vmatmul.mubr.msk.bf16.gmra.mxu1 %vm839_vm2, %v8035_v39  ;;  %v1636_v39 = vrot.slane %v8183_v11, 1 }
  0xa6   : > { %7259 = vmatprep.mubr.msk.bf16.mxu1 %vm839_vm2, %v8059_v50  ;;  %v8624_v50 = vsel %vm1586_vm3, %v1632_v13, %v1634_v18 }
  0xa7   : > { %v8627_v23 = vsel %vm1586_vm3, %v1634_v18, %v1636_v39  ;;  %v1646_v18 = vrot.slane %v8327_v14, 1 }
  0xab   : > { %7326 = vmatmul.mubr.msk.bf16.gmra.mxu0 %vm839_vm2, %v8608_v27 }
  0xac   : > { %7329 = vmatprep.mubr.msk.bf16.mxu0 %vm839_vm2, %v8611_v25 }
  0xad   : > { %7260 = vmatmul.mubr.msk.bf16.gmra.mxu1 %vm839_vm2, %v8088_v62  ;;  %v1640_v62 = vrot.slane %v8225_v2, 1 }
  0xae   : > { %7263 = vmatprep.mubr.msk.bf16.mxu1 %vm839_vm2, %v8099_v3  ;;  %v8640_v3 = vsel %vm1586_vm3, %v1636_v39, %v1638_v44 }
  0xaf   : > { %v8643_v16 = vsel %vm1586_vm3, %v1638_v44, %v1640_v62  ;;  %v2475_v44 = vrot.slane %v8014_v31, 1  ;;  %v10674_v31 = vld [vmem:[#allocation36_spill] sm:$0xff] }
  0xb3   : > { %7330 = vmatmul.mubr.msk.bf16.gmra.mxu0 %vm839_vm2, %v8624_v50 }
  0xb4   : > { %7333 = vmatprep.mubr.msk.bf16.mxu0 %vm839_vm2, %v8627_v23 }
  0xb5   : > { %7264 = vmatmul.mubr.msk.bf16.gmra.mxu1 %vm839_vm2, %v8131_v37  ;;  %v1644_v37 = vrot.slane %v8283_v56, 1 }
  0xb6   : > { %7267 = vmatprep.mubr.msk.bf16.mxu1 %vm839_vm2, %v8161_v4  ;;  %v8656_v4 = vsel %vm1586_vm3, %v1640_v62, %v1642_v19  ;;  %v2476_v62 = vrot.slane %v8003_v26, 2 }
  0xb7   : > { %v8659_v13 = vsel %vm1586_vm3, %v1642_v19, %v1644_v37 }
  0xbb   : > { %7334 = vmatmul.mubr.msk.bf16.gmra.mxu0 %vm839_vm2, %v8640_v3 }
  0xbc   : > { %7337 = vmatprep.mubr.msk.bf16.mxu0 %vm839_vm2, %v8643_v16 }
  0xbd   : > { %7268 = vmatmul.mubr.msk.bf16.gmra.mxu1 %vm839_vm2, %v8183_v11  ;;  %v1648_v11 = vrot.slane %v8340_v36, 1 }
  0xbe   : > { %7271 = vmatprep.mubr.msk.bf16.mxu1 %vm839_vm2, %v8207_v55  ;;  %v8672_v55 = vsel %vm1586_vm3, %v1644_v37, %v1646_v18  ;;  %v2479_v37 = vrot.slane %v8047_v45, 1 }
  0xbf   : > { %v8675_v39 = vsel %vm1586_vm3, %v1646_v18, %v1648_v11  ;;  %v2480_v18 = vrot.slane %v8032_v38, 2  ;;  %v10670_v38 = vld [vmem:[#allocation37_spill] sm:$0xff] }
  0xc3   : > { %7338 = vmatmul.mubr.msk.bf16.gmra.mxu0 %vm839_vm2, %v8656_v4 }
  0xc4   : > { %7341 = vmatprep.mubr.msk.bf16.mxu0 %vm839_vm2, %v8659_v13 }
  0xc5   : > { %7272 = vmatmul.mubr.msk.bf16.gmra.mxu1 %vm839_vm2, %v8225_v2  ;;  %v10538_v2 = vrot.slane %v8378_v0, 1 }
  0xc6   : > { %7275 = vmatprep.mubr.msk.bf16.mxu1 %vm839_vm2, %v8265_v1  ;;  %v2477_v1 = vor.u32 %v2476_v62, %v2475_v44  ;;  %v2484_v44 = vrot.slane %v8056_v49, 2  ;;  %v3592_v62 = vsel %vm936_vm0, %v8456_v5, 0 }
  0xc7   : > { %v8691_v19 = vsel %vm1586_vm3, %v1648_v11, %v10538_v2 }
  0xc8   : > { %10655 = vst [vmem:[#allocation64_spill] sm:$0xff] %v8691_v19  ;;  %v2478_v43 = vsel %vm2471_vm4, %v2474_v42, %v2477_v1  ;;  %v2488_v42 = vrot.slane %v8085_v61, 2 }
  0xcb   : > { %7342 = vmatmul.mubr.msk.bf16.gmra.mxu0 %vm839_vm2, %v8672_v55 }
  0xcc   : > { %7345 = vmatprep.mubr.msk.bf16.mxu0 %vm839_vm2, %v8675_v39 }
  0xcd   : > { %7276 = vmatmul.mubr.msk.bf16.gmra.mxu1 %vm839_vm2, %v8283_v56  ;;  %v2483_v56 = vrot.slane %v8082_v60, 1 }
  0xce   : > { %7279 = vmatprep.mubr.msk.bf16.mxu1 %vm839_vm2, %v8327_v14  ;;  %v2481_v14 = vor.u32 %v2480_v18, %v2479_v37  ;;  %v10656_v37 = vld [vmem:[#allocation21_spill] sm:$0xff] }
  0xcf   : > { %v2485_v11 = vor.u32 %v2484_v44, %v2483_v56  ;;  %v2492_v18 = vrot.slane %v10656_v37, 2  ;;  %v2489_v56 = vor.u32 %v2488_v42, %v2487_v9  ;;  %v10661_v42 = vld [vmem:[#allocation29_spill] sm:$0xff] }
  0xd0   : > { %v2482_v52 = vsel %vm2471_vm4, %v2477_v1, %v2481_v14 }
  0xd1   : > { %v2486_v2 = vsel %vm2471_vm4, %v2481_v14, %v2485_v11  ;;  %v2490_v9 = vsel %vm2471_vm4, %v2485_v11, %v2489_v56  ;;  %v10666_v11 = vld [vmem:[#allocation28_spill] sm:$0xff] }
  0xd2   : > { %v2500_v17 = vrot.slane %v10666_v11, 2 }
  0xd3   : > { %7346 = vmatmul.mubr.msk.bf16.gmra.mxu0 %vm839_vm2, %v8691_v19 }
  0xd4   : > { %7417 = vmatprep.mubr.msk.bf16.mxu0 %vm839_vm2, %v2478_v43  ;;  %v2491_v43 = vrot.slane %v8138_v46, 1  ;;  %v10665_v46 = vld [vmem:[#allocation31_spill] sm:$0xff] }
  0xd5   : > { %7280 = vmatmul.mubr.msk.bf16.gmra.mxu1 %vm839_vm2, %v8340_v36  ;;  %v2499_v61 = vrot.slane %v10665_v46, 1 }
  0xd6   : > { %7351 = vmatprep.mubr.msk.bf16.mxu1 %vm839_vm2, %v8430_v10  ;;  %v10657_v10 = vrot.slane %v8427_v29, 2  ;;  %v2493_v14 = vor.u32 %v2492_v18, %v2491_v43  ;;  %v8734_v29 = vld [vmem:[%s10440_s3 + $0xc] ss:$0 sps:$4 sm:$0xcc]  }
  0xd7   : > { %10659 = vst [vmem:[#allocation66_spill] sm:$0xff] %v8734_v29  ;;  %v10543_v43 = vrot.slane %v8734_v29, 2  ;;  %v2501_v46 = vor.u32 %v2500_v17, %v2499_v61  ;;  %v10673_v61 = vld [vmem:[#allocation39_spill] sm:$0xff] }
  0xd8   : > { %v3230_v1 = vsel %vm936_vm0, %v10657_v10, 0  ;;  %v2494_v37 = vsel %vm2471_vm4, %v2489_v56, %v2493_v14  ;;  %v2507_v17 = vrot.slane %v10673_v61, 1 }
  0xdb   : > { %v8716_v36 = vpop.f32.mrf.mxu0  ;;  %7418 = vmatmul.mubr.msk.bf16.vlgmr.msra.gmra.mxu0 %vm839_vm2, %v2482_v52 }
  0xdc   : > { %7548 = vmatpush3.bf16.msra.mxu0 %v3592_v62  ;;  %7421 = vmatprep.mubr.msk.bf16.mxu0 %vm839_vm2, %v2486_v2  ;;  %v8723_v44 = vpop.f32.mrf.mxu1  ;;  %v10662_v62 = vld [vmem:[#allocation25_spill] sm:$0xff] }
  0xdd   : > { %10658 = vst [vmem:[#allocation65_spill] sm:$0xff] %v8723_v44  ;;  %7352 = vmatmul.mubr.msk.bf16.vlgmr.msra.gmra.mxu1 %vm839_vm2, %v8437_v6  ;;  %v8727_v5 = vpop.f32.mrf.mxu0  ;;  %v2495_v6 = vrot.slane %v10661_v42, 1  ;;  %v2496_v10 = vrot.slane %v10662_v62, 2  ;;  %v10703_v44 = vld [vmem:[#allocation8_spill] sm:$0xff] }
  0xde   : > { %7482 = vmatpush3.bf16.msra.mxu1 %v3230_v1  ;;  %7355 = vmatprep.mubr.msk.bf16.mxu1 %vm839_vm2, %v8464_v7  ;;  %v8736_v52 = vpop.f32.mrf.mxu1  ;;  %v8747_v7 = vld [vmem:[%s10440_s3 + $0x10] sm:$0x3] }
  0xdf   : > { %10660 = vst [vmem:[#allocation67_spill] sm:$0xff] %v8736_v52  ;;  %v8738_v2 = vpop.f32.mrf.mxu0  ;;  %10663 = vst [vmem:[#allocation68_spill] sm:$0xff] %v8747_v7  ;;  %7756 = vmatprep.subr.msk.bf16.mxu0 %vm936_vm0, %v8747_v7  ;;  %7755 = vmatprep.subr.msk.bf16.mxu1 %vm936_vm0, %v10543_v43  ;;  %v2497_v56 = vor.u32 %v2496_v10, %v2495_v6  ;;  %v10671_v6 = vld [vmem:[#allocation33_spill] sm:$0xff]  ;;  %v10714_v7 = vld [vmem:[#allocation15_spill] sm:$0xff] }
  0xe0   : > { %v8749_v18 = vpop.f32.mrf.mxu1  ;;  %v2504_v10 = vrot.slane %v10671_v6, 2 }
  0xe1   : > { %10664 = vst [vmem:[#allocation69_spill] sm:$0xff] %v8749_v18  ;;  %v8751_v1 = vpop.f32.mrf.mxu0 }
  0xe2   : > { %v8761_v62 = vpop.f32.mrf.mxu1 }
  0xe3   : > { %10667 = vst [vmem:[#allocation70_spill] sm:$0xff] %v8761_v62  ;;  %v8763_v42 = vpop.f32.mrf.mxu0  ;;  %7422 = vmatmul.mubr.msk.bf16.gmra.mxu0 %vm839_vm2, %v2490_v9  ;;  %v2498_v9 = vsel %vm2471_vm4, %v2493_v14, %v2497_v56  ;;  %v10682_v62 = vld [vmem:[#allocation44_spill] sm:$0xff] }
  0xe4   : > { %7425 = vmatprep.mubr.msk.bf16.mxu0 %vm839_vm2, %v2494_v37  ;;  %v8767_v60 = vpop.f32.mrf.mxu1  ;;  %v2503_v37 = vrot.slane %v10670_v38, 1 }
  0xe5   : > { %10668 = vst [vmem:[#allocation71_spill] sm:$0xff] %v8767_v60  ;;  %7356 = vmatmul.mubr.msk.bf16.gmra.mxu1 %vm839_vm2, %v8467_v51  ;;  %v8771_v11 = vpop.f32.mrf.mxu0  ;;  %v2502_v51 = vsel %vm2471_vm4, %v2497_v56, %v2501_v46 }
  0xe6   : > { %7359 = vmatprep.mubr.msk.bf16.mxu1 %vm839_vm2, %v8480_v8  ;;  %v8775_v43 = vpop.f32.mrf.mxu1  ;;  %v2508_v8 = vrot.slane %v10674_v31, 2  ;;  %v2505_v14 = vor.u32 %v2504_v10, %v2503_v37  ;;  %v10679_v37 = vld [vmem:[#allocation40_spill] sm:$0xff] }
  0xe7   : > { %10669 = vst [vmem:[#allocation72_spill] sm:$0xff] %v8775_v43  ;;  %v8777_v49 = vpop.f32.mrf.mxu0  ;;  %v2512_v10 = vrot.slane %v10679_v37, 2 }
  0xe8   : > { %v8782_v45 = vpop.f32.mrf.mxu1  ;;  %v2509_v56 = vor.u32 %v2508_v8, %v2507_v17  ;;  %v10681_v17 = vld [vmem:[#allocation47_spill] sm:$0xff] }
  0xe9   : > { %10672 = vst [vmem:[#allocation73_spill] sm:$0xff] %v8782_v45  ;;  %v8784_v26 = vpop.f32.mrf.mxu0  ;;  %v2515_v8 = vrot.slane %v10681_v17, 1 }
  0xea   : > { %v8789_v60 = vpop.f32.mrf.mxu1 }
  0xeb   : > { %10675 = vst [vmem:[#allocation74_spill] sm:$0xff] %v8789_v60  ;;  %v8791_v43 = vpop.f32.mrf.mxu0  ;;  %7426 = vmatmul.mubr.msk.bf16.gmra.mxu0 %vm839_vm2, %v2498_v9  ;;  %v2506_v9 = vsel %vm2471_vm4, %v2501_v46, %v2505_v14  ;;  %v10678_v60 = vld [vmem:[#allocation45_spill] sm:$0xff] }
  0xec   : > { %7429 = vmatprep.mubr.msk.bf16.mxu0 %vm839_vm2, %v2502_v51  ;;  %v8795_v6 = vpop.f32.mrf.mxu1  ;;  %v2511_v51 = vrot.slane %v10678_v60, 1 }
  0xed   : > { %10676 = vst [vmem:[#allocation75_spill] sm:$0xff] %v8795_v6  ;;  %7360 = vmatmul.mubr.msk.bf16.gmra.mxu1 %vm839_vm2, %v8483_v24  ;;  %v8799_v38 = vpop.f32.mrf.mxu0  ;;  %v2510_v24 = vsel %vm2471_vm4, %v2505_v14, %v2509_v56 }
  0xee   : > { %7363 = vmatprep.mubr.msk.bf16.mxu1 %vm839_vm2, %v8496_v41  ;;  %v8803_v31 = vpop.f32.mrf.mxu1  ;;  %v2516_v41 = vrot.slane %v10682_v62, 2  ;;  %v2513_v46 = vor.u32 %v2512_v10, %v2511_v51  ;;  %v10686_v51 = vld [vmem:[#allocation48_spill] sm:$0xff] }
  0xef   : > { %10677 = vst [vmem:[#allocation76_spill] sm:$0xff] %v8803_v31  ;;  %v8805_v61 = vpop.f32.mrf.mxu0  ;;  %v2520_v10 = vrot.slane %v10686_v51, 2 }
  0xf0   : > { %v8810_v6 = vpop.f32.mrf.mxu1  ;;  %v2517_v14 = vor.u32 %v2516_v41, %v2515_v8  ;;  %v10688_v8 = vld [vmem:[#allocation55_spill] sm:$0xff] }
  0xf1   : > { %10680 = vst [vmem:[#allocation77_spill] sm:$0xff] %v8810_v6  ;;  %v8812_v45 = vpop.f32.mrf.mxu0  ;;  %v2523_v41 = vrot.slane %v10688_v8, 1  ;;  %v10689_v6 = vld [vmem:[#allocation52_spill] sm:$0xff] }
  0xf2   : > { %v8817_v18 = vpop.f32.mrf.mxu1 }
  0xf3   : > { %10683 = vst [vmem:[#allocation78_spill] sm:$0xff] %v8817_v18  ;;  %v8819_v31 = vpop.f32.mrf.mxu0  ;;  %7430 = vmatmul.mubr.msk.bf16.gmra.mxu0 %vm839_vm2, %v2506_v9  ;;  %v2514_v9 = vsel %vm2471_vm4, %v2509_v56, %v2513_v46 }
  0xf4   : > { %7433 = vmatprep.mubr.msk.bf16.mxu0 %vm839_vm2, %v2510_v24  ;;  %v8823_v37 = vpop.f32.mrf.mxu1  ;;  %v2519_v24 = vrot.slane %v8344_v34, 1 }
  0xf5   : > { %10684 = vst [vmem:[#allocation79_spill] sm:$0xff] %v8823_v37  ;;  %7364 = vmatmul.mubr.msk.bf16.gmra.mxu1 %vm839_vm2, %v8499_v22  ;;  %v8827_v60 = vpop.f32.mrf.mxu0  ;;  %v2518_v22 = vsel %vm2471_vm4, %v2513_v46, %v2517_v14 }
  0xf6   : > { %7367 = vmatprep.mubr.msk.bf16.mxu1 %vm839_vm2, %v8512_v63  ;;  %v8831_v62 = vpop.f32.mrf.mxu1  ;;  %v2524_v63 = vrot.slane %v10689_v6, 2  ;;  %v2521_v56 = vor.u32 %v2520_v10, %v2519_v24  ;;  %v10693_v24 = vld [vmem:[#allocation56_spill] sm:$0xff] }
  0xf7   : > { %10685 = vst [vmem:[#allocation80_spill] sm:$0xff] %v8831_v62  ;;  %v8833_v17 = vpop.f32.mrf.mxu0  ;;  %v2528_v10 = vrot.slane %v10693_v24, 2 }
  0xf8   : > { %v8838_v37 = vpop.f32.mrf.mxu1  ;;  %v2525_v46 = vor.u32 %v2524_v63, %v2523_v41  ;;  %v10695_v41 = vld [vmem:[#allocation3_spill] sm:$0xff] }
  0xf9   : > { %10687 = vst [vmem:[#allocation81_spill] sm:$0xff] %v8838_v37  ;;  %v8840_v18 = vpop.f32.mrf.mxu0  ;;  %v2531_v63 = vrot.slane %v10695_v41, 1 }
  0xfa   : > { %v8845_v52 = vpop.f32.mrf.mxu1 }
  0xfb   : > { %10690 = vst [vmem:[#allocation82_spill] sm:$0xff] %v8845_v52  ;;  %v8847_v62 = vpop.f32.mrf.mxu0  ;;  %7434 = vmatmul.mubr.msk.bf16.gmra.mxu0 %vm839_vm2, %v2514_v9  ;;  %v2522_v9 = vsel %vm2471_vm4, %v2517_v14, %v2521_v56 }
  0xfc   : > { %7437 = vmatprep.mubr.msk.bf16.mxu0 %vm839_vm2, %v2518_v22  ;;  %v8851_v51 = vpop.f32.mrf.mxu1  ;;  %v2527_v22 = vrot.slane %v8384_v57, 1 }
  0xfd   : > { %10691 = vst [vmem:[#allocation83_spill] sm:$0xff] %v8851_v51  ;;  %7368 = vmatmul.mubr.msk.bf16.gmra.mxu1 %vm839_vm2, %v8515_v35  ;;  %v8855_v34 = vpop.f32.mrf.mxu0  ;;  %v2526_v35 = vsel %vm2471_vm4, %v2521_v56, %v2525_v46 }
  0xfe   : > { %7371 = vmatprep.mubr.msk.bf16.mxu1 %vm839_vm2, %v8528_v47  ;;  %v8859_v6 = vpop.f32.mrf.mxu1  ;;  %v2532_v47 = vrot.slane %v7989_v20, 2  ;;  %v2529_v14 = vor.u32 %v2528_v10, %v2527_v22  ;;  %v10700_v22 = vld [vmem:[#allocation4_spill] sm:$0xff] }
  0xff   : > { %10692 = vst [vmem:[#allocation84_spill] sm:$0xff] %v8859_v6  ;;  %v8861_v8 = vpop.f32.mrf.mxu0  ;;  %v2536_v10 = vrot.slane %v10700_v22, 2 }
 0x100   : > { %v8866_v51 = vpop.f32.mrf.mxu1  ;;  %v2533_v56 = vor.u32 %v2532_v47, %v2531_v63  ;;  %v10702_v63 = vld [vmem:[#allocation10_spill] sm:$0xff] }
 0x101   : > { %10694 = vst [vmem:[#allocation85_spill] sm:$0xff] %v8866_v51  ;;  %v8868_v52 = vpop.f32.mrf.mxu0  ;;  %v2539_v47 = vrot.slane %v10702_v63, 1 }
 0x102   : > { %v8873_v37 = vpop.f32.mrf.mxu1 }
 0x103   : > { %10696 = vst [vmem:[#allocation86_spill] sm:$0xff] %v8873_v37  ;;  %v8875_v6 = vpop.f32.mrf.mxu0  ;;  %7438 = vmatmul.mubr.msk.bf16.gmra.mxu0 %vm839_vm2, %v2522_v9  ;;  %v2530_v9 = vsel %vm2471_vm4, %v2525_v46, %v2529_v14  ;;  %v10699_v37 = vld [vmem:[#allocation5_spill] sm:$0xff] }
 0x104   : > { %7441 = vmatprep.mubr.msk.bf16.mxu0 %vm839_vm2, %v2526_v35  ;;  %v8879_v24 = vpop.f32.mrf.mxu1  ;;  %v2535_v35 = vrot.slane %v10699_v37, 1 }
 0x105   : > { %10697 = vst [vmem:[#allocation87_spill] sm:$0xff] %v8879_v24  ;;  %7372 = vmatmul.mubr.msk.bf16.gmra.mxu1 %vm839_vm2, %v8531_v32  ;;  %v8883_v57 = vpop.f32.mrf.mxu0  ;;  %v2534_v32 = vsel %vm2471_vm4, %v2529_v14, %v2533_v56 }
 0x106   : > { %7375 = vmatprep.mubr.msk.bf16.mxu1 %vm839_vm2, %v8544_v58  ;;  %v8887_v20 = vpop.f32.mrf.mxu1  ;;  %v2540_v58 = vrot.slane %v10703_v44, 2  ;;  %v2537_v46 = vor.u32 %v2536_v10, %v2535_v35  ;;  %v10710_v35 = vld [vmem:[#allocation12_spill] sm:$0xff] }
 0x107   : > { %10698 = vst [vmem:[#allocation88_spill] sm:$0xff] %v8887_v20  ;;  %v8889_v41 = vpop.f32.mrf.mxu0  ;;  %v2544_v10 = vrot.slane %v10710_v35, 2 }
 0x108   : > { %v8894_v24 = vpop.f32.mrf.mxu1  ;;  %v2541_v14 = vor.u32 %v2540_v58, %v2539_v47  ;;  %v10713_v47 = vld [vmem:[#allocation18_spill] sm:$0xff] }
 0x109   : > { %10701 = vst [vmem:[#allocation89_spill] sm:$0xff] %v8894_v24  ;;  %v8896_v51 = vpop.f32.mrf.mxu0  ;;  %v2547_v58 = vrot.slane %v10713_v47, 1 }
 0x10a   : > { %v8901_v29 = vpop.f32.mrf.mxu1 }
 0x10b   : > { %10704 = vst [vmem:[#allocation90_spill] sm:$0xff] %v8901_v29  ;;  %v8903_v20 = vpop.f32.mrf.mxu0  ;;  %7442 = vmatmul.mubr.msk.bf16.gmra.mxu0 %vm839_vm2, %v2530_v9  ;;  %v2538_v9 = vsel %vm2471_vm4, %v2533_v56, %v2537_v46  ;;  %v10709_v29 = vld [vmem:[#allocation14_spill] sm:$0xff] }
 0x10c   : > { %7445 = vmatprep.mubr.msk.bf16.mxu0 %vm839_vm2, %v2534_v32  ;;  %v8907_v22 = vpop.f32.mrf.mxu1  ;;  %v2543_v32 = vrot.slane %v10709_v29, 1 }
 0x10d   : > { %10705 = vst [vmem:[#allocation91_spill] sm:$0xff] %v8907_v22  ;;  %7376 = vmatmul.mubr.msk.bf16.gmra.mxu1 %vm839_vm2, %v8547_v30  ;;  %v8911_v37 = vpop.f32.mrf.mxu0  ;;  %v2542_v30 = vsel %vm2471_vm4, %v2537_v46, %v2541_v14 }
 0x10e   : > { %10706 = vst [vmem:[#allocation92_spill] sm:$0xff] %v8911_v37  ;;  %7379 = vmatprep.mubr.msk.bf16.mxu1 %vm839_vm2, %v8560_v53  ;;  %v8915_v44 = vpop.f32.mrf.mxu1  ;;  %v2548_v53 = vrot.slane %v10714_v7, 2  ;;  %v2545_v56 = vor.u32 %v2544_v10, %v2543_v32  ;;  %v10722_v32 = vld [vmem:[#allocation19_spill] sm:$0xff] }
 0x10f   : > { %10707 = vst [vmem:[#allocation93_spill] sm:$0xff] %v8915_v44  ;;  %v8917_v63 = vpop.f32.mrf.mxu0  ;;  %v2552_v10 = vrot.slane %v10722_v32, 2 }
 0x110   : > { %10708 = vst [vmem:[#allocation94_spill] sm:$0xff] %v8917_v63  ;;  %v8922_v22 = vpop.f32.mrf.mxu1  ;;  %v2549_v46 = vor.u32 %v2548_v53, %v2547_v58  ;;  %v10725_v58 = vld [vmem:[#allocation26_spill] sm:$0xff] }
 0x111   : > { %10711 = vst [vmem:[#allocation95_spill] sm:$0xff] %v8922_v22  ;;  %v8924_v24 = vpop.f32.mrf.mxu0  ;;  %v2555_v53 = vrot.slane %v10725_v58, 1 }
 0x112   : > { %10712 = vst [vmem:[#allocation96_spill] sm:$0xff] %v8924_v24  ;;  %v8929_v37 = vpop.f32.mrf.mxu1 }
 0x113   : > { %10715 = vst [vmem:[#allocation97_spill] sm:$0xff] %v8929_v37  ;;  %v8931_v44 = vpop.f32.mrf.mxu0  ;;  %7446 = vmatmul.mubr.msk.bf16.gmra.mxu0 %vm839_vm2, %v2538_v9  ;;  %v2546_v9 = vsel %vm2471_vm4, %v2541_v14, %v2545_v56  ;;  %v10721_v37 = vld [vmem:[#allocation22_spill] sm:$0xff] }
 0x114   : > { %10716 = vst [vmem:[#allocation98_spill] sm:$0xff] %v8931_v44  ;;  %7449 = vmatprep.mubr.msk.bf16.mxu0 %vm839_vm2, %v2542_v30  ;;  %v8935_v35 = vpop.f32.mrf.mxu1  ;;  %v2551_v30 = vrot.slane %v10721_v37, 1 }
 0x115   : > { %10717 = vst [vmem:[#allocation99_spill] sm:$0xff] %v8935_v35  ;;  %7380 = vmatmul.mubr.msk.bf16.gmra.mxu1 %vm839_vm2, %v8563_v54  ;;  %v8939_v29 = vpop.f32.mrf.mxu0  ;;  %v2550_v54 = vsel %vm2471_vm4, %v2545_v56, %v2549_v46 }
 0x116   : > { %10718 = vst [vmem:[#allocation100_spill] sm:$0xff] %v8939_v29  ;;  %7383 = vmatprep.mubr.msk.bf16.mxu1 %vm839_vm2, %v8576_v48  ;;  %v8943_v7 = vpop.f32.mrf.mxu1  ;;  %v10726_v29 = vld [vmem:[#allocation23_spill] sm:$0xff]  ;;  %v2553_v14 = vor.u32 %v2552_v10, %v2551_v30 }
 0x117   : > { %10719 = vst [vmem:[#allocation101_spill] sm:$0xff] %v8943_v7  ;;  %v8945_v47 = vpop.f32.mrf.mxu0  ;;  %v2556_v48 = vrot.slane %v10726_v29, 2 }
 0x118   : > { %10720 = vst [vmem:[#allocation102_spill] sm:$0xff] %v8945_v47  ;;  %v8950_v35 = vpop.f32.mrf.mxu1  ;;  %v10729_v47 = vld [vmem:[#allocation27_spill] sm:$0xff]  ;;  %v2554_v10 = vsel %vm2471_vm4, %v2549_v46, %v2553_v14 }
 0x119   : > { %10723 = vst [vmem:[#allocation103_spill] sm:$0xff] %v8950_v35  ;;  %v8952_v22 = vpop.f32.mrf.mxu0  ;;  %v2557_v35 = vor.u32 %v2556_v48, %v2555_v53  ;;  %v10731_v48 = vld [vmem:[#allocation30_spill] sm:$0xff] }
 0x11a   : > { %10724 = vst [vmem:[#allocation104_spill] sm:$0xff] %v8952_v22  ;;  %v8957_v44 = vpop.f32.mrf.mxu1 }
 0x11b   : > { %10727 = vst [vmem:[#allocation105_spill] sm:$0xff] %v8957_v44  ;;  %v7287_v7 = vpop.f32.mrf.mxu0  ;;  %7450 = vmatmul.mubr.msk.bf16.gmra.mxu0 %vm839_vm2, %v2546_v9  ;;  %v10728_v44 = vld [vmem:[#allocation32_spill] sm:$0xff]  ;;  %v2560_v9 = vrot.slane %v10729_v47, 2  ;;  %v2558_v53 = vsel %vm2471_vm4, %v2553_v14, %v2557_v35 }
 0x11c   : > { %7453 = vmatprep.mubr.msk.bf16.mxu0 %vm839_vm2, %v2550_v54  ;;  %v2559_v22 = vrot.slane %v10728_v44, 1 }
 0x11d   : > { %v7221_v37 = vpop.f32.mrf.mxu1  ;;  %7384 = vmatmul.mubr.msk.bf16.gmra.mxu1 %vm839_vm2, %v8579_v15  ;;  %v1785_v32 = vpop.f32.mrf.mxu0 }
 0x11e   : > { %v1339_v56 = vadd.f32 %v7221_v37, %v8716_v36  ;;  %7387 = vmatprep.mubr.msk.bf16.mxu1 %vm839_vm2, %v8592_v12  ;;  %v10730_v36 = vld [vmem:[#allocation34_spill] sm:$0xff]  ;;  %v2564_v12 = vrot.slane %v10731_v48, 2 }
 0x11f   : > { %v1330_v29 = vpop.f32.mrf.mxu1  ;;  %v7288_v58 = vpop.f32.mrf.mxu0  ;;  %v2563_v37 = vrot.slane %v10730_v36, 1 }
 0x120   : > { %v8968_v24 = vadd.f32 %v7287_v7, %v1339_v56  ;;  %v1331_v30 = vadd.f32 %v1330_v29, %v8727_v5  ;;  %v2561_v7 = vor.u32 %v2560_v9, %v2559_v22  ;;  %v10732_v9 = vld [vmem:[#allocation41_spill] sm:$0xff] }
 0x121   : > { %v7222_v15 = vpop.f32.mrf.mxu1  ;;  %v1788_v54 = vpop.f32.mrf.mxu0 }
 0x122   : > { %v8975_v63 = vadd.f32 %v1785_v32, %v1331_v30  ;;  %v1342_v44 = vadd.f32 %v7222_v15, %v8738_v2  ;;  %v2565_v32 = vor.u32 %v2564_v12, %v2563_v37  ;;  %v10733_v30 = vld [vmem:[#allocation35_spill] sm:$0xff]  ;;  %v10735_v12 = vld [vmem:[#allocation38_spill] sm:$0xff] }
 0x123   : > { %v1333_v19 = vpop.f32.mrf.mxu1  ;;  %v7291_v47 = vpop.f32.mrf.mxu0  ;;  %7454 = vmatmul.mubr.msk.bf16.gmra.mxu0 %vm839_vm2, %v2554_v10  ;;  %v2568_v10 = vrot.slane %v10733_v30, 2 }
 0x124   : > { %v8979_v5 = vadd.f32 %v7288_v58, %v1342_v44  ;;  %v1334_v29 = vadd.f32 %v1333_v19, %v8751_v1  ;;  %7457 = vmatprep.mubr.msk.bf16.mxu0 %vm839_vm2, %v2558_v53  ;;  %v2562_v19 = vsel %vm2471_vm4, %v2557_v35, %v2561_v7  ;;  %v2566_v53 = vsel %vm2471_vm4, %v2561_v7, %v2565_v32 }
 0x125   : > { %v7225_v46 = vpop.f32.mrf.mxu1  ;;  %7388 = vmatmul.mubr.msk.bf16.gmra.mxu1 %vm839_vm2, %v8595_v33  ;;  %v1801_v14 = vpop.f32.mrf.mxu0  ;;  %v2567_v33 = vrot.slane %v10732_v9, 1  ;;  %v7883_v7 = vmov 0   ;;  %v5089_v9 = vld [vmem:[%s9006_s9 + $0xe8] sm:$0xff] }
 0x126   : > { %v8985_v56 = vadd.f32 %v1788_v54, %v1334_v29  ;;  %v1355_v2 = vadd.f32 %v7225_v46, %v8763_v42  ;;  %7391 = vmatprep.mubr.msk.bf16.mxu1 %vm839_vm2, %v8608_v27  ;;  %v10734_v42 = vld [vmem:[#allocation42_spill] sm:$0xff]  ;;  %v2572_v27 = vrot.slane %v10735_v12, 2  ;;  %7783 = vset.pattern.permute.xlu0 %v7883_v7  ;;  %v5061_v12 = vld [vmem:[%s9006_s9 + $0x8] sm:$0xff] }
 0x127   : > { %v1346_v44 = vpop.f32.mrf.mxu1  ;;  %v7292_v22 = vpop.f32.mrf.mxu0  ;;  %v2571_v37 = vrot.slane %v10734_v42, 1  ;;  %v5060_v46 = vld [vmem:[%s9006_s9] sm:$0xff]  ;;  %7784 = vset.pattern.permute.xlu1 %v7883_v7 }
 0x128   : > { %v8991_v1 = vadd.f32 %v7291_v47, %v1355_v2  ;;  %v1347_v58 = vadd.f32 %v1346_v44, %v8771_v11  ;;  %5126 = vperm.xlu0 %7783, %v5060_v46   ;;  %v5062_v46 = vld [vmem:[%s9006_s9 + $0x10] sm:$0xff] }
 0x129   : > { %v7226_v15 = vpop.f32.mrf.mxu1  ;;  %v1804_v54 = vpop.f32.mrf.mxu0  ;;  %5136 = vperm.xlu1 %7784, %v5062_v46  }
 0x12a   : > { %v9000_v29 = vadd.f32 %v1801_v14, %v1347_v58  ;;  %v1358_v35 = vadd.f32 %v7226_v15, %v8777_v49  ;;  %v2569_v49 = vor.u32 %v2568_v10, %v2567_v33  ;;  %v2573_v15 = vor.u32 %v2572_v27, %v2571_v37  ;;  %v10737_v33 = vld [vmem:[#allocation43_spill] sm:$0xff]  ;;  %v10738_v27 = vld [vmem:[#allocation50_spill] sm:$0xff] }
 0x12b   : > { %v1349_v11 = vpop.f32.mrf.mxu1  ;;  %v7295_v47 = vpop.f32.mrf.mxu0  ;;  %7458 = vmatmul.mubr.msk.bf16.gmra.mxu0 %vm839_vm2, %v2562_v19  ;;  %v2576_v10 = vrot.slane %v10737_v33, 2  ;;  %v2579_v7 = vrot.slane %v10738_v27, 1 }
 0x12c   : > { %v9010_v2 = vadd.f32 %v7292_v22, %v1358_v35  ;;  %v1350_v14 = vadd.f32 %v1349_v11, %v8784_v26  ;;  %7461 = vmatprep.mubr.msk.bf16.mxu0 %vm839_vm2, %v2566_v53  ;;  %v10736_v53 = vld [vmem:[#allocation49_spill] sm:$0xff]  ;;  %5131 = vperm.xlu0 %7783, %v5061_v12   ;;  %v2574_v37 = vsel %vm2471_vm4, %v2569_v49, %v2573_v15 }
 0x12d   : > { %v7229_v44 = vpop.f32.mrf.mxu1  ;;  %7392 = vmatmul.mubr.msk.bf16.gmra.mxu1 %vm839_vm2, %v8611_v25  ;;  %v1817_v58 = vpop.f32.mrf.mxu0  ;;  %v2575_v11 = vrot.slane %v10736_v53, 1 }
 0x12e   : > { %v9016_v19 = vadd.f32 %v1804_v54, %v1350_v14  ;;  %v1371_v22 = vadd.f32 %v7229_v44, %v8791_v43  ;;  %7395 = vmatprep.mubr.msk.bf16.mxu1 %vm839_vm2, %v8624_v50  ;;  %v2570_v54 = vsel %vm2471_vm4, %v2565_v32, %v2569_v49  ;;  %v10739_v14 = vld [vmem:[#allocation46_spill] sm:$0xff]  ;;  %v5063_v32 = vld [vmem:[%s9006_s9 + $0x18] sm:$0xff] }
 0x12f   : > { %v1362_v26 = vpop.f32.mrf.mxu1  ;;  %v7296_v35 = vpop.f32.mrf.mxu0  ;;  %v2580_v44 = vrot.slane %v10739_v14, 2  ;;  %5141 = vperm.xlu1 %7784, %v5063_v32  }
 0x130   : > { %v9025_v42 = vadd.f32 %v7295_v47, %v1371_v22  ;;  %v1363_v25 = vadd.f32 %v1362_v26, %v8799_v38  ;;  %v2577_v38 = vor.u32 %v2576_v10, %v2575_v11  ;;  %v5064_v26 = vld [vmem:[%s9006_s9 + $0x20] sm:$0xff] }
 0x131   : > { %v7230_v43 = vpop.f32.mrf.mxu1  ;;  %v1820_v50 = vpop.f32.mrf.mxu0  ;;  %v2581_v46 = vor.u32 %v2580_v44, %v2579_v7  ;;  %5146 = vperm.xlu0 %7783, %v5064_v26   ;;  %v10740_v7 = vld [vmem:[#allocation51_spill] sm:$0xff] }
 0x132   : > { %v9032_v33 = vadd.f32 %v1817_v58, %v1363_v25  ;;  %v1374_v47 = vadd.f32 %v7230_v43, %v8805_v61  ;;  %v5066_v43 = vld [vmem:[%s9006_s9 + $0x30] sm:$0xff]  ;;  %v2584_v44 = vrot.slane %v10740_v7, 2 }
 0x133   : > { %v1365_v22 = vpop.f32.mrf.mxu1  ;;  %v7299_v53 = vpop.f32.mrf.mxu0  ;;  %7462 = vmatmul.mubr.msk.bf16.gmra.mxu0 %vm839_vm2, %v2570_v54  ;;  %v5065_v54 = vld [vmem:[%s9006_s9 + $0x28] sm:$0xff] }
 0x134   : > { %v9038_v12 = vadd.f32 %v7296_v35, %v1374_v47  ;;  %v1366_v49 = vadd.f32 %v1365_v22, %v8812_v45  ;;  %7465 = vmatprep.mubr.msk.bf16.mxu0 %vm839_vm2, %v2574_v37  ;;  %v2578_v45 = vsel %vm2471_vm4, %v2573_v15, %v2577_v38  ;;  %5151 = vperm.xlu1 %7784, %v5065_v54   ;;  %v2587_v22 = vrot.slane %v8364_v21, 1  ;;  %v10741_v15 = vld [vmem:[#allocation54_spill] sm:$0xff] }
 0x135   : > { %v7233_v58 = vpop.f32.mrf.mxu1  ;;  %7396 = vmatmul.mubr.msk.bf16.gmra.mxu1 %vm839_vm2, %v8627_v23  ;;  %v1833_v61 = vpop.f32.mrf.mxu0  ;;  %v2588_v32 = vrot.slane %v10741_v15, 2  ;;  %5156 = vperm.xlu0 %7783, %v5066_v43   ;;  %v5083_v15 = vld [vmem:[%s9006_s9 + $0xb8] sm:$0xff] }
 0x136   : > { %v9044_v25 = vadd.f32 %v1820_v50, %v1366_v49  ;;  %v1387_v11 = vadd.f32 %v7233_v58, %v8819_v31  ;;  %7399 = vmatprep.mubr.msk.bf16.mxu1 %vm839_vm2, %v8640_v3  ;;  %v2583_v50 = vrot.slane %v8358_v40, 1  ;;  %v2582_v3 = vsel %vm2471_vm4, %v2577_v38, %v2581_v46  ;;  %v5067_v58 = vld [vmem:[%s9006_s9 + $0x38] sm:$0xff]  ;;  %v10757_v40 = vld [vmem:[#allocation67_spill] sm:$0xff] }
 0x137   : > { %v1378_v35 = vpop.f32.mrf.mxu1  ;;  %v7300_v10 = vpop.f32.mrf.mxu0  ;;  %v2589_v43 = vor.u32 %v2588_v32, %v2587_v22 }
 0x138   : > { %v9052_v37 = vadd.f32 %v7299_v53, %v1387_v11  ;;  %v1379_v23 = vadd.f32 %v1378_v35, %v8827_v60  ;;  %v5068_v11 = vld [vmem:[%s9006_s9 + $0x40] sm:$0xff]  ;;  %v2585_v38 = vor.u32 %v2584_v44, %v2583_v50  ;;  %5161 = vperm.xlu1 %7784, %v5067_v58   ;;  %v2591_v44 = vrot.slane %v8389_v28, 1 }
 0x139   : > { %v7234_v31 = vpop.f32.mrf.mxu1  ;;  %v1836_v47 = vpop.f32.mrf.mxu0  ;;  %5166 = vperm.xlu0 %7783, %v5068_v11  }
 0x13a   : > { %v9060_v53 = vadd.f32 %v1833_v61, %v1379_v23  ;;  %v1390_v26 = vadd.f32 %v7234_v31, %v8833_v17  ;;  %v10742_v31 = vld [vmem:[#allocation59_spill] sm:$0xff]  ;;  %v2590_v58 = vsel %vm2471_vm4, %v2585_v38, %v2589_v43 }
 0x13b   : > { %v1381_v60 = vpop.f32.mrf.mxu1  ;;  %v7303_v49 = vpop.f32.mrf.mxu0  ;;  %7466 = vmatmul.mubr.msk.bf16.gmra.mxu0 %vm839_vm2, %v2578_v45  ;;  %v10557_v45 = vshrl.u32 %v8378_v0, 16 }
 0x13c   : > { %v9066_v35 = vadd.f32 %v7300_v10, %v1390_v26  ;;  %v1382_v54 = vadd.f32 %v1381_v60, %v8840_v18  ;;  %7469 = vmatprep.mubr.msk.bf16.mxu0 %vm839_vm2, %v2582_v3  ;;  %v2592_v3 = vrot.slane %v10742_v31, 2  ;;  %v5070_v26 = vld [vmem:[%s9006_s9 + $0x50] sm:$0xff] }
 0x13d   : > { %v7237_v61 = vpop.f32.mrf.mxu1  ;;  %7400 = vmatmul.mubr.msk.bf16.gmra.mxu1 %vm839_vm2, %v8643_v16  ;;  %v1849_v17 = vpop.f32.mrf.mxu0  ;;  %v5069_v16 = vld [vmem:[%s9006_s9 + $0x48] sm:$0xff]  ;;  %v2597_v11 = vrot.slane %v10557_v45, 1  ;;  %5176 = vperm.xlu0 %7783, %v5070_v26   ;;  %v10747_v45 = vrot.slane %v8378_v0, 1 }
 0x13e   : > { %v9073_v10 = vadd.f32 %v1836_v47, %v1382_v54  ;;  %v1403_v18 = vadd.f32 %v7237_v61, %v8847_v62  ;;  %7403 = vmatprep.mubr.msk.bf16.mxu1 %vm839_vm2, %v8656_v4  ;;  %v2586_v47 = vsel %vm2471_vm4, %v2581_v46, %v2585_v38  ;;  %v9087_v62 = vld [vmem:[%s8302_s15 + $0x8] sm:$0xff]   ;;  %5171 = vperm.xlu1 %7784, %v5069_v16   ;;  %v2598_v54 = vrot.slane %v8392_v59, 2  ;;  %v5072_v16 = vld [vmem:[%s9006_s9 + $0x60] sm:$0xff] }
 0x13f   : > { %v1394_v23 = vpop.f32.mrf.mxu1  ;;  %v7304_v50 = vpop.f32.mrf.mxu0  ;;  %10743 = vst [vmem:[#allocation106_spill] sm:$0xff] %v9087_v62  ;;  %v10555_v26 = vshll.u32 %v9087_v62, 16 }
 0x140   : > { %v9082_v60 = vadd.f32 %v7303_v49, %v1403_v18  ;;  %v1395_v22 = vadd.f32 %v1394_v23, %v8855_v34  ;;  %v2593_v18 = vor.u32 %v2592_v3, %v2591_v44  ;;  %v5071_v23 = vld [vmem:[%s9006_s9 + $0x58] sm:$0xff]  ;;  %v2599_v3 = vor.u32 %v2598_v54, %v2597_v11 }
 0x141   : > { %v7238_v4 = vpop.f32.mrf.mxu1  ;;  %v1852_v32 = vpop.f32.mrf.mxu0  ;;  %5186 = vperm.xlu0 %7783, %v5072_v16   ;;  %v5075_v16 = vld [vmem:[%s9006_s9 + $0x78] sm:$0xff] }
 0x142   : > { %v9093_v49 = vadd.f32 %v1849_v17, %v1395_v22  ;;  %v1406_v34 = vadd.f32 %v7238_v4, %v8861_v8  ;;  %v10556_v17 = vshrl.u32 %v9087_v62, 16  ;;  %5181 = vperm.xlu1 %7784, %v5071_v23   ;;  %v2594_v4 = vsel %vm2471_vm4, %v2589_v43, %v2593_v18 }
 0x143   : > { %v1397_v61 = vpop.f32.mrf.mxu1  ;;  %v7307_v46 = vpop.f32.mrf.mxu0  ;;  %7470 = vmatmul.mubr.msk.bf16.gmra.mxu0 %vm839_vm2, %v2586_v47  ;;  %v2600_v54 = vsel %vm2471_vm4, %v2593_v18, %v2599_v3 }
 0x144   : > { %v9099_v31 = vadd.f32 %v7304_v50, %v1406_v34  ;;  %v1398_v38 = vadd.f32 %v1397_v61, %v8868_v52  ;;  %7473 = vmatprep.mubr.msk.bf16.mxu0 %vm839_vm2, %v2590_v58  ;;  %v5073_v58 = vld [vmem:[%s9006_s9 + $0x68] sm:$0xff]  ;;  %v5074_v34 = vld [vmem:[%s9006_s9 + $0x70] sm:$0xff] }
 0x145   : > { %v7241_v8 = vpop.f32.mrf.mxu1  ;;  %7404 = vmatmul.mubr.msk.bf16.gmra.mxu1 %vm839_vm2, %v8659_v13  ;;  %v1865_v44 = vpop.f32.mrf.mxu0  ;;  %5196 = vperm.xlu0 %7783, %v5074_v34  }
 0x146   : > { %v9107_v50 = vadd.f32 %v1852_v32, %v1398_v38  ;;  %v1419_v52 = vadd.f32 %v7241_v8, %v8875_v6  ;;  %7407 = vmatprep.mubr.msk.bf16.mxu1 %vm839_vm2, %v8672_v55  ;;  %v2604_v32 = vrot.slane %v10556_v17, 1  ;;  %v2607_v6 = vrot.slane %v10555_v26, 2  ;;  %5191 = vperm.xlu1 %7784, %v5073_v58   ;;  %v5076_v38 = vld [vmem:[%s9006_s9 + $0x80] sm:$0xff] }
 0x147   : > { %v1410_v22 = vpop.f32.mrf.mxu1  ;;  %v7308_v47 = vpop.f32.mrf.mxu0 }
 0x148   : > { %v9115_v61 = vadd.f32 %v7307_v46, %v1419_v52  ;;  %v1411_v13 = vadd.f32 %v1410_v22, %v8883_v57  ;;  %v2608_v18 = vor.u32 %v2607_v6, %v2604_v32  ;;  %v9136_v22 = vld [vmem:[%s7957_s7 + $0x10] sm:$0xff]  }
 0x149   : > { %v7242_v55 = vpop.f32.mrf.mxu1  ;;  %v1868_v11 = vpop.f32.mrf.mxu0  ;;  %5206 = vperm.xlu0 %7783, %v5076_v38   ;;  %v10745_v38 = vld [vmem:[#allocation92_spill] sm:$0xff] }
 0x14a   : > { %v9123_v43 = vadd.f32 %v1865_v44, %v1411_v13  ;;  %v1422_v46 = vadd.f32 %v7242_v55, %v8889_v41  ;;  %5201 = vperm.xlu1 %7784, %v5075_v16   ;;  %v10744_v13 = vld [vmem:[#allocation64_spill] sm:$0xff]  ;;  %v7826_v55 = vld [vmem:[%s7957_s7 + $0x8] sm:$0xff]  }
 0x14b   : > { %v1413_v23 = vpop.f32.mrf.mxu1  ;;  %v7311_v57 = vpop.f32.mrf.mxu0  ;;  %7474 = vmatmul.mubr.msk.bf16.gmra.mxu0 %vm839_vm2, %v2594_v4  ;;  %v3065_v4 = vrot.slane %v9136_v22, 2 }
 0x14c   : > { %v9129_v8 = vadd.f32 %v7308_v47, %v1422_v46  ;;  %v1414_v52 = vadd.f32 %v1413_v23, %v8896_v51  ;;  %7477 = vmatprep.mubr.msk.bf16.mxu0 %vm839_vm2, %v2600_v54  ;;  %v9140_v47 = vld [vmem:[%s7957_s7 + $0x18] sm:$0xff]   ;;  %v3064_v54 = vrot.slane %v7826_v55, 2  ;;  %v5077_v46 = vld [vmem:[%s9006_s9 + $0x88] sm:$0xff]  ;;  %v5078_v23 = vld [vmem:[%s9006_s9 + $0x90] sm:$0xff] }
 0x14d   : > { %v7245_v44 = vpop.f32.mrf.mxu1  ;;  %7408 = vmatmul.mubr.msk.bf16.gmra.mxu1 %vm839_vm2, %v8675_v39  ;;  %v1881_v41 = vpop.f32.mrf.mxu0  ;;  %v3067_v51 = vrot.slane %v9140_v47, 2  ;;  %v2105_v39 = vrot.slane %v9087_v62, 1  ;;  %5216 = vperm.xlu0 %7783, %v5078_v23   ;;  %v10746_v55 = vld [vmem:[#allocation94_spill] sm:$0xff]  ;;  %v10748_v23 = vld [vmem:[#allocation96_spill] sm:$0xff] }
 0x14e   : > { %v9143_v58 = vadd.f32 %v1868_v11, %v1414_v52  ;;  %v1435_v34 = vadd.f32 %v7245_v44, %v8903_v20  ;;  %7411 = vmatprep.mubr.msk.bf16.mxu1 %vm839_vm2, %v10744_v13  ;;  %v2609_v20 = vsel %vm2471_vm4, %v2599_v3, %v2608_v18  ;;  %5211 = vperm.xlu1 %7784, %v5077_v46   ;;  %v5079_v18 = vld [vmem:[%s9006_s9 + $0x98] sm:$0xff]  ;;  %v5080_v46 = vld [vmem:[%s9006_s9 + $0xa0] sm:$0xff]  ;;  %v5082_v62 = vld [vmem:[%s9006_s9 + $0xb0] sm:$0xff] }
 0x14f   : > { %v1426_v32 = vpop.f32.mrf.mxu1  ;;  %v7312_v6 = vpop.f32.mrf.mxu0  ;;  %v3068_v13 = vsel %vm3063_vm5, %v3065_v4, %v3067_v51  ;;  %v3066_v3 = vsel %vm3063_vm5, %v3064_v54, %v3065_v4  ;;  %v9177_v4 = vld [vmem:[%s7957_s7 + $0x28] sm:$0xff]   ;;  %v10749_v54 = vld [vmem:[#allocation98_spill] sm:$0xff] }
 0x150   : > { %v9152_v16 = vadd.f32 %v7311_v57, %v1435_v34  ;;  %v1427_v11 = vadd.f32 %v1426_v32, %v10745_v38  ;;  %v2106_v57 = vsel %vm1586_vm3, %v10747_v45, %v2105_v39 }
 0x151   : > { %v7246_v52 = vpop.f32.mrf.mxu1  ;;  %v1884_v44 = vpop.f32.mrf.mxu0  ;;  %5226 = vperm.xlu0 %7783, %v5080_v46   ;;  %v10751_v46 = vld [vmem:[#allocation68_spill] sm:$0xff] }
 0x152   : > { %v9157_v26 = vadd.f32 %v1881_v41, %v1427_v11  ;;  %v1438_v17 = vadd.f32 %v7246_v52, %v10746_v55  ;;  %v9172_v11 = vld [vmem:[%s7957_s7 + $0x20] sm:$0xff]   ;;  %5221 = vperm.xlu1 %7784, %v5079_v18  }
 0x153   : > { %v1429_v34 = vpop.f32.mrf.mxu1  ;;  %v7315_v32 = vpop.f32.mrf.mxu0  ;;  %7478 = vmatmul.mubr.msk.bf16.gmra.mxu0 %vm839_vm2, %v2609_v20  ;;  %v3069_v45 = vrot.slane %v9172_v11, 2 }
 0x154   : > { %v9167_v38 = vadd.f32 %v7312_v6, %v1438_v17  ;;  %v1430_v41 = vadd.f32 %v1429_v34, %v10748_v23  ;;  %7549 = vmatprep.mubr.msk.bf16.mxu0 %vm839_vm2, %v3068_v13  ;;  %v3071_v17 = vrot.slane %v9177_v4, 2  ;;  %v5081_v23 = vld [vmem:[%s9006_s9 + $0xa8] sm:$0xff] }
 0x155   : > { %v7249_v39 = vpop.f32.mrf.mxu1  ;;  %7412 = vmatmul.mubr.msk.bf16.gmra.mxu1 %vm839_vm2, %v2106_v57  ;;  %v1897_v20 = vpop.f32.mrf.mxu0  ;;  %v10750_v57 = vld [vmem:[#allocation100_spill] sm:$0xff]  ;;  %v3070_v0 = vsel %vm3063_vm5, %v3067_v51, %v3069_v45  ;;  %5236 = vperm.xlu0 %7783, %v5082_v62   ;;  %v10753_v51 = vld [vmem:[#allocation66_spill] sm:$0xff] }
 0x156   : > { %v9180_v6 = vadd.f32 %v1884_v44, %v1430_v41  ;;  %v1451_v52 = vadd.f32 %v7249_v39, %v10749_v54  ;;  %7483 = vmatprep.mubr.msk.bf16.mxu1 %vm839_vm2, %v3066_v3  ;;  %5231 = vperm.xlu1 %7784, %v5081_v23   ;;  %v4705_v41 = vsel %vm936_vm0, %v10751_v46, 0  ;;  %v3072_v3 = vsel %vm3063_vm5, %v3069_v45, %v3071_v17  ;;  %v10752_v54 = vld [vmem:[#allocation102_spill] sm:$0xff]  ;;  %v10755_v46 = vld [vmem:[#allocation104_spill] sm:$0xff] }
 0x157   : > { %v1442_v55 = vpop.f32.mrf.mxu1  ;;  %v7316_v34 = vpop.f32.mrf.mxu0  ;;  %v10754_v23 = vrot.slane %v10753_v51, 2  ;;  %v5084_v62 = vld [vmem:[%s9006_s9 + $0xc0] sm:$0xff] }
 0x158   : > { %v9186_v18 = vadd.f32 %v7315_v32, %v1451_v52  ;;  %v1443_v59 = vadd.f32 %v1442_v55, %v10750_v57 }
 0x159   : > { %v7250_v28 = vpop.f32.mrf.mxu1  ;;  %v1900_v44 = vpop.f32.mrf.mxu0  ;;  %v4186_v57 = vsel %vm936_vm0, %v10754_v23, 0  ;;  %5246 = vperm.xlu0 %7783, %v5084_v62  }
 0x15a   : > { %v9193_v39 = vadd.f32 %v1897_v20, %v1443_v59  ;;  %v1454_v32 = vadd.f32 %v7250_v28, %v10752_v54  ;;  %v9206_v59 = vld [vmem:[%s7957_s7 + $0x30] sm:$0xff]   ;;  %v9212_v54 = vld [vmem:[%s7957_s7 + $0x38] sm:$0xff]   ;;  %5241 = vperm.xlu1 %7784, %v5083_v15  }
 0x15b   : > { %v1445_v52 = vpop.f32.mrf.mxu1  ;;  %v7319_v55 = vpop.f32.mrf.mxu0  ;;  %7550 = vmatmul.mubr.msk.bf16.vlgmr.msra.gmra.mxu0 %vm839_vm2, %v3070_v0  ;;  %v3073_v28 = vrot.slane %v9206_v59, 2  ;;  %v5086_v15 = vld [vmem:[%s9006_s9 + $0xd0] sm:$0xff] }
 0x15c   : > { %v9201_v21 = vadd.f32 %v7316_v34, %v1454_v32  ;;  %v1446_v7 = vadd.f32 %v1445_v52, %v10755_v46  ;;  %7680 = vmatpush3.bf16.msra.mxu0 %v4705_v41  ;;  %7553 = vmatprep.mubr.msk.bf16.mxu0 %vm839_vm2, %v3072_v3  ;;  %v3075_v34 = vrot.slane %v9212_v54, 2  ;;  %v10756_v41 = vld [vmem:[#allocation65_spill] sm:$0xff]  ;;  %v5085_v46 = vld [vmem:[%s9006_s9 + $0xc8] sm:$0xff] }
 0x15d   : > { %v7253_v45 = vpop.f32.mrf.mxu1  ;;  %7484 = vmatmul.mubr.msk.bf16.vlgmr.msra.gmra.mxu1 %vm839_vm2, %v3068_v13  ;;  %v1913_v20 = vpop.f32.mrf.mxu0  ;;  %v3074_v27 = vsel %vm3063_vm5, %v3071_v17, %v3073_v28  ;;  %5256 = vperm.xlu0 %7783, %v5086_v15  }
 0x15e   : > { %v9215_v32 = vadd.f32 %v1900_v44, %v1446_v7  ;;  %v1467_v52 = vadd.f32 %v7253_v45, %v10756_v41  ;;  %7614 = vmatpush3.bf16.msra.mxu1 %v4186_v57  ;;  %7487 = vmatprep.mubr.msk.bf16.mxu1 %vm839_vm2, %v3070_v0  ;;  %v3076_v57 = vsel %vm3063_vm5, %v3073_v28, %v3075_v34  ;;  %v10758_v45 = vld [vmem:[#allocation69_spill] sm:$0xff]  ;;  %v9236_v28 = vld [vmem:[%s7957_s7 + $0x40] sm:$0xff]  }
 0x15f   : > { %v1458_v51 = vpop.f32.mrf.mxu1  ;;  %v7320_v23 = vpop.f32.mrf.mxu0  ;;  %5251 = vperm.xlu1 %7784, %v5085_v46   ;;  %10760 = vst [vmem:[#allocation64_spill] sm:$0xff] %v9236_v28 }
 0x160   : > { %v9220_v13 = vadd.f32 %v7319_v55, %v1467_v52  ;;  %v1459_v14 = vadd.f32 %v1458_v51, %v10757_v40  ;;  %v5087_v40 = vld [vmem:[%s9006_s9 + $0xd8] sm:$0xff]  ;;  %v10759_v52 = vld [vmem:[#allocation70_spill] sm:$0xff] }
 0x161   : > { %v7254_v7 = vpop.f32.mrf.mxu1  ;;  %v1916_v44 = vpop.f32.mrf.mxu0 }
 0x162   : > { %v9226_v0 = vadd.f32 %v1913_v20, %v1459_v14  ;;  %v1470_v62 = vadd.f32 %v7254_v7, %v10758_v45  ;;  %v3077_v14 = vrot.slane %v9236_v28, 2  ;;  %v5088_v20 = vld [vmem:[%s9006_s9 + $0xe0] sm:$0xff]  ;;  %v9242_v45 = vld [vmem:[%s7957_s7 + $0x48] sm:$0xff]  }
 0x163   : > { %v1461_v41 = vpop.f32.mrf.mxu1  ;;  %v7323_v55 = vpop.f32.mrf.mxu0  ;;  %7554 = vmatmul.mubr.msk.bf16.gmra.mxu0 %vm839_vm2, %v3074_v27  ;;  %10761 = vst [vmem:[#allocation92_spill] sm:$0xff] %v9242_v45  ;;  %5261 = vperm.xlu1 %7784, %v5087_v40  }
 0x164   : > { %v9231_v17 = vadd.f32 %v7320_v23, %v1470_v62  ;;  %v1462_v51 = vadd.f32 %v1461_v41, %v10759_v52  ;;  %7557 = vmatprep.mubr.msk.bf16.mxu0 %vm839_vm2, %v3076_v57  ;;  %v3079_v23 = vrot.slane %v9242_v45, 2  ;;  %v10763_v62 = vld [vmem:[#allocation71_spill] sm:$0xff]  ;;  %5266 = vperm.xlu0 %7783, %v5088_v20   ;;  %v3078_v28 = vsel %vm3063_vm5, %v3075_v34, %v3077_v14  ;;  %v5090_v45 = vld [vmem:[%s9006_s9 + $0xf0] sm:$0xff] }
 0x165   : > { %v7257_v46 = vpop.f32.mrf.mxu1  ;;  %7488 = vmatmul.mubr.msk.bf16.gmra.mxu1 %vm839_vm2, %v3072_v3  ;;  %v1929_v7 = vpop.f32.mrf.mxu0  ;;  %v10765_v3 = vld [vmem:[#allocation72_spill] sm:$0xff] }
 0x166   : > { %v9245_v15 = vadd.f32 %v1916_v44, %v1462_v51  ;;  %v1483_v41 = vadd.f32 %v7257_v46, %v10763_v62  ;;  %7491 = vmatprep.mubr.msk.bf16.mxu1 %vm839_vm2, %v3074_v27  ;;  %v3080_v51 = vsel %vm3063_vm5, %v3077_v14, %v3079_v23  ;;  %v10767_v46 = vld [vmem:[#allocation73_spill] sm:$0xff]  ;;  %v9266_v14 = vld [vmem:[%s7957_s7 + $0x50] sm:$0xff]  }
 0x167   : > { %v1474_v52 = vpop.f32.mrf.mxu1  ;;  %v7324_v30 = vpop.f32.mrf.mxu0  ;;  %5271 = vperm.xlu1 %7784, %v5089_v9   ;;  %10770 = vst [vmem:[#allocation68_spill] sm:$0xff] %v9266_v14  ;;  %v5092_v9 = vld [vmem:[%s9006_s9 + $0x100] sm:$0xff] }
 0x168   : > { %10762 = vst [vmem:[#allocation94_spill] sm:$0xff] %v9245_v15  ;;  %v9250_v48 = vadd.f32 %v7323_v55, %v1483_v41  ;;  %v1475_v36 = vadd.f32 %v1474_v52, %v10765_v3  ;;  %5276 = vperm.xlu0 %7783, %v5090_v45   ;;  %v5091_v41 = vld [vmem:[%s9006_s9 + $0xf8] sm:$0xff]  ;;  %v10769_v52 = vld [vmem:[#allocation74_spill] sm:$0xff] }
 0x169   : > { %v7258_v40 = vpop.f32.mrf.mxu1  ;;  %v1932_v44 = vpop.f32.mrf.mxu0 }
 0x16a   : > { %10764 = vst [vmem:[#allocation96_spill] sm:$0xff] %v9250_v48  ;;  %v9256_v27 = vadd.f32 %v1929_v7, %v1475_v36  ;;  %v1486_v20 = vadd.f32 %v7258_v40, %v10767_v46  ;;  %v3081_v36 = vrot.slane %v9266_v14, 2  ;;  %v9272_v46 = vld [vmem:[%s7957_s7 + $0x58] sm:$0xff]   ;;  %v5093_v14 = vld [vmem:[%s9006_s9 + $0x108] sm:$0xff] }
 0x16b   : > { %v1477_v62 = vpop.f32.mrf.mxu1  ;;  %v7327_v55 = vpop.f32.mrf.mxu0  ;;  %7558 = vmatmul.mubr.msk.bf16.gmra.mxu0 %vm839_vm2, %v3078_v28  ;;  %10771 = vst [vmem:[#allocation102_spill] sm:$0xff] %v9272_v46  ;;  %5281 = vperm.xlu1 %7784, %v5091_v41  }
 0x16c   : > { %10766 = vst [vmem:[#allocation98_spill] sm:$0xff] %v9256_v27  ;;  %v9261_v34 = vadd.f32 %v7324_v30, %v1486_v20  ;;  %v1478_v3 = vadd.f32 %v1477_v62, %v10769_v52  ;;  %7561 = vmatprep.mubr.msk.bf16.mxu0 %vm839_vm2, %v3080_v51  ;;  %v3083_v30 = vrot.slane %v9272_v46, 2  ;;  %v10773_v20 = vld [vmem:[#allocation75_spill] sm:$0xff]  ;;  %5286 = vperm.xlu0 %7783, %v5092_v9   ;;  %v5094_v46 = vld [vmem:[%s9006_s9 + $0x110] sm:$0xff] }
 0x16d   : > { %v7261_v7 = vpop.f32.mrf.mxu1  ;;  %7492 = vmatmul.mubr.msk.bf16.gmra.mxu1 %vm839_vm2, %v3076_v57  ;;  %v1945_v40 = vpop.f32.mrf.mxu0  ;;  %v10775_v57 = vld [vmem:[#allocation76_spill] sm:$0xff]  ;;  %v3082_v15 = vsel %vm3063_vm5, %v3079_v23, %v3081_v36 }
 0x16e   : > { %10768 = vst [vmem:[#allocation100_spill] sm:$0xff] %v9261_v34  ;;  %v9275_v45 = vadd.f32 %v1932_v44, %v1478_v3  ;;  %v1499_v62 = vadd.f32 %v7261_v7, %v10773_v20  ;;  %7495 = vmatprep.mubr.msk.bf16.mxu1 %vm839_vm2, %v3078_v28  ;;  %v3084_v3 = vsel %vm3063_vm5, %v3081_v36, %v3083_v30  ;;  %v10777_v7 = vld [vmem:[#allocation77_spill] sm:$0xff]  ;;  %v9296_v36 = vld [vmem:[%s7957_s7 + $0x60] sm:$0xff]  }
 0x16f   : > { %v1490_v52 = vpop.f32.mrf.mxu1  ;;  %v7328_v34 = vpop.f32.mrf.mxu0  ;;  %5291 = vperm.xlu1 %7784, %v5093_v14   ;;  %10780 = vst [vmem:[#allocation69_spill] sm:$0xff] %v9296_v36  ;;  %v5096_v14 = vld [vmem:[%s9006_s9 + $0x120] sm:$0xff] }
 0x170   : > { %10772 = vst [vmem:[#allocation66_spill] sm:$0xff] %v9275_v45  ;;  %v9280_v27 = vadd.f32 %v7327_v55, %v1499_v62  ;;  %v1491_v48 = vadd.f32 %v1490_v52, %v10775_v57  ;;  %5296 = vperm.xlu0 %7783, %v5094_v46   ;;  %v5095_v62 = vld [vmem:[%s9006_s9 + $0x118] sm:$0xff]  ;;  %v10779_v52 = vld [vmem:[#allocation78_spill] sm:$0xff] }
 0x171   : > { %v7262_v41 = vpop.f32.mrf.mxu1  ;;  %v1948_v44 = vpop.f32.mrf.mxu0 }
 0x172   : > { %10774 = vst [vmem:[#allocation104_spill] sm:$0xff] %v9280_v27  ;;  %v9286_v28 = vadd.f32 %v1945_v40, %v1491_v48  ;;  %v1502_v9 = vadd.f32 %v7262_v41, %v10777_v7  ;;  %v3085_v48 = vrot.slane %v9296_v36, 2  ;;  %v9302_v7 = vld [vmem:[%s7957_s7 + $0x68] sm:$0xff]  }
 0x173   : > { %v1493_v20 = vpop.f32.mrf.mxu1  ;;  %v7331_v55 = vpop.f32.mrf.mxu0  ;;  %7562 = vmatmul.mubr.msk.bf16.gmra.mxu0 %vm839_vm2, %v3082_v15  ;;  %10781 = vst [vmem:[#allocation70_spill] sm:$0xff] %v9302_v7  ;;  %5301 = vperm.xlu1 %7784, %v5095_v62   ;;  %v5097_v36 = vld [vmem:[%s9006_s9 + $0x128] sm:$0xff] }
 0x174   : > { %10776 = vst [vmem:[#allocation65_spill] sm:$0xff] %v9286_v28  ;;  %v9291_v23 = vadd.f32 %v7328_v34, %v1502_v9  ;;  %v1494_v57 = vadd.f32 %v1493_v20, %v10779_v52  ;;  %7565 = vmatprep.mubr.msk.bf16.mxu0 %vm839_vm2, %v3084_v3  ;;  %v3087_v34 = vrot.slane %v9302_v7, 2  ;;  %v10783_v9 = vld [vmem:[#allocation79_spill] sm:$0xff]  ;;  %5306 = vperm.xlu0 %7783, %v5096_v14   ;;  %v5098_v7 = vld [vmem:[%s9006_s9 + $0x130] sm:$0xff] }
 0x175   : > { %v7265_v40 = vpop.f32.mrf.mxu1  ;;  %7496 = vmatmul.mubr.msk.bf16.gmra.mxu1 %vm839_vm2, %v3080_v51  ;;  %v1961_v41 = vpop.f32.mrf.mxu0  ;;  %v10785_v51 = vld [vmem:[#allocation80_spill] sm:$0xff]  ;;  %v3086_v45 = vsel %vm3063_vm5, %v3083_v30, %v3085_v48 }
 0x176   : > { %10778 = vst [vmem:[#allocation67_spill] sm:$0xff] %v9291_v23  ;;  %v9305_v46 = vadd.f32 %v1948_v44, %v1494_v57  ;;  %v1515_v20 = vadd.f32 %v7265_v40, %v10783_v9  ;;  %7499 = vmatprep.mubr.msk.bf16.mxu1 %vm839_vm2, %v3082_v15  ;;  %v3088_v57 = vsel %vm3063_vm5, %v3085_v48, %v3087_v34  ;;  %v10787_v40 = vld [vmem:[#allocation81_spill] sm:$0xff]  ;;  %v9326_v48 = vld [vmem:[%s7957_s7 + $0x70] sm:$0xff]  }
 0x177   : > { %v1506_v52 = vpop.f32.mrf.mxu1  ;;  %v7332_v23 = vpop.f32.mrf.mxu0  ;;  %5311 = vperm.xlu1 %7784, %v5097_v36   ;;  %10790 = vst [vmem:[#allocation75_spill] sm:$0xff] %v9326_v48  ;;  %v5100_v36 = vld [vmem:[%s9006_s9 + $0x140] sm:$0xff] }
 0x178   : > { %10782 = vst [vmem:[#allocation71_spill] sm:$0xff] %v9305_v46  ;;  %v9310_v28 = vadd.f32 %v7331_v55, %v1515_v20  ;;  %v1507_v27 = vadd.f32 %v1506_v52, %v10785_v51  ;;  %5316 = vperm.xlu0 %7783, %v5098_v7   ;;  %v5099_v20 = vld [vmem:[%s9006_s9 + $0x138] sm:$0xff]  ;;  %v10789_v52 = vld [vmem:[#allocation82_spill] sm:$0xff] }
 0x179   : > { %v7266_v62 = vpop.f32.mrf.mxu1  ;;  %v1964_v44 = vpop.f32.mrf.mxu0 }
 0x17a   : > { %10784 = vst [vmem:[#allocation72_spill] sm:$0xff] %v9310_v28  ;;  %v9316_v15 = vadd.f32 %v1961_v41, %v1507_v27  ;;  %v1518_v14 = vadd.f32 %v7266_v62, %v10787_v40  ;;  %v3089_v27 = vrot.slane %v9326_v48, 2  ;;  %v9332_v40 = vld [vmem:[%s7957_s7 + $0x78] sm:$0xff]   ;;  %v5101_v48 = vld [vmem:[%s9006_s9 + $0x148] sm:$0xff] }
 0x17b   : > { %v1509_v9 = vpop.f32.mrf.mxu1  ;;  %v7335_v55 = vpop.f32.mrf.mxu0  ;;  %7566 = vmatmul.mubr.msk.bf16.gmra.mxu0 %vm839_vm2, %v3086_v45  ;;  %10791 = vst [vmem:[#allocation76_spill] sm:$0xff] %v9332_v40  ;;  %5321 = vperm.xlu1 %7784, %v5099_v20  }
 0x17c   : > { %10786 = vst [vmem:[#allocation73_spill] sm:$0xff] %v9316_v15  ;;  %v9321_v30 = vadd.f32 %v7332_v23, %v1518_v14  ;;  %v1510_v51 = vadd.f32 %v1509_v9, %v10789_v52  ;;  %7569 = vmatprep.mubr.msk.bf16.mxu0 %vm839_vm2, %v3088_v57  ;;  %v3091_v23 = vrot.slane %v9332_v40, 2  ;;  %v10793_v14 = vld [vmem:[#allocation83_spill] sm:$0xff]  ;;  %5326 = vperm.xlu0 %7783, %v5100_v36   ;;  %v5102_v40 = vld [vmem:[%s9006_s9 + $0x150] sm:$0xff] }
 0x17d   : > { %v7269_v41 = vpop.f32.mrf.mxu1  ;;  %7500 = vmatmul.mubr.msk.bf16.gmra.mxu1 %vm839_vm2, %v3084_v3  ;;  %v1977_v62 = vpop.f32.mrf.mxu0  ;;  %v10795_v3 = vld [vmem:[#allocation84_spill] sm:$0xff]  ;;  %v3090_v46 = vsel %vm3063_vm5, %v3087_v34, %v3089_v27 }
 0x17e   : > { %10788 = vst [vmem:[#allocation74_spill] sm:$0xff] %v9321_v30  ;;  %v9335_v7 = vadd.f32 %v1964_v44, %v1510_v51  ;;  %v1531_v9 = vadd.f32 %v7269_v41, %v10793_v14  ;;  %7503 = vmatprep.mubr.msk.bf16.mxu1 %vm839_vm2, %v3086_v45  ;;  %v3092_v51 = vsel %vm3063_vm5, %v3089_v27, %v3091_v23  ;;  %v10797_v41 = vld [vmem:[#allocation85_spill] sm:$0xff]  ;;  %v9356_v27 = vld [vmem:[%s7957_s7 + $0x80] sm:$0xff]  }
 0x17f   : > { %v1522_v52 = vpop.f32.mrf.mxu1  ;;  %v7336_v30 = vpop.f32.mrf.mxu0  ;;  %5331 = vperm.xlu1 %7784, %v5101_v48   ;;  %10800 = vst [vmem:[#allocation81_spill] sm:$0xff] %v9356_v27  ;;  %v5104_v48 = vld [vmem:[%s9006_s9 + $0x160] sm:$0xff] }
 0x180   : > { %10792 = vst [vmem:[#allocation77_spill] sm:$0xff] %v9335_v7  ;;  %v9340_v15 = vadd.f32 %v7335_v55, %v1531_v9  ;;  %v1523_v28 = vadd.f32 %v1522_v52, %v10795_v3  ;;  %5336 = vperm.xlu0 %7783, %v5102_v40   ;;  %v5103_v9 = vld [vmem:[%s9006_s9 + $0x158] sm:$0xff]  ;;  %v10799_v52 = vld [vmem:[#allocation86_spill] sm:$0xff] }
 0x181   : > { %v7270_v20 = vpop.f32.mrf.mxu1  ;;  %v1980_v44 = vpop.f32.mrf.mxu0 }
 0x182   : > { %10794 = vst [vmem:[#allocation78_spill] sm:$0xff] %v9340_v15  ;;  %v9346_v45 = vadd.f32 %v1977_v62, %v1523_v28  ;;  %v1534_v36 = vadd.f32 %v7270_v20, %v10797_v41  ;;  %v3093_v28 = vrot.slane %v9356_v27, 2  ;;  %v9362_v41 = vld [vmem:[%s7957_s7 + $0x88] sm:$0xff]  }
 0x183   : > { %v1525_v14 = vpop.f32.mrf.mxu1  ;;  %v7339_v55 = vpop.f32.mrf.mxu0  ;;  %7570 = vmatmul.mubr.msk.bf16.gmra.mxu0 %vm839_vm2, %v3090_v46  ;;  %10801 = vst [vmem:[#allocation82_spill] sm:$0xff] %v9362_v41  ;;  %5341 = vperm.xlu1 %7784, %v5103_v9   ;;  %v5105_v27 = vld [vmem:[%s9006_s9 + $0x168] sm:$0xff] }
 0x184   : > { %10796 = vst [vmem:[#allocation79_spill] sm:$0xff] %v9346_v45  ;;  %v9351_v34 = vadd.f32 %v7336_v30, %v1534_v36  ;;  %v1526_v3 = vadd.f32 %v1525_v14, %v10799_v52  ;;  %7573 = vmatprep.mubr.msk.bf16.mxu0 %vm839_vm2, %v3092_v51  ;;  %v3095_v30 = vrot.slane %v9362_v41, 2  ;;  %v10803_v36 = vld [vmem:[#allocation87_spill] sm:$0xff]  ;;  %5346 = vperm.xlu0 %7783, %v5104_v48   ;;  %v5106_v41 = vld [vmem:[%s9006_s9 + $0x170] sm:$0xff] }
 0x185   : > { %v7273_v62 = vpop.f32.mrf.mxu1  ;;  %7504 = vmatmul.mubr.msk.bf16.gmra.mxu1 %vm839_vm2, %v3088_v57  ;;  %v1993_v20 = vpop.f32.mrf.mxu0  ;;  %v10805_v57 = vld [vmem:[#allocation88_spill] sm:$0xff]  ;;  %v3094_v7 = vsel %vm3063_vm5, %v3091_v23, %v3093_v28 }
 0x186   : > { %10798 = vst [vmem:[#allocation80_spill] sm:$0xff] %v9351_v34  ;;  %v9365_v40 = vadd.f32 %v1980_v44, %v1526_v3  ;;  %v1547_v14 = vadd.f32 %v7273_v62, %v10803_v36  ;;  %7507 = vmatprep.mubr.msk.bf16.mxu1 %vm839_vm2, %v3090_v46  ;;  %v3096_v3 = vsel %vm3063_vm5, %v3093_v28, %v3095_v30  ;;  %v10807_v62 = vld [vmem:[#allocation89_spill] sm:$0xff]  ;;  %v9386_v28 = vld [vmem:[%s7957_s7 + $0x90] sm:$0xff]  }
 0x187   : > { %v1538_v52 = vpop.f32.mrf.mxu1  ;;  %v7340_v34 = vpop.f32.mrf.mxu0  ;;  %5351 = vperm.xlu1 %7784, %v5105_v27   ;;  %10810 = vst [vmem:[#allocation87_spill] sm:$0xff] %v9386_v28  ;;  %v5108_v27 = vld [vmem:[%s9006_s9 + $0x180] sm:$0xff] }
 0x188   : > { %10802 = vst [vmem:[#allocation83_spill] sm:$0xff] %v9365_v40  ;;  %v9370_v45 = vadd.f32 %v7339_v55, %v1547_v14  ;;  %v1539_v15 = vadd.f32 %v1538_v52, %v10805_v57  ;;  %5356 = vperm.xlu0 %7783, %v5106_v41   ;;  %v5107_v14 = vld [vmem:[%s9006_s9 + $0x178] sm:$0xff]  ;;  %v10809_v52 = vld [vmem:[#allocation90_spill] sm:$0xff] }
 0x189   : > { %v7274_v9 = vpop.f32.mrf.mxu1  ;;  %v1996_v44 = vpop.f32.mrf.mxu0 }
 0x18a   : > { %10804 = vst [vmem:[#allocation84_spill] sm:$0xff] %v9370_v45  ;;  %v9376_v46 = vadd.f32 %v1993_v20, %v1539_v15  ;;  %v1550_v48 = vadd.f32 %v7274_v9, %v10807_v62  ;;  %v3097_v15 = vrot.slane %v9386_v28, 2  ;;  %v9392_v62 = vld [vmem:[%s7957_s7 + $0x98] sm:$0xff]   ;;  %v5109_v28 = vld [vmem:[%s9006_s9 + $0x188] sm:$0xff] }
 0x18b   : > { %v1541_v36 = vpop.f32.mrf.mxu1  ;;  %v7343_v55 = vpop.f32.mrf.mxu0  ;;  %7574 = vmatmul.mubr.msk.bf16.gmra.mxu0 %vm839_vm2, %v3094_v7  ;;  %10811 = vst [vmem:[#allocation88_spill] sm:$0xff] %v9392_v62  ;;  %5361 = vperm.xlu1 %7784, %v5107_v14  }
 0x18c   : > { %10806 = vst [vmem:[#allocation85_spill] sm:$0xff] %v9376_v46  ;;  %v9381_v23 = vadd.f32 %v7340_v34, %v1550_v48  ;;  %v1542_v57 = vadd.f32 %v1541_v36, %v10809_v52  ;;  %7577 = vmatprep.mubr.msk.bf16.mxu0 %vm839_vm2, %v3096_v3  ;;  %v3099_v34 = vrot.slane %v9392_v62, 2  ;;  %v10813_v48 = vld [vmem:[#allocation91_spill] sm:$0xff]  ;;  %5366 = vperm.xlu0 %7783, %v5108_v27   ;;  %v5110_v62 = vld [vmem:[%s9006_s9 + $0x190] sm:$0xff] }
 0x18d   : > { %v7277_v20 = vpop.f32.mrf.mxu1  ;;  %7508 = vmatmul.mubr.msk.bf16.gmra.mxu1 %vm839_vm2, %v3092_v51  ;;  %v2009_v9 = vpop.f32.mrf.mxu0  ;;  %v10815_v51 = vld [vmem:[#allocation93_spill] sm:$0xff]  ;;  %v3098_v40 = vsel %vm3063_vm5, %v3095_v30, %v3097_v15 }
 0x18e   : > { %10808 = vst [vmem:[#allocation86_spill] sm:$0xff] %v9381_v23  ;;  %v9395_v41 = vadd.f32 %v1996_v44, %v1542_v57  ;;  %v1563_v36 = vadd.f32 %v7277_v20, %v10813_v48  ;;  %7511 = vmatprep.mubr.msk.bf16.mxu1 %vm839_vm2, %v3094_v7  ;;  %v3100_v57 = vsel %vm3063_vm5, %v3097_v15, %v3099_v34  ;;  %v10817_v20 = vld [vmem:[#allocation95_spill] sm:$0xff]  ;;  %v9416_v15 = vld [vmem:[%s7957_s7 + $0xa0] sm:$0xff]  }
 0x18f   : > { %v1554_v52 = vpop.f32.mrf.mxu1  ;;  %v7344_v23 = vpop.f32.mrf.mxu0  ;;  %5371 = vperm.xlu1 %7784, %v5109_v28   ;;  %10820 = vst [vmem:[#allocation95_spill] sm:$0xff] %v9416_v15  ;;  %v5112_v28 = vld [vmem:[%s9006_s9 + $0x1a0] sm:$0xff] }
 0x190   : > { %10812 = vst [vmem:[#allocation89_spill] sm:$0xff] %v9395_v41  ;;  %v9400_v46 = vadd.f32 %v7343_v55, %v1563_v36  ;;  %v1555_v45 = vadd.f32 %v1554_v52, %v10815_v51  ;;  %5376 = vperm.xlu0 %7783, %v5110_v62   ;;  %v5111_v36 = vld [vmem:[%s9006_s9 + $0x198] sm:$0xff] }
 0x191   : > { %v7278_v14 = vpop.f32.mrf.mxu1  ;;  %v2012_v44 = vpop.f32.mrf.mxu0  ;;  %v10819_v52 = vld [vmem:[#allocation97_spill] sm:$0xff] }
 0x192   : > { %10814 = vst [vmem:[#allocation90_spill] sm:$0xff] %v9400_v46  ;;  %v9406_v7 = vadd.f32 %v2009_v9, %v1555_v45  ;;  %v1566_v27 = vadd.f32 %v7278_v14, %v10817_v20  ;;  %v3101_v45 = vrot.slane %v9416_v15, 2  ;;  %v9422_v20 = vld [vmem:[%s7957_s7 + $0xa8] sm:$0xff]  }
 0x193   : > { %v1557_v48 = vpop.f32.mrf.mxu1  ;;  %v7347_v55 = vpop.f32.mrf.mxu0  ;;  %7578 = vmatmul.mubr.msk.bf16.gmra.mxu0 %vm839_vm2, %v3098_v40  ;;  %10821 = vst [vmem:[#allocation97_spill] sm:$0xff] %v9422_v20  ;;  %5381 = vperm.xlu1 %7784, %v5111_v36   ;;  %v5113_v15 = vld [vmem:[%s9006_s9 + $0x1a8] sm:$0xff] }
 0x194   : > { %10816 = vst [vmem:[#allocation91_spill] sm:$0xff] %v9406_v7  ;;  %v9411_v30 = vadd.f32 %v7344_v23, %v1566_v27  ;;  %v1558_v51 = vadd.f32 %v1557_v48, %v10819_v52  ;;  %7581 = vmatprep.mubr.msk.bf16.mxu0 %vm839_vm2, %v3100_v57  ;;  %v3103_v23 = vrot.slane %v9422_v20, 2  ;;  %v10822_v27 = vld [vmem:[#allocation99_spill] sm:$0xff]  ;;  %5386 = vperm.xlu0 %7783, %v5112_v28   ;;  %v5114_v20 = vld [vmem:[%s9006_s9 + $0x1b0] sm:$0xff] }
 0x195   : > { %v7281_v9 = vpop.f32.mrf.mxu1  ;;  %7512 = vmatmul.mubr.msk.bf16.gmra.mxu1 %vm839_vm2, %v3096_v3  ;;  %v2025_v14 = vpop.f32.mrf.mxu0  ;;  %v10823_v3 = vld [vmem:[#allocation101_spill] sm:$0xff]  ;;  %v3102_v41 = vsel %vm3063_vm5, %v3099_v34, %v3101_v45 }
 0x196   : > { %10818 = vst [vmem:[#allocation93_spill] sm:$0xff] %v9411_v30  ;;  %v9425_v62 = vadd.f32 %v2012_v44, %v1558_v51  ;;  %v1579_v48 = vadd.f32 %v7281_v9, %v10822_v27  ;;  %7515 = vmatprep.mubr.msk.bf16.mxu1 %vm839_vm2, %v3098_v40  ;;  %v3104_v51 = vsel %vm3063_vm5, %v3101_v45, %v3103_v23  ;;  %v10825_v9 = vld [vmem:[#allocation103_spill] sm:$0xff]  ;;  %v9446_v45 = vld [vmem:[%s7957_s7 + $0xb0] sm:$0xff]  }
 0x197   : > { %v1570_v52 = vpop.f32.mrf.mxu1  ;;  %v7348_v30 = vpop.f32.mrf.mxu0  ;;  %5391 = vperm.xlu1 %7784, %v5113_v15   ;;  %10828 = vst [vmem:[#allocation103_spill] sm:$0xff] %v9446_v45  ;;  %v5116_v15 = vld [vmem:[%s9006_s9 + $0x1c0] sm:$0xff] }
 0x198   : > { %v9430_v7 = vadd.f32 %v7347_v55, %v1579_v48  ;;  %v1571_v46 = vadd.f32 %v1570_v52, %v10823_v3  ;;  %5396 = vperm.xlu0 %7783, %v5114_v20   ;;  %v5115_v48 = vld [vmem:[%s9006_s9 + $0x1b8] sm:$0xff] }
 0x199   : > { %v7282_v36 = vpop.f32.mrf.mxu1  ;;  %v2028_v44 = vpop.f32.mrf.mxu0  ;;  %v10827_v52 = vld [vmem:[#allocation105_spill] sm:$0xff] }
 0x19a   : > { %v9436_v40 = vadd.f32 %v2025_v14, %v1571_v46  ;;  %v1582_v28 = vadd.f32 %v7282_v36, %v10825_v9  ;;  %v3105_v46 = vrot.slane %v9446_v45, 2  ;;  %v9452_v9 = vld [vmem:[%s7957_s7 + $0xb8] sm:$0xff]   ;;  %v5117_v45 = vld [vmem:[%s9006_s9 + $0x1c8] sm:$0xff] }
 0x19b   : > { %v1573_v27 = vpop.f32.mrf.mxu1  ;;  %v7419_v55 = vpop.f32.mrf.mxu0  ;;  %7582 = vmatmul.mubr.msk.bf16.gmra.mxu0 %vm839_vm2, %v3102_v41  ;;  %10829 = vst [vmem:[#allocation105_spill] sm:$0xff] %v9452_v9  ;;  %5401 = vperm.xlu1 %7784, %v5115_v48  }
 0x19c   : > { %10824 = vst [vmem:[#allocation99_spill] sm:$0xff] %v9436_v40  ;;  %v9441_v34 = vadd.f32 %v7348_v30, %v1582_v28  ;;  %v1574_v3 = vadd.f32 %v1573_v27, %v10827_v52  ;;  %7585 = vmatprep.mubr.msk.bf16.mxu0 %vm839_vm2, %v3104_v51  ;;  %v3107_v30 = vrot.slane %v9452_v9, 2  ;;  %5406 = vperm.xlu0 %7783, %v5116_v15   ;;  %v5118_v9 = vld [vmem:[%s9006_s9 + $0x1d0] sm:$0xff] }
 0x19d   : > { %v7353_v14 = vpop.f32.mrf.mxu1  ;;  %7516 = vmatmul.mubr.msk.bf16.gmra.mxu1 %vm839_vm2, %v3100_v57  ;;  %v2743_v36 = vpop.f32.mrf.mxu0  ;;  %v3106_v40 = vsel %vm3063_vm5, %v3103_v23, %v3105_v46 }
 0x19e   : > { %10826 = vst [vmem:[#allocation101_spill] sm:$0xff] %v9441_v34  ;;  %v9455_v20 = vadd.f32 %v2028_v44, %v1574_v3  ;;  %v2408_v28 = vadd.f32 %v7353_v14, %v8968_v24  ;;  %7519 = vmatprep.mubr.msk.bf16.mxu1 %vm839_vm2, %v3102_v41  ;;  %v3108_v24 = vsel %vm3063_vm5, %v3105_v46, %v3107_v30  ;;  %v9476_v46 = vld [vmem:[%s7957_s7 + $0xc0] sm:$0xff]  }
 0x19f   : > { %v2151_v27 = vpop.f32.mrf.mxu1  ;;  %v7420_v52 = vpop.f32.mrf.mxu0  ;;  %5411 = vperm.xlu1 %7784, %v5117_v45   ;;  %10830 = vst [vmem:[#allocation107_spill] sm:$0xff] %v9476_v46  ;;  %v3109_v45 = vrot.slane %v9476_v46, 2 }
 0x1a0   : > { %v9460_v34 = vadd.f32 %v7419_v55, %v2408_v28  ;;  %v2406_v57 = vadd.f32 %v2151_v27, %v8975_v63  ;;  %5416 = vperm.xlu0 %7783, %v5118_v9   ;;  %v5119_v63 = vld [vmem:[%s9006_s9 + $0x1d8] sm:$0xff]  ;;  %v9482_v27 = vld [vmem:[%s7957_s7 + $0xc8] sm:$0xff]  }
 0x1a1   : > { %v7354_v48 = vpop.f32.mrf.mxu1  ;;  %v2746_v44 = vpop.f32.mrf.mxu0  ;;  %10831 = vst [vmem:[#allocation108_spill] sm:$0xff] %v9482_v27  ;;  %v3111_v9 = vrot.slane %v9482_v27, 2  ;;  %v3110_v46 = vsel %vm3063_vm5, %v3107_v30, %v3109_v45  ;;  %v5122_v27 = vld [vmem:[%s9006_s9 + $0x1f0] sm:$0xff] }
 0x1a2   : > { %v9466_v41 = vadd.f32 %v2743_v36, %v2406_v57  ;;  %v2409_v3 = vadd.f32 %v7354_v48, %v8979_v5  ;;  %v5120_v36 = vld [vmem:[%s9006_s9 + $0x1e0] sm:$0xff] }
 0x1a3   : > { %v2154_v15 = vpop.f32.mrf.mxu1  ;;  %v7423_v55 = vpop.f32.mrf.mxu0  ;;  %7586 = vmatmul.mubr.msk.bf16.gmra.mxu0 %vm839_vm2, %v3106_v40  ;;  %5421 = vperm.xlu1 %7784, %v5119_v63  }
 0x1a4   : > { %v9471_v23 = vadd.f32 %v7420_v52, %v2409_v3  ;;  %v2407_v14 = vadd.f32 %v2154_v15, %v8985_v56  ;;  %7589 = vmatprep.mubr.msk.bf16.mxu0 %vm839_vm2, %v3108_v24  ;;  %5426 = vperm.xlu0 %7783, %v5120_v36   ;;  %v5121_v3 = vld [vmem:[%s9006_s9 + $0x1e8] sm:$0xff] }
 0x1a5   : > { %v7357_v28 = vpop.f32.mrf.mxu1  ;;  %7520 = vmatmul.mubr.msk.bf16.gmra.mxu1 %vm839_vm2, %v3104_v51  ;;  %v2759_v5 = vpop.f32.mrf.mxu0 }
 0x1a6   : > { %v9485_v52 = vadd.f32 %v2746_v44, %v2407_v14  ;;  %v2412_v56 = vadd.f32 %v7357_v28, %v8991_v1  ;;  %7523 = vmatprep.mubr.msk.bf16.mxu1 %vm839_vm2, %v3106_v40  ;;  %v3112_v14 = vsel %vm3063_vm5, %v3109_v45, %v3111_v9 }
 0x1a7   : > { %v2167_v57 = vpop.f32.mrf.mxu1  ;;  %v7424_v48 = vpop.f32.mrf.mxu0  ;;  %5431 = vperm.xlu1 %7784, %v5121_v3  }
 0x1a8   : > { %v9490_v15 = vadd.f32 %v7423_v55, %v2412_v56  ;;  %v2410_v51 = vadd.f32 %v2167_v57, %v9000_v29  ;;  %5436 = vperm.xlu0 %7783, %v5122_v27   ;;  %v5123_v29 = vld [vmem:[%s9006_s9 + $0x1f8] sm:$0xff]  ;;  %v9506_v56 = vld [vmem:[%s7957_s7 + $0xd0] sm:$0xff]  }
 0x1a9   : > { %v7358_v63 = vpop.f32.mrf.mxu1  ;;  %v2762_v44 = vpop.f32.mrf.mxu0  ;;  %10832 = vst [vmem:[#allocation109_spill] sm:$0xff] %v9506_v56  ;;  %v3113_v45 = vrot.slane %v9506_v56, 2  ;;  %v9511_v57 = vld [vmem:[%s7957_s7 + $0xd8] sm:$0xff]  }
 0x1aa   : > { %v9496_v1 = vadd.f32 %v2759_v5, %v2410_v51  ;;  %v2413_v40 = vadd.f32 %v7358_v63, %v9010_v2  ;;  %v3115_v3 = vrot.slane %v9511_v57, 2 }
 0x1ab   : > { %v2170_v36 = vpop.f32.mrf.mxu1  ;;  %v7427_v28 = vpop.f32.mrf.mxu0  ;;  %7590 = vmatmul.mubr.msk.bf16.gmra.mxu0 %vm839_vm2, %v3110_v46  ;;  %5441 = vperm.xlu1 %7784, %v5123_v29  }
 0x1ac   : > { %v9501_v55 = vadd.f32 %v7424_v48, %v2413_v40  ;;  %v2411_v30 = vadd.f32 %v2170_v36, %v9016_v19  ;;  %7593 = vmatprep.mubr.msk.bf16.mxu0 %vm839_vm2, %v3112_v14  ;;  %v3116_v29 = vsel %vm3063_vm5, %v3113_v45, %v3115_v3 }
 0x1ad   : > { %v7361_v5 = vpop.f32.mrf.mxu1  ;;  %7524 = vmatmul.mubr.msk.bf16.gmra.mxu1 %vm839_vm2, %v3108_v24  ;;  %v2775_v2 = vpop.f32.mrf.mxu0  ;;  %v3114_v24 = vsel %vm3063_vm5, %v3111_v9, %v3113_v45 }
 0x1ae   : > { %v9514_v27 = vadd.f32 %v2762_v44, %v2411_v30  ;;  %v2416_v48 = vadd.f32 %v7361_v5, %v9025_v42  ;;  %7527 = vmatprep.mubr.msk.bf16.mxu1 %vm839_vm2, %v3110_v46 }
 0x1af   : > { %v2183_v19 = vpop.f32.mrf.mxu1  ;;  %v7428_v51 = vpop.f32.mrf.mxu0 }
 0x1b0   : > { %v9518_v63 = vadd.f32 %v7427_v28, %v2416_v48  ;;  %v2414_v40 = vadd.f32 %v2183_v19, %v9032_v33  ;;  %v9532_v33 = vld [vmem:[%s7957_s7 + $0xe0] sm:$0xff]  }
 0x1b1   : > { %v7362_v36 = vpop.f32.mrf.mxu1  ;;  %v2778_v56 = vpop.f32.mrf.mxu0  ;;  %10833 = vst [vmem:[#allocation110_spill] sm:$0xff] %v9532_v33  ;;  %v3117_v9 = vrot.slane %v9532_v33, 2 }
 0x1b2   : > { %v9523_v44 = vadd.f32 %v2775_v2, %v2414_v40  ;;  %v2417_v42 = vadd.f32 %v7362_v36, %v9038_v12  ;;  %v9537_v2 = vld [vmem:[%s7957_s7 + $0xe8] sm:$0xff]  }
 0x1b3   : > { %v2186_v30 = vpop.f32.mrf.mxu1  ;;  %v7431_v46 = vpop.f32.mrf.mxu0  ;;  %7594 = vmatmul.mubr.msk.bf16.gmra.mxu0 %vm839_vm2, %v3114_v24  ;;  %10834 = vst [vmem:[#allocation111_spill] sm:$0xff] %v9537_v2  ;;  %v3119_v12 = vrot.slane %v9537_v2, 2 }
 0x1b4   : > { %v9527_v5 = vadd.f32 %v7428_v51, %v2417_v42  ;;  %v2415_v28 = vadd.f32 %v2186_v30, %v9044_v25  ;;  %7597 = vmatprep.mubr.msk.bf16.mxu0 %vm839_vm2, %v3116_v29 }
 0x1b5   : > { %v7365_v48 = vpop.f32.mrf.mxu1  ;;  %7528 = vmatmul.mubr.msk.bf16.gmra.mxu1 %vm839_vm2, %v3112_v14  ;;  %v2791_v45 = vpop.f32.mrf.mxu0  ;;  %v3118_v14 = vsel %vm3063_vm5, %v3115_v3, %v3117_v9  ;;  %v3120_v2 = vsel %vm3063_vm5, %v3117_v9, %v3119_v12 }
 0x1b6   : > { %v9540_v19 = vadd.f32 %v2778_v56, %v2415_v28  ;;  %v2420_v51 = vadd.f32 %v7365_v48, %v9052_v37  ;;  %7531 = vmatprep.mubr.msk.bf16.mxu1 %vm839_vm2, %v3114_v24 }
 0x1b7   : > { %v2199_v25 = vpop.f32.mrf.mxu1  ;;  %v7432_v40 = vpop.f32.mrf.mxu0 }
 0x1b8   : > { %v9544_v36 = vadd.f32 %v7431_v46, %v2420_v51  ;;  %v2418_v42 = vadd.f32 %v2199_v25, %v9060_v53  ;;  %v9558_v53 = vld [vmem:[%s7957_s7 + $0xf0] sm:$0xff]  }
 0x1b9   : > { %v7366_v30 = vpop.f32.mrf.mxu1  ;;  %v2794_v33 = vpop.f32.mrf.mxu0  ;;  %10835 = vst [vmem:[#allocation112_spill] sm:$0xff] %v9558_v53  ;;  %v3121_v3 = vrot.slane %v9558_v53, 2 }
 0x1ba   : > { %v9549_v56 = vadd.f32 %v2791_v45, %v2418_v42  ;;  %v2421_v37 = vadd.f32 %v7366_v30, %v9066_v35  ;;  %v9563_v45 = vld [vmem:[%s7957_s7 + $0xf8] sm:$0xff]  }
 0x1bb   : > { %v2202_v28 = vpop.f32.mrf.mxu1  ;;  %v7435_v24 = vpop.f32.mrf.mxu0  ;;  %7598 = vmatmul.mubr.msk.bf16.gmra.mxu0 %vm839_vm2, %v3118_v14  ;;  %10836 = vst [vmem:[#allocation113_spill] sm:$0xff] %v9563_v45  ;;  %v3123_v35 = vrot.slane %v9563_v45, 2 }
 0x1bc   : > { %v9553_v48 = vadd.f32 %v7432_v40, %v2421_v37  ;;  %v2419_v46 = vadd.f32 %v2202_v28, %v9073_v10  ;;  %7601 = vmatprep.mubr.msk.bf16.mxu0 %vm839_vm2, %v3120_v2 }
 0x1bd   : > { %v7369_v51 = vpop.f32.mrf.mxu1  ;;  %7532 = vmatmul.mubr.msk.bf16.gmra.mxu1 %vm839_vm2, %v3116_v29  ;;  %v2807_v9 = vpop.f32.mrf.mxu0  ;;  %v3122_v29 = vsel %vm3063_vm5, %v3119_v12, %v3121_v3  ;;  %v3124_v45 = vsel %vm3063_vm5, %v3121_v3, %v3123_v35 }
 0x1be   : > { %v9566_v25 = vadd.f32 %v2794_v33, %v2419_v46  ;;  %v2424_v40 = vadd.f32 %v7369_v51, %v9082_v60  ;;  %7535 = vmatprep.mubr.msk.bf16.mxu1 %vm839_vm2, %v3118_v14 }
 0x1bf   : > { %v2215_v10 = vpop.f32.mrf.mxu1  ;;  %v7436_v42 = vpop.f32.mrf.mxu0 }
 0x1c0   : > { %v9570_v30 = vadd.f32 %v7435_v24, %v2424_v40  ;;  %v2422_v37 = vadd.f32 %v2215_v10, %v9093_v49  ;;  %v9584_v49 = vld [vmem:[%s8302_s15] sm:$0xff]  }
 0x1c1   : > { %v7370_v28 = vpop.f32.mrf.mxu1  ;;  %v2810_v53 = vpop.f32.mrf.mxu0  ;;  %10839 = vst [vmem:[#allocation116_spill] sm:$0xff] %v9584_v49  ;;  %v3125_v12 = vrot.slane %v9584_v49, 2  ;;  %v9598_v49 = vld [vmem:[%s8302_s15 + $0x10] sm:$0xff]  }
 0x1c2   : > { %v9575_v33 = vadd.f32 %v2807_v9, %v2422_v37  ;;  %v2425_v60 = vadd.f32 %v7370_v28, %v9099_v31  ;;  %v7856_v31 = vld [vmem:[%s8302_s15 + $0x8] sm:$0xff]  }
 0x1c3   : > { %v2218_v46 = vpop.f32.mrf.mxu1  ;;  %v7439_v14 = vpop.f32.mrf.mxu0  ;;  %7602 = vmatmul.mubr.msk.bf16.gmra.mxu0 %vm839_vm2, %v3122_v29  ;;  %v3127_v40 = vrot.slane %v7856_v31, 2 }
 0x1c4   : > { %10837 = vst [vmem:[#allocation114_spill] sm:$0xff] %v9575_v33  ;;  %v9579_v51 = vadd.f32 %v7436_v42, %v2425_v60  ;;  %v2423_v24 = vadd.f32 %v2218_v46, %v9107_v50  ;;  %7605 = vmatprep.mubr.msk.bf16.mxu0 %vm839_vm2, %v3124_v45  ;;  %v3126_v46 = vsel %vm3063_vm5, %v3123_v35, %v3125_v12 }
 0x1c5   : > { %v7373_v3 = vpop.f32.mrf.mxu1  ;;  %7536 = vmatmul.mubr.msk.bf16.gmra.mxu1 %vm839_vm2, %v3120_v2  ;;  %v2823_v9 = vpop.f32.mrf.mxu0  ;;  %v3128_v31 = vsel %vm3063_vm5, %v3125_v12, %v3127_v40 }
 0x1c6   : > { %10838 = vst [vmem:[#allocation115_spill] sm:$0xff] %v9579_v51  ;;  %v9589_v10 = vadd.f32 %v2810_v53, %v2423_v24  ;;  %v2428_v42 = vadd.f32 %v7373_v3, %v9115_v61  ;;  %7539 = vmatprep.mubr.msk.bf16.mxu1 %vm839_vm2, %v3122_v29 }
 0x1c7   : > { %v2231_v50 = vpop.f32.mrf.mxu1  ;;  %v7440_v37 = vpop.f32.mrf.mxu0 }
 0x1c8   : > { %10840 = vst [vmem:[#allocation117_spill] sm:$0xff] %v9589_v10  ;;  %v9593_v28 = vadd.f32 %v7439_v14, %v2428_v42  ;;  %v2426_v60 = vadd.f32 %v2231_v50, %v9123_v43  ;;  %v10842_v14 = vld [vmem:[#allocation7_spill] sm:$0xff]  ;;  %v10843_v42 = vld [vmem:[#allocation6_spill] sm:$0xff] }
 0x1c9   : > { %v7374_v2 = vpop.f32.mrf.mxu1  ;;  %v2826_v51 = vpop.f32.mrf.mxu0  ;;  %v3949_v3 = vrot.slane %v10842_v14, 2  ;;  %v3950_v43 = vrot.slane %v10843_v42, 3  ;;  %v10844_v50 = vld [vmem:[#allocation11_spill] sm:$0xff]  ;;  %v4544_v14 = vrot.slane %v9140_v47, 3 }
 0x1ca   : > { %10841 = vst [vmem:[#allocation118_spill] sm:$0xff] %v9593_v28  ;;  %v9601_v53 = vadd.f32 %v2823_v9, %v2426_v60  ;;  %v2429_v61 = vadd.f32 %v7374_v2, %v9129_v8  ;;  %v3952_v35 = vrot.slane %v10844_v50, 2  ;;  %v10845_v28 = vld [vmem:[#allocation9_spill] sm:$0xff]  ;;  %v3586_v8 = vrot.slane %v9598_v49, 2 }
 0x1cb   : > { %v2234_v24 = vpop.f32.mrf.mxu1  ;;  %v7443_v29 = vpop.f32.mrf.mxu0  ;;  %7606 = vmatmul.mubr.msk.bf16.gmra.mxu0 %vm839_vm2, %v3126_v46  ;;  %v3953_v10 = vrot.slane %v10845_v28, 3  ;;  %v4543_v2 = vrot.slane %v9136_v22, 3  ;;  %v10848_v22 = vld [vmem:[#allocation13_spill] sm:$0xff] }
 0x1cc   : > { %v9609_v33 = vadd.f32 %v7440_v37, %v2429_v61  ;;  %v2427_v12 = vadd.f32 %v2234_v24, %v9143_v58  ;;  %7609 = vmatprep.mubr.msk.bf16.mxu0 %vm839_vm2, %v3128_v31  ;;  %v3951_v61 = vor.u32 %v3950_v43, %v3949_v3  ;;  %v3957_v47 = vrot.slane %v10848_v22, 3 }
 0x1cd   : > { %v7377_v9 = vpop.f32.mrf.mxu1  ;;  %7540 = vmatmul.mubr.msk.bf16.gmra.mxu1 %vm839_vm2, %v3124_v45  ;;  %v2839_v60 = vpop.f32.mrf.mxu0  ;;  %v3954_v24 = vor.u32 %v3953_v10, %v3952_v35  ;;  %v10851_v35 = vld [vmem:[#allocation17_spill] sm:$0xff] }
 0x1ce   : > { %10846 = vst [vmem:[#allocation7_spill] sm:$0xff] %v9609_v33  ;;  %v9617_v42 = vadd.f32 %v2826_v51, %v2427_v12  ;;  %v2432_v28 = vadd.f32 %v7377_v9, %v9152_v16  ;;  %7543 = vmatprep.mubr.msk.bf16.mxu1 %vm839_vm2, %v3126_v46  ;;  %v3587_v33 = vsel %vm3063_vm5, %v3127_v40, %v3586_v8  ;;  %v10849_v51 = vld [vmem:[#allocation16_spill] sm:$0xff]  ;;  %v3961_v8 = vrot.slane %v10851_v35, 3 }
 0x1cf   : > { %v2247_v58 = vpop.f32.mrf.mxu1  ;;  %v7444_v37 = vpop.f32.mrf.mxu0  ;;  %v3956_v12 = vrot.slane %v10849_v51, 2  ;;  %v4545_v46 = vsel %vm4542_vm6, %v4543_v2, %v4544_v14  ;;  %v10850_v40 = vld [vmem:[#allocation20_spill] sm:$0xff] }
 0x1d0   : > { %10847 = vst [vmem:[#allocation6_spill] sm:$0xff] %v9617_v42  ;;  %v9621_v50 = vadd.f32 %v7443_v29, %v2432_v28  ;;  %v2430_v45 = vadd.f32 %v2247_v58, %v9157_v26  ;;  %v3955_v26 = vsel %vm3948_vm7, %v3951_v61, %v3954_v24  ;;  %v3960_v43 = vrot.slane %v10850_v40, 2 }
 0x1d1   : > { %v7378_v42 = vpop.f32.mrf.mxu1  ;;  %v2842_v16 = vpop.f32.mrf.mxu0 }
 0x1d2   : > { %v9628_v9 = vadd.f32 %v2839_v60, %v2430_v45  ;;  %v2433_v3 = vadd.f32 %v7378_v42, %v9167_v38  ;;  %v4546_v60 = vrot.slane %v9172_v11, 3  ;;  %v3958_v42 = vor.u32 %v3957_v47, %v3956_v12 }
 0x1d3   : > { %v2250_v10 = vpop.f32.mrf.mxu1  ;;  %v7447_v29 = vpop.f32.mrf.mxu0  ;;  %7610 = vmatmul.mubr.msk.bf16.gmra.mxu0 %vm839_vm2, %v3587_v33  ;;  %v4548_v33 = vrot.slane %v9177_v4, 3 }
 0x1d4   : > { %v9635_v28 = vadd.f32 %v7444_v37, %v2433_v3  ;;  %v2431_v58 = vadd.f32 %v2250_v10, %v9180_v6  ;;  %7681 = vmatprep.mubr.msk.bf16.mxu0 %vm839_vm2, %v4545_v46  ;;  %v3962_v6 = vor.u32 %v3961_v8, %v3960_v43  ;;  %v4547_v46 = vsel %vm4542_vm6, %v4544_v14, %v4546_v60  ;;  %v10854_v14 = vld [vmem:[#allocation29_spill] sm:$0xff] }
 0x1d5   : > { %v7381_v2 = vpop.f32.mrf.mxu1  ;;  %7544 = vmatmul.mubr.msk.bf16.gmra.mxu1 %vm839_vm2, %v3128_v31  ;;  %v2855_v38 = vpop.f32.mrf.mxu0  ;;  %v3959_v47 = vsel %vm3948_vm7, %v3954_v24, %v3958_v42  ;;  %v4549_v4 = vsel %vm4542_vm6, %v4546_v60, %v4548_v33  ;;  %v3968_v35 = vrot.slane %v10854_v14, 2  ;;  %v10855_v8 = vld [vmem:[#allocation25_spill] sm:$0xff] }
 0x1d6   : > { %v9642_v61 = vadd.f32 %v2842_v16, %v2431_v58  ;;  %v2436_v45 = vadd.f32 %v7381_v2, %v9186_v18  ;;  %7615 = vmatprep.mubr.msk.bf16.mxu1 %vm839_vm2, %v3955_v26  ;;  %v10852_v16 = vld [vmem:[#allocation24_spill] sm:$0xff]  ;;  %v10853_v26 = vld [vmem:[#allocation21_spill] sm:$0xff]  ;;  %v3969_v24 = vrot.slane %v10855_v8, 3 }
 0x1d7   : > { %v2263_v37 = vpop.f32.mrf.mxu1  ;;  %v7448_v22 = vpop.f32.mrf.mxu0  ;;  %v3964_v10 = vrot.slane %v10852_v16, 2  ;;  %v3965_v40 = vrot.slane %v10853_v26, 3  ;;  %v10857_v26 = vld [vmem:[#allocation28_spill] sm:$0xff] }
 0x1d8   : > { %v9646_v51 = vadd.f32 %v7447_v29, %v2436_v45  ;;  %v2434_v11 = vadd.f32 %v2263_v37, %v9193_v39  ;;  %v3963_v39 = vsel %vm3948_vm7, %v3958_v42, %v3962_v6  ;;  %v4552_v45 = vrot.slane %v9212_v54, 3 }
 0x1d9   : > { %v7382_v31 = vpop.f32.mrf.mxu1  ;;  %v2858_v3 = vpop.f32.mrf.mxu0 }
 0x1da   : > { %v9652_v12 = vadd.f32 %v2855_v38, %v2434_v11  ;;  %v2437_v18 = vadd.f32 %v7382_v31, %v9201_v21  ;;  %v4550_v21 = vrot.slane %v9206_v59, 3 }
 0x1db   : > { %v2266_v29 = vpop.f32.mrf.mxu1  ;;  %v7451_v43 = vpop.f32.mrf.mxu0  ;;  %7682 = vmatmul.mubr.msk.bf16.vlgmr.msra.gmra.mxu0 %vm839_vm2, %v4547_v46 }
 0x1dc   : > { %v9661_v58 = vadd.f32 %v7448_v22, %v2437_v18  ;;  %v2435_v60 = vadd.f32 %v2266_v29, %v9215_v32  ;;  %7685 = vmatprep.mubr.msk.bf16.mxu0 %vm839_vm2, %v4549_v4  ;;  %v3966_v22 = vor.u32 %v3965_v40, %v3964_v10  ;;  %v3970_v32 = vor.u32 %v3969_v24, %v3968_v35  ;;  %v10859_v35 = vld [vmem:[#allocation33_spill] sm:$0xff] }
 0x1dd   : > { %v7385_v2 = vpop.f32.mrf.mxu1  ;;  %7616 = vmatmul.mubr.msk.bf16.vlgmr.msra.gmra.mxu1 %vm839_vm2, %v3959_v47  ;;  %v2871_v38 = vpop.f32.mrf.mxu0  ;;  %v4551_v4 = vsel %vm4542_vm6, %v4548_v33, %v4550_v21  ;;  %v4553_v54 = vsel %vm4542_vm6, %v4550_v21, %v4552_v45  ;;  %v10858_v33 = vld [vmem:[#allocation37_spill] sm:$0xff]  ;;  %v3977_v8 = vrot.slane %v10859_v35, 3 }
 0x1de   : > { %v9668_v37 = vadd.f32 %v2858_v3, %v2435_v60  ;;  %v2440_v42 = vadd.f32 %v7385_v2, %v9220_v13  ;;  %7619 = vmatprep.mubr.msk.bf16.mxu1 %vm839_vm2, %v3963_v39  ;;  %v10856_v3 = vld [vmem:[#allocation31_spill] sm:$0xff]  ;;  %v3973_v13 = vrot.slane %v10857_v26, 3  ;;  %v3967_v40 = vsel %vm3948_vm7, %v3962_v6, %v3966_v22  ;;  %v10860_v60 = vld [vmem:[#allocation94_spill] sm:$0xff]  ;;  %v10861_v2 = vld [vmem:[#allocation64_spill] sm:$0xff] }
 0x1df   : > { %v2279_v11 = vpop.f32.mrf.mxu1  ;;  %v7452_v46 = vpop.f32.mrf.mxu0  ;;  %v3972_v16 = vrot.slane %v10856_v3, 2  ;;  %v3976_v14 = vrot.slane %v10858_v33, 2 }
 0x1e0   : > { %v9672_v31 = vadd.f32 %v7451_v43, %v2440_v42  ;;  %v2438_v59 = vadd.f32 %v2279_v11, %v9226_v0  ;;  %v3971_v0 = vsel %vm3948_vm7, %v3966_v22, %v3970_v32  ;;  %v10862_v11 = vld [vmem:[#allocation92_spill] sm:$0xff] }
 0x1e1   : > { %v7386_v47 = vpop.f32.mrf.mxu1  ;;  %v2874_v18 = vpop.f32.mrf.mxu0  ;;  %v3974_v42 = vor.u32 %v3973_v13, %v3972_v16  ;;  %v3978_v26 = vor.u32 %v3977_v8, %v3976_v14 }
 0x1e2   : > { %v9679_v29 = vadd.f32 %v2871_v38, %v2438_v59  ;;  %v2441_v10 = vadd.f32 %v7386_v47, %v9231_v17  ;;  %v4554_v17 = vrot.slane %v10861_v2, 3  ;;  %v4556_v59 = vrot.slane %v10862_v11, 3  ;;  %v10869_v11 = vld [vmem:[#allocation45_spill] sm:$0xff] }
 0x1e3   : > { %v2282_v43 = vpop.f32.mrf.mxu1  ;;  %v7455_v39 = vpop.f32.mrf.mxu0  ;;  %7686 = vmatmul.mubr.msk.bf16.gmra.mxu0 %vm839_vm2, %v4551_v4  ;;  %v10863_v4 = vld [vmem:[#allocation96_spill] sm:$0xff]  ;;  %v3975_v16 = vsel %vm3948_vm7, %v3970_v32, %v3974_v42 }
 0x1e4   : > { %v9687_v24 = vadd.f32 %v7452_v46, %v2441_v10  ;;  %v2439_v21 = vadd.f32 %v2282_v43, %v10860_v60  ;;  %7689 = vmatprep.mubr.msk.bf16.mxu0 %vm839_vm2, %v4553_v54  ;;  %v10864_v54 = vld [vmem:[#allocation98_spill] sm:$0xff]  ;;  %v4555_v33 = vsel %vm4542_vm6, %v4552_v45, %v4554_v17  ;;  %v10866_v60 = vld [vmem:[#allocation100_spill] sm:$0xff]  ;;  %v3979_v45 = vsel %vm3948_vm7, %v3974_v42, %v3978_v26 }
 0x1e5   : > { %v7389_v38 = vpop.f32.mrf.mxu1  ;;  %7620 = vmatmul.mubr.msk.bf16.gmra.mxu1 %vm839_vm2, %v3967_v40  ;;  %v2887_v6 = vpop.f32.mrf.mxu0  ;;  %v10876_v42 = vld [vmem:[#allocation104_spill] sm:$0xff] }
 0x1e6   : > { %v9694_v22 = vadd.f32 %v2874_v18, %v2439_v21  ;;  %v2444_v47 = vadd.f32 %v7389_v38, %v10863_v4  ;;  %7623 = vmatprep.mubr.msk.bf16.mxu1 %vm839_vm2, %v3971_v0  ;;  %v4557_v18 = vsel %vm4542_vm6, %v4554_v17, %v4556_v59  ;;  %v10867_v0 = vld [vmem:[#allocation39_spill] sm:$0xff]  ;;  %v10868_v38 = vld [vmem:[#allocation36_spill] sm:$0xff]  ;;  %v3984_v4 = vrot.slane %v10869_v11, 2  ;;  %v10872_v17 = vld [vmem:[#allocation66_spill] sm:$0xff] }
 0x1e7   : > { %v2295_v46 = vpop.f32.mrf.mxu1  ;;  %v7456_v3 = vpop.f32.mrf.mxu0  ;;  %v3980_v2 = vrot.slane %v10867_v0, 2  ;;  %v3981_v14 = vrot.slane %v10868_v38, 3  ;;  %v10874_v0 = vld [vmem:[#allocation102_spill] sm:$0xff] }
 0x1e8   : > { %v9698_v10 = vadd.f32 %v7455_v39, %v2444_v47  ;;  %v2442_v43 = vadd.f32 %v2295_v46, %v10864_v54  ;;  %v10870_v47 = vld [vmem:[#allocation40_spill] sm:$0xff] }
 0x1e9   : > { %v7390_v40 = vpop.f32.mrf.mxu1  ;;  %v2890_v35 = vpop.f32.mrf.mxu0  ;;  %v3985_v32 = vrot.slane %v10870_v47, 3  ;;  %v10873_v54 = vld [vmem:[#allocation68_spill] sm:$0xff] }
 0x1ea   : > { %v9704_v13 = vadd.f32 %v2887_v6, %v2442_v43  ;;  %v2445_v21 = vadd.f32 %v7390_v40, %v10866_v60  ;;  %v4558_v43 = vrot.slane %v10873_v54, 3 }
 0x1eb   : > { %v2298_v39 = vpop.f32.mrf.mxu1  ;;  %v7459_v8 = vpop.f32.mrf.mxu0  ;;  %7690 = vmatmul.mubr.msk.bf16.gmra.mxu0 %vm839_vm2, %v4555_v33  ;;  %v4560_v33 = vrot.slane %v10874_v0, 3 }
 0x1ec   : > { %10865 = vst [vmem:[#allocation11_spill] sm:$0xff] %v9704_v13  ;;  %v9713_v46 = vadd.f32 %v7456_v3, %v2445_v21  ;;  %v2443_v6 = vadd.f32 %v2298_v39, %v10872_v17  ;;  %7693 = vmatprep.mubr.msk.bf16.mxu0 %vm839_vm2, %v4557_v18  ;;  %v3982_v3 = vor.u32 %v3981_v14, %v3980_v2  ;;  %v10878_v18 = vld [vmem:[#allocation65_spill] sm:$0xff]  ;;  %v10882_v2 = vld [vmem:[#allocation67_spill] sm:$0xff] }
 0x1ed   : > { %v7393_v40 = vpop.f32.mrf.mxu1  ;;  %7624 = vmatmul.mubr.msk.bf16.gmra.mxu1 %vm839_vm2, %v3975_v16  ;;  %v2903_v60 = vpop.f32.mrf.mxu0  ;;  %v3986_v39 = vor.u32 %v3985_v32, %v3984_v4  ;;  %v4561_v0 = vsel %vm4542_vm6, %v4558_v43, %v4560_v33  ;;  %v10883_v32 = vld [vmem:[#allocation53_spill] sm:$0xff] }
 0x1ee   : > { %10871 = vst [vmem:[#allocation9_spill] sm:$0xff] %v9713_v46  ;;  %v9720_v38 = vadd.f32 %v2890_v35, %v2443_v6  ;;  %v2448_v11 = vadd.f32 %v7393_v40, %v10876_v42  ;;  %7627 = vmatprep.mubr.msk.bf16.mxu1 %vm839_vm2, %v3979_v45  ;;  %v4559_v46 = vsel %vm4542_vm6, %v4556_v59, %v4558_v43  ;;  %v10879_v35 = vld [vmem:[#allocation47_spill] sm:$0xff] }
 0x1ef   : > { %v2311_v21 = vpop.f32.mrf.mxu1  ;;  %v7460_v47 = vpop.f32.mrf.mxu0  ;;  %v3988_v6 = vrot.slane %v10879_v35, 2  ;;  %v3983_v45 = vsel %vm3948_vm7, %v3978_v26, %v3982_v3  ;;  %v3987_v59 = vsel %vm3948_vm7, %v3982_v3, %v3986_v39  ;;  %v10886_v35 = vld [vmem:[#allocation71_spill] sm:$0xff] }
 0x1f0   : > { %10875 = vst [vmem:[#allocation13_spill] sm:$0xff] %v9720_v38  ;;  %v9724_v17 = vadd.f32 %v7459_v8, %v2448_v11  ;;  %v2446_v54 = vadd.f32 %v2311_v21, %v10878_v18  ;;  %v10880_v38 = vld [vmem:[#allocation44_spill] sm:$0xff]  ;;  %v3992_v11 = vrot.slane %v10883_v32, 2 }
 0x1f1   : > { %v7394_v16 = vpop.f32.mrf.mxu1  ;;  %v2906_v13 = vpop.f32.mrf.mxu0  ;;  %v3989_v40 = vrot.slane %v10880_v38, 3  ;;  %v10884_v21 = vld [vmem:[#allocation48_spill] sm:$0xff] }
 0x1f2   : > { %10877 = vst [vmem:[#allocation16_spill] sm:$0xff] %v9724_v17  ;;  %v9731_v42 = vadd.f32 %v2903_v60, %v2446_v54  ;;  %v2449_v14 = vadd.f32 %v7394_v16, %v10882_v2  ;;  %v3993_v43 = vrot.slane %v10884_v21, 3  ;;  %v10887_v60 = vld [vmem:[#allocation69_spill] sm:$0xff]  ;;  %v10890_v32 = vld [vmem:[#allocation72_spill] sm:$0xff] }
 0x1f3   : > { %v2314_v8 = vpop.f32.mrf.mxu1  ;;  %v7463_v4 = vpop.f32.mrf.mxu0  ;;  %7694 = vmatmul.mubr.msk.bf16.gmra.mxu0 %vm839_vm2, %v4559_v46  ;;  %v4562_v54 = vrot.slane %v10887_v60, 3  ;;  %v3990_v2 = vor.u32 %v3989_v40, %v3988_v6  ;;  %v10888_v46 = vld [vmem:[#allocation70_spill] sm:$0xff] }
 0x1f4   : > { %10881 = vst [vmem:[#allocation20_spill] sm:$0xff] %v9731_v42  ;;  %v9739_v18 = vadd.f32 %v7460_v47, %v2449_v14  ;;  %v2447_v38 = vadd.f32 %v2314_v8, %v10886_v35  ;;  %7697 = vmatprep.mubr.msk.bf16.mxu0 %vm839_vm2, %v4561_v0  ;;  %v4564_v42 = vrot.slane %v10888_v46, 3  ;;  %v3994_v8 = vor.u32 %v3993_v43, %v3992_v11  ;;  %v10892_v0 = vld [vmem:[#allocation73_spill] sm:$0xff] }
 0x1f5   : > { %v7397_v16 = vpop.f32.mrf.mxu1  ;;  %7628 = vmatmul.mubr.msk.bf16.gmra.mxu1 %vm839_vm2, %v3983_v45  ;;  %v2919_v26 = vpop.f32.mrf.mxu0  ;;  %v4563_v60 = vsel %vm4542_vm6, %v4560_v33, %v4562_v54  ;;  %v3991_v6 = vsel %vm3948_vm7, %v3986_v39, %v3990_v2  ;;  %v10897_v43 = vld [vmem:[#allocation61_spill] sm:$0xff] }
 0x1f6   : > { %10885 = vst [vmem:[#allocation17_spill] sm:$0xff] %v9739_v18  ;;  %v9746_v3 = vadd.f32 %v2906_v13, %v2447_v38  ;;  %v2452_v17 = vadd.f32 %v7397_v16, %v10890_v32  ;;  %7631 = vmatprep.mubr.msk.bf16.mxu1 %vm839_vm2, %v3987_v59  ;;  %v4565_v13 = vsel %vm4542_vm6, %v4562_v54, %v4564_v42  ;;  %v10894_v38 = vld [vmem:[#allocation74_spill] sm:$0xff]  ;;  %v10895_v59 = vld [vmem:[#allocation55_spill] sm:$0xff]  ;;  %v10896_v32 = vld [vmem:[#allocation52_spill] sm:$0xff] }
 0x1f7   : > { %v2327_v47 = vpop.f32.mrf.mxu1  ;;  %v7464_v14 = vpop.f32.mrf.mxu0  ;;  %v3996_v46 = vrot.slane %v10895_v59, 2  ;;  %v3997_v11 = vrot.slane %v10896_v32, 3  ;;  %v3995_v33 = vsel %vm3948_vm7, %v3990_v2, %v3994_v8  ;;  %v10900_v54 = vld [vmem:[#allocation77_spill] sm:$0xff]  ;;  %v10902_v32 = vld [vmem:[#allocation76_spill] sm:$0xff]  ;;  %v10904_v2 = vld [vmem:[#allocation78_spill] sm:$0xff] }
 0x1f8   : > { %10889 = vst [vmem:[#allocation24_spill] sm:$0xff] %v9746_v3  ;;  %v9750_v21 = vadd.f32 %v7463_v4, %v2452_v17  ;;  %v2450_v35 = vadd.f32 %v2327_v47, %v10892_v0  ;;  %v4000_v47 = vrot.slane %v10897_v43, 2  ;;  %v10898_v0 = vld [vmem:[#allocation56_spill] sm:$0xff] }
 0x1f9   : > { %v7398_v45 = vpop.f32.mrf.mxu1  ;;  %v2922_v18 = vpop.f32.mrf.mxu0  ;;  %v4001_v39 = vrot.slane %v10898_v0, 3 }
 0x1fa   : > { %10891 = vst [vmem:[#allocation21_spill] sm:$0xff] %v9750_v21  ;;  %v9756_v40 = vadd.f32 %v2919_v26, %v2450_v35  ;;  %v2453_v16 = vadd.f32 %v7398_v45, %v10894_v38  ;;  %v10901_v35 = vld [vmem:[#allocation75_spill] sm:$0xff] }
 0x1fb   : > { %v2330_v17 = vpop.f32.mrf.mxu1  ;;  %v7467_v4 = vpop.f32.mrf.mxu0  ;;  %7698 = vmatmul.mubr.msk.bf16.gmra.mxu0 %vm839_vm2, %v4563_v60  ;;  %v4566_v45 = vrot.slane %v10901_v35, 3  ;;  %v4568_v60 = vrot.slane %v10902_v32, 3 }
 0x1fc   : > { %10893 = vst [vmem:[#allocation29_spill] sm:$0xff] %v9756_v40  ;;  %v9765_v21 = vadd.f32 %v7464_v14, %v2453_v16  ;;  %v2451_v26 = vadd.f32 %v2330_v17, %v10900_v54  ;;  %7701 = vmatprep.mubr.msk.bf16.mxu0 %vm839_vm2, %v4565_v13  ;;  %v3998_v14 = vor.u32 %v3997_v11, %v3996_v46  ;;  %v10906_v13 = vld [vmem:[#allocation79_spill] sm:$0xff]  ;;  %v10910_v46 = vld [vmem:[#allocation80_spill] sm:$0xff] }
 0x1fd   : > { %v7401_v38 = vpop.f32.mrf.mxu1  ;;  %7632 = vmatmul.mubr.msk.bf16.gmra.mxu1 %vm839_vm2, %v3991_v6  ;;  %v2935_v59 = vpop.f32.mrf.mxu0  ;;  %v4002_v17 = vor.u32 %v4001_v39, %v4000_v47  ;;  %v4569_v32 = vsel %vm4542_vm6, %v4566_v45, %v4568_v60  ;;  %v10911_v39 = vld [vmem:[#allocation5_spill] sm:$0xff] }
 0x1fe   : > { %10899 = vst [vmem:[#allocation25_spill] sm:$0xff] %v9765_v21  ;;  %v9772_v40 = vadd.f32 %v2922_v18, %v2451_v26  ;;  %v2456_v43 = vadd.f32 %v7401_v38, %v10904_v2  ;;  %7635 = vmatprep.mubr.msk.bf16.mxu1 %vm839_vm2, %v3995_v33  ;;  %v4567_v21 = vsel %vm4542_vm6, %v4564_v42, %v4566_v45  ;;  %v10907_v18 = vld [vmem:[#allocation3_spill] sm:$0xff] }
 0x1ff   : > { %v2343_v16 = vpop.f32.mrf.mxu1  ;;  %v7468_v0 = vpop.f32.mrf.mxu0  ;;  %v4004_v26 = vrot.slane %v10907_v18, 2  ;;  %v3999_v33 = vsel %vm3948_vm7, %v3994_v8, %v3998_v14  ;;  %v4003_v42 = vsel %vm3948_vm7, %v3998_v14, %v4002_v17  ;;  %v10914_v18 = vld [vmem:[#allocation83_spill] sm:$0xff] }
 0x200   : > { %10903 = vst [vmem:[#allocation31_spill] sm:$0xff] %v9772_v40  ;;  %v9776_v54 = vadd.f32 %v7467_v4, %v2456_v43  ;;  %v2454_v35 = vadd.f32 %v2343_v16, %v10906_v13  ;;  %v10908_v40 = vld [vmem:[#allocation2_spill] sm:$0xff]  ;;  %v4008_v43 = vrot.slane %v10911_v39, 2  ;;  %v10912_v16 = vld [vmem:[#allocation4_spill] sm:$0xff] }
 0x201   : > { %v7402_v6 = vpop.f32.mrf.mxu1  ;;  %v2938_v3 = vpop.f32.mrf.mxu0  ;;  %v4005_v38 = vrot.slane %v10908_v40, 3  ;;  %v4009_v45 = vrot.slane %v10912_v16, 3  ;;  %v10918_v39 = vld [vmem:[#allocation84_spill] sm:$0xff] }
 0x202   : > { %10905 = vst [vmem:[#allocation28_spill] sm:$0xff] %v9776_v54  ;;  %v9783_v2 = vadd.f32 %v2935_v59, %v2454_v35  ;;  %v2457_v11 = vadd.f32 %v7402_v6, %v10910_v46  ;;  %v10915_v59 = vld [vmem:[#allocation81_spill] sm:$0xff] }
 0x203   : > { %v2346_v4 = vpop.f32.mrf.mxu1  ;;  %v7471_v47 = vpop.f32.mrf.mxu0  ;;  %7702 = vmatmul.mubr.msk.bf16.gmra.mxu0 %vm839_vm2, %v4567_v21  ;;  %v4570_v35 = vrot.slane %v10915_v59, 3  ;;  %v4006_v46 = vor.u32 %v4005_v38, %v4004_v26  ;;  %v10916_v21 = vld [vmem:[#allocation82_spill] sm:$0xff] }
 0x204   : > { %10909 = vst [vmem:[#allocation37_spill] sm:$0xff] %v9783_v2  ;;  %v9791_v13 = vadd.f32 %v7468_v0, %v2457_v11  ;;  %v2455_v40 = vadd.f32 %v2346_v4, %v10914_v18  ;;  %7705 = vmatprep.mubr.msk.bf16.mxu0 %vm839_vm2, %v4569_v32  ;;  %v4572_v2 = vrot.slane %v10916_v21, 3  ;;  %v4010_v4 = vor.u32 %v4009_v45, %v4008_v43  ;;  %v10920_v32 = vld [vmem:[#allocation85_spill] sm:$0xff]  ;;  %v10925_v45 = vld [vmem:[#allocation14_spill] sm:$0xff] }
 0x205   : > { %v7405_v6 = vpop.f32.mrf.mxu1  ;;  %7636 = vmatmul.mubr.msk.bf16.gmra.mxu1 %vm839_vm2, %v3999_v33  ;;  %v2951_v8 = vpop.f32.mrf.mxu0  ;;  %v4571_v59 = vsel %vm4542_vm6, %v4568_v60, %v4570_v35  ;;  %v4007_v26 = vsel %vm3948_vm7, %v4002_v17, %v4006_v46 }
 0x206   : > { %10913 = vst [vmem:[#allocation33_spill] sm:$0xff] %v9791_v13  ;;  %v9798_v14 = vadd.f32 %v2938_v3, %v2455_v40  ;;  %v2460_v54 = vadd.f32 %v7405_v6, %v10918_v39  ;;  %7639 = vmatprep.mubr.msk.bf16.mxu1 %vm839_vm2, %v4003_v42  ;;  %v4573_v3 = vsel %vm4542_vm6, %v4570_v35, %v4572_v2  ;;  %v10922_v40 = vld [vmem:[#allocation86_spill] sm:$0xff]  ;;  %v10924_v39 = vld [vmem:[#allocation8_spill] sm:$0xff]  ;;  %v10928_v35 = vld [vmem:[#allocation89_spill] sm:$0xff] }
 0x207   : > { %v2359_v0 = vpop.f32.mrf.mxu1  ;;  %v7472_v11 = vpop.f32.mrf.mxu0  ;;  %v10923_v42 = vld [vmem:[#allocation10_spill] sm:$0xff]  ;;  %v4013_v43 = vrot.slane %v10924_v39, 3  ;;  %v4011_v60 = vsel %vm3948_vm7, %v4006_v46, %v4010_v4  ;;  %v10930_v39 = vld [vmem:[#allocation88_spill] sm:$0xff] }
 0x208   : > { %10917 = vst [vmem:[#allocation94_spill] sm:$0xff] %v9798_v14  ;;  %v9802_v16 = vadd.f32 %v7471_v47, %v2460_v54  ;;  %v2458_v18 = vadd.f32 %v2359_v0, %v10920_v32  ;;  %v4012_v21 = vrot.slane %v10923_v42, 2  ;;  %v4016_v0 = vrot.slane %v10925_v45, 2  ;;  %v10926_v32 = vld [vmem:[#allocation12_spill] sm:$0xff]  ;;  %v10932_v46 = vld [vmem:[#allocation90_spill] sm:$0xff] }
 0x209   : > { %v7406_v33 = vpop.f32.mrf.mxu1  ;;  %v2954_v13 = vpop.f32.mrf.mxu0  ;;  %v4017_v17 = vrot.slane %v10926_v32, 3 }
 0x20a   : > { %10919 = vst [vmem:[#allocation64_spill] sm:$0xff] %v9802_v16  ;;  %v9808_v38 = vadd.f32 %v2951_v8, %v2458_v18  ;;  %v2461_v6 = vadd.f32 %v7406_v33, %v10922_v40  ;;  %v10929_v18 = vld [vmem:[#allocation87_spill] sm:$0xff] }
 0x20b   : > { %v2362_v54 = vpop.f32.mrf.mxu1  ;;  %v7475_v47 = vpop.f32.mrf.mxu0  ;;  %7706 = vmatmul.mubr.msk.bf16.gmra.mxu0 %vm839_vm2, %v4571_v59  ;;  %v4574_v33 = vrot.slane %v10929_v18, 3  ;;  %v4576_v59 = vrot.slane %v10930_v39, 3 }
 0x20c   : > { %10921 = vst [vmem:[#allocation92_spill] sm:$0xff] %v9808_v38  ;;  %v9817_v16 = vadd.f32 %v7472_v11, %v2461_v6  ;;  %v2459_v8 = vadd.f32 %v2362_v54, %v10928_v35  ;;  %7709 = vmatprep.mubr.msk.bf16.mxu0 %vm839_vm2, %v4573_v3  ;;  %v4014_v11 = vor.u32 %v4013_v43, %v4012_v21  ;;  %v10933_v3 = vld [vmem:[#allocation91_spill] sm:$0xff]  ;;  %v10936_v21 = vld [vmem:[#allocation93_spill] sm:$0xff] }
 0x20d   : > { %v7409_v40 = vpop.f32.mrf.mxu1  ;;  %7640 = vmatmul.mubr.msk.bf16.gmra.mxu1 %vm839_vm2, %v4007_v26  ;;  %v2967_v42 = vpop.f32.mrf.mxu0  ;;  %v4018_v54 = vor.u32 %v4017_v17, %v4016_v0  ;;  %v4577_v39 = vsel %vm4542_vm6, %v4574_v33, %v4576_v59  ;;  %v10937_v17 = vld [vmem:[#allocation22_spill] sm:$0xff] }
 0x20e   : > { %10927 = vst [vmem:[#allocation96_spill] sm:$0xff] %v9817_v16  ;;  %v9824_v38 = vadd.f32 %v2954_v13, %v2459_v8  ;;  %v2464_v45 = vadd.f32 %v7409_v40, %v10932_v46  ;;  %7643 = vmatprep.mubr.msk.bf16.mxu1 %vm839_vm2, %v4011_v60  ;;  %v4575_v16 = vsel %vm4542_vm6, %v4572_v2, %v4574_v33  ;;  %v10934_v13 = vld [vmem:[#allocation18_spill] sm:$0xff] }
 0x20f   : > { %v2375_v6 = vpop.f32.mrf.mxu1  ;;  %v7476_v32 = vpop.f32.mrf.mxu0  ;;  %v4020_v8 = vrot.slane %v10934_v13, 2  ;;  %v4015_v60 = vsel %vm3948_vm7, %v4010_v4, %v4014_v11  ;;  %v4019_v2 = vsel %vm3948_vm7, %v4014_v11, %v4018_v54 }
 0x210   : > { %10931 = vst [vmem:[#allocation98_spill] sm:$0xff] %v9824_v38  ;;  %v9828_v35 = vadd.f32 %v7475_v47, %v2464_v45  ;;  %v2462_v18 = vadd.f32 %v2375_v6, %v10933_v3  ;;  %v10935_v38 = vld [vmem:[#allocation15_spill] sm:$0xff]  ;;  %v4024_v45 = vrot.slane %v10937_v17, 2 }
 0x211   : > { %v7410_v26 = vpop.f32.mrf.mxu1  ;;  %v2970_v14 = vpop.f32.mrf.mxu0  ;;  %v4021_v40 = vrot.slane %v10935_v38, 3  ;;  %v10938_v6 = vld [vmem:[#allocation19_spill] sm:$0xff] }
 0x212   : > { %v9835_v46 = vadd.f32 %v2967_v42, %v2462_v18  ;;  %v2465_v43 = vadd.f32 %v7410_v26, %v10936_v21  ;;  %v4025_v33 = vrot.slane %v10938_v6, 3  ;;  %v10940_v42 = vld [vmem:[#allocation95_spill] sm:$0xff] }
 0x213   : > { %v2378_v47 = vpop.f32.mrf.mxu1  ;;  %v7479_v0 = vpop.f32.mrf.mxu0  ;;  %7710 = vmatmul.mubr.msk.bf16.gmra.mxu0 %vm839_vm2, %v4575_v16  ;;  %v4578_v18 = vrot.slane %v10940_v42, 3  ;;  %v4022_v13 = vor.u32 %v4021_v40, %v4020_v8  ;;  %v10941_v16 = vld [vmem:[#allocation97_spill] sm:$0xff] }
 0x214   : > { %v9843_v3 = vadd.f32 %v7476_v32, %v2465_v43  ;;  %v2463_v38 = vadd.f32 %v2378_v47, %v9425_v62  ;;  %7713 = vmatprep.mubr.msk.bf16.mxu0 %vm839_vm2, %v4577_v39  ;;  %v4580_v21 = vrot.slane %v10941_v16, 3  ;;  %v4026_v62 = vor.u32 %v4025_v33, %v4024_v45  ;;  %v10943_v39 = vld [vmem:[#allocation99_spill] sm:$0xff] }
 0x215   : > { %v7413_v26 = vpop.f32.mrf.mxu1  ;;  %7644 = vmatmul.mubr.msk.bf16.gmra.mxu1 %vm839_vm2, %v4015_v60  ;;  %v2983_v4 = vpop.f32.mrf.mxu0  ;;  %v4579_v42 = vsel %vm4542_vm6, %v4576_v59, %v4578_v18  ;;  %v4023_v8 = vsel %vm3948_vm7, %v4018_v54, %v4022_v13  ;;  %v10946_v16 = vld [vmem:[#allocation23_spill] sm:$0xff] }
 0x216   : > { %10939 = vst [vmem:[#allocation100_spill] sm:$0xff] %v9843_v3  ;;  %v9850_v11 = vadd.f32 %v2970_v14, %v2463_v38  ;;  %v2468_v17 = vadd.f32 %v7413_v26, %v9430_v7  ;;  %7647 = vmatprep.mubr.msk.bf16.mxu1 %vm839_vm2, %v4019_v2  ;;  %v4581_v14 = vsel %vm4542_vm6, %v4578_v18, %v4580_v21  ;;  %v10944_v7 = vld [vmem:[#allocation101_spill] sm:$0xff]  ;;  %v10945_v2 = vld [vmem:[#allocation26_spill] sm:$0xff]  ;;  %v4029_v45 = vrot.slane %v10946_v16, 3 }
 0x217   : > { %v2391_v32 = vpop.f32.mrf.mxu1  ;;  %v7480_v43 = vpop.f32.mrf.mxu0  ;;  %v4028_v26 = vrot.slane %v10945_v2, 2  ;;  %v4027_v59 = vsel %vm3948_vm7, %v4022_v13, %v4026_v62  ;;  %v10950_v2 = vld [vmem:[#allocation105_spill] sm:$0xff] }
 0x218   : > { %v9854_v47 = vadd.f32 %v7479_v0, %v2468_v17  ;;  %v2466_v6 = vadd.f32 %v2391_v32, %v10943_v39  ;;  %v10947_v17 = vld [vmem:[#allocation32_spill] sm:$0xff]  ;;  %v10948_v39 = vld [vmem:[#allocation27_spill] sm:$0xff] }
 0x219   : > { %v7414_v60 = vpop.f32.mrf.mxu1  ;;  %v2986_v3 = vpop.f32.mrf.mxu0  ;;  %v4032_v32 = vrot.slane %v10947_v17, 2  ;;  %v4033_v54 = vrot.slane %v10948_v39, 3 }
 0x21a   : > { %10942 = vst [vmem:[#allocation39_spill] sm:$0xff] %v9854_v47  ;;  %v9860_v40 = vadd.f32 %v2983_v4, %v2466_v6  ;;  %v2469_v38 = vadd.f32 %v7414_v60, %v10944_v7  ;;  %v10949_v4 = vld [vmem:[#allocation103_spill] sm:$0xff] }
 0x21b   : > { %v2394_v0 = vpop.f32.mrf.mxu1  ;;  %v7551_v33 = vpop.f32.mrf.mxu0  ;;  %7714 = vmatmul.mubr.msk.bf16.gmra.mxu0 %vm839_vm2, %v4579_v42  ;;  %v4582_v6 = vrot.slane %v10949_v4, 3  ;;  %v4584_v42 = vrot.slane %v10950_v2, 3 }
 0x21c   : > { %v9869_v47 = vadd.f32 %v7480_v43, %v2469_v38  ;;  %v2467_v18 = vadd.f32 %v2394_v0, %v9455_v20  ;;  %7717 = vmatprep.mubr.msk.bf16.mxu0 %vm839_vm2, %v4581_v14  ;;  %v4030_v43 = vor.u32 %v4029_v45, %v4028_v26  ;;  %v4034_v20 = vor.u32 %v4033_v54, %v4032_v32  ;;  %v10955_v54 = vld [vmem:[#allocation35_spill] sm:$0xff] }
 0x21d   : > { %v7485_v60 = vpop.f32.mrf.mxu1  ;;  %7648 = vmatmul.mubr.msk.bf16.gmra.mxu1 %vm839_vm2, %v4023_v8  ;;  %v3628_v7 = vpop.f32.mrf.mxu0  ;;  %v4583_v39 = vsel %vm4542_vm6, %v4580_v21, %v4582_v6  ;;  %v4585_v2 = vsel %vm4542_vm6, %v4582_v6, %v4584_v42  ;;  %v10954_v21 = vld [vmem:[#allocation41_spill] sm:$0xff]  ;;  %v4041_v6 = vrot.slane %v10955_v54, 3 }
 0x21e   : > { %v9876_v16 = vadd.f32 %v2986_v3, %v2467_v18  ;;  %v3523_v13 = vadd.f32 %v7485_v60, %v9460_v34  ;;  %7651 = vmatprep.mubr.msk.bf16.mxu1 %vm839_vm2, %v4027_v59  ;;  %v10952_v3 = vld [vmem:[#allocation34_spill] sm:$0xff]  ;;  %v4031_v45 = vsel %vm3948_vm7, %v4026_v62, %v4030_v43  ;;  %v4040_v32 = vrot.slane %v10954_v21, 2 }
 0x21f   : > { %v3266_v38 = vpop.f32.mrf.mxu1  ;;  %v7552_v17 = vpop.f32.mrf.mxu0  ;;  %v4036_v18 = vrot.slane %v10952_v3, 2 }
 0x220   : > { %10951 = vst [vmem:[#allocation36_spill] sm:$0xff] %v9876_v16  ;;  %v9880_v0 = vadd.f32 %v7551_v33, %v3523_v13  ;;  %v3521_v14 = vadd.f32 %v3266_v38, %v9466_v41  ;;  %v10953_v16 = vld [vmem:[#allocation30_spill] sm:$0xff]  ;;  %v4035_v41 = vsel %vm3948_vm7, %v4030_v43, %v4034_v20 }
 0x221   : > { %v7486_v8 = vpop.f32.mrf.mxu1  ;;  %v3631_v4 = vpop.f32.mrf.mxu0  ;;  %v4037_v34 = vrot.slane %v10953_v16, 3 }
 0x222   : > { %v9887_v60 = vadd.f32 %v3628_v7, %v3521_v14  ;;  %v3524_v26 = vadd.f32 %v7486_v8, %v9471_v23  ;;  %v10956_v7 = vld [vmem:[#allocation107_spill] sm:$0xff] }
 0x223   : > { %v3269_v33 = vpop.f32.mrf.mxu1  ;;  %v7555_v59 = vpop.f32.mrf.mxu0  ;;  %7718 = vmatmul.mubr.msk.bf16.gmra.mxu0 %vm839_vm2, %v4583_v39  ;;  %v4586_v23 = vrot.slane %v10956_v7, 3  ;;  %v4038_v14 = vor.u32 %v4037_v34, %v4036_v18  ;;  %v10957_v39 = vld [vmem:[#allocation108_spill] sm:$0xff]  ;;  %v10959_v7 = vld [vmem:[#allocation38_spill] sm:$0xff] }
 0x224   : > { %v9895_v13 = vadd.f32 %v7552_v17, %v3524_v26  ;;  %v3522_v16 = vadd.f32 %v3269_v33, %v9485_v52  ;;  %7721 = vmatprep.mubr.msk.bf16.mxu0 %vm839_vm2, %v4585_v2  ;;  %v4588_v8 = vrot.slane %v10957_v39, 3  ;;  %v4042_v52 = vor.u32 %v4041_v6, %v4040_v32  ;;  %v10961_v39 = vld [vmem:[#allocation43_spill] sm:$0xff] }
 0x225   : > { %v7489_v38 = vpop.f32.mrf.mxu1  ;;  %7652 = vmatmul.mubr.msk.bf16.gmra.mxu1 %vm839_vm2, %v4031_v45  ;;  %v3644_v62 = vpop.f32.mrf.mxu0  ;;  %v4587_v21 = vsel %vm4542_vm6, %v4584_v42, %v4586_v23  ;;  %v4039_v18 = vsel %vm3948_vm7, %v4034_v20, %v4038_v14  ;;  %v4045_v32 = vrot.slane %v10959_v7, 3  ;;  %v10960_v42 = vld [vmem:[#allocation49_spill] sm:$0xff]  ;;  %v4049_v20 = vrot.slane %v10961_v39, 3 }
 0x226   : > { %v9902_v43 = vadd.f32 %v3631_v4, %v3522_v16  ;;  %v3527_v3 = vadd.f32 %v7489_v38, %v9490_v15  ;;  %7655 = vmatprep.mubr.msk.bf16.mxu1 %vm839_vm2, %v4035_v41  ;;  %v4589_v4 = vsel %vm4542_vm6, %v4586_v23, %v4588_v8  ;;  %v10958_v41 = vld [vmem:[#allocation42_spill] sm:$0xff]  ;;  %v4048_v38 = vrot.slane %v10960_v42, 2 }
 0x227   : > { %v3282_v17 = vpop.f32.mrf.mxu1  ;;  %v7556_v26 = vpop.f32.mrf.mxu0  ;;  %v4044_v16 = vrot.slane %v10958_v41, 2 }
 0x228   : > { %v9906_v33 = vadd.f32 %v7555_v59, %v3527_v3  ;;  %v3525_v2 = vadd.f32 %v3282_v17, %v9496_v1  ;;  %v4043_v1 = vsel %vm3948_vm7, %v4038_v14, %v4042_v52 }
 0x229   : > { %v7490_v45 = vpop.f32.mrf.mxu1  ;;  %v3647_v54 = vpop.f32.mrf.mxu0 }
 0x22a   : > { %v9912_v34 = vadd.f32 %v3644_v62, %v3525_v2  ;;  %v3528_v15 = vadd.f32 %v7490_v45, %v9501_v55  ;;  %v10962_v55 = vld [vmem:[#allocation109_spill] sm:$0xff] }
 0x22b   : > { %v3285_v59 = vpop.f32.mrf.mxu1  ;;  %v7559_v6 = vpop.f32.mrf.mxu0  ;;  %7722 = vmatmul.mubr.msk.bf16.gmra.mxu0 %vm839_vm2, %v4587_v21  ;;  %v4590_v62 = vrot.slane %v10962_v55, 3  ;;  %v4592_v21 = vrot.slane %v9511_v57, 3 }
 0x22c   : > { %v9921_v3 = vadd.f32 %v7556_v26, %v3528_v15  ;;  %v3526_v23 = vadd.f32 %v3285_v59, %v9514_v27  ;;  %7725 = vmatprep.mubr.msk.bf16.mxu0 %vm839_vm2, %v4589_v4  ;;  %v4046_v26 = vor.u32 %v4045_v32, %v4044_v16  ;;  %v4050_v27 = vor.u32 %v4049_v20, %v4048_v38  ;;  %v10966_v20 = vld [vmem:[#allocation51_spill] sm:$0xff] }
 0x22d   : > { %v7493_v17 = vpop.f32.mrf.mxu1  ;;  %7656 = vmatmul.mubr.msk.bf16.gmra.mxu1 %vm839_vm2, %v4039_v18  ;;  %v3660_v2 = vpop.f32.mrf.mxu0  ;;  %v4591_v59 = vsel %vm4542_vm6, %v4588_v8, %v4590_v62  ;;  %v4593_v57 = vsel %vm4542_vm6, %v4590_v62, %v4592_v21  ;;  %v10965_v8 = vld [vmem:[#allocation57_spill] sm:$0xff]  ;;  %v4057_v62 = vrot.slane %v10966_v20, 3 }
 0x22e   : > { %v9928_v45 = vadd.f32 %v3647_v54, %v3526_v23  ;;  %v3531_v14 = vadd.f32 %v7493_v17, %v9518_v63  ;;  %7659 = vmatprep.mubr.msk.bf16.mxu1 %vm839_vm2, %v4043_v1  ;;  %v10963_v54 = vld [vmem:[#allocation50_spill] sm:$0xff]  ;;  %v4047_v32 = vsel %vm3948_vm7, %v4042_v52, %v4046_v26  ;;  %v4056_v38 = vrot.slane %v10965_v8, 2 }
 0x22f   : > { %v3298_v15 = vpop.f32.mrf.mxu1  ;;  %v7560_v41 = vpop.f32.mrf.mxu0  ;;  %v4052_v39 = vrot.slane %v10963_v54, 2  ;;  %v10964_v23 = vld [vmem:[#allocation46_spill] sm:$0xff] }
 0x230   : > { %v9932_v7 = vadd.f32 %v7559_v6, %v3531_v14  ;;  %v3529_v4 = vadd.f32 %v3298_v15, %v9523_v44  ;;  %v4053_v63 = vrot.slane %v10964_v23, 3  ;;  %v4051_v44 = vsel %vm3948_vm7, %v4046_v26, %v4050_v27 }
 0x231   : > { %v7494_v18 = vpop.f32.mrf.mxu1  ;;  %v3663_v42 = vpop.f32.mrf.mxu0 }
 0x232   : > { %v9939_v55 = vadd.f32 %v3660_v2, %v3529_v4  ;;  %v3532_v16 = vadd.f32 %v7494_v18, %v9527_v5  ;;  %v10967_v2 = vld [vmem:[#allocation110_spill] sm:$0xff]  ;;  %v4054_v4 = vor.u32 %v4053_v63, %v4052_v39 }
 0x233   : > { %v3301_v6 = vpop.f32.mrf.mxu1  ;;  %v7563_v1 = vpop.f32.mrf.mxu0  ;;  %7726 = vmatmul.mubr.msk.bf16.gmra.mxu0 %vm839_vm2, %v4591_v59  ;;  %v4594_v5 = vrot.slane %v10967_v2, 3  ;;  %v10968_v59 = vld [vmem:[#allocation111_spill] sm:$0xff] }
 0x234   : > { %v9947_v17 = vadd.f32 %v7560_v41, %v3532_v16  ;;  %v3530_v14 = vadd.f32 %v3301_v6, %v9540_v19  ;;  %7729 = vmatprep.mubr.msk.bf16.mxu0 %vm839_vm2, %v4593_v57  ;;  %v4596_v18 = vrot.slane %v10968_v59, 3  ;;  %v4058_v19 = vor.u32 %v4057_v62, %v4056_v38 }
 0x235   : > { %v7497_v15 = vpop.f32.mrf.mxu1  ;;  %7660 = vmatmul.mubr.msk.bf16.gmra.mxu1 %vm839_vm2, %v4047_v32  ;;  %v3676_v52 = vpop.f32.mrf.mxu0  ;;  %v4595_v6 = vsel %vm4542_vm6, %v4592_v21, %v4594_v5  ;;  %v4055_v39 = vsel %vm3948_vm7, %v4050_v27, %v4054_v4  ;;  %v10971_v21 = vld [vmem:[#allocation62_spill] sm:$0xff] }
 0x236   : > { %v9954_v26 = vadd.f32 %v3663_v42, %v3530_v14  ;;  %v3535_v54 = vadd.f32 %v7497_v15, %v9544_v36  ;;  %7663 = vmatprep.mubr.msk.bf16.mxu1 %vm839_vm2, %v4051_v44  ;;  %v4597_v42 = vsel %vm4542_vm6, %v4594_v5, %v4596_v18  ;;  %v10969_v44 = vld [vmem:[#allocation58_spill] sm:$0xff]  ;;  %v4064_v2 = vrot.slane %v10971_v21, 2  ;;  %v10972_v15 = vld [vmem:[#allocation59_spill] sm:$0xff] }
 0x237   : > { %v3314_v41 = vpop.f32.mrf.mxu1  ;;  %v7564_v23 = vpop.f32.mrf.mxu0  ;;  %v4060_v20 = vrot.slane %v10969_v44, 2  ;;  %v10970_v14 = vld [vmem:[#allocation54_spill] sm:$0xff]  ;;  %v4065_v27 = vrot.slane %v10972_v15, 3 }
 0x238   : > { %v9958_v16 = vadd.f32 %v7563_v1, %v3535_v54  ;;  %v3533_v57 = vadd.f32 %v3314_v41, %v9549_v56  ;;  %v4061_v38 = vrot.slane %v10970_v14, 3  ;;  %v4059_v56 = vsel %vm3948_vm7, %v4054_v4, %v4058_v19 }
 0x239   : > { %v7498_v32 = vpop.f32.mrf.mxu1  ;;  %v3679_v8 = vpop.f32.mrf.mxu0 }
 0x23a   : > { %v9964_v63 = vadd.f32 %v3676_v52, %v3533_v57  ;;  %v3536_v36 = vadd.f32 %v7498_v32, %v9553_v48  ;;  %v10973_v48 = vld [vmem:[#allocation112_spill] sm:$0xff]  ;;  %v10974_v57 = vld [vmem:[#allocation113_spill] sm:$0xff] }
 0x23b   : > { %v3317_v1 = vpop.f32.mrf.mxu1  ;;  %v7567_v62 = vpop.f32.mrf.mxu0  ;;  %7730 = vmatmul.mubr.msk.bf16.gmra.mxu0 %vm839_vm2, %v4595_v6  ;;  %v4598_v52 = vrot.slane %v10973_v48, 3  ;;  %v4600_v6 = vrot.slane %v10974_v57, 3 }
 0x23c   : > { %v9973_v59 = vadd.f32 %v7564_v23, %v3536_v36  ;;  %v3534_v5 = vadd.f32 %v3317_v1, %v9566_v25  ;;  %7733 = vmatprep.mubr.msk.bf16.mxu0 %vm839_vm2, %v4597_v42  ;;  %v4062_v23 = vor.u32 %v4061_v38, %v4060_v20  ;;  %v4066_v25 = vor.u32 %v4065_v27, %v4064_v2  ;;  %v10976_v42 = vld [vmem:[#allocation114_spill] sm:$0xff]  ;;  %v10981_v20 = vld [vmem:[#allocation115_spill] sm:$0xff] }
 0x23d   : > { %v7501_v54 = vpop.f32.mrf.mxu1  ;;  %7664 = vmatmul.mubr.msk.bf16.gmra.mxu1 %vm839_vm2, %v4055_v39  ;;  %v3692_v41 = vpop.f32.mrf.mxu0  ;;  %v4599_v21 = vsel %vm4542_vm6, %v4596_v18, %v4598_v52  ;;  %v4601_v48 = vsel %vm4542_vm6, %v4598_v52, %v4600_v6 }
 0x23e   : > { %v9980_v32 = vadd.f32 %v3679_v8, %v3534_v5  ;;  %v3539_v4 = vadd.f32 %v7501_v54, %v9570_v30  ;;  %7667 = vmatprep.mubr.msk.bf16.mxu1 %vm839_vm2, %v4059_v56  ;;  %v10977_v8 = vld [vmem:[#allocation60_spill] sm:$0xff]  ;;  %v10979_v30 = vld [vmem:[#allocation63_spill] sm:$0xff]  ;;  %v4067_v18 = vsel %vm3948_vm7, %v4062_v23, %v4066_v25 }
 0x23f   : > { %v3330_v36 = vpop.f32.mrf.mxu1  ;;  %v7568_v44 = vpop.f32.mrf.mxu0  ;;  %v10978_v5 = vshrl.u32 %v10977_v8, 16  ;;  %v4069_v54 = vrot.slane %v10979_v30, 3 }
 0x240   : > { %v9984_v14 = vadd.f32 %v7567_v62, %v3539_v4  ;;  %v3537_v1 = vadd.f32 %v3330_v36, %v10976_v42  ;;  %v4063_v62 = vsel %vm3948_vm7, %v4058_v19, %v4062_v23  ;;  %v10982_v4 = vld [vmem:[#allocation106_spill] sm:$0xff]  ;;  %v7857_v23 = vld [vmem:[%s8302_s15 + $0x8] sm:$0xff]  }
 0x241   : > { %v7502_v39 = vpop.f32.mrf.mxu1  ;;  %v3695_v15 = vpop.f32.mrf.mxu0  ;;  %v4068_v57 = vrot.slane %v10978_v5, 2  ;;  %v10983_v52 = vshrl.u32 %v10982_v4, 16  ;;  %v10984_v42 = vshll.u32 %v10982_v4, 16 }
 0x242   : > { %10975 = vst [vmem:[#allocation45_spill] sm:$0xff] %v9984_v14  ;;  %v9992_v56 = vadd.f32 %v3692_v41, %v3537_v1  ;;  %v3540_v38 = vadd.f32 %v7502_v39, %v10981_v20  ;;  %v10985_v41 = vld [vmem:[#allocation117_spill] sm:$0xff]  ;;  %v10986_v39 = vld [vmem:[#allocation116_spill] sm:$0xff] }
 0x243   : > { %v3333_v2 = vpop.f32.mrf.mxu1  ;;  %v7571_v27 = vpop.f32.mrf.mxu0  ;;  %7734 = vmatmul.mubr.msk.bf16.gmra.mxu0 %vm839_vm2, %v4599_v21  ;;  %v4072_v36 = vrot.slane %v10983_v52, 2  ;;  %v4073_v8 = vrot.slane %v10984_v42, 3  ;;  %v4602_v19 = vrot.slane %v10986_v39, 3  ;;  %v4070_v20 = vor.u32 %v4069_v54, %v4068_v57  ;;  %v10987_v52 = vld [vmem:[#allocation118_spill] sm:$0xff] }
 0x244   : > { %10980 = vst [vmem:[#allocation40_spill] sm:$0xff] %v9992_v56  ;;  %v10002_v5 = vadd.f32 %v7568_v44, %v3540_v38  ;;  %v3538_v1 = vadd.f32 %v3333_v2, %v10985_v41  ;;  %7737 = vmatprep.mubr.msk.bf16.mxu0 %vm839_vm2, %v4601_v48  ;;  %v4604_v56 = vrot.slane %v7857_v23, 3  ;;  %v4077_v44 = vshrl.u32 %v9598_v49, 16 }
 0x245   : > { %v7505_v30 = vpop.f32.mrf.mxu1  ;;  %7668 = vmatmul.mubr.msk.bf16.gmra.mxu1 %vm839_vm2, %v4063_v62  ;;  %v3708_v21 = vpop.f32.mrf.mxu0  ;;  %v4080_v38 = vshll.u32 %v9598_v49, 16  ;;  %v4074_v42 = vor.u32 %v4073_v8, %v4072_v36  ;;  %v4603_v57 = vsel %vm4542_vm6, %v4600_v6, %v4602_v19  ;;  %v10989_v8 = vld [vmem:[#allocation6_spill] sm:$0xff] }
 0x246   : > { %v10009_v14 = vadd.f32 %v3695_v15, %v3538_v1  ;;  %v3543_v4 = vadd.f32 %v7505_v30, %v10987_v52  ;;  %7671 = vmatprep.mubr.msk.bf16.mxu1 %vm839_vm2, %v4067_v18  ;;  %v4071_v1 = vsel %vm3948_vm7, %v4066_v25, %v4070_v20  ;;  %v4605_v18 = vsel %vm4542_vm6, %v4602_v19, %v4604_v56  ;;  %v10988_v30 = vld [vmem:[#allocation7_spill] sm:$0xff]  ;;  %v7858_v25 = vld [vmem:[%s8302_s15 + $0x10] sm:$0xff]  }
 0x247   : > { %v3346_v48 = vpop.f32.mrf.mxu1  ;;  %v7572_v2 = vpop.f32.mrf.mxu0  ;;  %v4079_v23 = vrot.slane %v4077_v44, 2  ;;  %v4082_v52 = vrot.slane %v4080_v38, 3  ;;  %v4606_v19 = vrot.slane %v7858_v25, 3 }
 0x248   : > { %v10015_v41 = vadd.f32 %v7571_v27, %v3543_v4  ;;  %v3541_v62 = vadd.f32 %v3346_v48, %v9601_v53  ;;  %v4075_v53 = vsel %vm3948_vm7, %v4070_v20, %v4074_v42 }
 0x249   : > { %v7506_v15 = vpop.f32.mrf.mxu1  ;;  %v3711_v54 = vpop.f32.mrf.mxu0 }
 0x24a   : > { %v10021_v39 = vadd.f32 %v3708_v21, %v3541_v62  ;;  %v3544_v49 = vadd.f32 %v7506_v15, %v10988_v30  ;;  %v4083_v62 = vor.u32 %v4082_v52, %v4079_v23 }
 0x24b   : > { %v3349_v36 = vpop.f32.mrf.mxu1  ;;  %v7575_v27 = vpop.f32.mrf.mxu0  ;;  %7738 = vmatmul.mubr.msk.bf16.gmra.mxu0 %vm839_vm2, %v4603_v57 }
 0x24c   : > { %v10026_v6 = vadd.f32 %v7572_v2, %v3544_v49  ;;  %v3542_v4 = vadd.f32 %v3349_v36, %v10989_v8  ;;  %7741 = vmatprep.mubr.msk.bf16.mxu0 %vm839_vm2, %v4605_v18  ;;  %v4607_v18 = vsel %vm4542_vm6, %v4604_v56, %v4606_v19 }
 0x24d   : > { %v7509_v21 = vpop.f32.mrf.mxu1  ;;  %7672 = vmatmul.mubr.msk.bf16.gmra.mxu1 %vm839_vm2, %v4071_v1  ;;  %v3724_v48 = vpop.f32.mrf.mxu0  ;;  %v4084_v1 = vsel %vm3948_vm7, %v4074_v42, %v4083_v62 }
 0x24e   : > { %v10032_v44 = vadd.f32 %v3711_v54, %v3542_v4  ;;  %v3547_v38 = vadd.f32 %v7509_v21, %v9621_v50  ;;  %7675 = vmatprep.mubr.msk.bf16.mxu1 %vm839_vm2, %v4075_v53 }
 0x24f   : > { %v3362_v20 = vpop.f32.mrf.mxu1  ;;  %v7576_v2 = vpop.f32.mrf.mxu0 }
 0x250   : > { %v10036_v57 = vadd.f32 %v7575_v27, %v3547_v38  ;;  %v3545_v15 = vadd.f32 %v3362_v20, %v9628_v9 }
 0x251   : > { %v7510_v30 = vpop.f32.mrf.mxu1  ;;  %v3727_v49 = vpop.f32.mrf.mxu0 }
 0x252   : > { %v10040_v36 = vadd.f32 %v3724_v48, %v3545_v15  ;;  %v3548_v54 = vadd.f32 %v7510_v30, %v9635_v28 }
 0x253   : > { %v3365_v50 = vpop.f32.mrf.mxu1  ;;  %v7579_v8 = vpop.f32.mrf.mxu0  ;;  %7742 = vmatmul.mubr.msk.bf16.gmra.mxu0 %vm839_vm2, %v4607_v18 }
 0x254   : > { %10990 = vst [vmem:[#allocation66_spill] sm:$0xff] %v10040_v36  ;;  %v10045_v23 = vadd.f32 %v7576_v2, %v3548_v54  ;;  %v3546_v52 = vadd.f32 %v3365_v50, %v9642_v61 }
 0x255   : > { %v7513_v27 = vpop.f32.mrf.mxu1  ;;  %7676 = vmatmul.mubr.msk.bf16.gmra.mxu1 %vm839_vm2, %v4084_v1  ;;  %v3740_v9 = vpop.f32.mrf.mxu0 }
 0x256   : > { %10991 = vst [vmem:[#allocation68_spill] sm:$0xff] %v10045_v23  ;;  %v10049_v56 = vadd.f32 %v3727_v49, %v3546_v52  ;;  %v3551_v53 = vadd.f32 %v7513_v27, %v9646_v51 }
 0x257   : > { %v3378_v4 = vpop.f32.mrf.mxu1  ;;  %v7580_v28 = vpop.f32.mrf.mxu0 }
 0x258   : > { %10992 = vst [vmem:[#allocation102_spill] sm:$0xff] %v10049_v56  ;;  %v10052_v25 = vadd.f32 %v7579_v8, %v3551_v53  ;;  %v3549_v42 = vadd.f32 %v3378_v4, %v9652_v12  ;;  %v10072_v53 = vpop.permute.xlu1 %5136 }
 0x259   : > { %v7514_v19 = vpop.f32.mrf.mxu1  ;;  %v3743_v21 = vpop.f32.mrf.mxu0 }
 0x25a   : > { %10993 = vst [vmem:[#allocation104_spill] sm:$0xff] %v10052_v25  ;;  %v10055_v48 = vadd.f32 %v3740_v9, %v3549_v42  ;;  %v3552_v61 = vadd.f32 %v7514_v19, %v9661_v58  ;;  %v10070_v9 = vpop.permute.xlu0 %5126 }
 0x25b   : > { %v3381_v38 = vpop.f32.mrf.mxu1  ;;  %v7583_v62 = vpop.f32.mrf.mxu0 }
 0x25c   : > { %10994 = vst [vmem:[#allocation65_spill] sm:$0xff] %v10055_v48  ;;  %v10058_v20 = vadd.f32 %v7580_v28, %v3552_v61  ;;  %v3550_v2 = vadd.f32 %v3381_v38, %v9668_v37 }
 0x25d   : > { %v7517_v15 = vpop.f32.mrf.mxu1  ;;  %v3756_v51 = vpop.f32.mrf.mxu0 }
 0x25e   : > { %10995 = vst [vmem:[#allocation47_spill] sm:$0xff] %v10058_v20  ;;  %v10061_v18 = vadd.f32 %v3743_v21, %v3550_v2  ;;  %v3555_v30 = vadd.f32 %v7517_v15, %v9672_v31 }
 0x25f   : > { %v3394_v49 = vpop.f32.mrf.mxu1  ;;  %v7584_v12 = vpop.f32.mrf.mxu0 }
 0x260   : > { %10996 = vst [vmem:[#allocation44_spill] sm:$0xff] %v10061_v18  ;;  %v10064_v54 = vadd.f32 %v7583_v62, %v3555_v30  ;;  %v3553_v1 = vadd.f32 %v3394_v49, %v9679_v29  ;;  %v10085_v30 = vpop.permute.xlu1 %5141 }
 0x261   : > { %v7518_v50 = vpop.f32.mrf.mxu1  ;;  %v3759_v58 = vpop.f32.mrf.mxu0 }
 0x262   : > { %10997 = vst [vmem:[#allocation67_spill] sm:$0xff] %v10064_v54  ;;  %v10067_v8 = vadd.f32 %v3756_v51, %v3553_v1  ;;  %v3556_v52 = vadd.f32 %v7518_v50, %v9687_v24  ;;  %v11002_v24 = vld [vmem:[#allocation11_spill] sm:$0xff]  ;;  %v10083_v51 = vpop.permute.xlu0 %5131 }
 0x263   : > { %v3397_v27 = vpop.f32.mrf.mxu1  ;;  %v7587_v37 = vpop.f32.mrf.mxu0 }
 0x264   : > { %10998 = vst [vmem:[#allocation53_spill] sm:$0xff] %v10067_v8  ;;  %v10074_v4 = vadd.f32 %v7584_v12, %v3556_v52  ;;  %v3554_v31 = vadd.f32 %v3397_v27, %v9694_v22  ;;  %v11004_v22 = vld [vmem:[#allocation9_spill] sm:$0xff] }
 0x265   : > { %v7521_v28 = vpop.f32.mrf.mxu1  ;;  %v3772_v42 = vpop.f32.mrf.mxu0 }
 0x266   : > { %10999 = vst [vmem:[#allocation48_spill] sm:$0xff] %v10074_v4  ;;  %v10077_v19 = vadd.f32 %v3759_v58, %v3554_v31  ;;  %v3559_v29 = vadd.f32 %v7521_v28, %v9698_v10  ;;  %v11006_v10 = vld [vmem:[#allocation13_spill] sm:$0xff]  ;;  %v11008_v28 = vld [vmem:[#allocation16_spill] sm:$0xff] }
 0x267   : > { %v3410_v21 = vpop.f32.mrf.mxu1  ;;  %v7588_v61 = vpop.f32.mrf.mxu0 }
 0x268   : > { %11000 = vst [vmem:[#allocation71_spill] sm:$0xff] %v10077_v19  ;;  %v10080_v38 = vadd.f32 %v7587_v37, %v3559_v29  ;;  %v3557_v62 = vadd.f32 %v3410_v21, %v11002_v24 }
 0x269   : > { %v7522_v2 = vpop.f32.mrf.mxu1  ;;  %v3775_v15 = vpop.f32.mrf.mxu0 }
 0x26a   : > { %11001 = vst [vmem:[#allocation69_spill] sm:$0xff] %v10080_v38  ;;  %v10087_v49 = vadd.f32 %v3772_v42, %v3557_v62  ;;  %v3560_v12 = vadd.f32 %v7522_v2, %v11004_v22  ;;  %v10096_v38 = vpop.permute.xlu0 %5146  ;;  %v10098_v42 = vpop.permute.xlu1 %5151  ;;  %v11010_v2 = vld [vmem:[#allocation20_spill] sm:$0xff] }
 0x26b   : > { %v3413_v1 = vpop.f32.mrf.mxu1  ;;  %v7591_v50 = vpop.f32.mrf.mxu0 }
 0x26c   : > { %11003 = vst [vmem:[#allocation70_spill] sm:$0xff] %v10087_v49  ;;  %v10090_v58 = vadd.f32 %v7588_v61, %v3560_v12  ;;  %v3558_v52 = vadd.f32 %v3413_v1, %v11006_v10  ;;  %v11012_v1 = vld [vmem:[#allocation17_spill] sm:$0xff] }
 0x26d   : > { %v7525_v27 = vpop.f32.mrf.mxu1  ;;  %v3788_v37 = vpop.f32.mrf.mxu0 }
 0x26e   : > { %11005 = vst [vmem:[#allocation72_spill] sm:$0xff] %v10090_v58  ;;  %v10093_v31 = vadd.f32 %v3775_v15, %v3558_v52  ;;  %v3563_v29 = vadd.f32 %v7525_v27, %v11008_v28  ;;  %v11014_v27 = vld [vmem:[#allocation24_spill] sm:$0xff]  ;;  %v10109_v4 = vpop.permute.xlu0 %5156 }
 0x26f   : > { %v3426_v21 = vpop.f32.mrf.mxu1  ;;  %v7592_v24 = vpop.f32.mrf.mxu0 }
 0x270   : > { %11007 = vst [vmem:[#allocation73_spill] sm:$0xff] %v10093_v31  ;;  %v10100_v62 = vadd.f32 %v7591_v50, %v3563_v29  ;;  %v3561_v22 = vadd.f32 %v3426_v21, %v11010_v2  ;;  %v10111_v50 = vpop.permute.xlu1 %5161  ;;  %v11016_v21 = vld [vmem:[#allocation21_spill] sm:$0xff] }
 0x271   : > { %v7526_v61 = vpop.f32.mrf.mxu1  ;;  %v3791_v12 = vpop.f32.mrf.mxu0 }
 0x272   : > { %11009 = vst [vmem:[#allocation74_spill] sm:$0xff] %v10100_v62  ;;  %v10103_v58 = vadd.f32 %v3788_v37, %v3561_v22  ;;  %v3564_v10 = vadd.f32 %v7526_v61, %v11012_v1  ;;  %v11018_v61 = vld [vmem:[#allocation29_spill] sm:$0xff]  ;;  %v10122_v54 = vpop.permute.xlu0 %5166 }
 0x273   : > { %v3429_v15 = vpop.f32.mrf.mxu1  ;;  %v7595_v52 = vpop.f32.mrf.mxu0 }
 0x274   : > { %11011 = vst [vmem:[#allocation55_spill] sm:$0xff] %v10103_v58  ;;  %v10106_v31 = vadd.f32 %v7592_v24, %v3564_v10  ;;  %v3562_v28 = vadd.f32 %v3429_v15, %v11014_v27  ;;  %v11020_v15 = vld [vmem:[#allocation25_spill] sm:$0xff] }
 0x275   : > { %v7529_v49 = vpop.f32.mrf.mxu1  ;;  %v3804_v19 = vpop.f32.mrf.mxu0 }
 0x276   : > { %11013 = vst [vmem:[#allocation52_spill] sm:$0xff] %v10106_v31  ;;  %v10113_v29 = vadd.f32 %v3791_v12, %v3562_v28  ;;  %v3567_v2 = vadd.f32 %v7529_v49, %v11016_v21  ;;  %v10124_v12 = vpop.permute.xlu1 %5171  ;;  %v11022_v49 = vld [vmem:[#allocation31_spill] sm:$0xff]  ;;  %v10135_v20 = vpop.permute.xlu0 %5176 }
 0x277   : > { %v3442_v37 = vpop.f32.mrf.mxu1  ;;  %v7596_v22 = vpop.f32.mrf.mxu0 }
 0x278   : > { %11015 = vst [vmem:[#allocation61_spill] sm:$0xff] %v10113_v29  ;;  %v10116_v58 = vadd.f32 %v7595_v52, %v3567_v2  ;;  %v3565_v1 = vadd.f32 %v3442_v37, %v11018_v61  ;;  %v11024_v37 = vld [vmem:[#allocation28_spill] sm:$0xff] }
 0x279   : > { %v7530_v24 = vpop.f32.mrf.mxu1  ;;  %v3807_v10 = vpop.f32.mrf.mxu0 }
 0x27a   : > { %11017 = vst [vmem:[#allocation56_spill] sm:$0xff] %v10116_v58  ;;  %v10119_v31 = vadd.f32 %v3804_v19, %v3565_v1  ;;  %v3568_v27 = vadd.f32 %v7530_v24, %v11020_v15  ;;  %v11026_v24 = vld [vmem:[#allocation37_spill] sm:$0xff]  ;;  %v10148_v25 = vpop.permute.xlu0 %5186 }
 0x27b   : > { %v3445_v62 = vpop.f32.mrf.mxu1  ;;  %v7599_v8 = vpop.f32.mrf.mxu0 }
 0x27c   : > { %11019 = vst [vmem:[#allocation77_spill] sm:$0xff] %v10119_v31  ;;  %v10126_v28 = vadd.f32 %v7596_v22, %v3568_v27  ;;  %v3566_v21 = vadd.f32 %v3445_v62, %v11022_v49  ;;  %v10137_v22 = vpop.permute.xlu1 %5181  ;;  %v11028_v62 = vld [vmem:[#allocation33_spill] sm:$0xff] }
 0x27d   : > { %v7533_v52 = vpop.f32.mrf.mxu1  ;;  %v3820_v2 = vpop.f32.mrf.mxu0 }
 0x27e   : > { %11021 = vst [vmem:[#allocation75_spill] sm:$0xff] %v10126_v28  ;;  %v10129_v58 = vadd.f32 %v3807_v10, %v3566_v21  ;;  %v3571_v61 = vadd.f32 %v7533_v52, %v11024_v37  ;;  %v11030_v52 = vld [vmem:[#allocation94_spill] sm:$0xff]  ;;  %v10161_v23 = vpop.permute.xlu0 %5196 }
 0x27f   : > { %v3458_v19 = vpop.f32.mrf.mxu1  ;;  %v7600_v1 = vpop.f32.mrf.mxu0 }
 0x280   : > { %11023 = vst [vmem:[#allocation76_spill] sm:$0xff] %v10129_v58  ;;  %v10132_v31 = vadd.f32 %v7599_v8, %v3571_v61  ;;  %v3569_v15 = vadd.f32 %v3458_v19, %v11026_v24  ;;  %v11032_v19 = vld [vmem:[#allocation64_spill] sm:$0xff] }
 0x281   : > { %v7534_v29 = vpop.f32.mrf.mxu1  ;;  %v3823_v18 = vpop.f32.mrf.mxu0 }
 0x282   : > { %11025 = vst [vmem:[#allocation78_spill] sm:$0xff] %v10132_v31  ;;  %v10139_v27 = vadd.f32 %v3820_v2, %v3569_v15  ;;  %v3572_v49 = vadd.f32 %v7534_v29, %v11028_v62  ;;  %v10150_v2 = vpop.permute.xlu1 %5191  ;;  %v11034_v29 = vld [vmem:[#allocation92_spill] sm:$0xff] }
 0x283   : > { %v3461_v10 = vpop.f32.mrf.mxu1  ;;  %v7603_v21 = vpop.f32.mrf.mxu0 }
 0x284   : > { %11027 = vst [vmem:[#allocation79_spill] sm:$0xff] %v10139_v27  ;;  %v10142_v58 = vadd.f32 %v7600_v1, %v3572_v49  ;;  %v3570_v37 = vadd.f32 %v3461_v10, %v11030_v52  ;;  %v11036_v10 = vld [vmem:[#allocation96_spill] sm:$0xff] }
 0x285   : > { %v7537_v8 = vpop.f32.mrf.mxu1  ;;  %v3836_v61 = vpop.f32.mrf.mxu0 }
 0x286   : > { %11029 = vst [vmem:[#allocation3_spill] sm:$0xff] %v10142_v58  ;;  %v10145_v31 = vadd.f32 %v3823_v18, %v3570_v37  ;;  %v3575_v24 = vadd.f32 %v7537_v8, %v11032_v19  ;;  %v11038_v8 = vld [vmem:[#allocation98_spill] sm:$0xff] }
 0x287   : > { %v3474_v28 = vpop.f32.mrf.mxu1  ;;  %v7604_v48 = vpop.f32.mrf.mxu0 }
 0x288   : > { %11031 = vst [vmem:[#allocation2_spill] sm:$0xff] %v10145_v31  ;;  %v10152_v15 = vadd.f32 %v7603_v21, %v3575_v24  ;;  %v3573_v62 = vadd.f32 %v3474_v28, %v11034_v29  ;;  %v10163_v21 = vpop.permute.xlu1 %5201 }
 0x289   : > { %v7538_v1 = vpop.f32.mrf.mxu1  ;;  %v3839_v49 = vpop.f32.mrf.mxu0 }
 0x28a   : > { %11033 = vst [vmem:[#allocation80_spill] sm:$0xff] %v10152_v15  ;;  %v10155_v58 = vadd.f32 %v3836_v61, %v3573_v62  ;;  %v3576_v52 = vadd.f32 %v7538_v1, %v11036_v10  ;;  %v10174_v15 = vpop.permute.xlu0 %5206 }
 0x28b   : > { %v3477_v18 = vpop.f32.mrf.mxu1  ;;  %v7607_v37 = vpop.f32.mrf.mxu0 }
 0x28c   : > { %11035 = vst [vmem:[#allocation5_spill] sm:$0xff] %v10155_v58  ;;  %v10158_v31 = vadd.f32 %v7604_v48, %v3576_v52  ;;  %v3574_v19 = vadd.f32 %v3477_v18, %v11038_v8  ;;  %v11042_v18 = vld [vmem:[#allocation100_spill] sm:$0xff] }
 0x28d   : > { %v7541_v27 = vpop.f32.mrf.mxu1  ;;  %v3852_v56 = vpop.f32.mrf.mxu0 }
 0x28e   : > { %11037 = vst [vmem:[#allocation4_spill] sm:$0xff] %v10158_v31  ;;  %v10165_v24 = vadd.f32 %v3839_v49, %v3574_v19  ;;  %v3579_v28 = vadd.f32 %v7541_v27, %v9828_v35  ;;  %v10176_v49 = vpop.permute.xlu1 %5211 }
 0x28f   : > { %v3490_v61 = vpop.f32.mrf.mxu1  ;;  %v7608_v29 = vpop.f32.mrf.mxu0 }
 0x290   : > { %11039 = vst [vmem:[#allocation83_spill] sm:$0xff] %v10165_v24  ;;  %v10168_v62 = vadd.f32 %v7607_v37, %v3579_v28  ;;  %v3577_v1 = vadd.f32 %v3490_v61, %v9835_v46  ;;  %v11045_v46 = vld [vmem:[#allocation39_spill] sm:$0xff]  ;;  %v10187_v24 = vpop.permute.xlu0 %5216 }
 0x291   : > { %v7542_v48 = vpop.f32.mrf.mxu1  ;;  %v3855_v10 = vpop.f32.mrf.mxu0 }
 0x292   : > { %11040 = vst [vmem:[#allocation81_spill] sm:$0xff] %v10168_v62  ;;  %v10171_v52 = vadd.f32 %v3852_v56, %v3577_v1  ;;  %v3580_v8 = vadd.f32 %v7542_v48, %v11042_v18 }
 0x293   : > { %v3493_v31 = vpop.f32.mrf.mxu1  ;;  %v7611_v58 = vpop.f32.mrf.mxu0 }
 0x294   : > { %11041 = vst [vmem:[#allocation82_spill] sm:$0xff] %v10171_v52  ;;  %v10178_v19 = vadd.f32 %v7608_v29, %v3580_v8  ;;  %v3578_v35 = vadd.f32 %v3493_v31, %v9850_v11  ;;  %v10189_v29 = vpop.permute.xlu1 %5221 }
 0x295   : > { %v7545_v27 = vpop.f32.mrf.mxu1  ;;  %v3868_v37 = vpop.f32.mrf.mxu0 }
 0x296   : > { %11043 = vst [vmem:[#allocation84_spill] sm:$0xff] %v10178_v19  ;;  %v10181_v28 = vadd.f32 %v3855_v10, %v3578_v35  ;;  %v3583_v61 = vadd.f32 %v7545_v27, %v11045_v46  ;;  %v11049_v27 = vld [vmem:[#allocation36_spill] sm:$0xff]  ;;  %v10200_v19 = vpop.permute.xlu0 %5226 }
 0x297   : > { %v3506_v56 = vpop.f32.mrf.mxu1  ;;  %v7612_v1 = vpop.f32.mrf.mxu0 }
 0x298   : > { %11044 = vst [vmem:[#allocation85_spill] sm:$0xff] %v10181_v28  ;;  %v10184_v52 = vadd.f32 %v7611_v58, %v3583_v61  ;;  %v3581_v48 = vadd.f32 %v3506_v56, %v9860_v40 }
 0x299   : > { %v7546_v18 = vpop.f32.mrf.mxu1  ;;  %v3871_v62 = vpop.f32.mrf.mxu0 }
 0x29a   : > { %11046 = vst [vmem:[#allocation86_spill] sm:$0xff] %v10184_v52  ;;  %v10191_v8 = vadd.f32 %v3868_v37, %v3581_v48  ;;  %v3584_v11 = vadd.f32 %v7546_v18, %v9869_v47  ;;  %v10202_v37 = vpop.permute.xlu1 %5231 }
 0x29b   : > { %v3509_v31 = vpop.f32.mrf.mxu1  ;;  %v7683_v10 = vpop.f32.mrf.mxu0 }
 0x29c   : > { %11047 = vst [vmem:[#allocation10_spill] sm:$0xff] %v10191_v8  ;;  %v10194_v35 = vadd.f32 %v7612_v1, %v3584_v11  ;;  %v3582_v46 = vadd.f32 %v3509_v31, %v11049_v27 }
 0x29d   : > { %v7617_v58 = vpop.f32.mrf.mxu1  ;;  %v4741_v61 = vpop.f32.mrf.mxu0 }
 0x29e   : > { %11048 = vst [vmem:[#allocation8_spill] sm:$0xff] %v10194_v35  ;;  %v10197_v52 = vadd.f32 %v3871_v62, %v3582_v46  ;;  %v4479_v40 = vadd.f32 %v7617_v58, %v9880_v0  ;;  %v10207_v35 = vpop.permute.xlu0 %5236  ;;  %v10209_v8 = vpop.permute.xlu1 %5241 }
 0x29f   : > { %v4222_v56 = vpop.f32.mrf.mxu1  ;;  %v7684_v28 = vpop.f32.mrf.mxu0 }
 0x2a0   : > { %11050 = vst [vmem:[#allocation14_spill] sm:$0xff] %v10197_v52  ;;  %v4477_v47 = vadd.f32 %v4222_v56, %v9887_v60  ;;  %v4998_v1 = vadd.f32 %v7683_v10, %v4479_v40 }
 0x2a1   : > { %v7618_v48 = vpop.f32.mrf.mxu1  ;;  %v4744_v18 = vpop.f32.mrf.mxu0 }
 0x2a2   : > { %v4996_v11 = vadd.f32 %v4741_v61, %v4477_v47  ;;  %v4480_v31 = vadd.f32 %v7618_v48, %v9895_v13  ;;  %v5446_v60 = vmul.f32 %v10072_v53, %v4998_v1  ;;  %v10228_v36 = vpop.permute.xlu1 %5251 }
 0x2a3   : > { %v4225_v27 = vpop.f32.mrf.mxu1  ;;  %v7687_v62 = vpop.f32.mrf.mxu0  ;;  %11052 = vst [vmem:[#allocation89_spill] sm:$0xff] %v10228_v36 }
 0x2a4   : > { %v4999_v46 = vadd.f32 %v7684_v28, %v4480_v31  ;;  %v4478_v0 = vadd.f32 %v4225_v27, %v9902_v43  ;;  %v5444_v56 = vmul.f32 %v10070_v9, %v4996_v11 }
 0x2a5   : > { %v7621_v58 = vpop.f32.mrf.mxu1  ;;  %v4757_v52 = vpop.f32.mrf.mxu0 }
 0x2a6   : > { %v5447_v10 = vmul.f32 %v10085_v30, %v4999_v46  ;;  %v4997_v61 = vadd.f32 %v4744_v18, %v4478_v0  ;;  %v4483_v13 = vadd.f32 %v7621_v58, %v9906_v33  ;;  %v5897_v48 = vmul.f32 %v5444_v56, %v5444_v56  ;;  %v10226_v58 = vpop.permute.xlu0 %5246 }
 0x2a7   : > { %v4238_v43 = vpop.f32.mrf.mxu1  ;;  %v7688_v28 = vpop.f32.mrf.mxu0  ;;  %11051 = vst [vmem:[#allocation12_spill] sm:$0xff] %v10226_v58 }
 0x2a8   : > { %v6671_v40 = vpack.c.bf16 %v5447_v10, %v5446_v60  ;;  %v5445_v47 = vmul.f32 %v10083_v51, %v4997_v61  ;;  %v4481_v53 = vadd.f32 %v4238_v43, %v9912_v34  ;;  %v5002_v31 = vadd.f32 %v7687_v62, %v4483_v13 }
 0x2a9   : > { %v7622_v9 = vpop.f32.mrf.mxu1  ;;  %v4760_v30 = vpop.f32.mrf.mxu0  ;;  %v5899_v51 = vmul.f32 %v5446_v60, %v5446_v60 }
 0x2aa   : > { %6823 = vst [vmem:[%s10219_s11 + $0x8] sm:$0xff] %v6671_v40   ;;  %v6666_v18 = vpack.c.bf16 %v5445_v47, %v5444_v56  ;;  %v5828_v1 = vadd.f32 %v5445_v47, %v5444_v56  ;;  %v5898_v11 = vmul.f32 %v5445_v47, %v5445_v47  ;;  %v5000_v27 = vadd.f32 %v4757_v52, %v4481_v53 }
 0x2ab   : > { %v4484_v46 = vadd.f32 %v7622_v9, %v9921_v3  ;;  %v4241_v33 = vpop.f32.mrf.mxu1  ;;  %v7691_v0 = vpop.f32.mrf.mxu0  ;;  %v5900_v52 = vmul.f32 %v5447_v10, %v5447_v10  ;;  %v5450_v9 = vmul.f32 %v10109_v4, %v5002_v31 }
 0x2ac   : > { %6667 = vst [vmem:[%s10219_s11] sm:$0xff] %v6666_v18   ;;  %v5829_v34 = vadd.f32 %v5828_v1, %v5446_v60  ;;  %v5961_v61 = vadd.f32 %v5898_v11, %v5897_v48  ;;  %v4482_v43 = vadd.f32 %v4241_v33, %v9928_v45  ;;  %v5448_v40 = vmul.f32 %v10096_v38, %v5000_v27  ;;  %v10238_v27 = vpop.permute.xlu0 %5256  ;;  %v10240_v4 = vpop.permute.xlu1 %5261 }
 0x2ad   : > { %v5003_v56 = vadd.f32 %v7688_v28, %v4484_v46  ;;  %v7625_v47 = vpop.f32.mrf.mxu1  ;;  %v4773_v62 = vpop.f32.mrf.mxu0 }
 0x2ae   : > { %v5962_v13 = vadd.f32 %v5961_v61, %v5899_v51  ;;  %v5830_v3 = vadd.f32 %v5829_v34, %v5447_v10  ;;  %v5001_v53 = vadd.f32 %v4760_v30, %v4482_v43  ;;  %v4487_v36 = vadd.f32 %v7625_v47, %v9932_v7 }
 0x2af   : > { %v5451_v58 = vmul.f32 %v10111_v50, %v5003_v56  ;;  %v4254_v18 = vpop.f32.mrf.mxu1  ;;  %v7692_v60 = vpop.f32.mrf.mxu0  ;;  %v5901_v45 = vmul.f32 %v5448_v40, %v5448_v40  ;;  %v5903_v43 = vmul.f32 %v5450_v9, %v5450_v9 }
 0x2b0   : > { %v5831_v48 = vadd.f32 %v5830_v3, %v5448_v40  ;;  %v5963_v1 = vadd.f32 %v5962_v13, %v5900_v52  ;;  %v5449_v38 = vmul.f32 %v10098_v42, %v5001_v53  ;;  %v4485_v11 = vadd.f32 %v4254_v18, %v9939_v55 }
 0x2b1   : > { %v6681_v28 = vpack.c.bf16 %v5451_v58, %v5450_v9  ;;  %v7626_v10 = vpop.f32.mrf.mxu1  ;;  %v4776_v30 = vpop.f32.mrf.mxu0  ;;  %v5006_v33 = vadd.f32 %v7691_v0, %v4487_v36  ;;  %v5904_v53 = vmul.f32 %v5451_v58, %v5451_v58 }
 0x2b2   : > { %v5964_v50 = vadd.f32 %v5963_v1, %v5901_v45  ;;  %v6676_v7 = vpack.c.bf16 %v5449_v38, %v5448_v40  ;;  %v5832_v31 = vadd.f32 %v5831_v48, %v5449_v38  ;;  %v5902_v46 = vmul.f32 %v5449_v38, %v5449_v38  ;;  %v10250_v1 = vpop.permute.xlu0 %5266 }
 0x2b3   : > { %6825 = vst [vmem:[%s10219_s11 + $0x18] sm:$0xff] %v6681_v28   ;;  %v5004_v51 = vadd.f32 %v4773_v62, %v4485_v11  ;;  %v4488_v34 = vadd.f32 %v7626_v10, %v9947_v17  ;;  %v4257_v42 = vpop.f32.mrf.mxu1  ;;  %v7695_v61 = vpop.f32.mrf.mxu0  ;;  %v5454_v0 = vmul.f32 %v10135_v20, %v5006_v33 }
 0x2b4   : > { %6824 = vst [vmem:[%s10219_s11 + $0x10] sm:$0xff] %v6676_v7   ;;  %v5833_v55 = vadd.f32 %v5832_v31, %v5450_v9  ;;  %v5965_v56 = vadd.f32 %v5964_v50, %v5902_v46  ;;  %v4486_v47 = vadd.f32 %v4257_v42, %v9954_v26  ;;  %v10252_v26 = vpop.permute.xlu1 %5271 }
 0x2b5   : > { %v5452_v52 = vmul.f32 %v10122_v54, %v5004_v51  ;;  %v5007_v13 = vadd.f32 %v7692_v60, %v4488_v34  ;;  %v7629_v3 = vpop.f32.mrf.mxu1  ;;  %v4789_v40 = vpop.f32.mrf.mxu0  ;;  %v5907_v34 = vmul.f32 %v5454_v0, %v5454_v0 }
 0x2b6   : > { %v5966_v18 = vadd.f32 %v5965_v56, %v5903_v43  ;;  %v5834_v48 = vadd.f32 %v5833_v55, %v5451_v58  ;;  %v5005_v36 = vadd.f32 %v4776_v30, %v4486_v47  ;;  %v4491_v62 = vadd.f32 %v7629_v3, %v9958_v16 }
 0x2b7   : > { %v5455_v17 = vmul.f32 %v10137_v22, %v5007_v13  ;;  %v4270_v45 = vpop.f32.mrf.mxu1  ;;  %v7696_v9 = vpop.f32.mrf.mxu0  ;;  %v5905_v60 = vmul.f32 %v5452_v52, %v5452_v52 }
 0x2b8   : > { %v5835_v54 = vadd.f32 %v5834_v48, %v5452_v52  ;;  %v5967_v38 = vadd.f32 %v5966_v18, %v5904_v53  ;;  %v5453_v28 = vmul.f32 %v10124_v12, %v5005_v36  ;;  %v4489_v20 = vadd.f32 %v4270_v45, %v9964_v63  ;;  %v10263_v13 = vpop.permute.xlu1 %5281  ;;  %v11053_v48 = vld [vmem:[#allocation45_spill] sm:$0xff] }
 0x2b9   : > { %v6691_v58 = vpack.c.bf16 %v5455_v17, %v5454_v0  ;;  %v7630_v11 = vpop.f32.mrf.mxu1  ;;  %v4792_v22 = vpop.f32.mrf.mxu0  ;;  %v5010_v7 = vadd.f32 %v7695_v61, %v4491_v62  ;;  %v5908_v61 = vmul.f32 %v5455_v17, %v5455_v17 }
 0x2ba   : > { %v5968_v10 = vadd.f32 %v5967_v38, %v5905_v60  ;;  %v6686_v16 = vpack.c.bf16 %v5453_v28, %v5452_v52  ;;  %v5836_v30 = vadd.f32 %v5835_v54, %v5453_v28  ;;  %v5906_v50 = vmul.f32 %v5453_v28, %v5453_v28  ;;  %v10261_v52 = vpop.permute.xlu0 %5276  ;;  %v11054_v60 = vld [vmem:[#allocation40_spill] sm:$0xff] }
 0x2bb   : > { %6827 = vst [vmem:[%s10219_s11 + $0x28] sm:$0xff] %v6691_v58   ;;  %v5008_v31 = vadd.f32 %v4789_v40, %v4489_v20  ;;  %v4492_v46 = vadd.f32 %v7630_v11, %v9973_v59  ;;  %v4273_v33 = vpop.f32.mrf.mxu1  ;;  %v7699_v51 = vpop.f32.mrf.mxu0  ;;  %v5458_v53 = vmul.f32 %v10161_v23, %v5010_v7 }
 0x2bc   : > { %6826 = vst [vmem:[%s10219_s11 + $0x20] sm:$0xff] %v6686_v16   ;;  %v5837_v12 = vadd.f32 %v5836_v30, %v5454_v0  ;;  %v5969_v42 = vadd.f32 %v5968_v10, %v5906_v50  ;;  %v4490_v43 = vadd.f32 %v4273_v33, %v9980_v32 }
 0x2bd   : > { %v5456_v63 = vmul.f32 %v10148_v25, %v5008_v31  ;;  %v5011_v55 = vadd.f32 %v7696_v9, %v4492_v46  ;;  %v7633_v56 = vpop.f32.mrf.mxu1  ;;  %v4805_v47 = vpop.f32.mrf.mxu0  ;;  %v5911_v7 = vmul.f32 %v5458_v53, %v5458_v53 }
 0x2be   : > { %v5970_v3 = vadd.f32 %v5969_v42, %v5907_v34  ;;  %v5838_v59 = vadd.f32 %v5837_v12, %v5455_v17  ;;  %v5009_v40 = vadd.f32 %v4792_v22, %v4490_v43  ;;  %v4495_v32 = vadd.f32 %v7633_v56, %v11053_v48  ;;  %v10272_v50 = vpop.permute.xlu0 %5286 }
 0x2bf   : > { %v5459_v18 = vmul.f32 %v10163_v21, %v5011_v55  ;;  %v4286_v36 = vpop.f32.mrf.mxu1  ;;  %v7700_v25 = vpop.f32.mrf.mxu0  ;;  %v5909_v62 = vmul.f32 %v5456_v63, %v5456_v63 }
 0x2c0   : > { %v5839_v0 = vadd.f32 %v5838_v59, %v5456_v63  ;;  %v5971_v45 = vadd.f32 %v5970_v3, %v5908_v61  ;;  %v5457_v9 = vmul.f32 %v10150_v2, %v5009_v40  ;;  %v4493_v38 = vadd.f32 %v4286_v36, %v11054_v60  ;;  %v10274_v2 = vpop.permute.xlu1 %5291 }
 0x2c1   : > { %v6701_v54 = vpack.c.bf16 %v5459_v18, %v5458_v53  ;;  %v7634_v17 = vpop.f32.mrf.mxu1  ;;  %v4808_v28 = vpop.f32.mrf.mxu0  ;;  %v5014_v11 = vadd.f32 %v7699_v51, %v4495_v32  ;;  %v5912_v43 = vmul.f32 %v5459_v18, %v5459_v18 }
 0x2c2   : > { %v5972_v58 = vadd.f32 %v5971_v45, %v5909_v62  ;;  %v6696_v23 = vpack.c.bf16 %v5457_v9, %v5456_v63  ;;  %v5840_v20 = vadd.f32 %v5839_v0, %v5457_v9  ;;  %v5910_v21 = vmul.f32 %v5457_v9, %v5457_v9 }
 0x2c3   : > { %6829 = vst [vmem:[%s10219_s11 + $0x38] sm:$0xff] %v6701_v54   ;;  %v5012_v22 = vadd.f32 %v4805_v47, %v4493_v38  ;;  %v4496_v10 = vadd.f32 %v7634_v17, %v10002_v5  ;;  %v4289_v16 = vpop.f32.mrf.mxu1  ;;  %v7703_v30 = vpop.f32.mrf.mxu0  ;;  %v5462_v56 = vmul.f32 %v10187_v24, %v5014_v11 }
 0x2c4   : > { %6828 = vst [vmem:[%s10219_s11 + $0x30] sm:$0xff] %v6696_v23   ;;  %v5841_v31 = vadd.f32 %v5840_v20, %v5458_v53  ;;  %v5973_v46 = vadd.f32 %v5972_v58, %v5910_v21  ;;  %v4494_v33 = vadd.f32 %v4289_v16, %v10009_v14  ;;  %v10286_v24 = vpop.permute.xlu1 %5301 }
 0x2c5   : > { %v5460_v34 = vmul.f32 %v10174_v15, %v5012_v22  ;;  %v5015_v12 = vadd.f32 %v7700_v25, %v4496_v10  ;;  %v7637_v42 = vpop.f32.mrf.mxu1  ;;  %v4821_v51 = vpop.f32.mrf.mxu0  ;;  %v5915_v38 = vmul.f32 %v5462_v56, %v5462_v56 }
 0x2c6   : > { %v5974_v63 = vadd.f32 %v5973_v46, %v5911_v7  ;;  %v5842_v5 = vadd.f32 %v5841_v31, %v5459_v18  ;;  %v5013_v55 = vadd.f32 %v4808_v28, %v4494_v33  ;;  %v4499_v61 = vadd.f32 %v7637_v42, %v10015_v41  ;;  %v10284_v25 = vpop.permute.xlu0 %5296 }
 0x2c7   : > { %v5463_v47 = vmul.f32 %v10189_v29, %v5015_v12  ;;  %v4302_v3 = vpop.f32.mrf.mxu1  ;;  %v7704_v59 = vpop.f32.mrf.mxu0  ;;  %v5913_v14 = vmul.f32 %v5460_v34, %v5460_v34 }
 0x2c8   : > { %v5843_v40 = vadd.f32 %v5842_v5, %v5460_v34  ;;  %v5975_v53 = vadd.f32 %v5974_v63, %v5912_v43  ;;  %v5461_v15 = vmul.f32 %v10176_v49, %v5013_v55  ;;  %v4497_v32 = vadd.f32 %v4302_v3, %v10021_v39  ;;  %v11055_v43 = vld [vmem:[#allocation66_spill] sm:$0xff]  ;;  %v11056_v3 = vld [vmem:[#allocation68_spill] sm:$0xff] }
 0x2c9   : > { %v6711_v48 = vpack.c.bf16 %v5463_v47, %v5462_v56  ;;  %v7638_v18 = vpop.f32.mrf.mxu1  ;;  %v4824_v36 = vpop.f32.mrf.mxu0  ;;  %v5018_v45 = vadd.f32 %v7703_v30, %v4499_v61  ;;  %v5916_v11 = vmul.f32 %v5463_v47, %v5463_v47 }
 0x2ca   : > { %v5976_v29 = vadd.f32 %v5975_v53, %v5913_v14  ;;  %v6706_v41 = vpack.c.bf16 %v5461_v15, %v5460_v34  ;;  %v5844_v0 = vadd.f32 %v5843_v40, %v5461_v15  ;;  %v5914_v62 = vmul.f32 %v5461_v15, %v5461_v15  ;;  %v10296_v33 = vpop.permute.xlu0 %5306 }
 0x2cb   : > { %6831 = vst [vmem:[%s10219_s11 + $0x48] sm:$0xff] %v6711_v48   ;;  %v5016_v9 = vadd.f32 %v4821_v51, %v4497_v32  ;;  %v4500_v54 = vadd.f32 %v7638_v18, %v10026_v6  ;;  %v4305_v49 = vpop.f32.mrf.mxu1  ;;  %v7707_v60 = vpop.f32.mrf.mxu0  ;;  %v5466_v30 = vmul.f32 %v10207_v35, %v5018_v45  ;;  %v11057_v48 = vld [vmem:[#allocation102_spill] sm:$0xff]  ;;  %v11058_v18 = vld [vmem:[#allocation12_spill] sm:$0xff] }
 0x2cc   : > { %6830 = vst [vmem:[%s10219_s11 + $0x40] sm:$0xff] %v6706_v41   ;;  %v5845_v39 = vadd.f32 %v5844_v0, %v5462_v56  ;;  %v5977_v17 = vadd.f32 %v5976_v29, %v5914_v62  ;;  %v4498_v28 = vadd.f32 %v4305_v49, %v10032_v44  ;;  %v10298_v44 = vpop.permute.xlu1 %5311 }
 0x2cd   : > { %v5464_v58 = vmul.f32 %v10200_v19, %v5016_v9  ;;  %v5019_v23 = vadd.f32 %v7704_v59, %v4500_v54  ;;  %v7641_v20 = vpop.f32.mrf.mxu1  ;;  %v4837_v21 = vpop.f32.mrf.mxu0  ;;  %v5919_v53 = vmul.f32 %v5466_v30, %v5466_v30 }
 0x2ce   : > { %v5978_v22 = vadd.f32 %v5977_v17, %v5915_v38  ;;  %v5846_v10 = vadd.f32 %v5845_v39, %v5463_v47  ;;  %v5017_v16 = vadd.f32 %v4824_v36, %v4498_v28  ;;  %v4503_v7 = vadd.f32 %v7641_v20, %v10036_v57  ;;  %v10307_v62 = vpop.permute.xlu0 %5316  ;;  %v11059_v17 = vld [vmem:[#allocation104_spill] sm:$0xff] }
 0x2cf   : > { %v5467_v6 = vmul.f32 %v10209_v8, %v5019_v23  ;;  %v4318_v31 = vpop.f32.mrf.mxu1  ;;  %v7708_v46 = vpop.f32.mrf.mxu0  ;;  %v5917_v34 = vmul.f32 %v5464_v58, %v5464_v58 }
 0x2d0   : > { %v5847_v19 = vadd.f32 %v5846_v10, %v5464_v58  ;;  %v5979_v12 = vadd.f32 %v5978_v22, %v5916_v11  ;;  %v5465_v42 = vmul.f32 %v10202_v37, %v5017_v16  ;;  %v4501_v35 = vadd.f32 %v4318_v31, %v11055_v43  ;;  %v10309_v45 = vpop.permute.xlu1 %5321  ;;  %v11060_v22 = vld [vmem:[#allocation89_spill] sm:$0xff] }
 0x2d1   : > { %v6721_v51 = vpack.c.bf16 %v5467_v6, %v5466_v30  ;;  %v7642_v63 = vpop.f32.mrf.mxu1  ;;  %v4840_v8 = vpop.f32.mrf.mxu0  ;;  %v5022_v47 = vadd.f32 %v7707_v60, %v4503_v7  ;;  %v5920_v9 = vmul.f32 %v5467_v6, %v5467_v6 }
 0x2d2   : > { %v5980_v5 = vadd.f32 %v5979_v12, %v5917_v34  ;;  %v6716_v57 = vpack.c.bf16 %v5465_v42, %v5464_v58  ;;  %v5848_v55 = vadd.f32 %v5847_v19, %v5465_v42  ;;  %v5918_v56 = vmul.f32 %v5465_v42, %v5465_v42  ;;  %v11062_v42 = vld [vmem:[#allocation47_spill] sm:$0xff] }
 0x2d3   : > { %6833 = vst [vmem:[%s10219_s11 + $0x58] sm:$0xff] %v6721_v51   ;;  %v5020_v61 = vadd.f32 %v4837_v21, %v4501_v35  ;;  %v4504_v59 = vadd.f32 %v7642_v63, %v11056_v3  ;;  %v4321_v40 = vpop.f32.mrf.mxu1  ;;  %v7711_v14 = vpop.f32.mrf.mxu0  ;;  %v5470_v38 = vmul.f32 %v10238_v27, %v5022_v47 }
 0x2d4   : > { %6832 = vst [vmem:[%s10219_s11 + $0x50] sm:$0xff] %v6716_v57   ;;  %v5849_v37 = vadd.f32 %v5848_v55, %v5466_v30  ;;  %v5981_v15 = vadd.f32 %v5980_v5, %v5918_v56  ;;  %v4502_v32 = vadd.f32 %v4321_v40, %v11057_v48  ;;  %v11061_v30 = vld [vmem:[#allocation65_spill] sm:$0xff]  ;;  %v10318_v63 = vpop.permute.xlu0 %5326  ;;  %v11063_v56 = vld [vmem:[#allocation44_spill] sm:$0xff] }
 0x2d5   : > { %v5468_v36 = vmul.f32 %v11058_v18, %v5020_v61  ;;  %v5023_v29 = vadd.f32 %v7708_v46, %v4504_v59  ;;  %v7645_v41 = vpop.f32.mrf.mxu1  ;;  %v4853_v0 = vpop.f32.mrf.mxu0  ;;  %v5923_v5 = vmul.f32 %v5470_v38, %v5470_v38  ;;  %v11064_v18 = vld [vmem:[#allocation67_spill] sm:$0xff] }
 0x2d6   : > { %v5982_v54 = vadd.f32 %v5981_v15, %v5919_v53  ;;  %v5850_v49 = vadd.f32 %v5849_v37, %v5467_v6  ;;  %v5021_v60 = vadd.f32 %v4840_v8, %v4502_v32  ;;  %v4507_v28 = vadd.f32 %v7645_v41, %v11059_v17  ;;  %v10320_v8 = vpop.permute.xlu1 %5331 }
 0x2d7   : > { %v5471_v39 = vmul.f32 %v10240_v4, %v5023_v29  ;;  %v4334_v58 = vpop.f32.mrf.mxu1  ;;  %v7712_v23 = vpop.f32.mrf.mxu0  ;;  %v5921_v21 = vmul.f32 %v5468_v36, %v5468_v36 }
 0x2d8   : > { %v5851_v20 = vadd.f32 %v5850_v49, %v5468_v36  ;;  %v5983_v11 = vadd.f32 %v5982_v54, %v5920_v9  ;;  %v5469_v10 = vmul.f32 %v11060_v22, %v5021_v60  ;;  %v4505_v7 = vadd.f32 %v4334_v58, %v11061_v30  ;;  %v11065_v60 = vld [vmem:[#allocation53_spill] sm:$0xff]  ;;  %v11066_v22 = vld [vmem:[#allocation48_spill] sm:$0xff] }
 0x2d9   : > { %v6731_v16 = vpack.c.bf16 %v5471_v39, %v5470_v38  ;;  %v7646_v6 = vpop.f32.mrf.mxu1  ;;  %v4856_v31 = vpop.f32.mrf.mxu0  ;;  %v5026_v34 = vadd.f32 %v7711_v14, %v4507_v28  ;;  %v5924_v14 = vmul.f32 %v5471_v39, %v5471_v39 }
 0x2da   : > { %v5984_v46 = vadd.f32 %v5983_v11, %v5921_v21  ;;  %v6726_v27 = vpack.c.bf16 %v5469_v10, %v5468_v36  ;;  %v5852_v19 = vadd.f32 %v5851_v20, %v5469_v10  ;;  %v5922_v4 = vmul.f32 %v5469_v10, %v5469_v10  ;;  %v10330_v28 = vpop.permute.xlu0 %5336 }
 0x2db   : > { %6835 = vst [vmem:[%s10219_s11 + $0x68] sm:$0xff] %v6731_v16   ;;  %v5024_v12 = vadd.f32 %v4853_v0, %v4505_v7  ;;  %v4508_v51 = vadd.f32 %v7646_v6, %v11062_v42  ;;  %v4337_v43 = vpop.f32.mrf.mxu1  ;;  %v7715_v35 = vpop.f32.mrf.mxu0  ;;  %v5474_v48 = vmul.f32 %v10261_v52, %v5026_v34 }
 0x2dc   : > { %6834 = vst [vmem:[%s10219_s11 + $0x60] sm:$0xff] %v6726_v27   ;;  %v5853_v57 = vadd.f32 %v5852_v19, %v5470_v38  ;;  %v5985_v55 = vadd.f32 %v5984_v46, %v5922_v4  ;;  %v4506_v47 = vadd.f32 %v4337_v43, %v11063_v56  ;;  %v10332_v52 = vpop.permute.xlu1 %5341 }
 0x2dd   : > { %v5472_v61 = vmul.f32 %v10250_v1, %v5024_v12  ;;  %v5027_v3 = vadd.f32 %v7712_v23, %v4508_v51  ;;  %v7649_v59 = vpop.f32.mrf.mxu1  ;;  %v4869_v40 = vpop.f32.mrf.mxu0  ;;  %v5927_v30 = vmul.f32 %v5474_v48, %v5474_v48 }
 0x2de   : > { %v5986_v53 = vadd.f32 %v5985_v55, %v5923_v5  ;;  %v5854_v37 = vadd.f32 %v5853_v57, %v5471_v39  ;;  %v5025_v15 = vadd.f32 %v4856_v31, %v4506_v47  ;;  %v4511_v36 = vadd.f32 %v7649_v59, %v11064_v18  ;;  %v11067_v31 = vld [vmem:[#allocation71_spill] sm:$0xff]  ;;  %v11068_v57 = vld [vmem:[#allocation69_spill] sm:$0xff] }
 0x2df   : > { %v5475_v32 = vmul.f32 %v10263_v13, %v5027_v3  ;;  %v4350_v29 = vpop.f32.mrf.mxu1  ;;  %v7716_v41 = vpop.f32.mrf.mxu0  ;;  %v5925_v9 = vmul.f32 %v5472_v61, %v5472_v61 }
 0x2e0   : > { %v5855_v0 = vadd.f32 %v5854_v37, %v5472_v61  ;;  %v5987_v54 = vadd.f32 %v5986_v53, %v5924_v14  ;;  %v5473_v1 = vmul.f32 %v10252_v26, %v5025_v15  ;;  %v4509_v38 = vadd.f32 %v4350_v29, %v11065_v60  ;;  %v10344_v3 = vpop.permute.xlu1 %5351  ;;  %v11069_v37 = vld [vmem:[#allocation70_spill] sm:$0xff] }
 0x2e1   : > { %v6741_v49 = vpack.c.bf16 %v5475_v32, %v5474_v48  ;;  %v7650_v39 = vpop.f32.mrf.mxu1  ;;  %v4872_v17 = vpop.f32.mrf.mxu0  ;;  %v5030_v21 = vadd.f32 %v7715_v35, %v4511_v36  ;;  %v5928_v12 = vmul.f32 %v5475_v32, %v5475_v32 }
 0x2e2   : > { %v5988_v13 = vadd.f32 %v5987_v54, %v5925_v9  ;;  %v6736_v58 = vpack.c.bf16 %v5473_v1, %v5472_v61  ;;  %v5856_v23 = vadd.f32 %v5855_v0, %v5473_v1  ;;  %v5926_v20 = vmul.f32 %v5473_v1, %v5473_v1  ;;  %v10342_v61 = vpop.permute.xlu0 %5346  ;;  %v11070_v0 = vld [vmem:[#allocation72_spill] sm:$0xff] }
 0x2e3   : > { %6837 = vst [vmem:[%s10219_s11 + $0x78] sm:$0xff] %v6741_v49   ;;  %v5028_v11 = vadd.f32 %v4869_v40, %v4509_v38  ;;  %v4512_v10 = vadd.f32 %v7650_v39, %v11066_v22  ;;  %v4353_v26 = vpop.f32.mrf.mxu1  ;;  %v7719_v16 = vpop.f32.mrf.mxu0  ;;  %v5478_v35 = vmul.f32 %v10284_v25, %v5030_v21  ;;  %v11071_v38 = vld [vmem:[#allocation73_spill] sm:$0xff] }
 0x2e4   : > { %6836 = vst [vmem:[%s10219_s11 + $0x70] sm:$0xff] %v6736_v58   ;;  %v5857_v7 = vadd.f32 %v5856_v23, %v5474_v48  ;;  %v5989_v6 = vadd.f32 %v5988_v13, %v5926_v20  ;;  %v4510_v46 = vadd.f32 %v4353_v26, %v11067_v31  ;;  %v10355_v21 = vpop.permute.xlu1 %5361 }
 0x2e5   : > { %v5476_v27 = vmul.f32 %v10272_v50, %v5028_v11  ;;  %v5031_v19 = vadd.f32 %v7716_v41, %v4512_v10  ;;  %v7653_v4 = vpop.f32.mrf.mxu1  ;;  %v4885_v34 = vpop.f32.mrf.mxu0  ;;  %v5931_v49 = vmul.f32 %v5478_v35, %v5478_v35 }
 0x2e6   : > { %v5990_v42 = vadd.f32 %v5989_v6, %v5927_v30  ;;  %v5858_v51 = vadd.f32 %v5857_v7, %v5475_v32  ;;  %v5029_v43 = vadd.f32 %v4872_v17, %v4510_v46  ;;  %v4515_v55 = vadd.f32 %v7653_v4, %v11068_v57  ;;  %v10353_v20 = vpop.permute.xlu0 %5356  ;;  %v11072_v7 = vld [vmem:[#allocation74_spill] sm:$0xff] }
 0x2e7   : > { %v5479_v5 = vmul.f32 %v10286_v24, %v5031_v19  ;;  %v4366_v56 = vpop.f32.mrf.mxu1  ;;  %v7720_v47 = vpop.f32.mrf.mxu0  ;;  %v5929_v59 = vmul.f32 %v5476_v27, %v5476_v27 }
 0x2e8   : > { %v5859_v50 = vadd.f32 %v5858_v51, %v5476_v27  ;;  %v5991_v40 = vadd.f32 %v5990_v42, %v5928_v12  ;;  %v5477_v14 = vmul.f32 %v10274_v2, %v5029_v43  ;;  %v4513_v25 = vadd.f32 %v4366_v56, %v11069_v37  ;;  %v11073_v12 = vld [vmem:[#allocation55_spill] sm:$0xff]  ;;  %v11074_v56 = vld [vmem:[#allocation52_spill] sm:$0xff] }
 0x2e9   : > { %v6751_v53 = vpack.c.bf16 %v5479_v5, %v5478_v35  ;;  %v7654_v15 = vpop.f32.mrf.mxu1  ;;  %v4888_v24 = vpop.f32.mrf.mxu0  ;;  %v5034_v29 = vadd.f32 %v7719_v16, %v4515_v55  ;;  %v5932_v11 = vmul.f32 %v5479_v5, %v5479_v5 }
 0x2ea   : > { %v5992_v48 = vadd.f32 %v5991_v40, %v5929_v59  ;;  %v6746_v32 = vpack.c.bf16 %v5477_v14, %v5476_v27  ;;  %v5860_v18 = vadd.f32 %v5859_v50, %v5477_v14  ;;  %v5930_v36 = vmul.f32 %v5477_v14, %v5477_v14  ;;  %v10364_v40 = vpop.permute.xlu0 %5366 }
 0x2eb   : > { %6839 = vst [vmem:[%s10219_s11 + $0x88] sm:$0xff] %v6751_v53   ;;  %v5032_v41 = vadd.f32 %v4885_v34, %v4513_v25  ;;  %v4516_v9 = vadd.f32 %v7654_v15, %v11070_v0  ;;  %v4369_v54 = vpop.f32.mrf.mxu1  ;;  %v7723_v1 = vpop.f32.mrf.mxu0  ;;  %v5482_v16 = vmul.f32 %v10307_v62, %v5034_v29  ;;  %v11075_v25 = vld [vmem:[#allocation61_spill] sm:$0xff] }
 0x2ec   : > { %6838 = vst [vmem:[%s10219_s11 + $0x80] sm:$0xff] %v6746_v32   ;;  %v5861_v2 = vadd.f32 %v5860_v18, %v5478_v35  ;;  %v5993_v60 = vadd.f32 %v5992_v48, %v5930_v36  ;;  %v4514_v39 = vadd.f32 %v4369_v54, %v11071_v38 }
 0x2ed   : > { %v5480_v17 = vmul.f32 %v10296_v33, %v5032_v41  ;;  %v5035_v13 = vadd.f32 %v7720_v47, %v4516_v9  ;;  %v7657_v58 = vpop.f32.mrf.mxu1  ;;  %v4901_v23 = vpop.f32.mrf.mxu0  ;;  %v5935_v14 = vmul.f32 %v5482_v16, %v5482_v16 }
 0x2ee   : > { %v5994_v22 = vadd.f32 %v5993_v60, %v5931_v49  ;;  %v5862_v10 = vadd.f32 %v5861_v2, %v5479_v5  ;;  %v5033_v26 = vadd.f32 %v4888_v24, %v4514_v39  ;;  %v4519_v6 = vadd.f32 %v7657_v58, %v11072_v7  ;;  %v11077_v58 = vld [vmem:[#allocation77_spill] sm:$0xff] }
 0x2ef   : > { %v5483_v30 = vmul.f32 %v10309_v45, %v5035_v13  ;;  %v4382_v31 = vpop.f32.mrf.mxu1  ;;  %v7724_v33 = vpop.f32.mrf.mxu0  ;;  %v5933_v27 = vmul.f32 %v5480_v17, %v5480_v17 }
 0x2f0   : > { %v5863_v46 = vadd.f32 %v5862_v10, %v5480_v17  ;;  %v5995_v19 = vadd.f32 %v5994_v22, %v5932_v11  ;;  %v5481_v4 = vmul.f32 %v10298_v44, %v5033_v26  ;;  %v4517_v42 = vadd.f32 %v4382_v31, %v11073_v12  ;;  %v10366_v44 = vpop.permute.xlu1 %5371  ;;  %v10376_v10 = vpop.permute.xlu0 %5376  ;;  %v11078_v31 = vld [vmem:[#allocation75_spill] sm:$0xff] }
 0x2f1   : > { %v6761_v34 = vpack.c.bf16 %v5483_v30, %v5482_v16  ;;  %v7658_v51 = vpop.f32.mrf.mxu1  ;;  %v4904_v43 = vpop.f32.mrf.mxu0  ;;  %v5038_v57 = vadd.f32 %v7723_v1, %v4519_v6  ;;  %v5936_v36 = vmul.f32 %v5483_v30, %v5483_v30  ;;  %v11076_v1 = vld [vmem:[#allocation56_spill] sm:$0xff] }
 0x2f2   : > { %v5996_v35 = vadd.f32 %v5995_v19, %v5933_v27  ;;  %v6756_v62 = vpack.c.bf16 %v5481_v4, %v5480_v17  ;;  %v5864_v5 = vadd.f32 %v5863_v46, %v5481_v4  ;;  %v5934_v45 = vmul.f32 %v5481_v4, %v5481_v4 }
 0x2f3   : > { %6841 = vst [vmem:[%s10219_s11 + $0x98] sm:$0xff] %v6761_v34   ;;  %v5036_v55 = vadd.f32 %v4901_v23, %v4517_v42  ;;  %v4520_v47 = vadd.f32 %v7658_v51, %v11074_v56  ;;  %v4385_v50 = vpop.f32.mrf.mxu1  ;;  %v7727_v59 = vpop.f32.mrf.mxu0  ;;  %v5486_v9 = vmul.f32 %v10330_v28, %v5038_v57  ;;  %v11079_v34 = vld [vmem:[#allocation76_spill] sm:$0xff] }
 0x2f4   : > { %6840 = vst [vmem:[%s10219_s11 + $0x90] sm:$0xff] %v6756_v62   ;;  %v5865_v53 = vadd.f32 %v5864_v5, %v5482_v16  ;;  %v5997_v37 = vadd.f32 %v5996_v35, %v5934_v45  ;;  %v4518_v15 = vadd.f32 %v4385_v50, %v11075_v25  ;;  %v10378_v28 = vpop.permute.xlu1 %5381 }
 0x2f5   : > { %v5484_v24 = vmul.f32 %v10318_v63, %v5036_v55  ;;  %v5039_v48 = vadd.f32 %v7724_v33, %v4520_v47  ;;  %v7661_v32 = vpop.f32.mrf.mxu1  ;;  %v4917_v18 = vpop.f32.mrf.mxu0  ;;  %v5939_v27 = vmul.f32 %v5486_v9, %v5486_v9  ;;  %v11080_v47 = vld [vmem:[#allocation78_spill] sm:$0xff] }
 0x2f6   : > { %v5998_v29 = vadd.f32 %v5997_v37, %v5935_v14  ;;  %v5866_v41 = vadd.f32 %v5865_v53, %v5483_v30  ;;  %v5037_v0 = vadd.f32 %v4904_v43, %v4518_v15  ;;  %v4523_v49 = vadd.f32 %v7661_v32, %v11076_v1  ;;  %v10388_v53 = vpop.permute.xlu0 %5386  ;;  %v11081_v32 = vld [vmem:[#allocation79_spill] sm:$0xff] }
 0x2f7   : > { %v5487_v54 = vmul.f32 %v10332_v52, %v5039_v48  ;;  %v4398_v2 = vpop.f32.mrf.mxu1  ;;  %v7728_v60 = vpop.f32.mrf.mxu0  ;;  %v5937_v39 = vmul.f32 %v5484_v24, %v5484_v24  ;;  %v11082_v1 = vld [vmem:[#allocation3_spill] sm:$0xff] }
 0x2f8   : > { %v5867_v38 = vadd.f32 %v5866_v41, %v5484_v24  ;;  %v5999_v17 = vadd.f32 %v5998_v29, %v5936_v36  ;;  %v5485_v63 = vmul.f32 %v10320_v8, %v5037_v0  ;;  %v4521_v23 = vadd.f32 %v4398_v2, %v11077_v58  ;;  %v10390_v37 = vpop.permute.xlu1 %5391 }
 0x2f9   : > { %v6771_v13 = vpack.c.bf16 %v5487_v54, %v5486_v9  ;;  %v7662_v11 = vpop.f32.mrf.mxu1  ;;  %v4920_v22 = vpop.f32.mrf.mxu0  ;;  %v5042_v7 = vadd.f32 %v7727_v59, %v4523_v49  ;;  %v5940_v62 = vmul.f32 %v5487_v54, %v5487_v54 }
 0x2fa   : > { %v6000_v52 = vadd.f32 %v5999_v17, %v5937_v39  ;;  %v6766_v26 = vpack.c.bf16 %v5485_v63, %v5484_v24  ;;  %v5868_v16 = vadd.f32 %v5867_v38, %v5485_v63  ;;  %v5938_v30 = vmul.f32 %v5485_v63, %v5485_v63  ;;  %v11083_v17 = vld [vmem:[#allocation2_spill] sm:$0xff] }
 0x2fb   : > { %6843 = vst [vmem:[%s10219_s11 + $0xa8] sm:$0xff] %v6771_v13   ;;  %v5040_v6 = vadd.f32 %v4917_v18, %v4521_v23  ;;  %v4524_v33 = vadd.f32 %v7662_v11, %v11078_v31  ;;  %v4401_v8 = vpop.f32.mrf.mxu1  ;;  %v7731_v46 = vpop.f32.mrf.mxu0  ;;  %v5490_v55 = vmul.f32 %v10353_v20, %v5042_v7 }
 0x2fc   : > { %6842 = vst [vmem:[%s10219_s11 + $0xa0] sm:$0xff] %v6766_v26   ;;  %v5869_v19 = vadd.f32 %v5868_v16, %v5486_v9  ;;  %v6001_v4 = vadd.f32 %v6000_v52, %v5938_v30  ;;  %v4522_v12 = vadd.f32 %v4401_v8, %v11079_v34  ;;  %v5402_v52 = vpop.permute.xlu1 %5401 }
 0x2fd   : > { %v5488_v42 = vmul.f32 %v10342_v61, %v5040_v6  ;;  %v5043_v51 = vadd.f32 %v7728_v60, %v4524_v33  ;;  %v7665_v43 = vpop.f32.mrf.mxu1  ;;  %v4933_v35 = vpop.f32.mrf.mxu0  ;;  %v5943_v38 = vmul.f32 %v5490_v55, %v5490_v55  ;;  %v11084_v33 = vld [vmem:[#allocation80_spill] sm:$0xff] }
 0x2fe   : > { %v6002_v5 = vadd.f32 %v6001_v4, %v5939_v27  ;;  %v5870_v45 = vadd.f32 %v5869_v19, %v5487_v54  ;;  %v5041_v57 = vadd.f32 %v4920_v22, %v4522_v12  ;;  %v4527_v50 = vadd.f32 %v7665_v43, %v11080_v47  ;;  %v5397_v22 = vpop.permute.xlu0 %5396 }
 0x2ff   : > { %v5491_v56 = vmul.f32 %v10355_v21, %v5043_v51  ;;  %v4414_v59 = vpop.f32.mrf.mxu1  ;;  %v7732_v14 = vpop.f32.mrf.mxu0  ;;  %v5941_v25 = vmul.f32 %v5488_v42, %v5488_v42 }
 0x300   : > { %v5871_v61 = vadd.f32 %v5870_v45, %v5488_v42  ;;  %v6003_v15 = vadd.f32 %v6002_v5, %v5940_v62  ;;  %v5489_v24 = vmul.f32 %v10344_v3, %v5041_v57  ;;  %v4525_v20 = vadd.f32 %v4414_v59, %v11081_v32 }
 0x301   : > { %v6781_v48 = vpack.c.bf16 %v5491_v56, %v5490_v55  ;;  %v7666_v18 = vpop.f32.mrf.mxu1  ;;  %v4936_v21 = vpop.f32.mrf.mxu0  ;;  %v5046_v9 = vadd.f32 %v7731_v46, %v4527_v50  ;;  %v5944_v26 = vmul.f32 %v5491_v56, %v5491_v56 }
 0x302   : > { %v6004_v36 = vadd.f32 %v6003_v15, %v5941_v25  ;;  %v6776_v29 = vpack.c.bf16 %v5489_v24, %v5488_v42  ;;  %v5872_v41 = vadd.f32 %v5871_v61, %v5489_v24  ;;  %v5942_v0 = vmul.f32 %v5489_v24, %v5489_v24  ;;  %v11085_v42 = vld [vmem:[#allocation5_spill] sm:$0xff]  ;;  %v5407_v59 = vpop.permute.xlu0 %5406  ;;  %v11087_v15 = vld [vmem:[#allocation83_spill] sm:$0xff] }
 0x303   : > { %6845 = vst [vmem:[%s10219_s11 + $0xb8] sm:$0xff] %v6781_v48   ;;  %v5044_v54 = vadd.f32 %v4933_v35, %v4525_v20  ;;  %v4528_v49 = vadd.f32 %v7666_v18, %v11082_v1  ;;  %v4417_v2 = vpop.f32.mrf.mxu1  ;;  %v7735_v60 = vpop.f32.mrf.mxu0  ;;  %v5494_v6 = vmul.f32 %v10376_v10, %v5046_v9 }
 0x304   : > { %6844 = vst [vmem:[%s10219_s11 + $0xb0] sm:$0xff] %v6776_v29   ;;  %v5873_v3 = vadd.f32 %v5872_v41, %v5490_v55  ;;  %v6005_v39 = vadd.f32 %v6004_v36, %v5942_v0  ;;  %v4526_v63 = vadd.f32 %v4417_v2, %v11083_v17  ;;  %v11086_v55 = vld [vmem:[#allocation4_spill] sm:$0xff]  ;;  %v11089_v17 = vld [vmem:[#allocation82_spill] sm:$0xff] }
 0x305   : > { %v5492_v13 = vmul.f32 %v10364_v40, %v5044_v54  ;;  %v5047_v58 = vadd.f32 %v7732_v14, %v4528_v49  ;;  %v7669_v23 = vpop.f32.mrf.mxu1  ;;  %v4949_v11 = vpop.f32.mrf.mxu0  ;;  %v11088_v54 = vld [vmem:[#allocation81_spill] sm:$0xff] }
 0x306   : > { %v6006_v16 = vadd.f32 %v6005_v39, %v5943_v38  ;;  %v5874_v30 = vadd.f32 %v5873_v3, %v5491_v56  ;;  %v5045_v7 = vadd.f32 %v4936_v21, %v4526_v63  ;;  %v4531_v8 = vadd.f32 %v7669_v23, %v11084_v33  ;;  %v5412_v14 = vpop.permute.xlu1 %5411  ;;  %v5417_v23 = vpop.permute.xlu0 %5416 }
 0x307   : > { %v5495_v31 = vmul.f32 %v10378_v28, %v5047_v58  ;;  %v4430_v46 = vpop.f32.mrf.mxu1  ;;  %v7736_v27 = vpop.f32.mrf.mxu0  ;;  %v5945_v40 = vmul.f32 %v5492_v13, %v5492_v13 }
 0x308   : > { %v5875_v19 = vadd.f32 %v5874_v30, %v5492_v13  ;;  %v6007_v4 = vadd.f32 %v6006_v16, %v5944_v26  ;;  %v5493_v34 = vmul.f32 %v10366_v44, %v5045_v7  ;;  %v4529_v51 = vadd.f32 %v4430_v46, %v11085_v42 }
 0x309   : > { %v6791_v12 = vpack.c.bf16 %v5495_v31, %v5494_v6  ;;  %v7670_v43 = vpop.f32.mrf.mxu1  ;;  %v4952_v35 = vpop.f32.mrf.mxu0  ;;  %v5050_v45 = vadd.f32 %v7735_v60, %v4531_v8  ;;  %v5947_v44 = vmul.f32 %v5494_v6, %v5494_v6  ;;  %v5948_v21 = vmul.f32 %v5495_v31, %v5495_v31 }
 0x30a   : > { %v6008_v62 = vadd.f32 %v6007_v4, %v5945_v40  ;;  %v6786_v10 = vpack.c.bf16 %v5493_v34, %v5492_v13  ;;  %v5876_v5 = vadd.f32 %v5875_v19, %v5493_v34  ;;  %v5946_v28 = vmul.f32 %v5493_v34, %v5493_v34  ;;  %v11091_v19 = vld [vmem:[#allocation85_spill] sm:$0xff] }
 0x30b   : > { %6847 = vst [vmem:[%s10219_s11 + $0xc8] sm:$0xff] %v6791_v12   ;;  %v5048_v57 = vadd.f32 %v4949_v11, %v4529_v51  ;;  %v4532_v56 = vadd.f32 %v7670_v43, %v11086_v55  ;;  %v4433_v47 = vpop.f32.mrf.mxu1  ;;  %v7739_v50 = vpop.f32.mrf.mxu0  ;;  %v5498_v0 = vmul.f32 %v5397_v22, %v5050_v45 }
 0x30c   : > { %6846 = vst [vmem:[%s10219_s11 + $0xc0] sm:$0xff] %v6786_v10   ;;  %v5877_v61 = vadd.f32 %v5876_v5, %v5494_v6  ;;  %v6009_v25 = vadd.f32 %v6008_v62, %v5946_v28  ;;  %v4530_v24 = vadd.f32 %v4433_v47, %v11087_v15  ;;  %v5422_v11 = vpop.permute.xlu1 %5421  ;;  %v11090_v6 = vld [vmem:[#allocation84_spill] sm:$0xff]  ;;  %v11092_v28 = vld [vmem:[#allocation86_spill] sm:$0xff]  ;;  %v5427_v55 = vpop.permute.xlu0 %5426 }
 0x30d   : > { %v5496_v48 = vmul.f32 %v10388_v53, %v5048_v57  ;;  %v5051_v32 = vadd.f32 %v7736_v27, %v4532_v56  ;;  %v7673_v20 = vpop.f32.mrf.mxu1  ;;  %v4965_v18 = vpop.f32.mrf.mxu0 }
 0x30e   : > { %v6010_v36 = vadd.f32 %v6009_v25, %v5947_v44  ;;  %v5878_v29 = vadd.f32 %v5877_v61, %v5495_v31  ;;  %v5049_v41 = vadd.f32 %v4952_v35, %v4530_v24  ;;  %v4535_v1 = vadd.f32 %v7673_v20, %v11088_v54  ;;  %v11093_v25 = vld [vmem:[#allocation10_spill] sm:$0xff] }
 0x30f   : > { %v5499_v9 = vmul.f32 %v5402_v52, %v5051_v32  ;;  %v4446_v49 = vpop.f32.mrf.mxu1  ;;  %v7740_v2 = vpop.f32.mrf.mxu0  ;;  %v5949_v38 = vmul.f32 %v5496_v48, %v5496_v48 }
 0x310   : > { %v5879_v60 = vadd.f32 %v5878_v29, %v5496_v48  ;;  %v6011_v3 = vadd.f32 %v6010_v36, %v5948_v21  ;;  %v5497_v39 = vmul.f32 %v10390_v37, %v5049_v41  ;;  %v4533_v63 = vadd.f32 %v4446_v49, %v11089_v17  ;;  %v5432_v56 = vpop.permute.xlu1 %5431  ;;  %v11094_v41 = vld [vmem:[#allocation8_spill] sm:$0xff] }
 0x311   : > { %v6801_v53 = vpack.c.bf16 %v5499_v9, %v5498_v0  ;;  %v7674_v13 = vpop.f32.mrf.mxu1  ;;  %v4968_v58 = vpop.f32.mrf.mxu0  ;;  %v5054_v30 = vadd.f32 %v7739_v50, %v4535_v1  ;;  %v5951_v37 = vmul.f32 %v5498_v0, %v5498_v0  ;;  %v5952_v51 = vmul.f32 %v5499_v9, %v5499_v9 }
 0x312   : > { %v6012_v22 = vadd.f32 %v6011_v3, %v5949_v38  ;;  %v6796_v52 = vpack.c.bf16 %v5497_v39, %v5496_v48  ;;  %v5880_v26 = vadd.f32 %v5879_v60, %v5497_v39  ;;  %v5950_v16 = vmul.f32 %v5497_v39, %v5497_v39  ;;  %v5437_v39 = vpop.permute.xlu0 %5436 }
 0x313   : > { %6849 = vst [vmem:[%s10219_s11 + $0xd8] sm:$0xff] %v6801_v53   ;;  %v5052_v7 = vadd.f32 %v4965_v18, %v4533_v63  ;;  %v4536_v31 = vadd.f32 %v7674_v13, %v11090_v6  ;;  %v4449_v33 = vpop.f32.mrf.mxu1  ;;  %v7743_v8 = vpop.f32.mrf.mxu0  ;;  %v5502_v10 = vmul.f32 %v5417_v23, %v5054_v30 }
 0x314   : > { %6848 = vst [vmem:[%s10219_s11 + $0xd0] sm:$0xff] %v6796_v52   ;;  %v5881_v46 = vadd.f32 %v5880_v26, %v5498_v0  ;;  %v6013_v27 = vadd.f32 %v6012_v22, %v5950_v16  ;;  %v4534_v40 = vadd.f32 %v4449_v33, %v11091_v19  ;;  %v5442_v53 = vpop.permute.xlu1 %5441 }
 0x315   : > { %v5500_v4 = vmul.f32 %v5407_v59, %v5052_v7  ;;  %v5055_v34 = vadd.f32 %v7740_v2, %v4536_v31  ;;  %v7677_v12 = vpop.f32.mrf.mxu1  ;;  %v4981_v42 = vpop.f32.mrf.mxu0  ;;  %v5955_v54 = vmul.f32 %v5502_v10, %v5502_v10 }
 0x316   : > { %v6014_v43 = vadd.f32 %v6013_v27, %v5951_v37  ;;  %v5882_v35 = vadd.f32 %v5881_v46, %v5499_v9  ;;  %v5053_v62 = vadd.f32 %v4968_v58, %v4534_v40  ;;  %v4539_v45 = vadd.f32 %v7677_v12, %v11092_v28 }
 0x317   : > { %v5503_v5 = vmul.f32 %v5422_v11, %v5055_v34  ;;  %v4462_v57 = vpop.f32.mrf.mxu1  ;;  %v5953_v50 = vmul.f32 %v5500_v4, %v5500_v4  ;;  %v7744_v48 = vpop.f32.mrf.mxu0 }
 0x318   : > { %v5883_v47 = vadd.f32 %v5882_v35, %v5500_v4  ;;  %v6015_v44 = vadd.f32 %v6014_v43, %v5952_v51  ;;  %v5501_v59 = vmul.f32 %v5412_v14, %v5053_v62  ;;  %v4537_v15 = vadd.f32 %v4462_v57, %v11093_v25  ;;  %v11095_v14 = vld [vmem:[#allocation14_spill] sm:$0xff] }
 0x319   : > { %v6811_v61 = vpack.c.bf16 %v5503_v5, %v5502_v10  ;;  %v7678_v24 = vpop.f32.mrf.mxu1  ;;  %v5058_v36 = vadd.f32 %v7743_v8, %v4539_v45  ;;  %v4984_v3 = vpop.f32.mrf.mxu0  ;;  %v5956_v17 = vmul.f32 %v5503_v5, %v5503_v5  ;;  %v6030_v51 = vlaneseq }
 0x31a   : > { %v6016_v32 = vadd.f32 %v6015_v44, %v5953_v50  ;;  %v6806_v20 = vpack.c.bf16 %v5501_v59, %v5500_v4  ;;  %v5884_v18 = vadd.f32 %v5883_v47, %v5501_v59  ;;  %v5954_v21 = vmul.f32 %v5501_v59, %v5501_v59 }
 0x31b   : > { %6851 = vst [vmem:[%s10219_s11 + $0xe8] sm:$0xff] %v6811_v61   ;;  %v5056_v29 = vadd.f32 %v4981_v42, %v4537_v15  ;;  %v4540_v0 = vadd.f32 %v7678_v24, %v11094_v41  ;;  %v4465_v9 = vpop.f32.mrf.mxu1  ;;  %v5506_v23 = vmul.f32 %v5437_v39, %v5058_v36 }
 0x31c   : > { %6850 = vst [vmem:[%s10219_s11 + $0xe0] sm:$0xff] %v6806_v20   ;;  %v5885_v1 = vadd.f32 %v5884_v18, %v5502_v10  ;;  %v6017_v49 = vadd.f32 %v6016_v32, %v5954_v21  ;;  %v4538_v2 = vadd.f32 %v4465_v9, %v11095_v14 }
 0x31d   : > { %v5504_v60 = vmul.f32 %v5427_v55, %v5056_v29  ;;  %v5059_v38 = vadd.f32 %v7744_v48, %v4540_v0  ;;  %v5959_v8 = vmul.f32 %v5506_v23, %v5506_v23 }
 0x31e   : > { %v6018_v63 = vadd.f32 %v6017_v49, %v5955_v54  ;;  %v5886_v13 = vadd.f32 %v5885_v1, %v5503_v5  ;;  %v5057_v58 = vadd.f32 %v4984_v3, %v4538_v2  ;;  %v6031_v5 = vshrl.u32 %v6030_v51, 7 }
 0x31f   : > { %v5507_v11 = vmul.f32 %v5442_v53, %v5059_v38  ;;  %v5957_v52 = vmul.f32 %v5504_v60, %v5504_v60 }
 0x320   : > { %v5887_v22 = vadd.f32 %v5886_v13, %v5504_v60  ;;  %v6019_v26 = vadd.f32 %v6018_v63, %v5956_v17  ;;  %v5505_v16 = vmul.f32 %v5432_v56, %v5057_v58  ;;  %vm6033_vm8 = vcmp.eq.s32.totalorder %v6031_v5, 1 }
 0x321   : > { %v6821_v30 = vpack.c.bf16 %v5507_v11, %v5506_v23  ;;  %v5960_v27 = vmul.f32 %v5507_v11, %v5507_v11  ;;  %vm6032_vm9 = vcmp.eq.s32.totalorder %v6031_v5, 0 }
 0x322   : > { %v6020_v7 = vadd.f32 %v6019_v26, %v5957_v52  ;;  %v6816_v6 = vpack.c.bf16 %v5505_v16, %v5504_v60  ;;  %v5888_v31 = vadd.f32 %v5887_v22, %v5505_v16  ;;  %v5958_v33 = vmul.f32 %v5505_v16, %v5505_v16 }
 0x323   : > { %6853 = vst [vmem:[%s10219_s11 + $0xf8] sm:$0xff] %v6821_v30  }
 0x324   : > { %6852 = vst [vmem:[%s10219_s11 + $0xf0] sm:$0xff] %v6816_v6   ;;  %v5889_v37 = vadd.f32 %v5888_v31, %v5506_v23  ;;  %v6021_v46 = vadd.f32 %v6020_v7, %v5958_v33 }
 0x326   : > { %v5890_v19 = vadd.f32 %v5889_v37, %v5507_v11  ;;  %v6022_v40 = vadd.f32 %v6021_v46, %v5959_v8 }
 0x328   : > { %v5891_v4 = vrot.slane %v5890_v19, 4  ;;  %v6023_v34 = vadd.f32 %v6022_v40, %v5960_v27 }
 0x32a   : > { %v5892_v12 = vadd.f32 %v5891_v4, %v5890_v19  ;;  %v6024_v42 = vrot.slane %v6023_v34, 4 }
 0x32c   : > { %v5893_v43 = vrot.slane %v5892_v12, 2  ;;  %v6025_v35 = vadd.f32 %v6024_v42, %v6023_v34 }
 0x32e   : > { %v5894_v62 = vadd.f32 %v5893_v43, %v5892_v12  ;;  %v6026_v10 = vrot.slane %v6025_v35, 2 }
 0x330   : > { %v6027_v28 = vadd.f32 %v6026_v10, %v6025_v35  ;;  %v5895_v45 = vrot.slane %v5894_v62, 1 }
 0x332   : > { %v6028_v57 = vrot.slane %v6027_v28, 1  ;;  %v5896_v56 = vadd.f32 %v5895_v45, %v5894_v62 }
 0x334   : > { %v6029_v55 = vadd.f32 %v6028_v57, %v6027_v28 }
 0x336   : > { %v6034_v47 = vsel %vm6033_vm8, %v6029_v55, 0.0 }
 0x337   : > { %v6035_v50 = vsel %vm6032_vm9, %v5896_v56, %v6034_v47 }
 0x338   : > { %6036 = vst [vmem:[%s325_s13] sm:$0xff] %v6035_v50 }
 0x339 PF: > { %s16_s20 = sadd.s32 1, %s7881_s20   ;;  %s11096_s18 = smov %s7877_s19 }
 0x33a   : > { %p13_p6 = scmp.ge.s32.totalorder %s16_s20, 4   ;;  %s11097_s19 = smov %s11099_s21 }
 0x33c   :  { %15 = sbr.rel (!%p13_p6) target bundleno = 2 (0x2), region = 87 }

</bundles_post_ra>
